<compile_context>
chip_gen: v5e
topology: v5e:2x2
jax: 0.10.0
libtpu: 0.0.40
codegen_flags: <defaults>
</compile_context>

<pallas_src>
import jax
import jax.numpy as jnp
from jax.experimental import pallas as pl
from jax.experimental.pallas import tpu as pltpu


# ---------------- fused Pallas kernel ----------------

def _make_bottleneck_kernel(use_im2col):
    def kernel(x_ref, w1_ref, w2_ref, w3_ref,
               s1_ref, b1_ref, s2_ref, b2_ref, s3_ref, b3_ref,
               o_ref):
        # x_ref : (H+2, W+2, cin)  zero-padded NHWC image (bf16), one batch element
        # w1_ref: (cin, planes)    w2_ref: (9, planes, planes)  w3_ref: (planes, cout)
        # s*/b* : (1, C)           folded-BN scale/bias (f32)
        # o_ref : (TH*W, cout)     bf16 output rows for this (n, row-tile) step
        Hp, Wp, cin = x_ref.shape
        H, W = Hp - 2, Wp - 2
        planes = w1_ref.shape[1]
        TH = o_ref.shape[0] // W

        r = pl.program_id(1)
        row0 = pl.multiple_of(r * TH, TH)        # first padded row of the window

        # Halo'd input window: padded rows [row0, row0 + TH + 2).
        xwin = x_ref[pl.ds(row0, TH + 2), :, :]  # (TH+2, W+2, cin) bf16

        # ---- conv1 (1x1) + bn1 + relu ---------------------------------------
        m2 = (TH + 2) * (W + 2)
        h1 = jnp.dot(xwin.reshape(m2, cin), w1_ref[...],
                     preferred_element_type=jnp.float32)
        h1 = jnp.maximum(h1 * s1_ref[...] + b1_ref[...], 0.0)
        h1 = h1.reshape(TH + 2, W + 2, planes)

        # conv2 zero-pads *h1*, not x: zero every position outside the original
        # image (there x_pad is 0, so h1 would otherwise be relu(b1) != 0).
        # (TH+2, W+2, 1) mask broadcast over channels (channel-independent VPU work).
        rows = jax.lax.broadcasted_iota(jnp.int32, (TH + 2, W + 2, 1), 0) + row0
        cols = jax.lax.broadcasted_iota(jnp.int32, (TH + 2, W + 2, 1), 1)
        inside = (rows >= 1) & (rows <= H) & (cols >= 1) & (cols <= W)
        h1 = jnp.where(inside, h1, 0.0).astype(jnp.bfloat16)

        # ---- conv2 (3x3, stride 1, pad 1) + bn2 + relu ------------------------
        if use_im2col:
            # Single im2col matmul, K = 9*planes (saturates the MXU contraction).
            # NOTE: the dx in {1,2} shifted views are sublane-offset slices; if
            # profiling shows relayout copies, generate them with pltpu.roll.
            patches = jnp.concatenate(
                [h1[dy:dy + TH, dx:dx + W, :]
                 for dy in range(3) for dx in range(3)],
                axis=-1).reshape(TH * W, 9 * planes)
            acc = jnp.dot(patches, w2_ref[...].reshape(9 * planes, planes),
                          preferred_element_type=jnp.float32)
        else:
            # Fallback: 9-tap MXU accumulation initialised from tap 0.
            acc = jnp.dot(h1[0:TH, 0:W, :].reshape(TH * W, planes), w2_ref[0],
                          preferred_element_type=jnp.float32)
            for tap in range(1, 9):
                dy, dx = tap // 3, tap % 3
                patch = h1[dy:dy + TH, dx:dx + W, :].reshape(TH * W, planes)
                acc = acc + jnp.dot(patch, w2_ref[tap],
                                    preferred_element_type=jnp.float32)
        h2 = jnp.maximum(acc * s2_ref[...] + b2_ref[...], 0.0).astype(jnp.bfloat16)

        # ---- conv3 (1x1, x4) + bn3 + identity residual + relu -----------------
        h3 = jnp.dot(h2, w3_ref[...], preferred_element_type=jnp.float32)
        res = xwin[1:1 + TH, 1:1 + W, :].reshape(TH * W, cin).astype(jnp.float32)
        y = h3 * s3_ref[...] + b3_ref[...] + res
        o_ref[...] = jnp.maximum(y, 0.0).astype(o_ref.dtype)

    return kernel


# ---------------- tile / VMEM budgeting ----------------

_VMEM_BUDGET = 40 * 1024 * 1024    # per-step budget, v7x-safe (64 MiB physical)
_VMEM_LIMIT = 64 * 1024 * 1024     # scoped VMEM limit handed to Mosaic


def _vmem_bytes_per_step(TH, H, W, cin, planes, cout):
    """Rough per-grid-step VMEM estimate (double-buffered blocks + temporaries)."""
    img = 2 * (H + 2) * (W + 2) * cin * 2                 # input block (bf16)
    out = 2 * TH * W * cout * 2                           # output block (bf16)
    wts = 2 * (cin * planes + 9 * planes * planes + planes * cout) * 2
    m2 = (TH + 2) * (W + 2)
    tmp = (m2 * planes * 6                                 # h1 f32 + bf16 copy
           + TH * W * (9 * planes * 2                      # im2col patches (bf16)
                       + planes * 6                        # h2 f32 + bf16
                       + cout * 8                          # h3 / y (f32)
                       + cin * 4))                         # residual (f32)
    return img + out + wts + tmp


def _choose_row_tile(H, W, cin, planes, cout, requested=None):
    """Largest divisor of H (prefer whole image) whose output block is sublane
    friendly and whose per-step VMEM estimate fits the v7x-safe budget."""
    def divisors(mod):
        return [t for t in range(H, 0, -1) if H % t == 0 and (t * W) % mod == 0]
    cands = divisors(16) or divisors(8) or [H]
    if requested is not None:
        smaller = [t for t in cands if t <= requested]
        cands = smaller if smaller else cands
    for t in cands:
        if _vmem_bytes_per_step(t, H, W, cin, planes, cout) <= _VMEM_BUDGET:
            return t
    return cands[-1]


# ---------------- wrappers ----------------

def bottleneck_forward_nhwc(x_nhwc, p, row_tile=None):
    """x_nhwc: (N, H, W, cin); stride=1, downsample=None => cin == 4*planes.
    Returns (N, H, W, 4*planes) bf16."""
    N, H, W, cin = x_nhwc.shape
    planes = p["w1"].shape[1]
    cout = 4 * planes
    assert cin == cout, "identity residual requires inplanes == 4*planes"
    # TODO(synk): downsample branch (folded 1x1 conv + BN on x) when provided.

    TH = _choose_row_tile(H, W, cin, planes, cout, row_tile)
    RT = H // TH

    # bf16 + zero spatial padding for the 3x3 receptive field (single pad op).
    x_pad = jnp.pad(x_nhwc.astype(jnp.bfloat16), ((0, 0), (1, 1), (1, 1), (0, 0)))

    w1 = p["w1"].astype(jnp.bfloat16)          # (cin, planes)
    w2 = p["w2"].astype(jnp.bfloat16)          # (9, planes, planes)
    w3 = p["w3"].astype(jnp.bfloat16)          # (planes, cout)

    M = N * H * W
    flops = 2 * M * (cin * planes + 9 * planes * planes + planes * cout)
    bytes_accessed = (x_pad.size * 2 + (w1.size + w2.size + w3.size) * 2
                      + 4 * (4 * planes + 2 * cout) + M * cout * 2)

    def call(kernel):
        return pl.pallas_call(
            kernel,
            out_shape=jax.ShapeDtypeStruct((M, cout), jnp.bfloat16),
            grid=(N, RT),
            in_specs=[
                # Whole padded image stays VMEM-resident across this image's
                # row tiles (constant block index over r => fetched once per n).
                pl.BlockSpec((None, H + 2, W + 2, cin), lambda n, r: (n, 0, 0, 0)),
                pl.BlockSpec((cin, planes), lambda n, r: (0, 0)),
                pl.BlockSpec((9, planes, planes), lambda n, r: (0, 0, 0)),
                pl.BlockSpec((planes, cout), lambda n, r: (0, 0)),
                pl.BlockSpec((1, planes), lambda n, r: (0, 0)),
                pl.BlockSpec((1, planes), lambda n, r: (0, 0)),
                pl.BlockSpec((1, planes), lambda n, r: (0, 0)),
                pl.BlockSpec((1, planes), lambda n, r: (0, 0)),
                pl.BlockSpec((1, cout), lambda n, r: (0, 0)),
                pl.BlockSpec((1, cout), lambda n, r: (0, 0)),
            ],
            # Lane-dense 2-D output slab: rows = flattened (n, h, w), lanes = cout.
            out_specs=pl.BlockSpec((TH * W, cout), lambda n, r: (n * RT + r, 0)),
            compiler_params=pltpu.CompilerParams(
                dimension_semantics=("parallel", "parallel"),
                vmem_limit_bytes=_VMEM_LIMIT),
            cost_estimate=pl.CostEstimate(flops=flops, transcendentals=0,
                                          bytes_accessed=bytes_accessed),
        )(x_pad, w1, w2, w3, p["s1"], p["b1"], p["s2"], p["b2"], p["s3"], p["b3"])

    try:
        out2d = call(_make_bottleneck_kernel(use_im2col=True))
    except Exception:
        # Fallback if the lane-concat im2col does not lower on this toolchain:
        # 9-tap MXU accumulation (known-good).  Only taken in eager mode.
        out2d = call(_make_bottleneck_kernel(use_im2col=False))

    return out2d.reshape(N, H, W, cout)


def bottleneck_forward(x_nchw, p, row_tile=None):
    """NCHW adapter around the NHWC kernel; returns NCHW bf16."""
    x_nhwc = jnp.transpose(x_nchw, (0, 2, 3, 1))
    out = bottleneck_forward_nhwc(x_nhwc, p, row_tile)
    return jnp.transpose(out, (0, 3, 1, 2))


# ---------------- pure-JAX reference (same bf16-at-the-boundary numerics) ----

def ref_forward(x_nchw, p):
    bf = lambda a: a.astype(jnp.bfloat16).astype(jnp.float32)
    planes = p["w1"].shape[1]
    x = bf(jnp.transpose(x_nchw, (0, 2, 3, 1)))
    h = jnp.maximum(jnp.einsum("nhwc,cd->nhwd", x, bf(p["w1"])) * p["s1"] + p["b1"], 0.0)
    h = bf(h)
    w2_hwio = bf(p["w2"]).reshape(3, 3, planes, planes)
    h = jax.lax.conv_general_dilated(
        h, w2_hwio, window_strides=(1, 1), padding="SAME",
        dimension_numbers=("NHWC", "HWIO", "NHWC"))
    h = bf(jnp.maximum(h * p["s2"] + p["b2"], 0.0))
    h = jnp.einsum("nhwc,cd->nhwd", h, bf(p["w3"])) * p["s3"] + p["b3"] + x
    return jnp.maximum(h, 0.0).transpose(0, 3, 1, 2)


# ---------------- deterministic parameter construction ----------------

def make_params(key, inplanes, planes, eps=1e-5):
    ks = jax.random.split(key, 12)

    def bn_fold(kg, kb, km, kv, c):
        gamma = 1.0 + 0.1 * jax.random.normal(kg, (c,), jnp.float32)
        beta = 0.1 * jax.random.normal(kb, (c,), jnp.float32)
        mean = 0.1 * jax.random.normal(km, (c,), jnp.float32)
        var = jnp.abs(jax.random.normal(kv, (c,), jnp.float32)) + 0.5
        s = gamma / jnp.sqrt(var + eps)
        b = beta - mean * s
        return s.reshape(1, c), b.reshape(1, c)

    w1 = 0.2 * jax.random.normal(ks[0], (inplanes, planes), jnp.float32)
    w2 = 0.2 * jax.random.normal(ks[1], (9, planes, planes), jnp.float32)
    w3 = 0.2 * jax.random.normal(ks[2], (planes, planes * 4), jnp.float32)
    s1, b1 = bn_fold(ks[3], ks[4], ks[5], ks[6], planes)
    s2, b2 = bn_fold(ks[7], ks[8], ks[9], ks[10], planes)
    s3k = jax.random.split(ks[11], 4)
    s3, b3 = bn_fold(s3k[0], s3k[1], s3k[2], s3k[3], planes * 4)
    return dict(w1=w1, w2=w2, w3=w3, s1=s1, b1=b1, s2=s2, b2=b2, s3=s3, b3=b3)


if __name__ == "__main__":
    key = jax.random.PRNGKey(0)
    kx, kp = jax.random.split(key)

    planes = 4
    inplanes = planes * 4          # downsample=None => identity residual
    N, H, W = 2, 16, 16            # NOTE: toy size; real HRNet uses planes>=32
                                   # so cout=4*planes is lane-dense (>=128).

    x = jax.random.normal(kx, (N, inplanes, H, W), jnp.float32)
    params = make_params(kp, inplanes, planes)

    out = jax.block_until_ready(bottleneck_forward(x, params))
    ref = jax.block_until_ready(ref_forward(x, params))

    assert out.shape == (N, inplanes, H, W)
    out_f = out.astype(jnp.float32)
    ref_f = ref.astype(jnp.bfloat16).astype(jnp.float32)   # kernel output is bf16
    err = jnp.max(jnp.abs(out_f - ref_f))
    assert jnp.allclose(out_f, ref_f, rtol=2e-2, atol=2e-2), \
        f"mismatch vs reference (max abs err {err})"

    print("KERNEL_OK")
</pallas_src>

<mosaic_0001>
module attributes {stable_mosaic.version = 11 : i64} {
  func.func @kernel(%arg0: i32, %arg1: i32, %arg2: memref<1x18x18x16xbf16, #tpu.memory_space<vmem>>, %arg3: memref<16x4xbf16, #tpu.memory_space<vmem>>, %arg4: memref<9x4x4xbf16, #tpu.memory_space<vmem>>, %arg5: memref<4x16xbf16, #tpu.memory_space<vmem>>, %arg6: memref<1x4xf32, #tpu.memory_space<vmem>>, %arg7: memref<1x4xf32, #tpu.memory_space<vmem>>, %arg8: memref<1x4xf32, #tpu.memory_space<vmem>>, %arg9: memref<1x4xf32, #tpu.memory_space<vmem>>, %arg10: memref<1x16xf32, #tpu.memory_space<vmem>>, %arg11: memref<1x16xf32, #tpu.memory_space<vmem>>, %arg12: memref<256x16xbf16, #tpu.memory_space<vmem>>) attributes {dimension_semantics = [#tpu.dimension_semantics<parallel>, #tpu.dimension_semantics<parallel>], iteration_bounds = array<i64: 2, 1>, scalar_prefetch = 0 : i64, scratch_operands = 0 : i64, tpu.core_type = #tpu.core_type<tc>, window_params = [{transform_indices = @transform_0, window_bounds = array<i64: 1, 18, 18, 16>}, {pipeline_mode = #tpu.pipeline_mode<synchronous>, transform_indices = @transform_1, window_bounds = array<i64: 16, 4>}, {pipeline_mode = #tpu.pipeline_mode<synchronous>, transform_indices = @transform_2, window_bounds = array<i64: 9, 4, 4>}, {pipeline_mode = #tpu.pipeline_mode<synchronous>, transform_indices = @transform_3, window_bounds = array<i64: 4, 16>}, {pipeline_mode = #tpu.pipeline_mode<synchronous>, transform_indices = @transform_4, window_bounds = array<i64: 1, 4>}, {pipeline_mode = #tpu.pipeline_mode<synchronous>, transform_indices = @transform_5, window_bounds = array<i64: 1, 4>}, {pipeline_mode = #tpu.pipeline_mode<synchronous>, transform_indices = @transform_6, window_bounds = array<i64: 1, 4>}, {pipeline_mode = #tpu.pipeline_mode<synchronous>, transform_indices = @transform_7, window_bounds = array<i64: 1, 4>}, {pipeline_mode = #tpu.pipeline_mode<synchronous>, transform_indices = @transform_8, window_bounds = array<i64: 1, 16>}, {pipeline_mode = #tpu.pipeline_mode<synchronous>, transform_indices = @transform_9, window_bounds = array<i64: 1, 16>}, {transform_indices = @transform_10, window_bounds = array<i64: 256, 16>}]} {
    %c16_i32 = arith.constant 16 : i32
    %0 = arith.muli %arg1, %c16_i32 : i32
    %1 = tpu.assume_multiple %0, 16 : i32
    %c0 = arith.constant 0 : index
    %2 = arith.index_cast %1 : i32 to index
    %c0_0 = arith.constant 0 : index
    %c0_1 = arith.constant 0 : index
    %3 = vector.load %arg2[%c0, %2, %c0_0, %c0_1] : memref<1x18x18x16xbf16, #tpu.memory_space<vmem>>, vector<1x18x18x16xbf16>
    %4 = vector.shape_cast %3 : vector<1x18x18x16xbf16> to vector<18x18x16xbf16>
    %5 = vector.shape_cast %4 : vector<18x18x16xbf16> to vector<324x16xbf16>
    %c0_2 = arith.constant 0 : index
    %c0_3 = arith.constant 0 : index
    %6 = vector.load %arg3[%c0_2, %c0_3] : memref<16x4xbf16, #tpu.memory_space<vmem>>, vector<16x4xbf16>
    %cst = arith.constant dense<0.000000e+00> : vector<324x4xf32>
    %7 = tpu.matmul %5, %6, %cst {dimension_numbers = #tpu.dot_dimension_numbers<[1], [0], [0], [1], [0, 0, 1, 1], [], []>} : vector<324x16xbf16>, vector<16x4xbf16>, vector<324x4xf32> -> vector<324x4xf32>
    %c0_4 = arith.constant 0 : index
    %c0_5 = arith.constant 0 : index
    %8 = vector.load %arg6[%c0_4, %c0_5] : memref<1x4xf32, #tpu.memory_space<vmem>>, vector<1x4xf32>
    %9 = vector.broadcast %8 : vector<1x4xf32> to vector<324x4xf32>
    %10 = arith.mulf %7, %9 : vector<324x4xf32>
    %c0_6 = arith.constant 0 : index
    %c0_7 = arith.constant 0 : index
    %11 = vector.load %arg7[%c0_6, %c0_7] : memref<1x4xf32, #tpu.memory_space<vmem>>, vector<1x4xf32>
    %12 = vector.broadcast %11 : vector<1x4xf32> to vector<324x4xf32>
    %13 = arith.addf %10, %12 : vector<324x4xf32>
    %cst_8 = arith.constant 0.000000e+00 : f32
    %14 = vector.broadcast %cst_8 : f32 to vector<324x4xf32>
    %15 = arith.maximumf %13, %14 : vector<324x4xf32>
    %16 = vector.shape_cast %15 : vector<324x4xf32> to vector<18x18x4xf32>
    %17 = tpu.iota {dimensions = array<i32: 0>} : vector<18x18x1xi32>
    %18 = vector.broadcast %1 : i32 to vector<18x18x1xi32>
    %19 = arith.addi %17, %18 : vector<18x18x1xi32>
    %20 = tpu.iota {dimensions = array<i32: 1>} : vector<18x18x1xi32>
    %c1_i32 = arith.constant 1 : i32
    %21 = vector.broadcast %c1_i32 : i32 to vector<18x18x1xi32>
    %22 = arith.cmpi sge, %19, %21 : vector<18x18x1xi32>
    %c16_i32_9 = arith.constant 16 : i32
    %23 = vector.broadcast %c16_i32_9 : i32 to vector<18x18x1xi32>
    %24 = arith.cmpi sle, %19, %23 : vector<18x18x1xi32>
    %25 = arith.andi %22, %24 : vector<18x18x1xi1>
    %c1_i32_10 = arith.constant 1 : i32
    %26 = vector.broadcast %c1_i32_10 : i32 to vector<18x18x1xi32>
    %27 = arith.cmpi sge, %20, %26 : vector<18x18x1xi32>
    %28 = arith.andi %25, %27 : vector<18x18x1xi1>
    %c16_i32_11 = arith.constant 16 : i32
    %29 = vector.broadcast %c16_i32_11 : i32 to vector<18x18x1xi32>
    %30 = arith.cmpi sle, %20, %29 : vector<18x18x1xi32>
    %31 = arith.andi %28, %30 : vector<18x18x1xi1>
    %cst_12 = arith.constant 0.000000e+00 : f32
    %32 = vector.shape_cast %31 : vector<18x18x1xi1> to vector<18x18x1xi1>
    %33 = vector.broadcast %32 : vector<18x18x1xi1> to vector<18x18x4xi1>
    %34 = vector.broadcast %cst_12 : f32 to vector<18x18x4xf32>
    %35 = arith.select %33, %16, %34 : vector<18x18x4xi1>, vector<18x18x4xf32>
    %36 = arith.truncf %35 : vector<18x18x4xf32> to vector<18x18x4xbf16>
    %37 = vector.extract_strided_slice %36 {offsets = [0, 0, 0], sizes = [16, 16, 4], strides = [1, 1, 1]} : vector<18x18x4xbf16> to vector<16x16x4xbf16>
    %38 = vector.extract_strided_slice %36 {offsets = [0, 1, 0], sizes = [16, 16, 4], strides = [1, 1, 1]} : vector<18x18x4xbf16> to vector<16x16x4xbf16>
    %39 = vector.extract_strided_slice %36 {offsets = [0, 2, 0], sizes = [16, 16, 4], strides = [1, 1, 1]} : vector<18x18x4xbf16> to vector<16x16x4xbf16>
    %40 = vector.extract_strided_slice %36 {offsets = [1, 0, 0], sizes = [16, 16, 4], strides = [1, 1, 1]} : vector<18x18x4xbf16> to vector<16x16x4xbf16>
    %41 = vector.extract_strided_slice %36 {offsets = [1, 1, 0], sizes = [16, 16, 4], strides = [1, 1, 1]} : vector<18x18x4xbf16> to vector<16x16x4xbf16>
    %42 = vector.extract_strided_slice %36 {offsets = [1, 2, 0], sizes = [16, 16, 4], strides = [1, 1, 1]} : vector<18x18x4xbf16> to vector<16x16x4xbf16>
    %43 = vector.extract_strided_slice %36 {offsets = [2, 0, 0], sizes = [16, 16, 4], strides = [1, 1, 1]} : vector<18x18x4xbf16> to vector<16x16x4xbf16>
    %44 = vector.extract_strided_slice %36 {offsets = [2, 1, 0], sizes = [16, 16, 4], strides = [1, 1, 1]} : vector<18x18x4xbf16> to vector<16x16x4xbf16>
    %45 = vector.extract_strided_slice %36 {offsets = [2, 2, 0], sizes = [16, 16, 4], strides = [1, 1, 1]} : vector<18x18x4xbf16> to vector<16x16x4xbf16>
    %46 = tpu.concatenate %37, %38, %39, %40, %41, %42, %43, %44, %45 in 2 : vector<16x16x4xbf16>, vector<16x16x4xbf16>, vector<16x16x4xbf16>, vector<16x16x4xbf16>, vector<16x16x4xbf16>, vector<16x16x4xbf16>, vector<16x16x4xbf16>, vector<16x16x4xbf16>, vector<16x16x4xbf16> -> vector<16x16x36xbf16>
    %47 = vector.shape_cast %46 : vector<16x16x36xbf16> to vector<256x36xbf16>
    %c0_13 = arith.constant 0 : index
    %c0_14 = arith.constant 0 : index
    %c0_15 = arith.constant 0 : index
    %48 = vector.load %arg4[%c0_13, %c0_14, %c0_15] : memref<9x4x4xbf16, #tpu.memory_space<vmem>>, vector<9x4x4xbf16>
    %49 = vector.shape_cast %48 : vector<9x4x4xbf16> to vector<36x4xbf16>
    %cst_16 = arith.constant dense<0.000000e+00> : vector<256x4xf32>
    %50 = tpu.matmul %47, %49, %cst_16 {dimension_numbers = #tpu.dot_dimension_numbers<[1], [0], [0], [1], [0, 0, 1, 1], [], []>} : vector<256x36xbf16>, vector<36x4xbf16>, vector<256x4xf32> -> vector<256x4xf32>
    %c0_17 = arith.constant 0 : index
    %c0_18 = arith.constant 0 : index
    %51 = vector.load %arg8[%c0_17, %c0_18] : memref<1x4xf32, #tpu.memory_space<vmem>>, vector<1x4xf32>
    %52 = vector.broadcast %51 : vector<1x4xf32> to vector<256x4xf32>
    %53 = arith.mulf %50, %52 : vector<256x4xf32>
    %c0_19 = arith.constant 0 : index
    %c0_20 = arith.constant 0 : index
    %54 = vector.load %arg9[%c0_19, %c0_20] : memref<1x4xf32, #tpu.memory_space<vmem>>, vector<1x4xf32>
    %55 = vector.broadcast %54 : vector<1x4xf32> to vector<256x4xf32>
    %56 = arith.addf %53, %55 : vector<256x4xf32>
    %cst_21 = arith.constant 0.000000e+00 : f32
    %57 = vector.broadcast %cst_21 : f32 to vector<256x4xf32>
    %58 = arith.maximumf %56, %57 : vector<256x4xf32>
    %59 = arith.truncf %58 : vector<256x4xf32> to vector<256x4xbf16>
    %c0_22 = arith.constant 0 : index
    %c0_23 = arith.constant 0 : index
    %60 = vector.load %arg5[%c0_22, %c0_23] : memref<4x16xbf16, #tpu.memory_space<vmem>>, vector<4x16xbf16>
    %cst_24 = arith.constant dense<0.000000e+00> : vector<256x16xf32>
    %61 = tpu.matmul %59, %60, %cst_24 {dimension_numbers = #tpu.dot_dimension_numbers<[1], [0], [0], [1], [0, 0, 1, 1], [], []>} : vector<256x4xbf16>, vector<4x16xbf16>, vector<256x16xf32> -> vector<256x16xf32>
    %62 = vector.extract_strided_slice %4 {offsets = [1, 1, 0], sizes = [16, 16, 16], strides = [1, 1, 1]} : vector<18x18x16xbf16> to vector<16x16x16xbf16>
    %63 = vector.shape_cast %62 : vector<16x16x16xbf16> to vector<256x16xbf16>
    %64 = arith.extf %63 : vector<256x16xbf16> to vector<256x16xf32>
    %c0_25 = arith.constant 0 : index
    %c0_26 = arith.constant 0 : index
    %65 = vector.load %arg10[%c0_25, %c0_26] : memref<1x16xf32, #tpu.memory_space<vmem>>, vector<1x16xf32>
    %66 = vector.broadcast %65 : vector<1x16xf32> to vector<256x16xf32>
    %67 = arith.mulf %61, %66 : vector<256x16xf32>
    %c0_27 = arith.constant 0 : index
    %c0_28 = arith.constant 0 : index
    %68 = vector.load %arg11[%c0_27, %c0_28] : memref<1x16xf32, #tpu.memory_space<vmem>>, vector<1x16xf32>
    %69 = vector.broadcast %68 : vector<1x16xf32> to vector<256x16xf32>
    %70 = arith.addf %67, %69 : vector<256x16xf32>
    %71 = arith.addf %70, %64 : vector<256x16xf32>
    %cst_29 = arith.constant 0.000000e+00 : f32
    %72 = vector.broadcast %cst_29 : f32 to vector<256x16xf32>
    %73 = arith.maximumf %71, %72 : vector<256x16xf32>
    %74 = arith.truncf %73 : vector<256x16xf32> to vector<256x16xbf16>
    %c0_30 = arith.constant 0 : index
    %c0_31 = arith.constant 0 : index
    %75 = vector.load %arg12[%c0_30, %c0_31] : memref<256x16xbf16, #tpu.memory_space<vmem>>, vector<256x16xbf16>
    tpu.vector_store %arg12[%c0_30, %c0_31], %74 {strides = array<i32>} : memref<256x16xbf16, #tpu.memory_space<vmem>>, vector<256x16xbf16>,
    return
  }
  func.func @transform_0(%arg0: i32, %arg1: i32) -> (i32, i32, i32, i32) {
    %c0_i32 = arith.constant 0 : i32
    %c0_i32_0 = arith.constant 0 : i32
    %c0_i32_1 = arith.constant 0 : i32
    %c0_i32_2 = arith.constant 0 : i32
    return %arg0, %c0_i32, %c0_i32_0, %c0_i32_1 : i32, i32, i32, i32
  }
  func.func @transform_1(%arg0: i32, %arg1: i32) -> (i32, i32) {
    %c0_i32 = arith.constant 0 : i32
    %c0_i32_0 = arith.constant 0 : i32
    %c0_i32_1 = arith.constant 0 : i32
    return %c0_i32, %c0_i32_0 : i32, i32
  }
  func.func @transform_2(%arg0: i32, %arg1: i32) -> (i32, i32, i32) {
    %c0_i32 = arith.constant 0 : i32
    %c0_i32_0 = arith.constant 0 : i32
    %c0_i32_1 = arith.constant 0 : i32
    %c0_i32_2 = arith.constant 0 : i32
    return %c0_i32, %c0_i32_0, %c0_i32_1 : i32, i32, i32
  }
  func.func @transform_3(%arg0: i32, %arg1: i32) -> (i32, i32) {
    %c0_i32 = arith.constant 0 : i32
    %c0_i32_0 = arith.constant 0 : i32
    %c0_i32_1 = arith.constant 0 : i32
    return %c0_i32, %c0_i32_0 : i32, i32
  }
  func.func @transform_4(%arg0: i32, %arg1: i32) -> (i32, i32) {
    %c0_i32 = arith.constant 0 : i32
    %c0_i32_0 = arith.constant 0 : i32
    %c0_i32_1 = arith.constant 0 : i32
    return %c0_i32, %c0_i32_0 : i32, i32
  }
  func.func @transform_5(%arg0: i32, %arg1: i32) -> (i32, i32) {
    %c0_i32 = arith.constant 0 : i32
    %c0_i32_0 = arith.constant 0 : i32
    %c0_i32_1 = arith.constant 0 : i32
    return %c0_i32, %c0_i32_0 : i32, i32
  }
  func.func @transform_6(%arg0: i32, %arg1: i32) -> (i32, i32) {
    %c0_i32 = arith.constant 0 : i32
    %c0_i32_0 = arith.constant 0 : i32
    %c0_i32_1 = arith.constant 0 : i32
    return %c0_i32, %c0_i32_0 : i32, i32
  }
  func.func @transform_7(%arg0: i32, %arg1: i32) -> (i32, i32) {
    %c0_i32 = arith.constant 0 : i32
    %c0_i32_0 = arith.constant 0 : i32
    %c0_i32_1 = arith.constant 0 : i32
    return %c0_i32, %c0_i32_0 : i32, i32
  }
  func.func @transform_8(%arg0: i32, %arg1: i32) -> (i32, i32) {
    %c0_i32 = arith.constant 0 : i32
    %c0_i32_0 = arith.constant 0 : i32
    %c0_i32_1 = arith.constant 0 : i32
    return %c0_i32, %c0_i32_0 : i32, i32
  }
  func.func @transform_9(%arg0: i32, %arg1: i32) -> (i32, i32) {
    %c0_i32 = arith.constant 0 : i32
    %c0_i32_0 = arith.constant 0 : i32
    %c0_i32_1 = arith.constant 0 : i32
    return %c0_i32, %c0_i32_0 : i32, i32
  }
  func.func @transform_10(%arg0: i32, %arg1: i32) -> (i32, i32) {
    %c1_i32 = arith.constant 1 : i32
    %0 = arith.muli %arg0, %c1_i32 : i32
    %1 = arith.addi %0, %arg1 : i32
    %c0_i32 = arith.constant 0 : i32
    %c0_i32_0 = arith.constant 0 : i32
    return %1, %c0_i32 : i32, i32
  }
}

module attributes {stable_mosaic.version = 11 : i64} {
  func.func @kernel(%arg0: i32, %arg1: i32, %arg2: memref<1x18x18x16xbf16, #tpu.memory_space<vmem>>, %arg3: memref<16x4xbf16, #tpu.memory_space<vmem>>, %arg4: memref<9x4x4xbf16, #tpu.memory_space<vmem>>, %arg5: memref<4x16xbf16, #tpu.memory_space<vmem>>, %arg6: memref<1x4xf32, #tpu.memory_space<vmem>>, %arg7: memref<1x4xf32, #tpu.memory_space<vmem>>, %arg8: memref<1x4xf32, #tpu.memory_space<vmem>>, %arg9: memref<1x4xf32, #tpu.memory_space<vmem>>, %arg10: memref<1x16xf32, #tpu.memory_space<vmem>>, %arg11: memref<1x16xf32, #tpu.memory_space<vmem>>, %arg12: memref<256x16xbf16, #tpu.memory_space<vmem>>) attributes {dimension_semantics = [#tpu.dimension_semantics<parallel>, #tpu.dimension_semantics<parallel>], iteration_bounds = array<i64: 2, 1>, scalar_prefetch = 0 : i64, scratch_operands = 0 : i64, tpu.core_type = #tpu.core_type<tc>, window_params = [{transform_indices = @transform_0, window_bounds = array<i64: 1, 18, 18, 16>}, {pipeline_mode = #tpu.pipeline_mode<synchronous>, transform_indices = @transform_1, window_bounds = array<i64: 16, 4>}, {pipeline_mode = #tpu.pipeline_mode<synchronous>, transform_indices = @transform_2, window_bounds = array<i64: 9, 4, 4>}, {pipeline_mode = #tpu.pipeline_mode<synchronous>, transform_indices = @transform_3, window_bounds = array<i64: 4, 16>}, {pipeline_mode = #tpu.pipeline_mode<synchronous>, transform_indices = @transform_4, window_bounds = array<i64: 1, 4>}, {pipeline_mode = #tpu.pipeline_mode<synchronous>, transform_indices = @transform_5, window_bounds = array<i64: 1, 4>}, {pipeline_mode = #tpu.pipeline_mode<synchronous>, transform_indices = @transform_6, window_bounds = array<i64: 1, 4>}, {pipeline_mode = #tpu.pipeline_mode<synchronous>, transform_indices = @transform_7, window_bounds = array<i64: 1, 4>}, {pipeline_mode = #tpu.pipeline_mode<synchronous>, transform_indices = @transform_8, window_bounds = array<i64: 1, 16>}, {pipeline_mode = #tpu.pipeline_mode<synchronous>, transform_indices = @transform_9, window_bounds = array<i64: 1, 16>}, {transform_indices = @transform_10, window_bounds = array<i64: 256, 16>}]} {
    %c16_i32 = arith.constant 16 : i32
    %0 = arith.muli %arg1, %c16_i32 : i32
    %1 = tpu.assume_multiple %0, 16 : i32
    %c0 = arith.constant 0 : index
    %2 = arith.index_cast %1 : i32 to index
    %c0_0 = arith.constant 0 : index
    %c0_1 = arith.constant 0 : index
    %3 = vector.load %arg2[%c0, %2, %c0_0, %c0_1] : memref<1x18x18x16xbf16, #tpu.memory_space<vmem>>, vector<1x18x18x16xbf16>
    %4 = vector.shape_cast %3 : vector<1x18x18x16xbf16> to vector<18x18x16xbf16>
    %5 = vector.shape_cast %4 : vector<18x18x16xbf16> to vector<324x16xbf16>
    %c0_2 = arith.constant 0 : index
    %c0_3 = arith.constant 0 : index
    %6 = vector.load %arg3[%c0_2, %c0_3] : memref<16x4xbf16, #tpu.memory_space<vmem>>, vector<16x4xbf16>
    %cst = arith.constant dense<0.000000e+00> : vector<324x4xf32>
    %7 = tpu.matmul %5, %6, %cst {dimension_numbers = #tpu.dot_dimension_numbers<[1], [0], [0], [1], [0, 0, 1, 1], [], []>} : vector<324x16xbf16>, vector<16x4xbf16>, vector<324x4xf32> -> vector<324x4xf32>
    %c0_4 = arith.constant 0 : index
    %c0_5 = arith.constant 0 : index
    %8 = vector.load %arg6[%c0_4, %c0_5] : memref<1x4xf32, #tpu.memory_space<vmem>>, vector<1x4xf32>
    %9 = vector.broadcast %8 : vector<1x4xf32> to vector<324x4xf32>
    %10 = arith.mulf %7, %9 : vector<324x4xf32>
    %c0_6 = arith.constant 0 : index
    %c0_7 = arith.constant 0 : index
    %11 = vector.load %arg7[%c0_6, %c0_7] : memref<1x4xf32, #tpu.memory_space<vmem>>, vector<1x4xf32>
    %12 = vector.broadcast %11 : vector<1x4xf32> to vector<324x4xf32>
    %13 = arith.addf %10, %12 : vector<324x4xf32>
    %cst_8 = arith.constant 0.000000e+00 : f32
    %14 = vector.broadcast %cst_8 : f32 to vector<324x4xf32>
    %15 = arith.maximumf %13, %14 : vector<324x4xf32>
    %16 = vector.shape_cast %15 : vector<324x4xf32> to vector<18x18x4xf32>
    %17 = tpu.iota {dimensions = array<i32: 0>} : vector<18x18x1xi32>
    %18 = vector.broadcast %1 : i32 to vector<18x18x1xi32>
    %19 = arith.addi %17, %18 : vector<18x18x1xi32>
    %20 = tpu.iota {dimensions = array<i32: 1>} : vector<18x18x1xi32>
    %c1_i32 = arith.constant 1 : i32
    %21 = vector.broadcast %c1_i32 : i32 to vector<18x18x1xi32>
    %22 = arith.cmpi sge, %19, %21 : vector<18x18x1xi32>
    %c16_i32_9 = arith.constant 16 : i32
    %23 = vector.broadcast %c16_i32_9 : i32 to vector<18x18x1xi32>
    %24 = arith.cmpi sle, %19, %23 : vector<18x18x1xi32>
    %25 = arith.andi %22, %24 : vector<18x18x1xi1>
    %c1_i32_10 = arith.constant 1 : i32
    %26 = vector.broadcast %c1_i32_10 : i32 to vector<18x18x1xi32>
    %27 = arith.cmpi sge, %20, %26 : vector<18x18x1xi32>
    %28 = arith.andi %25, %27 : vector<18x18x1xi1>
    %c16_i32_11 = arith.constant 16 : i32
    %29 = vector.broadcast %c16_i32_11 : i32 to vector<18x18x1xi32>
    %30 = arith.cmpi sle, %20, %29 : vector<18x18x1xi32>
    %31 = arith.andi %28, %30 : vector<18x18x1xi1>
    %cst_12 = arith.constant 0.000000e+00 : f32
    %32 = vector.shape_cast %31 : vector<18x18x1xi1> to vector<18x18x1xi1>
    %33 = vector.broadcast %32 : vector<18x18x1xi1> to vector<18x18x4xi1>
    %34 = vector.broadcast %cst_12 : f32 to vector<18x18x4xf32>
    %35 = arith.select %33, %16, %34 : vector<18x18x4xi1>, vector<18x18x4xf32>
    %36 = arith.truncf %35 : vector<18x18x4xf32> to vector<18x18x4xbf16>
    %37 = vector.extract_strided_slice %36 {offsets = [0, 0, 0], sizes = [16, 16, 4], strides = [1, 1, 1]} : vector<18x18x4xbf16> to vector<16x16x4xbf16>
    %38 = vector.shape_cast %37 : vector<16x16x4xbf16> to vector<256x4xbf16>
    %c0_13 = arith.constant 0 : index
    %c0_14 = arith.constant 0 : index
    %c0_15 = arith.constant 0 : index
    %39 = vector.load %arg4[%c0_13, %c0_14, %c0_15] : memref<9x4x4xbf16, #tpu.memory_space<vmem>>, vector<1x4x4xbf16>
    %40 = vector.shape_cast %39 : vector<1x4x4xbf16> to vector<4x4xbf16>
    %cst_16 = arith.constant dense<0.000000e+00> : vector<256x4xf32>
    %41 = tpu.matmul %38, %40, %cst_16 {dimension_numbers = #tpu.dot_dimension_numbers<[1], [0], [0], [1], [0, 0, 1, 1], [], []>} : vector<256x4xbf16>, vector<4x4xbf16>, vector<256x4xf32> -> vector<256x4xf32>
    %42 = vector.extract_strided_slice %36 {offsets = [0, 1, 0], sizes = [16, 16, 4], strides = [1, 1, 1]} : vector<18x18x4xbf16> to vector<16x16x4xbf16>
    %43 = vector.shape_cast %42 : vector<16x16x4xbf16> to vector<256x4xbf16>
    %c1 = arith.constant 1 : index
    %c0_17 = arith.constant 0 : index
    %c0_18 = arith.constant 0 : index
    %44 = vector.load %arg4[%c1, %c0_17, %c0_18] : memref<9x4x4xbf16, #tpu.memory_space<vmem>>, vector<1x4x4xbf16>
    %45 = vector.shape_cast %44 : vector<1x4x4xbf16> to vector<4x4xbf16>
    %cst_19 = arith.constant dense<0.000000e+00> : vector<256x4xf32>
    %46 = tpu.matmul %43, %45, %cst_19 {dimension_numbers = #tpu.dot_dimension_numbers<[1], [0], [0], [1], [0, 0, 1, 1], [], []>} : vector<256x4xbf16>, vector<4x4xbf16>, vector<256x4xf32> -> vector<256x4xf32>
    %47 = arith.addf %41, %46 : vector<256x4xf32>
    %48 = vector.extract_strided_slice %36 {offsets = [0, 2, 0], sizes = [16, 16, 4], strides = [1, 1, 1]} : vector<18x18x4xbf16> to vector<16x16x4xbf16>
    %49 = vector.shape_cast %48 : vector<16x16x4xbf16> to vector<256x4xbf16>
    %c2 = arith.constant 2 : index
    %c0_20 = arith.constant 0 : index
    %c0_21 = arith.constant 0 : index
    %50 = vector.load %arg4[%c2, %c0_20, %c0_21] : memref<9x4x4xbf16, #tpu.memory_space<vmem>>, vector<1x4x4xbf16>
    %51 = vector.shape_cast %50 : vector<1x4x4xbf16> to vector<4x4xbf16>
    %cst_22 = arith.constant dense<0.000000e+00> : vector<256x4xf32>
    %52 = tpu.matmul %49, %51, %cst_22 {dimension_numbers = #tpu.dot_dimension_numbers<[1], [0], [0], [1], [0, 0, 1, 1], [], []>} : vector<256x4xbf16>, vector<4x4xbf16>, vector<256x4xf32> -> vector<256x4xf32>
    %53 = arith.addf %47, %52 : vector<256x4xf32>
    %54 = vector.extract_strided_slice %36 {offsets = [1, 0, 0], sizes = [16, 16, 4], strides = [1, 1, 1]} : vector<18x18x4xbf16> to vector<16x16x4xbf16>
    %55 = vector.shape_cast %54 : vector<16x16x4xbf16> to vector<256x4xbf16>
    %c3 = arith.constant 3 : index
    %c0_23 = arith.constant 0 : index
    %c0_24 = arith.constant 0 : index
    %56 = vector.load %arg4[%c3, %c0_23, %c0_24] : memref<9x4x4xbf16, #tpu.memory_space<vmem>>, vector<1x4x4xbf16>
    %57 = vector.shape_cast %56 : vector<1x4x4xbf16> to vector<4x4xbf16>
    %cst_25 = arith.constant dense<0.000000e+00> : vector<256x4xf32>
    %58 = tpu.matmul %55, %57, %cst_25 {dimension_numbers = #tpu.dot_dimension_numbers<[1], [0], [0], [1], [0, 0, 1, 1], [], []>} : vector<256x4xbf16>, vector<4x4xbf16>, vector<256x4xf32> -> vector<256x4xf32>
    %59 = arith.addf %53, %58 : vector<256x4xf32>
    %60 = vector.extract_strided_slice %36 {offsets = [1, 1, 0], sizes = [16, 16, 4], strides = [1, 1, 1]} : vector<18x18x4xbf16> to vector<16x16x4xbf16>
    %61 = vector.shape_cast %60 : vector<16x16x4xbf16> to vector<256x4xbf16>
    %c4 = arith.constant 4 : index
    %c0_26 = arith.constant 0 : index
    %c0_27 = arith.constant 0 : index
    %62 = vector.load %arg4[%c4, %c0_26, %c0_27] : memref<9x4x4xbf16, #tpu.memory_space<vmem>>, vector<1x4x4xbf16>
    %63 = vector.shape_cast %62 : vector<1x4x4xbf16> to vector<4x4xbf16>
    %cst_28 = arith.constant dense<0.000000e+00> : vector<256x4xf32>
    %64 = tpu.matmul %61, %63, %cst_28 {dimension_numbers = #tpu.dot_dimension_numbers<[1], [0], [0], [1], [0, 0, 1, 1], [], []>} : vector<256x4xbf16>, vector<4x4xbf16>, vector<256x4xf32> -> vector<256x4xf32>
    %65 = arith.addf %59, %64 : vector<256x4xf32>
    %66 = vector.extract_strided_slice %36 {offsets = [1, 2, 0], sizes = [16, 16, 4], strides = [1, 1, 1]} : vector<18x18x4xbf16> to vector<16x16x4xbf16>
    %67 = vector.shape_cast %66 : vector<16x16x4xbf16> to vector<256x4xbf16>
    %c5 = arith.constant 5 : index
    %c0_29 = arith.constant 0 : index
    %c0_30 = arith.constant 0 : index
    %68 = vector.load %arg4[%c5, %c0_29, %c0_30] : memref<9x4x4xbf16, #tpu.memory_space<vmem>>, vector<1x4x4xbf16>
    %69 = vector.shape_cast %68 : vector<1x4x4xbf16> to vector<4x4xbf16>
    %cst_31 = arith.constant dense<0.000000e+00> : vector<256x4xf32>
    %70 = tpu.matmul %67, %69, %cst_31 {dimension_numbers = #tpu.dot_dimension_numbers<[1], [0], [0], [1], [0, 0, 1, 1], [], []>} : vector<256x4xbf16>, vector<4x4xbf16>, vector<256x4xf32> -> vector<256x4xf32>
    %71 = arith.addf %65, %70 : vector<256x4xf32>
    %72 = vector.extract_strided_slice %36 {offsets = [2, 0, 0], sizes = [16, 16, 4], strides = [1, 1, 1]} : vector<18x18x4xbf16> to vector<16x16x4xbf16>
    %73 = vector.shape_cast %72 : vector<16x16x4xbf16> to vector<256x4xbf16>
    %c6 = arith.constant 6 : index
    %c0_32 = arith.constant 0 : index
    %c0_33 = arith.constant 0 : index
    %74 = vector.load %arg4[%c6, %c0_32, %c0_33] : memref<9x4x4xbf16, #tpu.memory_space<vmem>>, vector<1x4x4xbf16>
    %75 = vector.shape_cast %74 : vector<1x4x4xbf16> to vector<4x4xbf16>
    %cst_34 = arith.constant dense<0.000000e+00> : vector<256x4xf32>
    %76 = tpu.matmul %73, %75, %cst_34 {dimension_numbers = #tpu.dot_dimension_numbers<[1], [0], [0], [1], [0, 0, 1, 1], [], []>} : vector<256x4xbf16>, vector<4x4xbf16>, vector<256x4xf32> -> vector<256x4xf32>
    %77 = arith.addf %71, %76 : vector<256x4xf32>
    %78 = vector.extract_strided_slice %36 {offsets = [2, 1, 0], sizes = [16, 16, 4], strides = [1, 1, 1]} : vector<18x18x4xbf16> to vector<16x16x4xbf16>
    %79 = vector.shape_cast %78 : vector<16x16x4xbf16> to vector<256x4xbf16>
    %c7 = arith.constant 7 : index
    %c0_35 = arith.constant 0 : index
    %c0_36 = arith.constant 0 : index
    %80 = vector.load %arg4[%c7, %c0_35, %c0_36] : memref<9x4x4xbf16, #tpu.memory_space<vmem>>, vector<1x4x4xbf16>
    %81 = vector.shape_cast %80 : vector<1x4x4xbf16> to vector<4x4xbf16>
    %cst_37 = arith.constant dense<0.000000e+00> : vector<256x4xf32>
    %82 = tpu.matmul %79, %81, %cst_37 {dimension_numbers = #tpu.dot_dimension_numbers<[1], [0], [0], [1], [0, 0, 1, 1], [], []>} : vector<256x4xbf16>, vector<4x4xbf16>, vector<256x4xf32> -> vector<256x4xf32>
    %83 = arith.addf %77, %82 : vector<256x4xf32>
    %84 = vector.extract_strided_slice %36 {offsets = [2, 2, 0], sizes = [16, 16, 4], strides = [1, 1, 1]} : vector<18x18x4xbf16> to vector<16x16x4xbf16>
    %85 = vector.shape_cast %84 : vector<16x16x4xbf16> to vector<256x4xbf16>
    %c8 = arith.constant 8 : index
    %c0_38 = arith.constant 0 : index
    %c0_39 = arith.constant 0 : index
    %86 = vector.load %arg4[%c8, %c0_38, %c0_39] : memref<9x4x4xbf16, #tpu.memory_space<vmem>>, vector<1x4x4xbf16>
    %87 = vector.shape_cast %86 : vector<1x4x4xbf16> to vector<4x4xbf16>
    %cst_40 = arith.constant dense<0.000000e+00> : vector<256x4xf32>
    %88 = tpu.matmul %85, %87, %cst_40 {dimension_numbers = #tpu.dot_dimension_numbers<[1], [0], [0], [1], [0, 0, 1, 1], [], []>} : vector<256x4xbf16>, vector<4x4xbf16>, vector<256x4xf32> -> vector<256x4xf32>
    %89 = arith.addf %83, %88 : vector<256x4xf32>
    %c0_41 = arith.constant 0 : index
    %c0_42 = arith.constant 0 : index
    %90 = vector.load %arg8[%c0_41, %c0_42] : memref<1x4xf32, #tpu.memory_space<vmem>>, vector<1x4xf32>
    %91 = vector.broadcast %90 : vector<1x4xf32> to vector<256x4xf32>
    %92 = arith.mulf %89, %91 : vector<256x4xf32>
    %c0_43 = arith.constant 0 : index
    %c0_44 = arith.constant 0 : index
    %93 = vector.load %arg9[%c0_43, %c0_44] : memref<1x4xf32, #tpu.memory_space<vmem>>, vector<1x4xf32>
    %94 = vector.broadcast %93 : vector<1x4xf32> to vector<256x4xf32>
    %95 = arith.addf %92, %94 : vector<256x4xf32>
    %cst_45 = arith.constant 0.000000e+00 : f32
    %96 = vector.broadcast %cst_45 : f32 to vector<256x4xf32>
    %97 = arith.maximumf %95, %96 : vector<256x4xf32>
    %98 = arith.truncf %97 : vector<256x4xf32> to vector<256x4xbf16>
    %c0_46 = arith.constant 0 : index
    %c0_47 = arith.constant 0 : index
    %99 = vector.load %arg5[%c0_46, %c0_47] : memref<4x16xbf16, #tpu.memory_space<vmem>>, vector<4x16xbf16>
    %cst_48 = arith.constant dense<0.000000e+00> : vector<256x16xf32>
    %100 = tpu.matmul %98, %99, %cst_48 {dimension_numbers = #tpu.dot_dimension_numbers<[1], [0], [0], [1], [0, 0, 1, 1], [], []>} : vector<256x4xbf16>, vector<4x16xbf16>, vector<256x16xf32> -> vector<256x16xf32>
    %101 = vector.extract_strided_slice %4 {offsets = [1, 1, 0], sizes = [16, 16, 16], strides = [1, 1, 1]} : vector<18x18x16xbf16> to vector<16x16x16xbf16>
    %102 = vector.shape_cast %101 : vector<16x16x16xbf16> to vector<256x16xbf16>
    %103 = arith.extf %102 : vector<256x16xbf16> to vector<256x16xf32>
    %c0_49 = arith.constant 0 : index
    %c0_50 = arith.constant 0 : index
    %104 = vector.load %arg10[%c0_49, %c0_50] : memref<1x16xf32, #tpu.memory_space<vmem>>, vector<1x16xf32>
    %105 = vector.broadcast %104 : vector<1x16xf32> to vector<256x16xf32>
    %106 = arith.mulf %100, %105 : vector<256x16xf32>
    %c0_51 = arith.constant 0 : index
    %c0_52 = arith.constant 0 : index
    %107 = vector.load %arg11[%c0_51, %c0_52] : memref<1x16xf32, #tpu.memory_space<vmem>>, vector<1x16xf32>
    %108 = vector.broadcast %107 : vector<1x16xf32> to vector<256x16xf32>
    %109 = arith.addf %106, %108 : vector<256x16xf32>
    %110 = arith.addf %109, %103 : vector<256x16xf32>
    %cst_53 = arith.constant 0.000000e+00 : f32
    %111 = vector.broadcast %cst_53 : f32 to vector<256x16xf32>
    %112 = arith.maximumf %110, %111 : vector<256x16xf32>
    %113 = arith.truncf %112 : vector<256x16xf32> to vector<256x16xbf16>
    %c0_54 = arith.constant 0 : index
    %c0_55 = arith.constant 0 : index
    %114 = vector.load %arg12[%c0_54, %c0_55] : memref<256x16xbf16, #tpu.memory_space<vmem>>, vector<256x16xbf16>
    tpu.vector_store %arg12[%c0_54, %c0_55], %113 {strides = array<i32>} : memref<256x16xbf16, #tpu.memory_space<vmem>>, vector<256x16xbf16>,
    return
  }
  func.func @transform_0(%arg0: i32, %arg1: i32) -> (i32, i32, i32, i32) {
    %c0_i32 = arith.constant 0 : i32
    %c0_i32_0 = arith.constant 0 : i32
    %c0_i32_1 = arith.constant 0 : i32
    %c0_i32_2 = arith.constant 0 : i32
    return %arg0, %c0_i32, %c0_i32_0, %c0_i32_1 : i32, i32, i32, i32
  }
  func.func @transform_1(%arg0: i32, %arg1: i32) -> (i32, i32) {
    %c0_i32 = arith.constant 0 : i32
    %c0_i32_0 = arith.constant 0 : i32
    %c0_i32_1 = arith.constant 0 : i32
    return %c0_i32, %c0_i32_0 : i32, i32
  }
  func.func @transform_2(%arg0: i32, %arg1: i32) -> (i32, i32, i32) {
    %c0_i32 = arith.constant 0 : i32
    %c0_i32_0 = arith.constant 0 : i32
    %c0_i32_1 = arith.constant 0 : i32
    %c0_i32_2 = arith.constant 0 : i32
    return %c0_i32, %c0_i32_0, %c0_i32_1 : i32, i32, i32
  }
  func.func @transform_3(%arg0: i32, %arg1: i32) -> (i32, i32) {
    %c0_i32 = arith.constant 0 : i32
    %c0_i32_0 = arith.constant 0 : i32
    %c0_i32_1 = arith.constant 0 : i32
    return %c0_i32, %c0_i32_0 : i32, i32
  }
  func.func @transform_4(%arg0: i32, %arg1: i32) -> (i32, i32) {
    %c0_i32 = arith.constant 0 : i32
    %c0_i32_0 = arith.constant 0 : i32
    %c0_i32_1 = arith.constant 0 : i32
    return %c0_i32, %c0_i32_0 : i32, i32
  }
  func.func @transform_5(%arg0: i32, %arg1: i32) -> (i32, i32) {
    %c0_i32 = arith.constant 0 : i32
    %c0_i32_0 = arith.constant 0 : i32
    %c0_i32_1 = arith.constant 0 : i32
    return %c0_i32, %c0_i32_0 : i32, i32
  }
  func.func @transform_6(%arg0: i32, %arg1: i32) -> (i32, i32) {
    %c0_i32 = arith.constant 0 : i32
    %c0_i32_0 = arith.constant 0 : i32
    %c0_i32_1 = arith.constant 0 : i32
    return %c0_i32, %c0_i32_0 : i32, i32
  }
  func.func @transform_7(%arg0: i32, %arg1: i32) -> (i32, i32) {
    %c0_i32 = arith.constant 0 : i32
    %c0_i32_0 = arith.constant 0 : i32
    %c0_i32_1 = arith.constant 0 : i32
    return %c0_i32, %c0_i32_0 : i32, i32
  }
  func.func @transform_8(%arg0: i32, %arg1: i32) -> (i32, i32) {
    %c0_i32 = arith.constant 0 : i32
    %c0_i32_0 = arith.constant 0 : i32
    %c0_i32_1 = arith.constant 0 : i32
    return %c0_i32, %c0_i32_0 : i32, i32
  }
  func.func @transform_9(%arg0: i32, %arg1: i32) -> (i32, i32) {
    %c0_i32 = arith.constant 0 : i32
    %c0_i32_0 = arith.constant 0 : i32
    %c0_i32_1 = arith.constant 0 : i32
    return %c0_i32, %c0_i32_0 : i32, i32
  }
  func.func @transform_10(%arg0: i32, %arg1: i32) -> (i32, i32) {
    %c1_i32 = arith.constant 1 : i32
    %0 = arith.muli %arg0, %c1_i32 : i32
    %1 = arith.addi %0, %arg1 : i32
    %c0_i32 = arith.constant 0 : i32
    %c0_i32_0 = arith.constant 0 : i32
    return %1, %c0_i32 : i32, i32
  }
}

</mosaic_0001>

<bundles_post_ra>
// kernel: tpu_custom_call.1
= control target key start
LH: loop header
LB: loop body
LE: loop exit
PB: predicated region body
PF: predicated region fallthrough
CT: control target
= control target key end

     0   :  { %s4760_s13 = smov 0   ;;  %s4762_s14 = smov 0   ;;  %s6326_s0 = inlined_call_operand.vmem [shape: bf16[2,18,18,16], index: 0, kind: input, shape index: {}]   ;;  %s6327_s1 = inlined_call_operand.vmem [shape: bf16[16,4], index: 1, kind: input, shape index: {}]   ;;  %s6328_s2 = inlined_call_operand.vmem [shape: bf16[9,4,4], index: 2, kind: input, shape index: {}]   ;;  %s6329_s3 = inlined_call_operand.vmem [shape: bf16[4,16], index: 3, kind: input, shape index: {}]   ;;  %s6330_s4 = inlined_call_operand.vmem [shape: f32[1,4], index: 4, kind: input, shape index: {}]   ;;  %s6331_s5 = inlined_call_operand.vmem [shape: f32[1,4], index: 5, kind: input, shape index: {}]   ;;  %s6332_s6 = inlined_call_operand.vmem [shape: f32[1,4], index: 6, kind: input, shape index: {}]   ;;  %s6333_s7 = inlined_call_operand.vmem [shape: f32[1,4], index: 7, kind: input, shape index: {}]   ;;  %s6334_s8 = inlined_call_operand.vmem [shape: f32[1,16], index: 8, kind: input, shape index: {}]   ;;  %s6335_s9 = inlined_call_operand.vmem [shape: f32[1,16], index: 9, kind: input, shape index: {}]   ;;  %s6336_s10 = inlined_call_operand.vmem [shape: bf16[512,16], index: 10, kind: output, shape index: {}]  }
   0x1   :  { %s4764_s15 = smov 0  }
   0x2 LB: > { %s32_s16 = sadd.s32 1, %s4690_s14  ;;  %p4511_p0 = scmp.ge.s32.totalorder %s4694_s15, 1  ;;  %s4694_s15 = sphi %s4764_s15, %s20_s15   ;;  %s4690_s14 = sphi %s4762_s14, %s6340_s14   ;;  %s4686_s13 = sphi %s4760_s13, %s6339_s13  }
   0x3   : > { %p34_p1 = scmp.ge.s32.totalorder %s32_s16, 2  ;;  %p326_p2 = scmp.lt.s32.totalorder %s4694_s15, 3 }
   0x5   : > { %s6342_s16 = smov (%p34_p1, %s32_s16), 0  ;;  %p327_p3 = pnand %p4511_p0, %p326_p2 }
   0x6   : > { %p365_p4 = scmp.lt.s32.totalorder (!%p327_p3), %s4686_s13, 1  ;;  %s4697_s28 = smov (!%p327_p3), 8  }
   0x7   : > { %330 = sbr.rel (%p327_p3) target bundleno = 1118 (0x45e), region = 60  ;;  %s4698_s29 = smov (!%p327_p3), 4  }
   0x8   : > { %s4699_s30 = smov (!%p327_p3), 12   ;;  %s4700_s11 = smov (!%p327_p3), 20  }
   0x9   : > { %s4701_s12 = smov (!%p327_p3), 16   ;;  %s4702_s17 = smov (!%p327_p3), 24  }
   0xa   : > { %s4703_s18 = smov (!%p327_p3), 32  }
   0xc   : > { %v4574_v0 = vld [vmem:[%s6327_s1] sm:$0xff]  ;;  %s366_s19 = scalar_select %p365_p4, %s4686_s13, 1  ;;  %vm545_vm0 = vcmask 1040384   ;;  %vm549_vm1 = vcmask 1041409   ;;  %vm553_vm2 = vcmask 1042434   ;;  %vm557_vm3 = vcmask 1043459  }
   0xd   : > { %1391 = vmatpush.bf16.msra.mxu0 %v4574_v0  ;;  %4575 = vmatpush.bf16.msra.mxu3 %v4574_v0  ;;  %vm1341_vm4 = vcmask 130048   ;;  %vm2601_vm5 = vsmask.f32 7424  ;;  %vm2826_vm8 = vcmask 1046528   ;;  %vm3178_vm9 = vcmask 64512  }
   0xe   : > { %s4580_s20 = smul.u32 216, %s366_s19  ;;  %s4704_s19 = smov 28   ;;  %vm3145_vm10 = vcmask 31744   ;;  %vm3211_vm11 = vcmask 97280   ;;  %vm3276_vm12 = vcmask 162816   ;;  %vm3309_vm13 = vcmask 195584  }
   0xf   : > { %vm3342_vm14 = vcmask 228352   ;;  %vm3375_vm15 = vcmask 261120  }
  0x10   : > { %s4788_s23 = scalar_lea.vmem %s6326_s0, %s4580_s20 }
  0x11   : > { %v383_v1 = vld [vmem:[%s4788_s23] sm:$0xf]  ;;  %v384_v2 = vld [vmem:[%s4788_s23 + $0x4] sm:$0xf]  ;;  %v386_v19 = vld [vmem:[%s4788_s23 + $0xc] sm:$0xf] }
  0x12   : > { %v491_v3 = vrot.slane %v383_v1, 3  ;;  %v492_v4 = vrot.slane %v384_v2, 3  ;;  %v385_v20 = vld [vmem:[%s4788_s23 + $0x8] sm:$0x1]  ;;  %v494_v21 = vrot.slane %v386_v19, 3 }
  0x13   : > { %v387_v22 = vld [vmem:[%s4788_s23 + $0x10] sm:$0xf]  ;;  %v493_v23 = vrot.slane %v385_v20, 3  ;;  %v389_v39 = vld [vmem:[%s4788_s23 + $0x18] sm:$0xf] }
  0x14   : > { %v548_v5 = vsel %vm545_vm0, %v383_v1, %v491_v3  ;;  %v550_v6 = vsel %vm549_vm1, %v383_v1, %v491_v3  ;;  %v554_v7 = vsel %vm553_vm2, %v383_v1, %v491_v3  ;;  %v558_v8 = vsel %vm557_vm3, %v383_v1, %v491_v3  ;;  %v388_v40 = vld [vmem:[%s4788_s23 + $0x14] sm:$0x1]  ;;  %v390_v42 = vld [vmem:[%s4788_s23 + $0x1c] sm:$0xf]  ;;  %v392_v59 = vld [vmem:[%s4788_s23 + $0x24] sm:$0xf] }
  0x15   : > { %v552_v9 = vrot.slane %v550_v6, 1  ;;  %v556_v10 = vrot.slane %v554_v7, 2  ;;  %v560_v11 = vrot.slane %v558_v8, 3  ;;  %v563_v12 = vsel %vm545_vm0, %v384_v2, %v492_v4  ;;  %1037 = vst [vmem:[#allocation1] ss:$9 sm:$0xff] %v548_v5 }
  0x16   : > { %v564_v13 = vsel %vm549_vm1, %v384_v2, %v492_v4  ;;  %v567_v14 = vsel %vm553_vm2, %v384_v2, %v492_v4  ;;  %v570_v15 = vsel %vm557_vm3, %v384_v2, %v492_v4  ;;  %1048 = vst [vmem:[#allocation1 + $0x4] ss:$9 sm:$0xff] %v563_v12  ;;  %v495_v24 = vrot.slane %v387_v22, 3  ;;  %v391_v60 = vld [vmem:[%s4788_s23 + $0x20] sm:$0x1] }
  0x17   : > { %v566_v16 = vrot.slane %v564_v13, 1  ;;  %v569_v17 = vrot.slane %v567_v14, 2  ;;  %1040 = vst [vmem:[#allocation1 + $0x1] ss:$9 sm:$0xff] %v552_v9  ;;  %v572_v18 = vrot.slane %v570_v15, 3  ;;  %v579_v25 = vsel %vm549_vm1, %v386_v19, %v494_v21 }
  0x18   : > { %1043 = vst [vmem:[#allocation1 + $0x2] ss:$9 sm:$0xff] %v556_v10  ;;  %v582_v26 = vsel %vm553_vm2, %v386_v19, %v494_v21  ;;  %v575_v27 = vsel %vm545_vm0, %v385_v20, %v493_v23  ;;  %v585_v28 = vsel %vm557_vm3, %v386_v19, %v494_v21  ;;  %v578_v29 = vsel %vm545_vm0, %v386_v19, %v494_v21  ;;  %v393_v2 = vld [vmem:[%s4788_s23 + $0x28] sm:$0xf]  ;;  %v395_v15 = vld [vmem:[%s4788_s23 + $0x30] sm:$0xf] }
  0x19   : > { %1046 = vst [vmem:[#allocation1 + $0x3] ss:$9 sm:$0xff] %v560_v11  ;;  %v581_v30 = vrot.slane %v579_v25, 1  ;;  %v584_v32 = vrot.slane %v582_v26, 2  ;;  %v591_v33 = vsel %vm549_vm1, %v387_v22, %v495_v24  ;;  %v587_v34 = vrot.slane %v585_v28, 3 }
  0x1a   : > { %1051 = vst [vmem:[#allocation1 + $0x5] ss:$9 sm:$0xff] %v566_v16  ;;  %v594_v35 = vsel %vm553_vm2, %v387_v22, %v495_v24  ;;  %v590_v36 = vsel %vm545_vm0, %v387_v22, %v495_v24  ;;  %v593_v37 = vrot.slane %v591_v33, 1  ;;  %v497_v41 = vrot.slane %v389_v39, 3  ;;  %v394_v16 = vld [vmem:[%s4788_s23 + $0x2c] sm:$0x1] }
  0x1b   : > { %1054 = vst [vmem:[#allocation1 + $0x6] ss:$9 sm:$0xff] %v569_v17  ;;  %v596_v38 = vrot.slane %v594_v35, 2  ;;  %v597_v43 = vsel %vm557_vm3, %v387_v22, %v495_v24  ;;  %v496_v44 = vrot.slane %v388_v40, 3  ;;  %v498_v45 = vrot.slane %v390_v42, 3 }
  0x1c   : > { %1057 = vst [vmem:[#allocation1 + $0x7] ss:$9 sm:$0xff] %v572_v18  ;;  %v599_v46 = vrot.slane %v597_v43, 3  ;;  %v606_v47 = vsel %vm549_vm1, %v389_v39, %v497_v41  ;;  %v609_v48 = vsel %vm553_vm2, %v389_v39, %v497_v41  ;;  %v612_v50 = vsel %vm557_vm3, %v389_v39, %v497_v41  ;;  %v396_v33 = vld [vmem:[%s4788_s23 + $0x34] sm:$0xf] }
  0x1d   : > { %v602_v49 = vsel %vm545_vm0, %v388_v40, %v496_v44  ;;  %v605_v52 = vsel %vm545_vm0, %v389_v39, %v497_v41  ;;  %v608_v53 = vrot.slane %v606_v47, 1  ;;  %v611_v54 = vrot.slane %v609_v48, 2 }
  0x1e   : > { %v618_v55 = vsel %vm549_vm1, %v390_v42, %v498_v45  ;;  %v614_v56 = vrot.slane %v612_v50, 3  ;;  %v617_v57 = vsel %vm545_vm0, %v390_v42, %v498_v45  ;;  %v500_v61 = vrot.slane %v392_v59, 3 }
  0x1f   : > { %v620_v58 = vrot.slane %v618_v55, 1  ;;  %v621_v62 = vsel %vm553_vm2, %v390_v42, %v498_v45  ;;  %v624_v63 = vsel %vm557_vm3, %v390_v42, %v498_v45  ;;  %v499_v0 = vrot.slane %v391_v60, 3 }
  0x20   : > { %v623_v1 = vrot.slane %v621_v62, 2  ;;  %v626_v3 = vrot.slane %v624_v63, 3  ;;  %v633_v4 = vsel %vm549_vm1, %v392_v59, %v500_v61  ;;  %v636_v5 = vsel %vm553_vm2, %v392_v59, %v500_v61 }
  0x21   : > { %v629_v7 = vsel %vm545_vm0, %v391_v60, %v499_v0  ;;  %v639_v8 = vsel %vm557_vm3, %v392_v59, %v500_v61  ;;  %v501_v9 = vrot.slane %v393_v2, 3  ;;  %v632_v10 = vsel %vm545_vm0, %v392_v59, %v500_v61 }
  0x22   : > { %v635_v11 = vrot.slane %v633_v4, 1  ;;  %v638_v12 = vrot.slane %v636_v5, 2  ;;  %v641_v13 = vrot.slane %v639_v8, 3  ;;  %v503_v18 = vrot.slane %v395_v15, 3 }
  0x23   : > { %v1058_v31 = vld [vmem:[#allocation1] sm:$0xff]  ;;  %v644_v14 = vsel %vm545_vm0, %v393_v2, %v501_v9  ;;  %v645_v17 = vsel %vm549_vm1, %v393_v2, %v501_v9  ;;  %v648_v19 = vsel %vm553_vm2, %v393_v2, %v501_v9  ;;  %v651_v20 = vsel %vm557_vm3, %v393_v2, %v501_v9 }
  0x24   : > { %4519 = vmatmul.msk.bf16.vlgmr.msra.gmra.mxu0 %vm1341_vm4, %v1058_v31  ;;  %1059 = vst [vmem:[#allocation1] ss:$9 sm:$0xff] %v575_v27  ;;  %v502_v21 = vrot.slane %v394_v16, 3  ;;  %v647_v22 = vrot.slane %v645_v17, 1  ;;  %v650_v23 = vrot.slane %v648_v19, 2  ;;  %v653_v24 = vrot.slane %v651_v20, 3 }
  0x25   : > { %1060 = vst [vmem:[#allocation1 + $0x1] ss:$9 sm:$0xff] %v578_v29  ;;  %v660_v25 = vsel %vm549_vm1, %v395_v15, %v503_v18  ;;  %v663_v27 = vsel %vm553_vm2, %v395_v15, %v503_v18  ;;  %v666_v29 = vsel %vm557_vm3, %v395_v15, %v503_v18  ;;  %v504_v35 = vrot.slane %v396_v33, 3  ;;  %v404_v17 = vld [vmem:[%s4788_s23 + $0x54] sm:$0xf] }
  0x26   : > { %1062 = vst [vmem:[#allocation1 + $0x2] ss:$9 sm:$0xff] %v581_v30  ;;  %v656_v28 = vsel %vm545_vm0, %v394_v16, %v502_v21  ;;  %v659_v30 = vsel %vm545_vm0, %v395_v15, %v503_v18  ;;  %v662_v31 = vrot.slane %v660_v25, 1  ;;  %v512_v25 = vrot.slane %v404_v17, 3 }
  0x27   : > { %1064 = vst [vmem:[#allocation1 + $0x3] ss:$9 sm:$0xff] %v584_v32  ;;  %v665_v32 = vrot.slane %v663_v27, 2  ;;  %v675_v40 = vsel %vm553_vm2, %v396_v33, %v504_v35  ;;  %v678_v41 = vsel %vm557_vm3, %v396_v33, %v504_v35  ;;  %v671_v43 = vsel %vm545_vm0, %v396_v33, %v504_v35 }
  0x28   : > { %1066 = vst [vmem:[#allocation1 + $0x4] ss:$9 sm:$0xff] %v587_v34  ;;  %v668_v34 = vrot.slane %v666_v29, 3  ;;  %v677_v45 = vrot.slane %v675_v40, 2  ;;  %v680_v47 = vrot.slane %v678_v41, 3  ;;  %v740_v29 = vsel %vm545_vm0, %v404_v17, %v512_v25 }
  0x29   : > { %1067 = vst [vmem:[#allocation1 + $0x5] ss:$9 sm:$0xff] %v590_v36  ;;  %v398_v36 = vld [vmem:[%s4788_s23 + $0x3c] sm:$0xf] }
  0x2a   : > { %1069 = vst [vmem:[#allocation1 + $0x6] ss:$9 sm:$0xff] %v593_v37  ;;  %v397_v37 = vld [vmem:[%s4788_s23 + $0x38] sm:$0x1]  ;;  %v506_v39 = vrot.slane %v398_v36, 3 }
  0x2b   : > { %1071 = vst [vmem:[#allocation1 + $0x7] ss:$9 sm:$0xff] %v596_v38  ;;  %v672_v38 = vsel %vm549_vm1, %v396_v33, %v504_v35  ;;  %v505_v42 = vrot.slane %v397_v37, 3  ;;  %v744_v33 = vsel %vm553_vm2, %v404_v17, %v512_v25 }
  0x2c   : > { %v674_v44 = vrot.slane %v672_v38, 1  ;;  %v687_v48 = vsel %vm549_vm1, %v398_v36, %v506_v39 }
  0x2d   : > { %v683_v50 = vsel %vm545_vm0, %v397_v37, %v505_v42  ;;  %v746_v37 = vrot.slane %v744_v33, 2 }
  0x32   : > { %v1072_v51 = vld [vmem:[#allocation1] sm:$0xff] }
  0x33   : > { %1074 = vst [vmem:[#allocation1] ss:$9 sm:$0xff] %v599_v46 }
  0x34   : > { %4520 = vmatmul.msk.bf16.gmra.mxu0 %vm1341_vm4, %v1072_v51  ;;  %1075 = vst [vmem:[#allocation1 + $0x1] ss:$9 sm:$0xff] %v602_v49  ;;  %v690_v49 = vsel %vm553_vm2, %v398_v36, %v506_v39  ;;  %v686_v51 = vsel %vm545_vm0, %v398_v36, %v506_v39 }
  0x35   : > { %1076 = vst [vmem:[#allocation1 + $0x2] ss:$9 sm:$0xff] %v605_v52  ;;  %v689_v52 = vrot.slane %v687_v48, 1  ;;  %v407_v48 = vld [vmem:[%s4788_s23 + $0x60] sm:$0xf] }
  0x36   : > { %1078 = vst [vmem:[#allocation1 + $0x3] ss:$9 sm:$0xff] %v608_v53  ;;  %v692_v53 = vrot.slane %v690_v49, 2 }
  0x37   : > { %1080 = vst [vmem:[#allocation1 + $0x4] ss:$9 sm:$0xff] %v611_v54  ;;  %v399_v54 = vld [vmem:[%s4788_s23 + $0x40] sm:$0xf] }
  0x38   : > { %1082 = vst [vmem:[#allocation1 + $0x5] ss:$9 sm:$0xff] %v614_v56  ;;  %v507_v55 = vrot.slane %v399_v54, 3  ;;  %v401_v56 = vld [vmem:[%s4788_s23 + $0x48] sm:$0xf] }
  0x39   : > { %1083 = vst [vmem:[#allocation1 + $0x6] ss:$9 sm:$0xff] %v617_v57  ;;  %v693_v57 = vsel %vm557_vm3, %v398_v36, %v506_v39  ;;  %v509_v60 = vrot.slane %v401_v56, 3  ;;  %v406_v36 = vld [vmem:[%s4788_s23 + $0x5c] sm:$0x1] }
  0x3a   : > { %1085 = vst [vmem:[#allocation1 + $0x7] ss:$9 sm:$0xff] %v620_v58  ;;  %v400_v58 = vld [vmem:[%s4788_s23 + $0x44] sm:$0x1]  ;;  %v699_v59 = vsel %vm549_vm1, %v399_v54, %v507_v55  ;;  %v695_v61 = vrot.slane %v693_v57, 3  ;;  %v702_v62 = vsel %vm553_vm2, %v399_v54, %v507_v55  ;;  %v705_v63 = vsel %vm557_vm3, %v399_v54, %v507_v55 }
  0x3b   : > { %v508_v0 = vrot.slane %v400_v58, 3  ;;  %v701_v2 = vrot.slane %v699_v59, 1  ;;  %v704_v4 = vrot.slane %v702_v62, 2  ;;  %v707_v5 = vrot.slane %v705_v63, 3 }
  0x3c   : > { %v713_v8 = vsel %vm545_vm0, %v401_v56, %v509_v60 }
  0x41   : > { %v1086_v6 = vld [vmem:[#allocation1] sm:$0xff] }
  0x42   : > { %1088 = vst [vmem:[#allocation1] ss:$9 sm:$0xff] %v623_v1  ;;  %v698_v1 = vsel %vm545_vm0, %v399_v54, %v507_v55 }
  0x43   : > { %1090 = vst [vmem:[#allocation1 + $0x1] ss:$9 sm:$0xff] %v626_v3 }
  0x44   : > { %4521 = vmatmul.msk.bf16.gmra.mxu0 %vm1341_vm4, %v1086_v6  ;;  %1091 = vst [vmem:[#allocation1 + $0x2] ss:$9 sm:$0xff] %v629_v7  ;;  %v714_v6 = vsel %vm549_vm1, %v401_v56, %v509_v60  ;;  %v710_v7 = vsel %vm545_vm0, %v400_v58, %v508_v0 }
  0x45   : > { %1092 = vst [vmem:[#allocation1 + $0x3] ss:$9 sm:$0xff] %v632_v10  ;;  %v716_v9 = vrot.slane %v714_v6, 1  ;;  %v402_v10 = vld [vmem:[%s4788_s23 + $0x4c] sm:$0xf] }
  0x46   : > { %1094 = vst [vmem:[#allocation1 + $0x4] ss:$9 sm:$0xff] %v635_v11  ;;  %v510_v11 = vrot.slane %v402_v10, 3 }
  0x47   : > { %1096 = vst [vmem:[#allocation1 + $0x5] ss:$9 sm:$0xff] %v638_v12  ;;  %v717_v12 = vsel %vm553_vm2, %v401_v56, %v509_v60 }
  0x48   : > { %1098 = vst [vmem:[#allocation1 + $0x6] ss:$9 sm:$0xff] %v641_v13  ;;  %v720_v13 = vsel %vm557_vm3, %v401_v56, %v509_v60  ;;  %v719_v15 = vrot.slane %v717_v12, 2  ;;  %v726_v16 = vsel %vm549_vm1, %v402_v10, %v510_v11  ;;  %v729_v19 = vsel %vm553_vm2, %v402_v10, %v510_v11 }
  0x49   : > { %1099 = vst [vmem:[#allocation1 + $0x7] ss:$9 sm:$0xff] %v644_v14  ;;  %v403_v14 = vld [vmem:[%s4788_s23 + $0x50] sm:$0x1]  ;;  %v722_v18 = vrot.slane %v720_v13, 3  ;;  %v732_v20 = vsel %vm557_vm3, %v402_v10, %v510_v11 }
  0x4a   : > { %v734_v27 = vrot.slane %v732_v20, 3 }
  0x50   : > { %v1100_v26 = vld [vmem:[#allocation1] sm:$0xff] }
  0x51   : > { %1102 = vst [vmem:[#allocation1] ss:$9 sm:$0xff] %v647_v22  ;;  %v511_v22 = vrot.slane %v403_v14, 3 }
  0x52   : > { %1104 = vst [vmem:[#allocation1 + $0x1] ss:$9 sm:$0xff] %v650_v23  ;;  %v725_v23 = vsel %vm545_vm0, %v402_v10, %v510_v11 }
  0x53   : > { %1106 = vst [vmem:[#allocation1 + $0x2] ss:$9 sm:$0xff] %v653_v24  ;;  %v728_v24 = vrot.slane %v726_v16, 1 }
  0x54   : > { %4522 = vmatmul.msk.bf16.gmra.mxu0 %vm1341_vm4, %v1100_v26  ;;  %1107 = vst [vmem:[#allocation1 + $0x3] ss:$9 sm:$0xff] %v656_v28  ;;  %v731_v26 = vrot.slane %v729_v19, 2  ;;  %v737_v28 = vsel %vm545_vm0, %v403_v14, %v511_v22 }
  0x55   : > { %1108 = vst [vmem:[#allocation1 + $0x4] ss:$9 sm:$0xff] %v659_v30  ;;  %v405_v30 = vld [vmem:[%s4788_s23 + $0x58] sm:$0xf] }
  0x56   : > { %1110 = vst [vmem:[#allocation1 + $0x5] ss:$9 sm:$0xff] %v662_v31  ;;  %v513_v31 = vrot.slane %v405_v30, 3 }
  0x57   : > { %1112 = vst [vmem:[#allocation1 + $0x6] ss:$9 sm:$0xff] %v665_v32  ;;  %v741_v32 = vsel %vm549_vm1, %v404_v17, %v512_v25 }
  0x58   : > { %1114 = vst [vmem:[#allocation1 + $0x7] ss:$9 sm:$0xff] %v668_v34  ;;  %v747_v34 = vsel %vm557_vm3, %v404_v17, %v512_v25  ;;  %v743_v35 = vrot.slane %v741_v32, 1  ;;  %v753_v38 = vsel %vm549_vm1, %v405_v30, %v513_v31  ;;  %v756_v40 = vsel %vm553_vm2, %v405_v30, %v513_v31  ;;  %v412_v25 = vld [vmem:[%s4788_s23 + $0x74] sm:$0x1] }
  0x59   : > { %v749_v39 = vrot.slane %v747_v34, 3  ;;  %v759_v42 = vsel %vm557_vm3, %v405_v30, %v513_v31 }
  0x5f   : > { %v1115_v46 = vld [vmem:[#allocation1] sm:$0xff] }
  0x60   : > { %1116 = vst [vmem:[#allocation1] ss:$9 sm:$0xff] %v671_v43  ;;  %v514_v43 = vrot.slane %v406_v36, 3 }
  0x61   : > { %1118 = vst [vmem:[#allocation1 + $0x1] ss:$9 sm:$0xff] %v674_v44  ;;  %v752_v44 = vsel %vm545_vm0, %v405_v30, %v513_v31 }
  0x62   : > { %1120 = vst [vmem:[#allocation1 + $0x2] ss:$9 sm:$0xff] %v677_v45  ;;  %v755_v45 = vrot.slane %v753_v38, 1  ;;  %v764_v49 = vsel %vm545_vm0, %v406_v36, %v514_v43 }
  0x63   : > { %1122 = vst [vmem:[#allocation1 + $0x3] ss:$9 sm:$0xff] %v680_v47  ;;  %v761_v47 = vrot.slane %v759_v42, 3 }
  0x64   : > { %4523 = vmatmul.msk.bf16.gmra.mxu0 %vm1341_vm4, %v1115_v46  ;;  %1123 = vst [vmem:[#allocation1 + $0x4] ss:$9 sm:$0xff] %v683_v50  ;;  %v758_v46 = vrot.slane %v756_v40, 2  ;;  %v515_v50 = vrot.slane %v407_v48, 3 }
  0x65   : > { %1124 = vst [vmem:[#allocation1 + $0x5] ss:$9 sm:$0xff] %v686_v51  ;;  %v408_v51 = vld [vmem:[%s4788_s23 + $0x64] sm:$0xf] }
  0x66   : > { %1126 = vst [vmem:[#allocation1 + $0x6] ss:$9 sm:$0xff] %v689_v52  ;;  %v516_v52 = vrot.slane %v408_v51, 3  ;;  %v771_v54 = vsel %vm553_vm2, %v407_v48, %v515_v50  ;;  %v774_v55 = vsel %vm557_vm3, %v407_v48, %v515_v50  ;;  %v767_v56 = vsel %vm545_vm0, %v407_v48, %v515_v50 }
  0x67   : > { %1128 = vst [vmem:[#allocation1 + $0x7] ss:$9 sm:$0xff] %v692_v53  ;;  %v768_v53 = vsel %vm549_vm1, %v407_v48, %v515_v50  ;;  %v773_v58 = vrot.slane %v771_v54, 2 }
  0x68   : > { %v770_v57 = vrot.slane %v768_v53, 1  ;;  %v780_v59 = vsel %vm549_vm1, %v408_v51, %v516_v52  ;;  %v783_v62 = vsel %vm553_vm2, %v408_v51, %v516_v52  ;;  %v786_v63 = vsel %vm557_vm3, %v408_v51, %v516_v52 }
  0x69   : > { %v779_v0 = vsel %vm545_vm0, %v408_v51, %v516_v52  ;;  %v417_v51 = vld [vmem:[%s4788_s23 + $0x88] sm:$0xf] }
  0x6e   : > { %v1129_v3 = vld [vmem:[#allocation1] sm:$0xff] }
  0x6f   : > { %1131 = vst [vmem:[#allocation1] ss:$9 sm:$0xff] %v695_v61  ;;  %v776_v61 = vrot.slane %v774_v55, 3 }
  0x70   : > { %1132 = vst [vmem:[#allocation1 + $0x1] ss:$9 sm:$0xff] %v698_v1  ;;  %v782_v1 = vrot.slane %v780_v59, 1 }
  0x71   : > { %1134 = vst [vmem:[#allocation1 + $0x2] ss:$9 sm:$0xff] %v701_v2  ;;  %v785_v2 = vrot.slane %v783_v62, 2 }
  0x72   : > { %1136 = vst [vmem:[#allocation1 + $0x3] ss:$9 sm:$0xff] %v704_v4  ;;  %v788_v4 = vrot.slane %v786_v63, 3 }
  0x73   : > { %1138 = vst [vmem:[#allocation1 + $0x4] ss:$9 sm:$0xff] %v707_v5  ;;  %v409_v5 = vld [vmem:[%s4788_s23 + $0x68] sm:$0x1] }
  0x74   : > { %4524 = vmatmul.msk.bf16.gmra.mxu0 %vm1341_vm4, %v1129_v3  ;;  %1139 = vst [vmem:[#allocation1 + $0x5] ss:$9 sm:$0xff] %v710_v7  ;;  %v410_v3 = vld [vmem:[%s4788_s23 + $0x6c] sm:$0xf]  ;;  %v411_v7 = vld [vmem:[%s4788_s23 + $0x70] sm:$0xf] }
  0x75   : > { %1140 = vst [vmem:[#allocation1 + $0x6] ss:$9 sm:$0xff] %v713_v8  ;;  %v518_v6 = vrot.slane %v410_v3, 3  ;;  %v517_v8 = vrot.slane %v409_v5, 3 }
  0x76   : > { %1142 = vst [vmem:[#allocation1 + $0x7] ss:$9 sm:$0xff] %v716_v9  ;;  %v519_v9 = vrot.slane %v411_v7, 3 }
  0x77   : > { %v795_v10 = vsel %vm549_vm1, %v410_v3, %v518_v6  ;;  %v798_v11 = vsel %vm553_vm2, %v410_v3, %v518_v6  ;;  %v791_v12 = vsel %vm545_vm0, %v409_v5, %v517_v8  ;;  %v801_v13 = vsel %vm557_vm3, %v410_v3, %v518_v6 }
  0x78   : > { %v794_v14 = vsel %vm545_vm0, %v410_v3, %v518_v6  ;;  %v800_v16 = vrot.slane %v798_v11, 2  ;;  %v807_v17 = vsel %vm549_vm1, %v411_v7, %v519_v9  ;;  %v803_v19 = vrot.slane %v801_v13, 3 }
  0x79   : > { %v810_v20 = vsel %vm553_vm2, %v411_v7, %v519_v9  ;;  %v809_v22 = vrot.slane %v807_v17, 1 }
  0x7d   : > { %v1143_v21 = vld [vmem:[#allocation1] sm:$0xff] }
  0x7e   : > { %1145 = vst [vmem:[#allocation1] ss:$9 sm:$0xff] %v719_v15  ;;  %v797_v15 = vrot.slane %v795_v10, 1 }
  0x7f   : > { %1147 = vst [vmem:[#allocation1 + $0x1] ss:$9 sm:$0xff] %v722_v18 }
  0x80   : > { %1148 = vst [vmem:[#allocation1 + $0x2] ss:$9 sm:$0xff] %v725_v23  ;;  %v812_v23 = vrot.slane %v810_v20, 2 }
  0x81   : > { %1150 = vst [vmem:[#allocation1 + $0x3] ss:$9 sm:$0xff] %v728_v24  ;;  %v413_v24 = vld [vmem:[%s4788_s23 + $0x78] sm:$0xf] }
  0x82   : > { %1152 = vst [vmem:[#allocation1 + $0x4] ss:$9 sm:$0xff] %v731_v26  ;;  %v521_v26 = vrot.slane %v413_v24, 3 }
  0x83   : > { %1154 = vst [vmem:[#allocation1 + $0x5] ss:$9 sm:$0xff] %v734_v27  ;;  %v414_v27 = vld [vmem:[%s4788_s23 + $0x7c] sm:$0xf] }
  0x84   : > { %4525 = vmatmul.msk.bf16.gmra.mxu0 %vm1341_vm4, %v1143_v21  ;;  %1155 = vst [vmem:[#allocation1 + $0x6] ss:$9 sm:$0xff] %v737_v28  ;;  %v806_v21 = vsel %vm545_vm0, %v411_v7, %v519_v9  ;;  %v813_v28 = vsel %vm557_vm3, %v411_v7, %v519_v9  ;;  %v522_v30 = vrot.slane %v414_v27, 3  ;;  %v822_v32 = vsel %vm549_vm1, %v413_v24, %v521_v26 }
  0x85   : > { %1156 = vst [vmem:[#allocation1 + $0x7] ss:$9 sm:$0xff] %v740_v29  ;;  %v520_v29 = vrot.slane %v412_v25, 3  ;;  %v815_v31 = vrot.slane %v813_v28, 3  ;;  %v825_v33 = vsel %vm553_vm2, %v413_v24, %v521_v26  ;;  %v821_v36 = vsel %vm545_vm0, %v413_v24, %v521_v26 }
  0x86   : > { %v834_v40 = vsel %vm549_vm1, %v414_v27, %v522_v30  ;;  %v833_v42 = vsel %vm545_vm0, %v414_v27, %v522_v30  ;;  %v840_v48 = vsel %vm557_vm3, %v414_v27, %v522_v30 }
  0x87   : > { %v818_v34 = vsel %vm545_vm0, %v412_v25, %v520_v29  ;;  %v836_v43 = vrot.slane %v834_v40, 1  ;;  %v842_v52 = vrot.slane %v840_v48, 3  ;;  %v423_v40 = vld [vmem:[%s4788_s23 + $0xa0] sm:$0xf] }
  0x8c   : > { %v1157_v41 = vld [vmem:[#allocation1] sm:$0xff] }
  0x8d   : > { %1159 = vst [vmem:[#allocation1] ss:$9 sm:$0xff] %v743_v35  ;;  %v828_v35 = vsel %vm557_vm3, %v413_v24, %v521_v26 }
  0x8e   : > { %1161 = vst [vmem:[#allocation1 + $0x1] ss:$9 sm:$0xff] %v746_v37  ;;  %v824_v37 = vrot.slane %v822_v32, 1 }
  0x8f   : > { %1163 = vst [vmem:[#allocation1 + $0x2] ss:$9 sm:$0xff] %v749_v39  ;;  %v827_v39 = vrot.slane %v825_v33, 2 }
  0x90   : > { %1164 = vst [vmem:[#allocation1 + $0x3] ss:$9 sm:$0xff] %v752_v44  ;;  %v416_v44 = vld [vmem:[%s4788_s23 + $0x84] sm:$0xf] }
  0x91   : > { %1166 = vst [vmem:[#allocation1 + $0x4] ss:$9 sm:$0xff] %v755_v45  ;;  %v415_v45 = vld [vmem:[%s4788_s23 + $0x80] sm:$0x1] }
  0x92   : > { %1168 = vst [vmem:[#allocation1 + $0x5] ss:$9 sm:$0xff] %v758_v46  ;;  %v524_v46 = vrot.slane %v416_v44, 3 }
  0x93   : > { %1170 = vst [vmem:[#allocation1 + $0x6] ss:$9 sm:$0xff] %v761_v47  ;;  %v837_v47 = vsel %vm553_vm2, %v414_v27, %v522_v30 }
  0x94   : > { %4526 = vmatmul.msk.bf16.gmra.mxu0 %vm1341_vm4, %v1157_v41  ;;  %1171 = vst [vmem:[#allocation1 + $0x7] ss:$9 sm:$0xff] %v764_v49  ;;  %v830_v41 = vrot.slane %v828_v35, 3  ;;  %v523_v49 = vrot.slane %v415_v45, 3  ;;  %v839_v50 = vrot.slane %v837_v47, 2  ;;  %v849_v53 = vsel %vm549_vm1, %v416_v44, %v524_v46 }
  0x95   : > { %v852_v54 = vsel %vm553_vm2, %v416_v44, %v524_v46  ;;  %v848_v59 = vsel %vm545_vm0, %v416_v44, %v524_v46 }
  0x96   : > { %v845_v55 = vsel %vm545_vm0, %v415_v45, %v523_v49  ;;  %v424_v45 = vld [vmem:[%s4788_s23 + $0xa4] sm:$0x1] }
  0x9b   : > { %v1172_v60 = vld [vmem:[#allocation1] sm:$0xff] }
  0x9c   : > { %1173 = vst [vmem:[#allocation1] ss:$9 sm:$0xff] %v767_v56  ;;  %v855_v56 = vsel %vm557_vm3, %v416_v44, %v524_v46 }
  0x9d   : > { %1175 = vst [vmem:[#allocation1 + $0x1] ss:$9 sm:$0xff] %v770_v57  ;;  %v857_v62 = vrot.slane %v855_v56, 3 }
  0x9e   : > { %1177 = vst [vmem:[#allocation1 + $0x2] ss:$9 sm:$0xff] %v773_v58  ;;  %v525_v58 = vrot.slane %v417_v51, 3 }
  0x9f   : > { %1179 = vst [vmem:[#allocation1 + $0x3] ss:$9 sm:$0xff] %v776_v61  ;;  %v854_v61 = vrot.slane %v852_v54, 2 }
  0xa0   : > { %1180 = vst [vmem:[#allocation1 + $0x4] ss:$9 sm:$0xff] %v779_v0  ;;  %v860_v63 = vsel %vm545_vm0, %v417_v51, %v525_v58  ;;  %v419_v0 = vld [vmem:[%s4788_s23 + $0x90] sm:$0xf]  ;;  %v867_v5 = vsel %vm557_vm3, %v417_v51, %v525_v58 }
  0xa1   : > { %1182 = vst [vmem:[#allocation1 + $0x5] ss:$9 sm:$0xff] %v782_v1  ;;  %v418_v1 = vld [vmem:[%s4788_s23 + $0x8c] sm:$0x1]  ;;  %v527_v3 = vrot.slane %v419_v0, 3  ;;  %v869_v9 = vrot.slane %v867_v5, 3  ;;  %v4951_v17 = vpop.f32.mrf.mxu0 }
  0xa2   : > { %1184 = vst [vmem:[#allocation1 + $0x6] ss:$9 sm:$0xff] %v785_v2  ;;  %v861_v2 = vsel %vm549_vm1, %v417_v51, %v525_v58  ;;  %v526_v6 = vrot.slane %v418_v1, 3 }
  0xa3   : > { %1186 = vst [vmem:[#allocation1 + $0x7] ss:$9 sm:$0xff] %v788_v4  ;;  %v864_v4 = vsel %vm553_vm2, %v417_v51, %v525_v58  ;;  %v863_v7 = vrot.slane %v861_v2, 1  ;;  %v876_v10 = vsel %vm549_vm1, %v419_v0, %v527_v3  ;;  %v879_v11 = vsel %vm553_vm2, %v419_v0, %v527_v3 }
  0xa4   : > { %4527 = vmatmul.msk.bf16.gmra.mxu0 %vm1341_vm4, %v1172_v60  ;;  %v851_v60 = vrot.slane %v849_v53, 1  ;;  %v866_v8 = vrot.slane %v864_v4, 2  ;;  %v872_v13 = vsel %vm545_vm0, %v418_v1, %v526_v6  ;;  %v532_v51 = vrot.slane %v424_v45, 3  ;;  %v427_v1 = vld [vmem:[%s4788_s23 + $0xb0] sm:$0x1] }
  0xa5   : > { %v428_v4 = vld [vmem:[%s4788_s23 + $0xb4] sm:$0xf] }
  0xa6   : > { %v926_v58 = vsel %vm545_vm0, %v424_v45, %v532_v51 }
  0xa9   : > { %v4959_v28 = vpop.f32.mrf.mxu0 }
  0xaa   : > { %v1187_v18 = vld [vmem:[#allocation1] sm:$0xff] }
  0xab   : > { %1188 = vst [vmem:[#allocation1] ss:$9 sm:$0xff] %v791_v12 }
  0xac   : > { %1189 = vst [vmem:[#allocation1 + $0x1] ss:$9 sm:$0xff] %v794_v14  ;;  %v882_v14 = vsel %vm557_vm3, %v419_v0, %v527_v3 }
  0xad   : > { %1191 = vst [vmem:[#allocation1 + $0x2] ss:$9 sm:$0xff] %v797_v15  ;;  %v875_v15 = vsel %vm545_vm0, %v419_v0, %v527_v3  ;;  %v884_v20 = vrot.slane %v882_v14, 3 }
  0xae   : > { %1193 = vst [vmem:[#allocation1 + $0x3] ss:$9 sm:$0xff] %v800_v16  ;;  %v878_v16 = vrot.slane %v876_v10, 1 }
  0xaf   : > { %1195 = vst [vmem:[#allocation1 + $0x4] ss:$9 sm:$0xff] %v803_v19  ;;  %v881_v19 = vrot.slane %v879_v11, 2 }
  0xb0   : > { %1196 = vst [vmem:[#allocation1 + $0x5] ss:$9 sm:$0xff] %v806_v21 }
  0xb1   : > { %1198 = vst [vmem:[#allocation1 + $0x6] ss:$9 sm:$0xff] %v809_v22  ;;  %v422_v22 = vld [vmem:[%s4788_s23 + $0x9c] sm:$0xf] }
  0xb2   : > { %1200 = vst [vmem:[#allocation1 + $0x7] ss:$9 sm:$0xff] %v812_v23  ;;  %v421_v23 = vld [vmem:[%s4788_s23 + $0x98] sm:$0x1]  ;;  %v530_v25 = vrot.slane %v422_v22, 3 }
  0xb3   : > { %v529_v29 = vrot.slane %v421_v23, 3 }
  0xb4   : > { %4528 = vmatmul.msk.bf16.gmra.mxu0 %vm1341_vm4, %v1187_v18  ;;  %v420_v18 = vld [vmem:[%s4788_s23 + $0x94] sm:$0xf]  ;;  %v909_v44 = vsel %vm557_vm3, %v422_v22, %v530_v25 }
  0xb5   : > { %v528_v21 = vrot.slane %v420_v18, 3  ;;  %v911_v48 = vrot.slane %v909_v44, 3 }
  0xb7   : > { %v888_v24 = vsel %vm549_vm1, %v420_v18, %v528_v21  ;;  %v891_v26 = vsel %vm553_vm2, %v420_v18, %v528_v21  ;;  %v894_v27 = vsel %vm557_vm3, %v420_v18, %v528_v21  ;;  %v887_v30 = vsel %vm545_vm0, %v420_v18, %v528_v21  ;;  %v429_v18 = vld [vmem:[%s4788_s23 + $0xb8] sm:$0xf] }
  0xb8   : > { %v893_v32 = vrot.slane %v891_v26, 2  ;;  %v896_v33 = vrot.slane %v894_v27, 3 }
  0xb9   : > { %v1201_v38 = vld [vmem:[#allocation1] sm:$0xff] }
  0xba   : > { %1203 = vst [vmem:[#allocation1] ss:$9 sm:$0xff] %v815_v31  ;;  %v890_v31 = vrot.slane %v888_v24, 1  ;;  %v430_v24 = vld [vmem:[%s4788_s23 + $0xbc] sm:$0x1] }
  0xbb   : > { %1204 = vst [vmem:[#allocation1 + $0x1] ss:$9 sm:$0xff] %v818_v34  ;;  %v903_v34 = vsel %vm549_vm1, %v422_v22, %v530_v25 }
  0xbc   : > { %1205 = vst [vmem:[#allocation1 + $0x2] ss:$9 sm:$0xff] %v821_v36  ;;  %v906_v36 = vsel %vm553_vm2, %v422_v22, %v530_v25 }
  0xbd   : > { %1207 = vst [vmem:[#allocation1 + $0x3] ss:$9 sm:$0xff] %v824_v37  ;;  %v899_v37 = vsel %vm545_vm0, %v421_v23, %v529_v29 }
  0xbe   : > { %1209 = vst [vmem:[#allocation1 + $0x4] ss:$9 sm:$0xff] %v827_v39  ;;  %v905_v39 = vrot.slane %v903_v34, 1 }
  0xbf   : > { %1211 = vst [vmem:[#allocation1 + $0x5] ss:$9 sm:$0xff] %v830_v41  ;;  %v908_v41 = vrot.slane %v906_v36, 2 }
  0xc0   : > { %1212 = vst [vmem:[#allocation1 + $0x6] ss:$9 sm:$0xff] %v833_v42  ;;  %v531_v42 = vrot.slane %v423_v40, 3 }
  0xc1   : > { %1214 = vst [vmem:[#allocation1 + $0x7] ss:$9 sm:$0xff] %v836_v43  ;;  %v425_v43 = vld [vmem:[%s4788_s23 + $0xa8] sm:$0xf] }
  0xc2   : > { %v915_v46 = vsel %vm549_vm1, %v423_v40, %v531_v42  ;;  %v533_v47 = vrot.slane %v425_v43, 3  ;;  %v918_v49 = vsel %vm553_vm2, %v423_v40, %v531_v42 }
  0xc3   : > { %v917_v53 = vrot.slane %v915_v46, 1  ;;  %v920_v54 = vrot.slane %v918_v49, 2 }
  0xc4   : > { %4529 = vmatmul.msk.bf16.gmra.mxu0 %vm1341_vm4, %v1201_v38  ;;  %v902_v38 = vsel %vm545_vm0, %v422_v22, %v530_v25  ;;  %v936_v0 = vsel %vm557_vm3, %v425_v43, %v533_v47 }
  0xc5   : > { %v938_v5 = vrot.slane %v936_v0, 3 }
  0xc8   : > { %v1215_v57 = vld [vmem:[#allocation1] sm:$0xff] }
  0xc9   : > { %1217 = vst [vmem:[#allocation1] ss:$9 sm:$0xff] %v839_v50  ;;  %v921_v50 = vsel %vm557_vm3, %v423_v40, %v531_v42 }
  0xca   : > { %1219 = vst [vmem:[#allocation1 + $0x1] ss:$9 sm:$0xff] %v842_v52  ;;  %v914_v52 = vsel %vm545_vm0, %v423_v40, %v531_v42  ;;  %v923_v56 = vrot.slane %v921_v50, 3  ;;  %v5006_v42 = vpop.f32.mrf.mxu0 }
  0xcb   : > { %1220 = vst [vmem:[#allocation1 + $0x2] ss:$9 sm:$0xff] %v845_v55 }
  0xcc   : > { %1221 = vst [vmem:[#allocation1 + $0x3] ss:$9 sm:$0xff] %v848_v59  ;;  %v929_v59 = vsel %vm545_vm0, %v425_v43, %v533_v47 }
  0xcd   : > { %1223 = vst [vmem:[#allocation1 + $0x4] ss:$9 sm:$0xff] %v851_v60 }
  0xce   : > { %1225 = vst [vmem:[#allocation1 + $0x5] ss:$9 sm:$0xff] %v854_v61  ;;  %v426_v61 = vld [vmem:[%s4788_s23 + $0xac] sm:$0xf] }
  0xcf   : > { %1227 = vst [vmem:[#allocation1 + $0x6] ss:$9 sm:$0xff] %v857_v62  ;;  %v534_v62 = vrot.slane %v426_v61, 3 }
  0xd0   : > { %1228 = vst [vmem:[#allocation1 + $0x7] ss:$9 sm:$0xff] %v860_v63  ;;  %v933_v63 = vsel %vm553_vm2, %v425_v43, %v533_v47 }
  0xd1   : > { %v935_v2 = vrot.slane %v933_v63, 2  ;;  %v942_v3 = vsel %vm549_vm1, %v426_v61, %v534_v62  ;;  %v945_v6 = vsel %vm553_vm2, %v426_v61, %v534_v62  ;;  %v435_v63 = vld [vmem:[%s4788_s23 + $0xd0] sm:$0xf] }
  0xd2   : > { %v944_v10 = vrot.slane %v942_v3, 1 }
  0xd4   : > { %4530 = vmatmul.msk.bf16.gmra.mxu0 %vm1341_vm4, %v1215_v57  ;;  %v930_v57 = vsel %vm549_vm1, %v425_v43, %v533_v47 }
  0xd5   : > { %v932_v60 = vrot.slane %v930_v57, 1 }
  0xd7   : > { %v1229_v12 = vld [vmem:[#allocation1] sm:$0xff] }
  0xd8   : > { %1231 = vst [vmem:[#allocation1] ss:$9 sm:$0xff] %v863_v7  ;;  %v948_v7 = vsel %vm557_vm3, %v426_v61, %v534_v62 }
  0xd9   : > { %1233 = vst [vmem:[#allocation1 + $0x1] ss:$9 sm:$0xff] %v866_v8  ;;  %v535_v8 = vrot.slane %v427_v1, 3  ;;  %v950_v14 = vrot.slane %v948_v7, 3 }
  0xda   : > { %1235 = vst [vmem:[#allocation1 + $0x2] ss:$9 sm:$0xff] %v869_v9  ;;  %v941_v9 = vsel %vm545_vm0, %v426_v61, %v534_v62  ;;  %v433_v61 = vld [vmem:[%s4788_s23 + $0xc8] sm:$0x1] }
  0xdb   : > { %1236 = vst [vmem:[#allocation1 + $0x3] ss:$9 sm:$0xff] %v872_v13  ;;  %v947_v13 = vrot.slane %v945_v6, 2  ;;  %v541_v0 = vrot.slane %v433_v61, 3 }
  0xdc   : > { %1237 = vst [vmem:[#allocation1 + $0x4] ss:$9 sm:$0xff] %v875_v15  ;;  %v953_v15 = vsel %vm545_vm0, %v427_v1, %v535_v8  ;;  %v543_v1 = vrot.slane %v435_v63, 3 }
  0xdd   : > { %1239 = vst [vmem:[#allocation1 + $0x5] ss:$9 sm:$0xff] %v878_v16 }
  0xde   : > { %1241 = vst [vmem:[#allocation1 + $0x6] ss:$9 sm:$0xff] %v881_v19  ;;  %v537_v19 = vrot.slane %v429_v18, 3 }
  0xdf   : > { %1243 = vst [vmem:[#allocation1 + $0x7] ss:$9 sm:$0xff] %v884_v20 }
  0xe0   : > { %v969_v26 = vsel %vm549_vm1, %v429_v18, %v537_v19  ;;  %v972_v29 = vsel %vm553_vm2, %v429_v18, %v537_v19 }
  0xe1   : > { %v971_v34 = vrot.slane %v969_v26, 1  ;;  %v974_v36 = vrot.slane %v972_v29, 2 }
  0xe4   : > { %4531 = vmatmul.msk.bf16.gmra.mxu0 %vm1341_vm4, %v1229_v12  ;;  %v536_v12 = vrot.slane %v428_v4, 3 }
  0xe6   : > { %v4964_v35 = vld [vmem:[#allocation1] sm:$0xff]  ;;  %v956_v16 = vsel %vm545_vm0, %v428_v4, %v536_v12  ;;  %v957_v20 = vsel %vm549_vm1, %v428_v4, %v536_v12  ;;  %v960_v21 = vsel %vm553_vm2, %v428_v4, %v536_v12  ;;  %v963_v22 = vsel %vm557_vm3, %v428_v4, %v536_v12 }
  0xe7   : > { %1245 = vst [vmem:[#allocation1] ss:$9 sm:$0xff] %v887_v30  ;;  %v959_v23 = vrot.slane %v957_v20, 1  ;;  %v962_v25 = vrot.slane %v960_v21, 2  ;;  %v965_v27 = vrot.slane %v963_v22, 3  ;;  %v975_v30 = vsel %vm557_vm3, %v429_v18, %v537_v19 }
  0xe8   : > { %1247 = vst [vmem:[#allocation1 + $0x1] ss:$9 sm:$0xff] %v890_v31  ;;  %v1026_v12 = vsel %vm553_vm2, %v435_v63, %v543_v1  ;;  %v5045_v21 = vld [vmem:[%s6331_s5] ss:$0 sm:$0xff] }
  0xe9   : > { %1249 = vst [vmem:[#allocation1 + $0x2] ss:$9 sm:$0xff] %v893_v32  ;;  %v538_v32 = vrot.slane %v430_v24, 3 }
  0xea   : > { %1251 = vst [vmem:[#allocation1 + $0x3] ss:$9 sm:$0xff] %v896_v33  ;;  %v968_v33 = vsel %vm545_vm0, %v429_v18, %v537_v19  ;;  %v4696_v18 = vmov 0.0|0.0  }
  0xeb   : > { %1252 = vst [vmem:[#allocation1 + $0x4] ss:$9 sm:$0xff] %v899_v37  ;;  %v431_v37 = vld [vmem:[%s4788_s23 + $0xc0] sm:$0xf]  ;;  %v2505_v19 = vunpack.c.l.b16 %v4696_v18 }
  0xec   : > { %1253 = vst [vmem:[#allocation1 + $0x5] ss:$9 sm:$0xff] %v902_v38  ;;  %v977_v38 = vrot.slane %v975_v30, 3  ;;  %v539_v40 = vrot.slane %v431_v37, 3 }
  0xed   : > { %1255 = vst [vmem:[#allocation1 + $0x6] ss:$9 sm:$0xff] %v905_v39  ;;  %v980_v39 = vsel %vm545_vm0, %v430_v24, %v538_v32  ;;  %v5047_v22 = vpack.c.b16 %v2505_v19, %v2505_v19 }
  0xee   : > { %1257 = vst [vmem:[#allocation1 + $0x7] ss:$9 sm:$0xff] %v908_v41  ;;  %v432_v41 = vld [vmem:[%s4788_s23 + $0xc4] sm:$0xf]  ;;  %v984_v44 = vsel %vm549_vm1, %v431_v37, %v539_v40  ;;  %v987_v45 = vsel %vm553_vm2, %v431_v37, %v539_v40  ;;  %v990_v46 = vsel %vm557_vm3, %v431_v37, %v539_v40  ;;  %v983_v47 = vsel %vm545_vm0, %v431_v37, %v539_v40 }
  0xef   : > { %v540_v43 = vrot.slane %v432_v41, 3  ;;  %v989_v49 = vrot.slane %v987_v45, 2  ;;  %v992_v51 = vrot.slane %v990_v46, 3 }
  0xf1   : > { %v996_v50 = vsel %vm549_vm1, %v432_v41, %v540_v43 }
  0xf5   : > { %v1258_v55 = vld [vmem:[#allocation1] sm:$0xff] }
  0xf6   : > { %1260 = vst [vmem:[#allocation1] ss:$9 sm:$0xff] %v911_v48  ;;  %4533 = vmatmul.msk.bf16.vlgmr.msra.gmra.mxu3 %vm1341_vm4, %v1258_v55  ;;  %v986_v48 = vrot.slane %v984_v44, 1  ;;  %v995_v55 = vsel %vm545_vm0, %v432_v41, %v540_v43 }
  0xf7   : > { %1261 = vst [vmem:[#allocation1 + $0x1] ss:$9 sm:$0xff] %v914_v52  ;;  %v999_v52 = vsel %vm553_vm2, %v432_v41, %v540_v43 }
  0xf8   : > { %1263 = vst [vmem:[#allocation1 + $0x2] ss:$9 sm:$0xff] %v917_v53  ;;  %v1001_v57 = vrot.slane %v999_v52, 2 }
  0xf9   : > { %1265 = vst [vmem:[#allocation1 + $0x3] ss:$9 sm:$0xff] %v920_v54  ;;  %v1002_v54 = vsel %vm557_vm3, %v432_v41, %v540_v43 }
  0xfa   : > { %1267 = vst [vmem:[#allocation1 + $0x4] ss:$9 sm:$0xff] %v923_v56  ;;  %v998_v56 = vrot.slane %v996_v50, 1 }
  0xfb   : > { %1268 = vst [vmem:[#allocation1 + $0x5] ss:$9 sm:$0xff] %v926_v58  ;;  %v5016_v58 = vpop.f32.mrf.mxu0  ;;  %4532 = vmatmul.msk.bf16.gmra.mxu0 %vm1341_vm4, %v4964_v35  ;;  %v1007_v35 = vsel %vm545_vm0, %v433_v61, %v541_v0  ;;  %v1808_v61 = vlaneseq }
  0xfc   : > { %1269 = vst [vmem:[#allocation1 + $0x6] ss:$9 sm:$0xff] %v929_v59  ;;  %v434_v59 = vld [vmem:[%s4788_s23 + $0xcc] sm:$0xf] }
  0xfd   : > { %1271 = vst [vmem:[#allocation1 + $0x7] ss:$9 sm:$0xff] %v932_v60  ;;  %v1004_v60 = vrot.slane %v1002_v54, 3  ;;  %v542_v62 = vrot.slane %v434_v59, 3 }
  0xff   : > { %v1014_v3 = vsel %vm553_vm2, %v434_v59, %v542_v62  ;;  %v1017_v4 = vsel %vm557_vm3, %v434_v59, %v542_v62  ;;  %vm3833_vm2 = vsmask.f32 3328 }
 0x100   : > { %v1016_v8 = vrot.slane %v1014_v3, 2  ;;  %v5078_v3 = vshrl.u32 %v1808_v61, 7 }
 0x102   : > { %vm1866_vm6 = vcmp.ge.s32.totalorder %v5078_v3, 1 }
 0x103   : > { %v5029_v7 = vpop.f32.mrf.mxu0 }
 0x104   : > { %v1272_v11 = vld [vmem:[#allocation1] sm:$0xff] }
 0x105   : > { %1274 = vst [vmem:[#allocation1] ss:$9 sm:$0xff] %v935_v2  ;;  %v1011_v2 = vsel %vm549_vm1, %v434_v59, %v542_v62 }
 0x106   : > { %1276 = vst [vmem:[#allocation1 + $0x1] ss:$9 sm:$0xff] %v938_v5  ;;  %4534 = vmatmul.msk.bf16.gmra.mxu3 %vm1341_vm4, %v1272_v11  ;;  %v1010_v5 = vsel %vm545_vm0, %v434_v59, %v542_v62  ;;  %v1013_v6 = vrot.slane %v1011_v2, 1  ;;  %v1019_v11 = vrot.slane %v1017_v4, 3 }
 0x107   : > { %1277 = vst [vmem:[#allocation1 + $0x2] ss:$9 sm:$0xff] %v941_v9  ;;  %v1023_v9 = vsel %vm549_vm1, %v435_v63, %v543_v1  ;;  %vm3447_vm1 = vcmask 293888  }
 0x108   : > { %1279 = vst [vmem:[#allocation1 + $0x3] ss:$9 sm:$0xff] %v944_v10 }
 0x109   : > { %1281 = vst [vmem:[#allocation1 + $0x4] ss:$9 sm:$0xff] %v947_v13  ;;  %v5036_v13 = vld [vmem:[%s6330_s4] ss:$0 sm:$0xff] }
 0x10a   : > { %1283 = vst [vmem:[#allocation1 + $0x5] ss:$9 sm:$0xff] %v950_v14  ;;  %v1022_v14 = vsel %vm545_vm0, %v435_v63, %v543_v1  ;;  %v1502_v20 = vmul.f32 %v5036_v13, %v4959_v28  ;;  %v1503_v24 = vmul.f32 %v5036_v13, %v5006_v42  ;;  %v2827_v28 = vrot.slane %v5047_v22, 1 }
 0x10b   : > { %1284 = vst [vmem:[#allocation1 + $0x6] ss:$9 sm:$0xff] %v953_v15  ;;  %v1025_v15 = vrot.slane %v1023_v9, 1  ;;  %v1501_v32 = vmul.f32 %v5036_v13, %v4951_v17  ;;  %v1504_v17 = vmul.f32 %v5036_v13, %v5016_v58 }
 0x10c   : > { %1285 = vst [vmem:[#allocation1 + $0x7] ss:$9 sm:$0xff] %v956_v16  ;;  %v1028_v16 = vrot.slane %v1026_v12, 2  ;;  %v1547_v26 = vadd.f32 %v5045_v21, %v1502_v20  ;;  %2875 = vrot.lane.b32.xlu0 %v2827_v28, %s4697_s28  ;;  %v1548_v30 = vadd.f32 %v5045_v21, %v1503_v24 }
 0x10d   : > { %v1546_v43 = vadd.f32 %v5045_v21, %v1501_v32 }
 0x10e   : > { %v1589_v40 = vmax.f32 %v1548_v30, 0.0 }
 0x110   : > { %v1677_v50 = vrot.slane %v1589_v40, 6 }
 0x113   : > { %v1286_v31 = vld [vmem:[#allocation1] sm:$0xff] }
 0x114   : > { %1288 = vst [vmem:[#allocation1] ss:$9 sm:$0xff] %v959_v23  ;;  %v436_v23 = vld [vmem:[%s4788_s23 + $0xd4] sm:$0x1] }
 0x115   : > { %1290 = vst [vmem:[#allocation1 + $0x1] ss:$9 sm:$0xff] %v962_v25  ;;  %v1405_v25 = vpop.f32.mrf.mxu0  ;;  %v544_v29 = vrot.slane %v436_v23, 3 }
 0x116   : > { %1292 = vst [vmem:[#allocation1 + $0x2] ss:$9 sm:$0xff] %v965_v27  ;;  %4535 = vmatmul.msk.bf16.gmra.mxu3 %vm1341_vm4, %v1286_v31  ;;  %v1029_v27 = vsel %vm557_vm3, %v435_v63, %v543_v1  ;;  %v2605_v31 = vshll.u32 %v5047_v22, 16  ;;  %v1506_v63 = vmul.f32 %v5036_v13, %v1405_v25  ;;  %vm3834_vm3 = vsmask.f32 7440 }
 0x117   : > { %1293 = vst [vmem:[#allocation1 + $0x3] ss:$9 sm:$0xff] %v968_v33  ;;  %v1031_v33 = vrot.slane %v1029_v27, 3 }
 0x118   : > { %1295 = vst [vmem:[#allocation1 + $0x4] ss:$9 sm:$0xff] %v971_v34  ;;  %v1588_v34 = vmax.f32 %v1547_v26, 0.0  ;;  %v2607_v37 = vrot.slane %v2605_v31, 1  ;;  %v1551_v4 = vadd.f32 %v5045_v21, %v1506_v63 }
 0x119   : > { %1297 = vst [vmem:[#allocation1 + $0x5] ss:$9 sm:$0xff] %v974_v36  ;;  %v2603_v36 = vshrl.u32 %v5047_v22, 16 }
 0x11a   : > { %1299 = vst [vmem:[#allocation1 + $0x6] ss:$9 sm:$0xff] %v977_v38  ;;  %v1034_v38 = vsel %vm545_vm0, %v436_v23, %v544_v29  ;;  %v1672_v44 = vrot.slane %v1588_v34, 2  ;;  %v1673_v46 = vrot.slane %v1588_v34, 4  ;;  %v1674_v52 = vrot.slane %v1588_v34, 6 }
 0x11b   : > { %1300 = vst [vmem:[#allocation1 + $0x7] ss:$9 sm:$0xff] %v980_v39  ;;  %v2608_v42 = vor.u32 %v2607_v37, %v2603_v36  ;;  %vm3480_vm0 = vcmask 1041408  }
 0x11d   : > { %v1408_v41 = vpop.f32.mrf.mxu0  ;;  %v5068_v45 = vsel %vm2601_vm5, %v2608_v42, %v2607_v37 }
 0x11e   : > { %2794 = vrot.lane.b32.xlu0 %v5068_v45, %s4698_s29 }
 0x122   : > { %v1301_v53 = vld [vmem:[#allocation1] sm:$0xff] }
 0x123   : > { %1302 = vst [vmem:[#allocation1] ss:$9 sm:$0xff] %v983_v47  ;;  %v1675_v47 = vrot.slane %v1589_v40, 2 }
 0x124   : > { %1304 = vst [vmem:[#allocation1 + $0x1] ss:$9 sm:$0xff] %v986_v48  ;;  %v1587_v48 = vmax.f32 %v1546_v43, 0.0 }
 0x125   : > { %1306 = vst [vmem:[#allocation1 + $0x2] ss:$9 sm:$0xff] %v989_v49  ;;  %v1676_v49 = vrot.slane %v1589_v40, 4  ;;  %v1410_v54 = vpop.f32.mrf.mxu0 }
 0x126   : > { %1308 = vst [vmem:[#allocation1 + $0x3] ss:$9 sm:$0xff] %v992_v51  ;;  %4536 = vmatmul.msk.bf16.gmra.mxu3 %vm1341_vm4, %v1301_v53  ;;  %v1549_v51 = vadd.f32 %v5045_v21, %v1504_v17  ;;  %v1505_v53 = vmul.f32 %v5036_v13, %v5029_v7  ;;  %v1671_v59 = vrot.slane %v1587_v48, 6  ;;  %v1508_v26 = vmul.f32 %v5036_v13, %v1410_v54 }
 0x127   : > { %1309 = vst [vmem:[#allocation1 + $0x4] ss:$9 sm:$0xff] %v995_v55  ;;  %v1669_v55 = vrot.slane %v1587_v48, 2 }
 0x128   : > { %1311 = vst [vmem:[#allocation1 + $0x5] ss:$9 sm:$0xff] %v998_v56  ;;  %v1590_v58 = vmax.f32 %v1549_v51, 0.0 }
 0x129   : > { %1313 = vst [vmem:[#allocation1 + $0x6] ss:$9 sm:$0xff] %v1001_v57  ;;  %v1670_v57 = vrot.slane %v1587_v48, 4 }
 0x12a   : > { %1315 = vst [vmem:[#allocation1 + $0x7] ss:$9 sm:$0xff] %v1004_v60  ;;  %v1550_v60 = vadd.f32 %v5045_v21, %v1505_v53  ;;  %v1678_v62 = vrot.slane %v1590_v58, 2  ;;  %v1679_v0 = vrot.slane %v1590_v58, 4  ;;  %v1680_v2 = vrot.slane %v1590_v58, 6 }
 0x12c   : > { %v1591_v1 = vmax.f32 %v1550_v60, 0.0 }
 0x131   : > { %v1316_v10 = vld [vmem:[#allocation1] sm:$0xff] }
 0x132   : > { %1317 = vst [vmem:[#allocation1] ss:$9 sm:$0xff] %v1007_v35  ;;  %v1413_v35 = vpop.f32.mrf.mxu0 }
 0x133   : > { %1318 = vst [vmem:[#allocation1 + $0x1] ss:$9 sm:$0xff] %v1010_v5  ;;  %v1507_v5 = vmul.f32 %v5036_v13, %v1408_v41  ;;  %v1509_v37 = vmul.f32 %v5036_v13, %v1413_v35 }
 0x134   : > { %1320 = vst [vmem:[#allocation1 + $0x2] ss:$9 sm:$0xff] %v1013_v6  ;;  %v1681_v6 = vrot.slane %v1591_v1, 2 }
 0x135   : > { %1322 = vst [vmem:[#allocation1 + $0x3] ss:$9 sm:$0xff] %v1016_v8  ;;  %v1592_v8 = vmax.f32 %v1551_v4, 0.0  ;;  %v1552_v9 = vadd.f32 %v5045_v21, %v1507_v5 }
 0x136   : > { %1324 = vst [vmem:[#allocation1 + $0x4] ss:$9 sm:$0xff] %v1019_v11  ;;  %4537 = vmatmul.msk.bf16.gmra.mxu3 %vm1341_vm4, %v1316_v10  ;;  %v5088_v11 = vadd.s32 16, %v5078_v3 }
 0x137   : > { %1325 = vst [vmem:[#allocation1 + $0x5] ss:$9 sm:$0xff] %v1022_v14  ;;  %v1682_v14 = vrot.slane %v1591_v1, 4  ;;  %v1684_v19 = vrot.slane %v1592_v8, 2  ;;  %v1593_v20 = vmax.f32 %v1552_v9, 0.0  ;;  %v1685_v23 = vrot.slane %v1592_v8, 4 }
 0x138   : > { %1327 = vst [vmem:[#allocation1 + $0x6] ss:$9 sm:$0xff] %v1025_v15  ;;  %v1686_v25 = vrot.slane %v1592_v8, 6  ;;  %vm1925_vm7 = vcmp.le.s32.totalorder %v5088_v11, 16 }
 0x139   : > { %1329 = vst [vmem:[#allocation1 + $0x7] ss:$9 sm:$0xff] %v1028_v16  ;;  %v1683_v16 = vrot.slane %v1591_v1, 6  ;;  %v1687_v31 = vrot.slane %v1593_v20, 2  ;;  %v1689_v53 = vrot.slane %v1593_v20, 6 }
 0x13a   : > { %v5090_v12 = vpop.f32.mrf.mxu0 }
 0x140   : > { %v1330_v39 = vld [vmem:[#allocation1] sm:$0xff] }
 0x141   : > { %1332 = vst [vmem:[#allocation1] ss:$9 sm:$0xff] %v1031_v33 }
 0x142   : > { %1333 = vst [vmem:[#allocation1 + $0x1] ss:$9 sm:$0xff] %v1034_v38  ;;  %v1418_v38 = vpop.f32.mrf.mxu0 }
 0x143   : > { %2096 = vst [vmem:[#allocation1 + $0x20] ss:$4 sm:$0xff] %v1588_v34  ;;  %v1553_v34 = vadd.f32 %v5045_v21, %v1508_v26  ;;  %v1511_v9 = vmul.f32 %v5036_v13, %v1418_v38 }
 0x144   : > { %2098 = vst [vmem:[#allocation1 + $0x21] ss:$4 sm:$0xff] %v1672_v44 }
 0x145   : > { %2100 = vst [vmem:[#allocation1 + $0x22] ss:$4 sm:$0xff] %v1673_v46  ;;  %v1594_v43 = vmax.f32 %v1553_v34, 0.0  ;;  %v1554_v46 = vadd.f32 %v5045_v21, %v1509_v37 }
 0x146   : > { %2107 = vst [vmem:[#allocation1 + $0x20] ss:$4 sm:$0xff] %v1675_v47  ;;  %4538 = vmatmul.msk.bf16.gmra.mxu3 %vm1341_vm4, %v1330_v39 }
 0x147   : > { %2108 = vst [vmem:[#allocation1 + $0x21] ss:$4 sm:$0xff] %v1676_v49  ;;  %v1690_v54 = vrot.slane %v1594_v43, 2  ;;  %v1691_v60 = vrot.slane %v1594_v43, 4 }
 0x148   : > { %2109 = vst [vmem:[#allocation1 + $0x22] ss:$4 sm:$0xff] %v1677_v50 }
 0x149   : > { %v1334_v56 = vld [vmem:[#allocation1] sm:$0xff]  ;;  %2102 = vst [vmem:[#allocation1 + $0x23] ss:$4 sm:$0xff] %v1674_v52 }
 0x14a   : > { %2088 = vst [vmem:[#allocation1] ss:$4 sm:$0xff] %v1587_v48 }
 0x14b   : > { %2090 = vst [vmem:[#allocation1 + $0x1] ss:$4 sm:$0xff] %v1669_v55 }
 0x14c   : > { %2092 = vst [vmem:[#allocation1 + $0x2] ss:$4 sm:$0xff] %v1670_v57  ;;  %v1595_v57 = vmax.f32 %v1554_v46, 0.0 }
 0x14d   : > { %2094 = vst [vmem:[#allocation1 + $0x3] ss:$4 sm:$0xff] %v1671_v59 }
 0x14e   : > { %2105 = vst [vmem:[#allocation1] ss:$4 sm:$0xff] %v1589_v40  ;;  %v1688_v40 = vrot.slane %v1593_v20, 4  ;;  %v1694_v5 = vrot.slane %v1595_v57, 4 }
 0x14f   : > { %2110 = vst [vmem:[#allocation1 + $0x23] ss:$4 sm:$0xff] %v1590_v58  ;;  %v1420_v58 = vpop.f32.mrf.mxu0 }
 0x150   : > { %2112 = vst [vmem:[#allocation1] ss:$4 sm:$0xff] %v1678_v62  ;;  %v1692_v62 = vrot.slane %v1594_v43, 6  ;;  %v1512_v38 = vmul.f32 %v5036_v13, %v1420_v58 }
 0x151   : > { %2113 = vst [vmem:[#allocation1 + $0x1] ss:$4 sm:$0xff] %v1679_v0 }
 0x152   : > { %2114 = vst [vmem:[#allocation1 + $0x2] ss:$4 sm:$0xff] %v1680_v2  ;;  %v1693_v2 = vrot.slane %v1595_v57, 2 }
 0x153   : > { %2115 = vst [vmem:[#allocation1 + $0x3] ss:$4 sm:$0xff] %v1591_v1  ;;  %v1510_v1 = vmul.f32 %v5036_v13, %v5090_v12 }
 0x156   : > { %v2111_v7 = vld.sshfl [vmem:[#allocation1 + $0x20] sm:$0xff pattern:$0x73625140]  ;;  %4539 = vmatmul.msk.bf16.gmra.mxu3 %vm1341_vm4, %v1334_v56 }
 0x157   : > { %2116 = vst [vmem:[#allocation1 + $0x20] ss:$4 sm:$0xff] %v1681_v6  ;;  %v2368_v10 = vsel %vm1866_vm6, %v2111_v7, 0.0  ;;  %v1555_v7 = vadd.f32 %v5045_v21, %v1510_v1 }
 0x158   : > { %v2422_v15 = vpack.c.bf16 %v2368_v10, %v2368_v10 }
 0x15a   : > { %v2117_v18 = vld.sshfl [vmem:[#allocation1] sm:$0xff pattern:$0x73625140]  ;;  %v2507_v27 = vunpack.c.l.b16 %v2422_v15  ;;  %v1695_v15 = vrot.slane %v1595_v57, 6 }
 0x15b   : > { %2119 = vst [vmem:[#allocation1] ss:$4 sm:$0xff] %v1682_v14  ;;  %v2423_v24 = vpack.c.bf16 %v2117_v18, %v2117_v18  ;;  %v1423_v14 = vpop.f32.mrf.mxu0  ;;  %v1596_v18 = vmax.f32 %v1555_v7, 0.0 }
 0x15c   : > { %2120 = vst [vmem:[#allocation1 + $0x1] ss:$4 sm:$0xff] %v1683_v16 }
 0x15d   : > { %2121 = vst [vmem:[#allocation1 + $0x2] ss:$4 sm:$0xff] %v1592_v8  ;;  %v2508_v29 = vunpack.c.l.b16 %v2423_v24  ;;  %v1698_v37 = vrot.slane %v1596_v18, 6 }
 0x15e   : > { %v2118_v30 = vld.sshfl [vmem:[#allocation1 + $0x20] sm:$0xff pattern:$0x73625140]  ;;  %2122 = vst [vmem:[#allocation1 + $0x3] ss:$4 sm:$0xff] %v1684_v19  ;;  %v1556_v19 = vadd.f32 %v5045_v21, %v1511_v9 }
 0x15f   : > { %2123 = vst [vmem:[#allocation1 + $0x20] ss:$4 sm:$0xff] %v1685_v23  ;;  %v5094_v32 = vpack.c.b16 %v2508_v29, %v2507_v27  ;;  %v2370_v33 = vsel %vm1925_vm7, %v2118_v30, 0.0  ;;  %v1696_v27 = vrot.slane %v1596_v18, 2  ;;  %v1697_v30 = vrot.slane %v1596_v18, 4 }
 0x160   : > { %2124 = vst [vmem:[#allocation1 + $0x21] ss:$4 sm:$0xff] %v1686_v25  ;;  %v2424_v36 = vpack.c.bf16 %v2370_v33, %v2370_v33  ;;  %v1597_v29 = vmax.f32 %v1556_v19, 0.0 }
 0x161   : > { %2125 = vst [vmem:[#allocation1 + $0x22] ss:$4 sm:$0xff] %v1593_v20  ;;  %2912 = vrot.lane.b32.xlu1 %v5094_v32, %s4699_s30  ;;  %v2617_v39 = vshll.u32 %v5094_v32, 16  ;;  %v2615_v17 = vshrl.u32 %v5094_v32, 16  ;;  %v2830_v48 = vrot.slane %v5094_v32, 1 }
 0x162   : > { %2126 = vst [vmem:[#allocation1 + $0x23] ss:$4 sm:$0xff] %v1687_v31  ;;  %v2570_v41 = vunpack.c.l.b16 %v2424_v36  ;;  %v1701_v46 = vrot.slane %v1597_v29, 6 }
 0x163   : > { %v2619_v42 = vrot.slane %v2617_v39, 1  ;;  %v1425_v39 = vpop.f32.mrf.mxu0 }
 0x164   : > { %v2586_v44 = vpack.c.b16 %v2570_v41, %v2570_v41  ;;  %v1699_v41 = vrot.slane %v1597_v29, 2 }
 0x165   : > { %v2127_v47 = vld.sshfl [vmem:[#allocation1] sm:$0xff pattern:$0x73625140]  ;;  %v2620_v50 = vor.u32 %v2619_v42, %v2615_v17  ;;  %v1700_v42 = vrot.slane %v1597_v29, 4 }
 0x166   : > { %2129 = vst [vmem:[#allocation1] ss:$4 sm:$0xff] %v1688_v40  ;;  %v2831_v49 = vrot.slane %v2586_v44, 1  ;;  %v2622_v51 = vshll.u32 %v2586_v44, 16  ;;  %v2371_v52 = vsel %vm1866_vm6, %v2127_v47, 0.0  ;;  %v1557_v47 = vadd.f32 %v5045_v21, %v1512_v38 }
 0x167   : > { %v2425_v61 = vpack.c.bf16 %v2371_v52, %v2371_v52 }
 0x168   : > { %v2832_v55 = vsel %vm2826_vm8, %v2830_v48, %v2831_v49  ;;  %v2624_v56 = vrot.slane %v2622_v51, 1  ;;  %v1513_v48 = vmul.f32 %v5036_v13, %v1423_v14 }
 0x169   : > { %v2128_v59 = vld.sshfl [vmem:[#allocation1 + $0x20] sm:$0xff pattern:$0x73625140]  ;;  %2877 = vrot.lane.b32.xlu0 %v2832_v55, %s4697_s28  ;;  %2994 = vrot.lane.b32.xlu2 %v2832_v55, %s4700_s11  ;;  %v2509_v6 = vunpack.c.l.b16 %v2425_v61 }
 0x16a   : > { %2131 = vst [vmem:[#allocation1 + $0x20] ss:$4 sm:$0xff] %v1689_v53  ;;  %v2625_v63 = vsel %vm2601_vm5, %v2620_v50, %v2624_v56  ;;  %v2426_v0 = vpack.c.bf16 %v2128_v59, %v2128_v59  ;;  %v1558_v56 = vadd.f32 %v5045_v21, %v1513_v48  ;;  %v1514_v59 = vmul.f32 %v5036_v13, %v1425_v39 }
 0x16b   : > { %2132 = vst [vmem:[#allocation1 + $0x21] ss:$4 sm:$0xff] %v1594_v43  ;;  %2959 = vrot.lane.b32.xlu1 %v2625_v63, %s4701_s12 }
 0x16c   : > { %2133 = vst [vmem:[#allocation1 + $0x22] ss:$4 sm:$0xff] %v1690_v54  ;;  %v2510_v35 = vunpack.c.l.b16 %v2426_v0  ;;  %v1598_v54 = vmax.f32 %v1557_v47, 0.0  ;;  %v1599_v0 = vmax.f32 %v1558_v56, 0.0 }
 0x16d   : > { %v2130_v4 = vld.sshfl [vmem:[#allocation1] sm:$0xff pattern:$0x73625140]  ;;  %2134 = vst [vmem:[#allocation1 + $0x23] ss:$4 sm:$0xff] %v1691_v60 }
 0x16e   : > { %2136 = vst [vmem:[#allocation1] ss:$4 sm:$0xff] %v1692_v62  ;;  %v2373_v8 = vsel %vm1925_vm7, %v2130_v4, 0.0  ;;  %v5119_v10 = vpack.c.b16 %v2510_v35, %v2509_v6  ;;  %v1702_v62 = vrot.slane %v1598_v54, 2  ;;  %v1703_v1 = vrot.slane %v1598_v54, 4 }
 0x16f   : > { %2137 = vst [vmem:[#allocation1 + $0x1] ss:$4 sm:$0xff] %v1595_v57  ;;  %v2427_v12 = vpack.c.bf16 %v2373_v8, %v2373_v8  ;;  %v1428_v57 = vpop.f32.mrf.mxu0  ;;  %v1559_v4 = vadd.f32 %v5045_v21, %v1514_v59  ;;  %v1705_v7 = vrot.slane %v1599_v0, 2  ;;  %v1706_v9 = vrot.slane %v1599_v0, 4 }
 0x170   : > { %2138 = vst [vmem:[#allocation1 + $0x2] ss:$4 sm:$0xff] %v1693_v2  ;;  %v2833_v23 = vrot.slane %v5119_v10, 1  ;;  %v2629_v24 = vshll.u32 %v5119_v10, 16  ;;  %v2627_v40 = vshrl.u32 %v5119_v10, 16  ;;  %v1704_v2 = vrot.slane %v1598_v54, 6 }
 0x171   : > { %2139 = vst [vmem:[#allocation1 + $0x3] ss:$4 sm:$0xff] %v1694_v5  ;;  %2796 = vrot.lane.b32.xlu2 %v2625_v63, %s4698_s29  ;;  %v2571_v16 = vunpack.c.l.b16 %v2427_v12  ;;  %v1707_v12 = vrot.slane %v1599_v0, 6 }
 0x172   : > { %v2631_v33 = vrot.slane %v2629_v24, 1 }
 0x173   : > { %2914 = vrot.lane.b32.xlu1 %v5119_v10, %s4699_s30  ;;  %v2587_v20 = vpack.c.b16 %v2571_v16, %v2571_v16 }
 0x174   : > { %v2135_v25 = vld.sshfl [vmem:[#allocation1 + $0x20] sm:$0xff pattern:$0x73625140]  ;;  %v2632_v43 = vor.u32 %v2631_v33, %v2627_v40 }
 0x175   : > { %2140 = vst [vmem:[#allocation1 + $0x20] ss:$4 sm:$0xff] %v1695_v15  ;;  %v2834_v26 = vrot.slane %v2587_v20, 1  ;;  %v2634_v34 = vshll.u32 %v2587_v20, 16  ;;  %v2374_v49 = vsel %vm1866_vm6, %v2135_v25, 0.0  ;;  %v1600_v15 = vmax.f32 %v1559_v4, 0.0 }
 0x176   : > { %v2428_v55 = vpack.c.bf16 %v2374_v49, %v2374_v49 }
 0x177   : > { %v2835_v31 = vsel %vm2826_vm8, %v2833_v23, %v2834_v26  ;;  %v2636_v44 = vrot.slane %v2634_v34, 1  ;;  %v1430_v8 = vpop.f32.mrf.mxu0  ;;  %v1708_v23 = vrot.slane %v1600_v15, 2 }
 0x178   : > { %v2141_v36 = vld.sshfl [vmem:[#allocation1] sm:$0xff pattern:$0x73625140]  ;;  %2996 = vrot.lane.b32.xlu0 %v2835_v31, %s4700_s11  ;;  %v2511_v63 = vunpack.c.l.b16 %v2428_v55  ;;  %v1516_v25 = vmul.f32 %v5036_v13, %v1430_v8 }
 0x179   : > { %2143 = vst [vmem:[#allocation1] ss:$4 sm:$0xff] %v1596_v18  ;;  %3031 = vrot.lane.b32.xlu2 %v5119_v10, %s4702_s17  ;;  %v2429_v51 = vpack.c.bf16 %v2141_v36, %v2141_v36  ;;  %v2637_v52 = vsel %vm2601_vm5, %v2632_v43, %v2636_v44  ;;  %v1515_v18 = vmul.f32 %v5036_v13, %v1428_v57  ;;  %v1709_v43 = vrot.slane %v1600_v15, 4 }
 0x17a   : > { %2144 = vst [vmem:[#allocation1 + $0x1] ss:$4 sm:$0xff] %v1696_v27  ;;  %v1561_v38 = vadd.f32 %v5045_v21, %v1516_v25  ;;  %v1710_v44 = vrot.slane %v1600_v15, 6 }
 0x17b   : > { %2145 = vst [vmem:[#allocation1 + $0x2] ss:$4 sm:$0xff] %v1697_v30  ;;  %3113 = vrot.lane.b32.xlu1 %v2835_v31, %s4703_s18  ;;  %v2512_v58 = vunpack.c.l.b16 %v2429_v51  ;;  %v1560_v24 = vadd.f32 %v5045_v21, %v1515_v18 }
 0x17c   : > { %v2142_v17 = vld.sshfl [vmem:[#allocation1 + $0x20] sm:$0xff pattern:$0x73625140]  ;;  %2146 = vst [vmem:[#allocation1 + $0x3] ss:$4 sm:$0xff] %v1698_v37  ;;  %v1602_v49 = vmax.f32 %v1561_v38, 0.0 }
 0x17d   : > { %2147 = vst [vmem:[#allocation1 + $0x20] ss:$4 sm:$0xff] %v1597_v29  ;;  %v2376_v50 = vsel %vm1925_vm7, %v2142_v17, 0.0  ;;  %v5146_v35 = vpack.c.b16 %v2512_v58, %v2511_v63  ;;  %v1601_v36 = vmax.f32 %v1560_v24, 0.0 }
 0x17e   : > { %2148 = vst [vmem:[#allocation1 + $0x21] ss:$4 sm:$0xff] %v1699_v41  ;;  %v2430_v53 = vpack.c.bf16 %v2376_v50, %v2376_v50  ;;  %v1714_v59 = vrot.slane %v1602_v49, 2 }
 0x17f   : > { %2149 = vst [vmem:[#allocation1 + $0x22] ss:$4 sm:$0xff] %v1700_v42  ;;  %v2836_v14 = vrot.slane %v5146_v35, 1  ;;  %v2641_v16 = vshll.u32 %v5146_v35, 16  ;;  %v2639_v33 = vshrl.u32 %v5146_v35, 16  ;;  %v1712_v51 = vrot.slane %v1601_v36, 4 }
 0x180   : > { %2150 = vst [vmem:[#allocation1 + $0x23] ss:$4 sm:$0xff] %v1701_v46  ;;  %3078 = vrot.lane.b32.xlu0 %v2637_v52, %s4704_s19  ;;  %v2572_v61 = vunpack.c.l.b16 %v2430_v53  ;;  %v1711_v46 = vrot.slane %v1601_v36, 2 }
 0x181   : > { %2879 = vrot.lane.b32.xlu2 %v2835_v31, %s4697_s28  ;;  %v2643_v27 = vrot.slane %v2641_v16, 1  ;;  %v1433_v31 = vpop.f32.mrf.mxu0 }
 0x182   : > { %v2588_v6 = vpack.c.b16 %v2572_v61, %v2572_v61 }
 0x183   : > { %v2151_v60 = vld.sshfl [vmem:[#allocation1] sm:$0xff pattern:$0x73625140]  ;;  %2798 = vrot.lane.b32.xlu1 %v2637_v52, %s4698_s29  ;;  %v2644_v39 = vor.u32 %v2643_v27, %v2639_v33 }
 0x184   : > { %2153 = vst [vmem:[#allocation1] ss:$4 sm:$0xff] %v1598_v54  ;;  %v2837_v20 = vrot.slane %v2588_v6, 1  ;;  %v2646_v29 = vshll.u32 %v2588_v6, 16  ;;  %v2377_v41 = vsel %vm1866_vm6, %v2151_v60, 0.0  ;;  %v1517_v54 = vmul.f32 %v5036_v13, %v1433_v31 }
 0x185   : > { %v2431_v47 = vpack.c.bf16 %v2377_v41, %v2377_v41 }
 0x186   : > { %v2838_v26 = vsel %vm2826_vm8, %v2836_v14, %v2837_v20  ;;  %v2648_v40 = vrot.slane %v2646_v29, 1  ;;  %v1562_v61 = vadd.f32 %v5045_v21, %v1517_v54 }
 0x187   : > { %v2152_v5 = vld.sshfl [vmem:[#allocation1 + $0x20] sm:$0xff pattern:$0x73625140]  ;;  %v2513_v57 = vunpack.c.l.b16 %v2431_v47 }
 0x188   : > { %2155 = vst [vmem:[#allocation1 + $0x20] ss:$4 sm:$0xff] %v1702_v62  ;;  %2916 = vrot.lane.b32.xlu0 %v5146_v35, %s4699_s30  ;;  %v2432_v42 = vpack.c.bf16 %v2152_v5, %v2152_v5  ;;  %v2649_v50 = vsel %vm2601_vm5, %v2644_v39, %v2648_v40  ;;  %v1603_v4 = vmax.f32 %v1562_v61, 0.0 }
 0x189   : > { %2156 = vst [vmem:[#allocation1 + $0x21] ss:$4 sm:$0xff] %v1703_v1  ;;  %2961 = vrot.lane.b32.xlu2 %v2637_v52, %s4701_s12  ;;  %v1713_v52 = vrot.slane %v1601_v36, 6  ;;  %v1435_v55 = vpop.f32.mrf.mxu0 }
 0x18a   : > { %2157 = vst [vmem:[#allocation1 + $0x22] ss:$4 sm:$0xff] %v1704_v2  ;;  %v2514_v53 = vunpack.c.l.b16 %v2432_v42  ;;  %v1518_v62 = vmul.f32 %v5036_v13, %v1435_v55 }
 0x18b   : > { %v2154_v19 = vld.sshfl [vmem:[#allocation1] sm:$0xff pattern:$0x73625140]  ;;  %3033 = vrot.lane.b32.xlu1 %v5146_v35, %s4702_s17  ;;  %2158 = vst [vmem:[#allocation1 + $0x23] ss:$4 sm:$0xff] %v1599_v0  ;;  %v1715_v0 = vrot.slane %v1602_v49, 4 }
 0x18c   : > { %2160 = vst [vmem:[#allocation1] ss:$4 sm:$0xff] %v1705_v7  ;;  %v2379_v30 = vsel %vm1925_vm7, %v2154_v19, 0.0  ;;  %v5178_v60 = vpack.c.b16 %v2514_v53, %v2513_v57  ;;  %v1563_v5 = vadd.f32 %v5045_v21, %v1518_v62 }
 0x18d   : > { %2161 = vst [vmem:[#allocation1 + $0x1] ss:$4 sm:$0xff] %v1706_v9  ;;  %v2433_v37 = vpack.c.bf16 %v2379_v30, %v2379_v30 }
 0x18e   : > { %2162 = vst [vmem:[#allocation1 + $0x2] ss:$4 sm:$0xff] %v1707_v12  ;;  %v2839_v1 = vrot.slane %v5178_v60, 1  ;;  %v2653_v2 = vshll.u32 %v5178_v60, 16  ;;  %v1716_v12 = vrot.slane %v1602_v49, 6  ;;  %v1604_v16 = vmax.f32 %v1563_v5, 0.0 }
 0x18f   : > { %2163 = vst [vmem:[#allocation1 + $0x3] ss:$4 sm:$0xff] %v1600_v15  ;;  %v2573_v48 = vunpack.c.l.b16 %v2433_v37  ;;  %v1717_v15 = vrot.slane %v1603_v4, 2  ;;  %v2651_v20 = vshrl.u32 %v5178_v60, 16 }
 0x190   : > { %3115 = vrot.lane.b32.xlu0 %v2838_v26, %s4703_s18  ;;  %v2655_v14 = vrot.slane %v2653_v2, 1 }
 0x191   : > { %2998 = vrot.lane.b32.xlu2 %v2838_v26, %s4700_s11  ;;  %v2589_v58 = vpack.c.b16 %v2573_v48, %v2573_v48  ;;  %v1438_v6 = vpop.f32.mrf.mxu0 }
 0x192   : > { %v5165_v34 = vld.sshfl [vmem:[#allocation1 + $0x20] sm:$0xff pattern:$0x73625140]  ;;  %v1519_v29 = vmul.f32 %v5036_v13, %v1438_v6  ;;  %v2656_v31 = vor.u32 %v2655_v14, %v2651_v20 }
 0x193   : > { %2881 = vrot.lane.b32.xlu1 %v2838_v26, %s4697_s28  ;;  %2164 = vst [vmem:[#allocation1 + $0x20] ss:$4 sm:$0xff] %v1708_v23  ;;  %v2840_v63 = vrot.slane %v2589_v58, 1  ;;  %v2658_v9 = vshll.u32 %v2589_v58, 16  ;;  %v1718_v23 = vrot.slane %v1603_v4, 4  ;;  %v2380_v24 = vsel %vm1866_vm6, %v5165_v34, 0.0 }
 0x194   : > { %v1719_v26 = vrot.slane %v1603_v4, 6  ;;  %v2434_v33 = vpack.c.bf16 %v2380_v24, %v2380_v24  ;;  %v1721_v34 = vrot.slane %v1604_v16, 4  ;;  %v1564_v41 = vadd.f32 %v5045_v21, %v1519_v29 }
 0x195   : > { %v2841_v8 = vsel %vm2826_vm8, %v2839_v1, %v2840_v63  ;;  %v2660_v25 = vrot.slane %v2658_v9, 1 }
 0x196   : > { %v5171_v17 = vld.sshfl [vmem:[#allocation1] sm:$0xff pattern:$0x73625140]  ;;  %v1605_v48 = vmax.f32 %v1564_v41, 0.0 }
 0x197   : > { %2167 = vst [vmem:[#allocation1] ss:$4 sm:$0xff] %v1709_v43  ;;  %v2435_v27 = vpack.c.bf16 %v5171_v17, %v5171_v17  ;;  %v2661_v39 = vsel %vm2601_vm5, %v2656_v31, %v2660_v25  ;;  %v1722_v17 = vrot.slane %v1604_v16, 6 }
 0x198   : > { %2168 = vst [vmem:[#allocation1 + $0x1] ss:$4 sm:$0xff] %v1710_v44  ;;  %2800 = vrot.lane.b32.xlu0 %v2649_v50, %s4698_s29  ;;  %v2515_v44 = vunpack.c.l.b16 %v2434_v33  ;;  %v1723_v53 = vrot.slane %v1605_v48, 2  ;;  %v1724_v57 = vrot.slane %v1605_v48, 4  ;;  %v5251_v33 = vpop.f32.mrf.mxu3 }
 0x199   : > { %3080 = vrot.lane.b32.xlu2 %v2649_v50, %s4704_s19  ;;  %2169 = vst [vmem:[#allocation1 + $0x2] ss:$4 sm:$0xff] %v1601_v36  ;;  %v1720_v36 = vrot.slane %v1604_v16, 2  ;;  %v1440_v37 = vpop.f32.mrf.mxu0  ;;  %v2516_v40 = vunpack.c.l.b16 %v2435_v27 }
 0x19a   : > { %v2166_v56 = vld.sshfl [vmem:[#allocation1 + $0x20] sm:$0xff pattern:$0x73625140]  ;;  %2170 = vst [vmem:[#allocation1 + $0x3] ss:$4 sm:$0xff] %v1711_v46  ;;  %v1520_v42 = vmul.f32 %v5036_v13, %v1440_v37  ;;  %v2876_v46 = vpop.permute.xlu0 %2875 }
 0x19b   : > { %2963 = vrot.lane.b32.xlu1 %v2649_v50, %s4701_s12  ;;  %2171 = vst [vmem:[#allocation1 + $0x20] ss:$4 sm:$0xff] %v1712_v51  ;;  %v2382_v18 = vsel %vm1925_vm7, %v2166_v56, 0.0  ;;  %v5212_v47 = vpack.c.b16 %v2516_v40, %v2515_v44 }
 0x19c   : > { %2172 = vst [vmem:[#allocation1 + $0x21] ss:$4 sm:$0xff] %v1713_v52  ;;  %v2436_v30 = vpack.c.bf16 %v2382_v18, %v2382_v18 }
 0x19d   : > { %2173 = vst [vmem:[#allocation1 + $0x22] ss:$4 sm:$0xff] %v1602_v49  ;;  %v1565_v49 = vadd.f32 %v5045_v21, %v1520_v42  ;;  %v2665_v54 = vshll.u32 %v5212_v47, 16  ;;  %v2842_v62 = vrot.slane %v5212_v47, 1 }
 0x19e   : > { %2174 = vst [vmem:[#allocation1 + $0x23] ss:$4 sm:$0xff] %v1714_v59  ;;  %v2574_v43 = vunpack.c.l.b16 %v2436_v30  ;;  %v1725_v59 = vrot.slane %v1605_v48, 6 }
 0x19f   : > { %v1606_v55 = vmax.f32 %v1565_v49, 0.0 }
 0x1a0   : > { %3035 = vrot.lane.b32.xlu0 %v5178_v60, %s4702_s17  ;;  %v2590_v50 = vpack.c.b16 %v2574_v43, %v2574_v43 }
 0x1a1   : > { %v5187_v7 = vld.sshfl [vmem:[#allocation1] sm:$0xff pattern:$0x73625140]  ;;  %2918 = vrot.lane.b32.xlu2 %v5178_v60, %s4699_s30  ;;  %v1443_v52 = vpop.f32.mrf.mxu0  ;;  %v1726_v1 = vrot.slane %v1606_v55, 2  ;;  %v1727_v6 = vrot.slane %v1606_v55, 4 }
 0x1a2   : > { %2177 = vst [vmem:[#allocation1] ss:$4 sm:$0xff] %v1715_v0  ;;  %v2843_v56 = vrot.slane %v2590_v50, 1  ;;  %v1521_v61 = vmul.f32 %v5036_v13, %v1443_v52  ;;  %v2795_v63 = vpop.permute.xlu0 %2794  ;;  %v2667_v0 = vrot.slane %v2665_v54, 1  ;;  %v2670_v5 = vshll.u32 %v2590_v50, 16 }
 0x1a3   : > { %3000 = vrot.lane.b32.xlu1 %v2841_v8, %s4700_s11  ;;  %v3147_v2 = vsel %vm3145_vm10, %v5047_v22, %v2795_v63 }
 0x1a4   : > { %v1566_v14 = vadd.f32 %v5045_v21, %v1521_v61 }
 0x1a5   : > { %v5195_v19 = vld.sshfl [vmem:[#allocation1 + $0x20] sm:$0xff pattern:$0x73625140] }
 0x1a6   : > { %2179 = vst [vmem:[#allocation1 + $0x20] ss:$4 sm:$0xff] %v1716_v12  ;;  %v1728_v12 = vrot.slane %v1606_v55, 6  ;;  %v1607_v24 = vmax.f32 %v1566_v14, 0.0  ;;  %v2438_v29 = vpack.c.bf16 %v5195_v19, %v5195_v19 }
 0x1a7   : > { %2180 = vst [vmem:[#allocation1 + $0x21] ss:$4 sm:$0xff] %v1603_v4  ;;  %v2844_v4 = vsel %vm2826_vm8, %v2842_v62, %v2843_v56 }
 0x1a8   : > { %2883 = vrot.lane.b32.xlu0 %v2841_v8, %s4697_s28  ;;  %2181 = vst [vmem:[#allocation1 + $0x22] ss:$4 sm:$0xff] %v1717_v15  ;;  %v1729_v37 = vrot.slane %v1607_v24, 2  ;;  %v2518_v19 = vunpack.c.l.b16 %v2438_v29  ;;  %v1731_v41 = vrot.slane %v1607_v24, 6 }
 0x1a9   : > { %v5205_v38 = vld.sshfl [vmem:[#allocation1] sm:$0xff pattern:$0x73625140]  ;;  %3117 = vrot.lane.b32.xlu2 %v2841_v8, %s4703_s18  ;;  %2182 = vst [vmem:[#allocation1 + $0x23] ss:$4 sm:$0xff] %v1718_v23  ;;  %v5230_v8 = vsel %vm3178_vm9, %v3147_v2, %v2876_v46  ;;  %v1445_v15 = vpop.f32.mrf.mxu0  ;;  %v2672_v23 = vrot.slane %v2670_v5, 1 }
 0x1aa   : > { %2184 = vst [vmem:[#allocation1] ss:$4 sm:$0xff] %v1719_v26  ;;  %v1522_v18 = vmul.f32 %v5036_v13, %v1445_v15  ;;  %v2385_v25 = vsel %vm1925_vm7, %v5205_v38, 0.0  ;;  %v2383_v26 = vsel %vm1866_vm6, %v5187_v7, 0.0  ;;  %v1730_v7 = vrot.slane %v1607_v24, 4 }
 0x1ab   : > { %3082 = vrot.lane.b32.xlu1 %v2661_v39, %s4704_s19  ;;  %2185 = vst [vmem:[#allocation1 + $0x1] ss:$4 sm:$0xff] %v1604_v16  ;;  %v2663_v16 = vshrl.u32 %v5212_v47, 16  ;;  %v2439_v31 = vpack.c.bf16 %v2385_v25, %v2385_v25 }
 0x1ac   : > { %2186 = vst [vmem:[#allocation1 + $0x2] ss:$4 sm:$0xff] %v1720_v36  ;;  %v1567_v27 = vadd.f32 %v5045_v21, %v1522_v18  ;;  %v2437_v36 = vpack.c.bf16 %v2383_v26, %v2383_v26 }
 0x1ad   : > { %2187 = vst [vmem:[#allocation1 + $0x3] ss:$4 sm:$0xff] %v1721_v34  ;;  %v2668_v20 = vor.u32 %v2667_v0, %v2663_v16  ;;  %v2575_v44 = vunpack.c.l.b16 %v2439_v31 }
 0x1ae   : > { %v2517_v46 = vunpack.c.l.b16 %v2437_v36 }
 0x1af   : > { %v2673_v30 = vsel %vm2601_vm5, %v2668_v20, %v2672_v23  ;;  %v2591_v52 = vpack.c.b16 %v2575_v44, %v2575_v44 }
 0x1b0   : > { %v5215_v51 = vld.sshfl [vmem:[#allocation1 + $0x20] sm:$0xff pattern:$0x73625140]  ;;  %2965 = vrot.lane.b32.xlu0 %v2661_v39, %s4701_s12  ;;  %v5264_v49 = vpack.c.b16 %v2518_v19, %v2517_v46 }
 0x1b1   : > { %2802 = vrot.lane.b32.xlu2 %v2661_v39, %s4698_s29  ;;  %2188 = vst [vmem:[#allocation1 + $0x20] ss:$4 sm:$0xff] %v1722_v17  ;;  %v1448_v34 = vpop.f32.mrf.mxu0  ;;  %v1608_v39 = vmax.f32 %v1567_v27, 0.0  ;;  %v2846_v0 = vrot.slane %v2591_v52, 1  ;;  %v2386_v23 = vsel %vm1866_vm6, %v5215_v51, 0.0 }
 0x1b2   : > { %v1523_v40 = vmul.f32 %v5036_v13, %v1448_v34  ;;  %v2677_v61 = vshll.u32 %v5264_v49, 16  ;;  %v2845_v63 = vrot.slane %v5264_v49, 1  ;;  %v2675_v18 = vshrl.u32 %v5264_v49, 16 }
 0x1b3   : > { %2920 = vrot.lane.b32.xlu1 %v5212_v47, %s4699_s30  ;;  %v1733_v50 = vrot.slane %v1608_v39, 4  ;;  %v2440_v51 = vpack.c.bf16 %v2386_v23, %v2386_v23 }
 0x1b4   : > { %v5222_v58 = vld.sshfl [vmem:[#allocation1] sm:$0xff pattern:$0x73625140]  ;;  %v1568_v17 = vadd.f32 %v5045_v21, %v1523_v40  ;;  %v2679_v5 = vrot.slane %v2677_v61, 1 }
 0x1b5   : > { %2191 = vst [vmem:[#allocation1] ss:$4 sm:$0xff] %v1605_v48  ;;  %v1732_v48 = vrot.slane %v1608_v39, 2 }
 0x1b6   : > { %2192 = vst [vmem:[#allocation1 + $0x1] ss:$4 sm:$0xff] %v1723_v53  ;;  %v1734_v53 = vrot.slane %v1608_v39, 6  ;;  %v1609_v54 = vmax.f32 %v1568_v17, 0.0  ;;  %v2680_v25 = vor.u32 %v2679_v5, %v2675_v18 }
 0x1b7   : > { %2193 = vst [vmem:[#allocation1 + $0x2] ss:$4 sm:$0xff] %v1724_v57 }
 0x1b8   : > { %v5232_v9 = vld.sshfl [vmem:[#allocation1 + $0x20] sm:$0xff pattern:$0x73625140]  ;;  %3002 = vrot.lane.b32.xlu0 %v2844_v4, %s4700_s11  ;;  %2194 = vst [vmem:[#allocation1 + $0x3] ss:$4 sm:$0xff] %v1725_v59  ;;  %v1736_v26 = vrot.slane %v1609_v54, 4 }
 0x1b9   : > { %3037 = vrot.lane.b32.xlu2 %v5212_v47, %s4702_s17  ;;  %2195 = vst [vmem:[#allocation1 + $0x20] ss:$4 sm:$0xff] %v1606_v55  ;;  %v5266_v55 = vpop.f32.mrf.mxu3  ;;  %v1450_v56 = vpop.f32.mrf.mxu0  ;;  %v2388_v14 = vsel %vm1925_vm7, %v5232_v9, 0.0  ;;  %v2441_v9 = vpack.c.bf16 %v5222_v58, %v5222_v58  ;;  %v1737_v36 = vrot.slane %v1609_v54, 6 }
 0x1ba   : > { %2196 = vst [vmem:[#allocation1 + $0x21] ss:$4 sm:$0xff] %v1726_v1  ;;  %v1524_v59 = vmul.f32 %v5036_v13, %v1450_v56  ;;  %v1735_v1 = vrot.slane %v1609_v54, 2  ;;  %v2442_v27 = vpack.c.bf16 %v2388_v14, %v2388_v14 }
 0x1bb   : > { %3119 = vrot.lane.b32.xlu1 %v2844_v4, %s4703_s18  ;;  %2197 = vst [vmem:[#allocation1 + $0x22] ss:$4 sm:$0xff] %v1727_v6  ;;  %v2847_v6 = vsel %vm2826_vm8, %v2845_v63, %v2846_v0  ;;  %v2520_v19 = vunpack.c.l.b16 %v2441_v9  ;;  %v5329_v63 = vld [vmem:[%s6331_s5] ss:$0 sm:$0xff] }
 0x1bc   : > { %2198 = vst [vmem:[#allocation1 + $0x23] ss:$4 sm:$0xff] %v1728_v12  ;;  %v1569_v2 = vadd.f32 %v5045_v21, %v1524_v59  ;;  %v2682_v12 = vshll.u32 %v2591_v52, 16 }
 0x1be   : > { %v1610_v15 = vmax.f32 %v1569_v2, 0.0  ;;  %v2684_v31 = vrot.slane %v2682_v12, 1 }
 0x1bf   : > { %v5254_v38 = vld.sshfl [vmem:[#allocation1] sm:$0xff pattern:$0x73625140] }
 0x1c0   : > { %3084 = vrot.lane.b32.xlu0 %v2673_v30, %s4704_s19  ;;  %2201 = vst [vmem:[#allocation1] ss:$4 sm:$0xff] %v1607_v24  ;;  %v2685_v44 = vsel %vm2601_vm5, %v2680_v25, %v2684_v31  ;;  %v1738_v46 = vrot.slane %v1610_v15, 2 }
 0x1c1   : > { %2885 = vrot.lane.b32.xlu2 %v2844_v4, %s4697_s28  ;;  %v5285_v16 = vpop.f32.mrf.mxu3  ;;  %v1453_v20 = vpop.f32.mrf.mxu0 }
 0x1c2   : > { %v1525_v24 = vmul.f32 %v5036_v13, %v1453_v20 }
 0x1c3   : > { %v5258_v42 = vpop.permute.xlu2 %2994  ;;  %2804 = vrot.lane.b32.xlu1 %v2673_v30, %s4698_s29  ;;  %v5261_v43 = vld.sshfl [vmem:[#allocation1 + $0x20] sm:$0xff pattern:$0x73625140] }
 0x1c4   : > { %2203 = vst [vmem:[#allocation1 + $0x20] ss:$4 sm:$0xff] %v1729_v37  ;;  %v1739_v37 = vrot.slane %v1610_v15, 4  ;;  %v1570_v34 = vadd.f32 %v5045_v21, %v1525_v24 }
 0x1c5   : > { %2204 = vst [vmem:[#allocation1 + $0x21] ss:$4 sm:$0xff] %v1730_v7 }
 0x1c6   : > { %2205 = vst [vmem:[#allocation1 + $0x22] ss:$4 sm:$0xff] %v1731_v41  ;;  %v5302_v40 = vmax.f32 %v1570_v34, 0.0  ;;  %v2576_v41 = vunpack.c.l.b16 %v2442_v27 }
 0x1c7   : > { %2206 = vst [vmem:[#allocation1 + $0x23] ss:$4 sm:$0xff] %v1608_v39  ;;  %v5270_v57 = vld.sshfl [vmem:[#allocation1] sm:$0xff pattern:$0x73625140]  ;;  %v1740_v39 = vrot.slane %v1610_v15, 6 }
 0x1c8   : > { %2922 = vrot.lane.b32.xlu0 %v5264_v49, %s4699_s30  ;;  %2208 = vst [vmem:[#allocation1] ss:$4 sm:$0xff] %v1732_v48  ;;  %v1741_v21 = vrot.slane %v5302_v40, 2  ;;  %v1742_v31 = vrot.slane %v5302_v40, 4 }
 0x1c9   : > { %2967 = vrot.lane.b32.xlu2 %v2673_v30, %s4701_s12  ;;  %2209 = vst [vmem:[#allocation1 + $0x1] ss:$4 sm:$0xff] %v1733_v50  ;;  %v5308_v17 = vpop.f32.mrf.mxu3  ;;  %v1455_v48 = vpop.f32.mrf.mxu0  ;;  %v5316_v50 = vld [vmem:[%s6330_s4] ss:$0 sm:$0xff] }
 0x1ca   : > { %2210 = vst [vmem:[#allocation1 + $0x2] ss:$4 sm:$0xff] %v1734_v53  ;;  %v1526_v52 = vmul.f32 %v5316_v50, %v1455_v48 }
 0x1cb   : > { %v2797_v62 = vpop.permute.xlu2 %2796  ;;  %3039 = vrot.lane.b32.xlu1 %v5264_v49, %s4702_s17  ;;  %2211 = vst [vmem:[#allocation1 + $0x3] ss:$4 sm:$0xff] %v1609_v54  ;;  %v2592_v54 = vpack.c.b16 %v2576_v41, %v2576_v41 }
 0x1cc   : > { %v3149_v56 = vsel %vm3145_vm10, %v5094_v32, %v2797_v62  ;;  %v1571_v0 = vadd.f32 %v5329_v63, %v1526_v52  ;;  %v2444_v52 = vpack.c.bf16 %v5261_v43, %v5261_v43 }
 0x1ce   : > { %v5279_v4 = vld.sshfl [vmem:[#allocation1 + $0x20] sm:$0xff pattern:$0x73625140]  ;;  %v5333_v32 = vmax.f32 %v1571_v0, 0.0 }
 0x1cf   : > { %2212 = vst [vmem:[#allocation1 + $0x20] ss:$4 sm:$0xff] %v1735_v1 }
 0x1d0   : > { %3121 = vrot.lane.b32.xlu0 %v2847_v6, %s4703_s18  ;;  %v1744_v23 = vrot.slane %v5333_v32, 2  ;;  %v1746_v0 = vrot.slane %v5333_v32, 6 }
 0x1d1   : > { %3004 = vrot.lane.b32.xlu2 %v2847_v6, %s4700_s11  ;;  %v5340_v18 = vpop.f32.mrf.mxu3  ;;  %v1458_v24 = vpop.f32.mrf.mxu0 }
 0x1d2   : > { %v5298_v7 = vld.sshfl [vmem:[#allocation1] sm:$0xff pattern:$0x73625140] }
 0x1d3   : > { %v3032_v29 = vpop.permute.xlu2 %3031  ;;  %v2913_v30 = vpop.permute.xlu1 %2912  ;;  %2887 = vrot.lane.b32.xlu1 %v2847_v6, %s4697_s28  ;;  %2215 = vst [vmem:[#allocation1] ss:$4 sm:$0xff] %v1736_v26  ;;  %v2849_v6 = vrot.slane %v2592_v54, 1  ;;  %v1527_v26 = vmul.f32 %v5316_v50, %v1458_v24 }
 0x1d4   : > { %v3213_v13 = vsel %vm3211_vm11, %v5230_v8, %v2913_v30  ;;  %2216 = vst [vmem:[#allocation1 + $0x1] ss:$4 sm:$0xff] %v1737_v36  ;;  %v2519_v8 = vunpack.c.l.b16 %v2440_v51  ;;  %v2694_v30 = vshll.u32 %v2592_v54, 16 }
 0x1d5   : > { %2217 = vst [vmem:[#allocation1 + $0x2] ss:$4 sm:$0xff] %v1610_v15  ;;  %v1743_v15 = vrot.slane %v5302_v40, 6  ;;  %v1572_v36 = vadd.f32 %v5329_v63, %v1527_v26 }
 0x1d6   : > { %v5304_v58 = vld.sshfl [vmem:[#allocation1 + $0x20] sm:$0xff pattern:$0x73625140]  ;;  %v5319_v53 = vpack.c.b16 %v2520_v19, %v2519_v8  ;;  %2218 = vst [vmem:[#allocation1 + $0x3] ss:$4 sm:$0xff] %v1738_v46  ;;  %v2696_v41 = vrot.slane %v2694_v30, 1  ;;  %v1529_v46 = vmul.f32 %v5316_v50, %v5251_v33  ;;  %v1530_v30 = vmul.f32 %v5316_v50, %v5266_v55 }
 0x1d7   : > { %2219 = vst [vmem:[#allocation1 + $0x20] ss:$4 sm:$0xff] %v1739_v37 }
 0x1d8   : > { %2806 = vrot.lane.b32.xlu0 %v2685_v44, %s4698_s29  ;;  %2220 = vst [vmem:[#allocation1 + $0x21] ss:$4 sm:$0xff] %v1740_v39  ;;  %v2848_v5 = vrot.slane %v5319_v53, 1  ;;  %v2689_v12 = vshll.u32 %v5319_v53, 16  ;;  %v2687_v34 = vshrl.u32 %v5319_v53, 16  ;;  %v1613_v39 = vmax.f32 %v1572_v36, 0.0 }
 0x1d9   : > { %3086 = vrot.lane.b32.xlu2 %v2685_v44, %s4704_s19  ;;  %2221 = vst [vmem:[#allocation1 + $0x22] ss:$4 sm:$0xff] %v5302_v40  ;;  %v5368_v8 = vpop.f32.mrf.mxu3  ;;  %v1460_v48 = vpop.f32.mrf.mxu0 }
 0x1da   : > { %2222 = vst [vmem:[#allocation1 + $0x23] ss:$4 sm:$0xff] %v1741_v21  ;;  %v2850_v9 = vsel %vm2826_vm8, %v2848_v5, %v2849_v6  ;;  %v2691_v27 = vrot.slane %v2689_v12, 1  ;;  %v1749_v54 = vrot.slane %v1613_v39, 6  ;;  %v1528_v33 = vmul.f32 %v5316_v50, %v1460_v48 }
 0x1db   : > { %v2878_v59 = vpop.permute.xlu0 %2877  ;;  %v5323_v61 = vpop.permute.xlu2 %2879  ;;  %2969 = vrot.lane.b32.xlu1 %v2685_v44, %s4701_s12  ;;  %v1574_v5 = vadd.f32 %v5329_v63, %v1529_v46  ;;  %v1747_v6 = vrot.slane %v1613_v39, 2 }
 0x1dc   : > { %v3182_v1 = vsel %vm3178_vm9, %v3149_v56, %v2878_v59  ;;  %v2692_v19 = vor.u32 %v2691_v27, %v2687_v34 }
 0x1dd   : > { %v2960_v2 = vpop.permute.xlu1 %2959  ;;  %v5360_v37 = vld.sshfl [vmem:[#allocation1] sm:$0xff pattern:$0x73625140] }
 0x1de   : > { %v3245_v62 = vsel %vm1341_vm4, %v3213_v13, %v2960_v2  ;;  %v2391_v13 = vsel %vm1925_vm7, %v5270_v57, 0.0  ;;  %2225 = vst [vmem:[#allocation1] ss:$4 sm:$0xff] %v1742_v31  ;;  %v2389_v57 = vsel %vm1866_vm6, %v5254_v38, 0.0  ;;  %v2697_v59 = vsel %vm2601_vm5, %v2692_v19, %v2696_v41 }
 0x1df   : > { %v3278_v14 = vsel %vm3276_vm12, %v3245_v62, %v5258_v42  ;;  %v1745_v42 = vrot.slane %v5333_v32, 4  ;;  %v2445_v21 = vpack.c.bf16 %v2391_v13, %v2391_v13  ;;  %v2443_v38 = vpack.c.bf16 %v2389_v57, %v2389_v57 }
 0x1e0   : > { %3041 = vrot.lane.b32.xlu0 %v5319_v53, %s4702_s17  ;;  %v5346_v20 = vsel %vm3309_vm13, %v3278_v14, %v3032_v29  ;;  %v2522_v14 = vunpack.c.l.b16 %v2444_v52 }
 0x1e1   : > { %2924 = vrot.lane.b32.xlu2 %v5319_v53, %s4699_s30  ;;  %v5351_v25 = vld.sshfl [vmem:[#allocation1 + $0x20] sm:$0xff pattern:$0x73625140]  ;;  %v2577_v62 = vunpack.c.l.b16 %v2445_v21  ;;  %v2521_v24 = vunpack.c.l.b16 %v2443_v38  ;;  %v5394_v26 = vpop.f32.mrf.mxu3 }
 0x1e2   : > { %2227 = vst [vmem:[#allocation1 + $0x20] ss:$4 sm:$0xff] %v1743_v15  ;;  %v1748_v15 = vrot.slane %v1613_v39, 4 }
 0x1e3   : > { %v2962_v29 = vpop.permute.xlu2 %2961  ;;  %3006 = vrot.lane.b32.xlu1 %v2850_v9, %s4700_s11  ;;  %2228 = vst [vmem:[#allocation1 + $0x21] ss:$4 sm:$0xff] %v5333_v32  ;;  %v5398_v27 = vpack.c.b16 %v2522_v14, %v2521_v24 }
 0x1e4   : > { %2229 = vst [vmem:[#allocation1 + $0x22] ss:$4 sm:$0xff] %v1744_v23  ;;  %v1573_v23 = vadd.f32 %v5329_v63, %v1528_v33 }
 0x1e5   : > { %v2915_v51 = vpop.permute.xlu1 %2914  ;;  %2230 = vst [vmem:[#allocation1 + $0x23] ss:$4 sm:$0xff] %v1745_v42  ;;  %v5391_v32 = vld.sshfl [vmem:[#allocation1] sm:$0xff pattern:$0x73625140]  ;;  %v2593_v42 = vpack.c.b16 %v2577_v62, %v2577_v62  ;;  %v2851_v55 = vrot.slane %v5398_v27, 1 }
 0x1e6   : > { %v3215_v40 = vsel %vm3211_vm11, %v3182_v1, %v2915_v51  ;;  %2232 = vst [vmem:[#allocation1] ss:$4 sm:$0xff] %v1746_v0 }
 0x1e7   : > { %v3247_v44 = vsel %vm1341_vm4, %v3215_v40, %v2962_v29  ;;  %2233 = vst [vmem:[#allocation1 + $0x1] ss:$4 sm:$0xff] %v1613_v39  ;;  %v1614_v29 = vmax.f32 %v1573_v23, 0.0  ;;  %v2852_v13 = vrot.slane %v2593_v42, 1  ;;  %v2394_v23 = vsel %vm1925_vm7, %v5304_v58, 0.0 }
 0x1e8   : > { %2889 = vrot.lane.b32.xlu0 %v2850_v9, %s4697_s28  ;;  %2234 = vst [vmem:[#allocation1 + $0x2] ss:$4 sm:$0xff] %v1747_v6 }
 0x1e9   : > { %3123 = vrot.lane.b32.xlu2 %v2850_v9, %s4703_s18  ;;  %v1615_v9 = vmax.f32 %v1574_v5, 0.0  ;;  %2235 = vst [vmem:[#allocation1 + $0x3] ss:$4 sm:$0xff] %v1748_v15  ;;  %v1750_v57 = vrot.slane %v1614_v29, 2  ;;  %v2853_v48 = vsel %vm2826_vm8, %v2851_v55, %v2852_v13  ;;  %v1752_v0 = vrot.slane %v1614_v29, 6 }
 0x1ea   : > { %v2997_v56 = vpop.permute.xlu0 %2996  ;;  %v2392_v15 = vsel %vm1866_vm6, %v5279_v4, 0.0  ;;  %v2448_v4 = vpack.c.bf16 %v2394_v23, %v2394_v23 }
 0x1eb   : > { %v5383_v1 = vsel %vm3276_vm12, %v3247_v44, %v2997_v56  ;;  %v5385_v2 = vpop.permute.xlu2 %2998  ;;  %3088 = vrot.lane.b32.xlu1 %v2697_v59, %s4704_s19  ;;  %v1753_v51 = vrot.slane %v1615_v9, 2  ;;  %v1754_v19 = vrot.slane %v1615_v9, 4  ;;  %v2701_v44 = vshll.u32 %v5398_v27, 16 }
 0x1ec   : > { %v5389_v43 = vld.sshfl [vmem:[#allocation1 + $0x20] sm:$0xff pattern:$0x73625140]  ;;  %v1755_v21 = vrot.slane %v1615_v9, 6  ;;  %v1751_v56 = vrot.slane %v1614_v29, 4 }
 0x1ed   : > { %v3114_v12 = vpop.permute.xlu1 %3113  ;;  %2236 = vst [vmem:[#allocation1 + $0x20] ss:$4 sm:$0xff] %v1749_v54  ;;  %v2706_v54 = vshll.u32 %v2593_v42, 16  ;;  %v2447_v42 = vpack.c.bf16 %v5298_v7, %v5298_v7 }
 0x1ef   : > { %v2708_v14 = vrot.slane %v2706_v54, 1 }
 0x1f0   : > { %2971 = vrot.lane.b32.xlu0 %v2697_v59, %s4701_s12  ;;  %v5422_v33 = vld.sshfl [vmem:[#allocation1] sm:$0xff pattern:$0x73625140] }
 0x1f1   : > { %2808 = vrot.lane.b32.xlu2 %v2697_v59, %s4698_s29  ;;  %v5419_v59 = vpop.f32.mrf.mxu3  ;;  %2239 = vst [vmem:[#allocation1] ss:$4 sm:$0xff] %v1614_v29 }
 0x1f2   : > { %v3079_v31 = vpop.permute.xlu0 %3078  ;;  %2240 = vst [vmem:[#allocation1 + $0x1] ss:$4 sm:$0xff] %v1750_v57 }
 0x1f3   : > { %v3344_v36 = vsel %vm3342_vm14, %v5346_v20, %v3079_v31  ;;  %v3081_v34 = vpop.permute.xlu2 %3080  ;;  %2926 = vrot.lane.b32.xlu1 %v5398_v27, %s4699_s30  ;;  %v1575_v20 = vadd.f32 %v5329_v63, %v1530_v30  ;;  %2241 = vst [vmem:[#allocation1 + $0x2] ss:$4 sm:$0xff] %v1751_v56 }
 0x1f4   : > { %v5406_v39 = vld.sshfl [vmem:[#allocation1 + $0x20] sm:$0xff pattern:$0x73625140]  ;;  %v5409_v40 = vsel %vm3375_vm15, %v3344_v36, %v3114_v12  ;;  %v2699_v12 = vshrl.u32 %v5398_v27, 16  ;;  %2242 = vst [vmem:[#allocation1 + $0x3] ss:$4 sm:$0xff] %v1752_v0  ;;  %v2446_v36 = vpack.c.bf16 %v2392_v15, %v2392_v15 }
 0x1f5   : > { %v2799_v41 = vpop.permute.xlu1 %2798  ;;  %2243 = vst [vmem:[#allocation1 + $0x20] ss:$4 sm:$0xff] %v1615_v9  ;;  %v1616_v38 = vmax.f32 %v1575_v20, 0.0 }
 0x1f6   : > { %v3151_v46 = vsel %vm3145_vm10, %v5119_v10, %v2799_v41  ;;  %2244 = vst [vmem:[#allocation1 + $0x21] ss:$4 sm:$0xff] %v1753_v51  ;;  %v2703_v10 = vrot.slane %v2701_v44, 1  ;;  %v2524_v41 = vunpack.c.l.b16 %v2447_v42  ;;  %v2523_v20 = vunpack.c.l.b16 %v2446_v36 }
 0x1f7   : > { %v3184_v52 = vsel %vm3178_vm9, %v3151_v46, %v5323_v61  ;;  %2245 = vst [vmem:[#allocation1 + $0x22] ss:$4 sm:$0xff] %v1754_v19  ;;  %v1531_v61 = vmul.f32 %v5316_v50, %v5285_v16  ;;  %v1756_v9 = vrot.slane %v1616_v38, 2  ;;  %v1757_v51 = vrot.slane %v1616_v38, 4 }
 0x1f8   : > { %3008 = vrot.lane.b32.xlu0 %v2853_v48, %s4700_s11  ;;  %2246 = vst [vmem:[#allocation1 + $0x23] ss:$4 sm:$0xff] %v1755_v21  ;;  %v2704_v24 = vor.u32 %v2703_v10, %v2699_v12  ;;  %v1758_v7 = vrot.slane %v1616_v38, 6  ;;  %v2578_v46 = vunpack.c.l.b16 %v2448_v4 }
 0x1f9   : > { %3043 = vrot.lane.b32.xlu2 %v5398_v27, %s4702_s17  ;;  %v1576_v31 = vadd.f32 %v5329_v63, %v1531_v61  ;;  %v5447_v13 = vpop.f32.mrf.mxu3 }
 0x1fa   : > { %v2917_v62 = vpop.permute.xlu0 %2916  ;;  %v2709_v29 = vsel %vm2601_vm5, %v2704_v24, %v2708_v14  ;;  %v2594_v54 = vpack.c.b16 %v2578_v46, %v2578_v46 }
 0x1fb   : > { %v5429_v5 = vsel %vm3211_vm11, %v3184_v52, %v2917_v62  ;;  %v5431_v6 = vpop.permute.xlu2 %2918  ;;  %3125 = vrot.lane.b32.xlu1 %v2853_v48, %s4703_s18  ;;  %v1617_v44 = vmax.f32 %v1576_v31, 0.0  ;;  %v5459_v57 = vld.sshfl [vmem:[#allocation1] sm:$0xff pattern:$0x73625140]  ;;  %v5464_v52 = vpack.c.b16 %v2524_v41, %v2523_v20  ;;  %v2397_v41 = vsel %vm1925_vm7, %v5391_v32, 0.0 }
 0x1fc   : > { %2249 = vst [vmem:[#allocation1] ss:$4 sm:$0xff] %v1616_v38  ;;  %v1533_v38 = vmul.f32 %v5316_v50, %v5340_v18  ;;  %v2855_v23 = vrot.slane %v2594_v54, 1  ;;  %v2451_v20 = vpack.c.bf16 %v2397_v41, %v2397_v41 }
 0x1fd   : > { %v3034_v16 = vpop.permute.xlu1 %3033  ;;  %v2713_v0 = vshll.u32 %v5464_v52, 16  ;;  %v1759_v10 = vrot.slane %v1617_v44, 2  ;;  %v1760_v12 = vrot.slane %v1617_v44, 4  ;;  %v1761_v24 = vrot.slane %v1617_v44, 6 }
 0x1fe   : > { %v3313_v30 = vsel %vm3309_vm13, %v5383_v1, %v3034_v16  ;;  %v1532_v1 = vmul.f32 %v5316_v50, %v5308_v17  ;;  %v1578_v36 = vadd.f32 %v5329_v63, %v1533_v38 }
 0x1ff   : > { %v5450_v58 = vld.sshfl [vmem:[#allocation1 + $0x20] sm:$0xff pattern:$0x73625140]  ;;  %v3346_v19 = vsel %vm3342_vm14, %v3313_v30, %v3081_v34  ;;  %v2715_v18 = vrot.slane %v2713_v0, 1 }
 0x200   : > { %3090 = vrot.lane.b32.xlu0 %v2709_v29, %s4704_s19  ;;  %2251 = vst [vmem:[#allocation1 + $0x20] ss:$4 sm:$0xff] %v1756_v9  ;;  %v1577_v17 = vadd.f32 %v5329_v63, %v1532_v1  ;;  %v2854_v9 = vrot.slane %v5464_v52, 1  ;;  %v1619_v32 = vmax.f32 %v1578_v36, 0.0 }
 0x201   : > { %2891 = vrot.lane.b32.xlu2 %v2853_v48, %s4697_s28  ;;  %2252 = vst [vmem:[#allocation1 + $0x21] ss:$4 sm:$0xff] %v1757_v51  ;;  %v5467_v56 = vpop.f32.mrf.mxu3  ;;  %v2718_v51 = vshll.u32 %v2594_v54, 16 }
 0x202   : > { %v3116_v55 = vpop.permute.xlu0 %3115  ;;  %2253 = vst [vmem:[#allocation1 + $0x22] ss:$4 sm:$0xff] %v1758_v7  ;;  %v1618_v62 = vmax.f32 %v1577_v17, 0.0  ;;  %v1767_v36 = vrot.slane %v1619_v32, 6 }
 0x203   : > { %v5456_v21 = vpop.permute.xlu2 %3117  ;;  %2810 = vrot.lane.b32.xlu1 %v2709_v29, %s4698_s29  ;;  %v5462_v34 = vsel %vm3375_vm15, %v3346_v19, %v3116_v55  ;;  %2254 = vst [vmem:[#allocation1 + $0x23] ss:$4 sm:$0xff] %v1617_v44  ;;  %v5479_v16 = vld.sshfl [vmem:[#allocation1] sm:$0xff pattern:$0x73625140]  ;;  %v2856_v19 = vsel %vm2826_vm8, %v2854_v9, %v2855_v23  ;;  %v2450_v55 = vpack.c.bf16 %v5351_v25, %v5351_v25  ;;  %v2720_v17 = vrot.slane %v2718_v51, 1 }
 0x204   : > { %2256 = vst [vmem:[#allocation1] ss:$4 sm:$0xff] %v1759_v10  ;;  %v1763_v0 = vrot.slane %v1618_v62, 4  ;;  %v1764_v38 = vrot.slane %v1618_v62, 6  ;;  %v1765_v23 = vrot.slane %v1619_v32, 2 }
 0x205   : > { %v2882_v48 = vpop.permute.xlu1 %2881  ;;  %2257 = vst [vmem:[#allocation1 + $0x1] ss:$4 sm:$0xff] %v1760_v12  ;;  %v2526_v25 = vunpack.c.l.b16 %v2450_v55  ;;  %v2579_v12 = vunpack.c.l.b16 %v2451_v20 }
 0x206   : > { %2258 = vst [vmem:[#allocation1 + $0x2] ss:$4 sm:$0xff] %v1761_v24 }
 0x207   : > { %2259 = vst [vmem:[#allocation1 + $0x3] ss:$4 sm:$0xff] %v1618_v62 }
 0x208   : > { %2928 = vrot.lane.b32.xlu0 %v5464_v52, %s4699_s30 }
 0x209   : > { %2973 = vrot.lane.b32.xlu2 %v2709_v29, %s4701_s12  ;;  %v1762_v29 = vrot.slane %v1618_v62, 2  ;;  %v5501_v1 = vpop.f32.mrf.mxu3  ;;  %v1535_v62 = vmul.f32 %v5316_v50, %v5394_v26 }
 0x20a   : > { %v2801_v61 = vpop.permute.xlu0 %2800 }
 0x20b   : > { %v3153_v14 = vsel %vm3145_vm10, %v5146_v35, %v2801_v61  ;;  %v2803_v15 = vpop.permute.xlu2 %2802  ;;  %3045 = vrot.lane.b32.xlu1 %v5464_v52, %s4702_s17  ;;  %v5487_v35 = vld.sshfl [vmem:[#allocation1 + $0x20] sm:$0xff pattern:$0x73625140] }
 0x20c   : > { %v3186_v42 = vsel %vm3178_vm9, %v3153_v14, %v2882_v48  ;;  %2260 = vst [vmem:[#allocation1 + $0x20] ss:$4 sm:$0xff] %v1762_v29  ;;  %v1766_v29 = vrot.slane %v1619_v32, 4 }
 0x20d   : > { %v2964_v30 = vpop.permute.xlu1 %2963  ;;  %v5485_v31 = vsel %vm3211_vm11, %v3186_v42, %v5431_v6  ;;  %v2395_v6 = vsel %vm1866_vm6, %v5360_v37, 0.0  ;;  %v2711_v37 = vshrl.u32 %v5464_v52, 16 }
 0x20e   : > { %v3249_v4 = vsel %vm1341_vm4, %v5429_v5, %v2964_v30  ;;  %v1534_v5 = vmul.f32 %v5316_v50, %v5368_v8  ;;  %v2449_v44 = vpack.c.bf16 %v2395_v6, %v2395_v6  ;;  %v5515_v14 = vld.sshfl [vmem:[#allocation1] sm:$0xff pattern:$0x73625140] }
 0x20f   : > { %v3282_v7 = vsel %vm3276_vm12, %v3249_v4, %v5385_v2  ;;  %v2716_v8 = vor.u32 %v2715_v18, %v2711_v37  ;;  %2263 = vst [vmem:[#allocation1] ss:$4 sm:$0xff] %v1763_v0  ;;  %v3155_v4 = vsel %vm3145_vm10, %v5178_v60, %v2803_v15  ;;  %v1536_v60 = vmul.f32 %v5316_v50, %v5419_v59 }
 0x210   : > { %3127 = vrot.lane.b32.xlu0 %v2856_v19, %s4703_s18  ;;  %v1579_v54 = vadd.f32 %v5329_v63, %v1534_v5  ;;  %v2525_v61 = vunpack.c.l.b16 %v2449_v44  ;;  %2264 = vst [vmem:[#allocation1 + $0x1] ss:$4 sm:$0xff] %v1764_v38  ;;  %v1580_v5 = vadd.f32 %v5329_v63, %v1535_v62 }
 0x211   : > { %3010 = vrot.lane.b32.xlu2 %v2856_v19, %s4700_s11  ;;  %v2721_v24 = vsel %vm2601_vm5, %v2716_v8, %v2720_v17  ;;  %v5518_v42 = vpop.f32.mrf.mxu3  ;;  %2265 = vst [vmem:[#allocation1 + $0x2] ss:$4 sm:$0xff] %v1619_v32 }
 0x212   : > { %v3036_v2 = vpop.permute.xlu0 %3035  ;;  %v1620_v9 = vmax.f32 %v1579_v54, 0.0  ;;  %v5521_v30 = vpack.c.b16 %v2526_v25, %v2525_v61  ;;  %2266 = vst [vmem:[#allocation1 + $0x3] ss:$4 sm:$0xff] %v1765_v23  ;;  %v1621_v17 = vmax.f32 %v1580_v5, 0.0  ;;  %v1581_v25 = vadd.f32 %v5329_v63, %v1536_v60 }
 0x213   : > { %v3315_v46 = vsel %vm3309_vm13, %v3282_v7, %v3036_v2  ;;  %v5511_v48 = vpop.permute.xlu2 %3037  ;;  %2893 = vrot.lane.b32.xlu1 %v2856_v19, %s4697_s28  ;;  %v5523_v18 = vld.sshfl [vmem:[#allocation1 + $0x20] sm:$0xff pattern:$0x73625140]  ;;  %v2595_v19 = vpack.c.b16 %v2579_v12, %v2579_v12 }
 0x214   : > { %2267 = vst [vmem:[#allocation1 + $0x20] ss:$4 sm:$0xff] %v1766_v29  ;;  %v1768_v41 = vrot.slane %v1620_v9, 2  ;;  %v2725_v26 = vshll.u32 %v5521_v30, 16  ;;  %v2857_v37 = vrot.slane %v5521_v30, 1  ;;  %v1769_v32 = vrot.slane %v1620_v9, 4 }
 0x215   : > { %v3001_v10 = vpop.permute.xlu1 %3000  ;;  %2268 = vst [vmem:[#allocation1 + $0x21] ss:$4 sm:$0xff] %v1767_v36  ;;  %v2858_v2 = vrot.slane %v2595_v19, 1  ;;  %v2723_v59 = vshrl.u32 %v5521_v30, 16  ;;  %v1770_v29 = vrot.slane %v1620_v9, 6  ;;  %v1622_v5 = vmax.f32 %v1581_v25, 0.0 }
 0x216   : > { %2269 = vst [vmem:[#allocation1 + $0x22] ss:$4 sm:$0xff] %v1620_v9  ;;  %v2727_v8 = vrot.slane %v2725_v26, 1 }
 0x217   : > { %2270 = vst [vmem:[#allocation1 + $0x23] ss:$4 sm:$0xff] %v1768_v41  ;;  %v2859_v38 = vsel %vm2826_vm8, %v2857_v37, %v2858_v2  ;;  %v1773_v2 = vrot.slane %v1621_v17, 6  ;;  %v1775_v25 = vrot.slane %v1622_v5, 4 }
 0x218   : > { %2812 = vrot.lane.b32.xlu0 %v2721_v24, %s4698_s29  ;;  %v2728_v36 = vor.u32 %v2727_v8, %v2723_v59  ;;  %v1774_v59 = vrot.slane %v1622_v5, 2 }
 0x219   : > { %3092 = vrot.lane.b32.xlu2 %v2721_v24, %s4704_s19  ;;  %v5540_v44 = vpop.f32.mrf.mxu3  ;;  %v2271_v54 = vld.sshfl [vmem:[#allocation1] sm:$0xff pattern:$0x73625140] }
 0x21a   : > { %v2884_v51 = vpop.permute.xlu0 %2883  ;;  %2273 = vst [vmem:[#allocation1] ss:$4 sm:$0xff] %v1769_v32  ;;  %v2407_v61 = vsel %vm1866_vm6, %v2271_v54, 0.0 }
 0x21b   : > { %v3188_v7 = vsel %vm3178_vm9, %v3155_v4, %v2884_v51  ;;  %v5531_v6 = vpop.permute.xlu2 %2885  ;;  %2975 = vrot.lane.b32.xlu1 %v2721_v24, %s4701_s12  ;;  %v2461_v24 = vpack.c.bf16 %v2407_v61, %v2407_v61  ;;  %v2398_v4 = vsel %vm1866_vm6, %v5389_v43, 0.0  ;;  %v2453_v43 = vpack.c.bf16 %v5422_v33, %v5422_v33 }
 0x21c   : > { %v1538_v61 = vmul.f32 %v5316_v50, %v5467_v56 }
 0x21d   : > { %v3083_v55 = vpop.permute.xlu1 %3082  ;;  %v2533_v60 = vunpack.c.l.b16 %v2461_v24 }
 0x21e   : > { %v3348_v15 = vsel %vm3342_vm14, %v3315_v46, %v3083_v55  ;;  %v2730_v46 = vshll.u32 %v2595_v19, 16 }
 0x21f   : > { %v5544_v20 = vsel %vm3375_vm15, %v3348_v15, %v5456_v21  ;;  %v2400_v21 = vsel %vm1925_vm7, %v5406_v39, 0.0  ;;  %v1771_v39 = vrot.slane %v1621_v17, 2 }
 0x220   : > { %3047 = vrot.lane.b32.xlu0 %v5521_v30, %s4702_s17  ;;  %v2732_v19 = vrot.slane %v2730_v46, 1  ;;  %v2454_v26 = vpack.c.bf16 %v2400_v21, %v2400_v21 }
 0x221   : > { %2930 = vrot.lane.b32.xlu2 %v5521_v30, %s4699_s30  ;;  %v1495_v37 = vpop.f32.mrf.mxu3  ;;  %v5575_v8 = vld.sshfl [vmem:[#allocation1] sm:$0xff pattern:$0x73625140] }
 0x222   : > { %v2966_v0 = vpop.permute.xlu0 %2965  ;;  %v2733_v33 = vsel %vm2601_vm5, %v2728_v36, %v2732_v19  ;;  %v2580_v54 = vunpack.c.l.b16 %v2454_v26  ;;  %2280 = vst [vmem:[#allocation1] ss:$4 sm:$0xff] %v1773_v2 }
 0x223   : > { %v3251_v12 = vsel %vm1341_vm4, %v5485_v31, %v2966_v0  ;;  %v2968_v23 = vpop.permute.xlu2 %2967  ;;  %3012 = vrot.lane.b32.xlu1 %v2859_v38, %s4700_s11  ;;  %v2272_v31 = vld.sshfl [vmem:[#allocation1 + $0x20] sm:$0xff pattern:$0x73625140]  ;;  %2281 = vst [vmem:[#allocation1 + $0x1] ss:$4 sm:$0xff] %v1622_v5 }
 0x224   : > { %v3284_v62 = vsel %vm3276_vm12, %v3251_v12, %v3001_v10  ;;  %2275 = vst [vmem:[#allocation1 + $0x20] ss:$4 sm:$0xff] %v1770_v29  ;;  %v2462_v9 = vpack.c.bf16 %v2272_v31, %v2272_v31  ;;  %v1772_v10 = vrot.slane %v1621_v17, 4  ;;  %v2596_v24 = vpack.c.b16 %v2580_v54, %v2580_v54 }
 0x225   : > { %v2921_v51 = vpop.permute.xlu1 %2920  ;;  %v3317_v41 = vsel %vm3309_vm13, %v3284_v62, %v5511_v48  ;;  %2276 = vst [vmem:[#allocation1 + $0x21] ss:$4 sm:$0xff] %v1621_v17  ;;  %v1537_v48 = vmul.f32 %v5316_v50, %v5447_v13  ;;  %v1776_v62 = vrot.slane %v1622_v5, 6  ;;  %v2401_v5 = vsel %vm1866_vm6, %v5459_v57, 0.0 }
 0x226   : > { %v3221_v55 = vsel %vm3211_vm11, %v3188_v7, %v2921_v51  ;;  %2277 = vst [vmem:[#allocation1 + $0x22] ss:$4 sm:$0xff] %v1771_v39  ;;  %v2534_v32 = vunpack.c.l.b16 %v2462_v9  ;;  %v2452_v7 = vpack.c.bf16 %v2398_v4, %v2398_v4  ;;  %v1583_v39 = vadd.f32 %v5329_v63, %v1538_v61 }
 0x227   : > { %v3253_v15 = vsel %vm1341_vm4, %v3221_v55, %v2968_v23  ;;  %2278 = vst [vmem:[#allocation1 + $0x23] ss:$4 sm:$0xff] %v1772_v10  ;;  %v1582_v21 = vadd.f32 %v5329_v63, %v1537_v48  ;;  %v2861_v19 = vrot.slane %v2596_v24, 1  ;;  %v2456_v48 = vpack.c.bf16 %v5450_v58, %v5450_v58 }
 0x228   : > { %2895 = vrot.lane.b32.xlu0 %v2859_v38, %s4697_s28  ;;  %v5578_v17 = vpack.c.b16 %v2534_v32, %v2533_v60  ;;  %2282 = vst [vmem:[#allocation1 + $0x2] ss:$4 sm:$0xff] %v1774_v59  ;;  %v2527_v23 = vunpack.c.l.b16 %v2452_v7  ;;  %v1624_v37 = vmax.f32 %v1583_v39, 0.0  ;;  %v1539_v7 = vmul.f32 %v5316_v50, %v5501_v1 }
 0x229   : > { %3129 = vrot.lane.b32.xlu2 %v2859_v38, %s4703_s18  ;;  %v2528_v38 = vunpack.c.l.b16 %v2453_v43  ;;  %2283 = vst [vmem:[#allocation1 + $0x3] ss:$4 sm:$0xff] %v1775_v25  ;;  %v1623_v36 = vmax.f32 %v1582_v21, 0.0  ;;  %v2742_v61 = vshll.u32 %v2596_v24, 16  ;;  %v1540_v24 = vmul.f32 %v5316_v50, %v5518_v42 }
 0x22a   : > { %v3003_v46 = vpop.permute.xlu0 %3002  ;;  %v1780_v1 = vrot.slane %v1624_v37, 2 }
 0x22b   : > { %v5581_v13 = vsel %vm3276_vm12, %v3253_v15, %v3003_v46  ;;  %v5583_v0 = vpop.permute.xlu2 %3004  ;;  %3094 = vrot.lane.b32.xlu1 %v2733_v33, %s4704_s19  ;;  %v5589_v29 = vpack.c.b16 %v2528_v38, %v2527_v23  ;;  %v1777_v9 = vrot.slane %v1623_v36, 2  ;;  %v1778_v43 = vrot.slane %v1623_v36, 4 }
 0x22c   : > { %v1779_v57 = vrot.slane %v1623_v36, 6  ;;  %v2455_v46 = vpack.c.bf16 %v2401_v5, %v2401_v5  ;;  %v1585_v42 = vadd.f32 %v5329_v63, %v1540_v24 }
 0x22d   : > { %v3120_v12 = vpop.permute.xlu1 %3119  ;;  %v2860_v31 = vrot.slane %v5589_v29, 1  ;;  %v2737_v60 = vshll.u32 %v5589_v29, 16  ;;  %v2735_v58 = vshrl.u32 %v5589_v29, 16 }
 0x22e   : > { %v2279_v4 = vld.sshfl [vmem:[#allocation1 + $0x20] sm:$0xff pattern:$0x73625140]  ;;  %v2529_v39 = vunpack.c.l.b16 %v2455_v46 }
 0x22f   : > { %2284 = vst [vmem:[#allocation1 + $0x20] ss:$4 sm:$0xff] %v1776_v62  ;;  %v2410_v55 = vsel %vm1866_vm6, %v2279_v4, 0.0  ;;  %v2739_v21 = vrot.slane %v2737_v60, 1  ;;  %v1781_v62 = vrot.slane %v1624_v37, 4 }
 0x230   : > { %2977 = vrot.lane.b32.xlu0 %v2733_v33, %s4701_s12  ;;  %v2285_v10 = vld.sshfl [vmem:[#allocation1] sm:$0xff pattern:$0x73625140]  ;;  %v2464_v15 = vpack.c.bf16 %v2410_v55, %v2410_v55 }
 0x231   : > { %2814 = vrot.lane.b32.xlu2 %v2733_v33, %s4698_s29  ;;  %2287 = vst [vmem:[#allocation1] ss:$4 sm:$0xff] %v1623_v36  ;;  %v2465_v32 = vpack.c.bf16 %v2285_v10, %v2285_v10  ;;  %v2862_v33 = vsel %vm2826_vm8, %v2860_v31, %v2861_v19  ;;  %v1584_v36 = vadd.f32 %v5329_v63, %v1539_v7  ;;  %v2744_v31 = vrot.slane %v2742_v61, 1 }
 0x232   : > { %v3085_v51 = vpop.permute.xlu0 %3084  ;;  %2288 = vst [vmem:[#allocation1 + $0x1] ss:$4 sm:$0xff] %v1777_v9  ;;  %v2535_v25 = vunpack.c.l.b16 %v2464_v15  ;;  %v1541_v15 = vmul.f32 %v5316_v50, %v5540_v44 }
 0x233   : > { %v3350_v56 = vsel %vm3342_vm14, %v3317_v41, %v3085_v51  ;;  %v3087_v26 = vpop.permute.xlu2 %3086  ;;  %2932 = vrot.lane.b32.xlu1 %v5589_v29, %s4699_s30  ;;  %2289 = vst [vmem:[#allocation1 + $0x2] ss:$4 sm:$0xff] %v1778_v43  ;;  %v2536_v38 = vunpack.c.l.b16 %v2465_v32  ;;  %v1782_v51 = vrot.slane %v1624_v37, 6  ;;  %v1625_v9 = vmax.f32 %v1584_v36, 0.0 }
 0x234   : > { %v5605_v41 = vsel %vm3375_vm15, %v3350_v56, %v3120_v12  ;;  %2290 = vst [vmem:[#allocation1 + $0x3] ss:$4 sm:$0xff] %v1779_v57  ;;  %v2403_v12 = vsel %vm1925_vm7, %v5479_v16, 0.0  ;;  %v2740_v16 = vor.u32 %v2739_v21, %v2735_v58  ;;  %v5649_v57 = vmax.f32 %v1585_v42, 0.0 }
 0x235   : > { %v2805_v2 = vpop.permute.xlu1 %2804  ;;  %v5625_v23 = vpack.c.b16 %v2536_v38, %v2535_v25  ;;  %v2457_v5 = vpack.c.bf16 %v2403_v12, %v2403_v12  ;;  %v1783_v44 = vrot.slane %v1625_v9, 2  ;;  %v1785_v38 = vrot.slane %v1625_v9, 6 }
 0x236   : > { %v3157_v59 = vsel %vm3145_vm10, %v5212_v47, %v2805_v2  ;;  %v2530_v47 = vunpack.c.l.b16 %v2456_v48  ;;  %v2745_v2 = vsel %vm2601_vm5, %v2740_v16, %v2744_v31  ;;  %v1788_v24 = vrot.slane %v5649_v57, 6  ;;  %v3408_v31 = vld [vmem:[%s6328_s2] sm:$0x3] }
 0x237   : > { %v3190_v54 = vsel %vm3178_vm9, %v3157_v59, %v5531_v6  ;;  %v5623_v6 = vld.sshfl [vmem:[#allocation1 + $0x20] sm:$0xff pattern:$0x73625140]  ;;  %v2581_v48 = vunpack.c.l.b16 %v2457_v5 }
 0x238   : > { %3014 = vrot.lane.b32.xlu0 %v2862_v33, %s4700_s11  ;;  %2291 = vst [vmem:[#allocation1 + $0x20] ss:$4 sm:$0xff] %v1624_v37  ;;  %v5639_v10 = vpack.c.b16 %v2530_v47, %v2529_v39  ;;  %v1787_v47 = vrot.slane %v5649_v57, 4 }
 0x239   : > { %3049 = vrot.lane.b32.xlu2 %v5589_v29, %s4702_s17  ;;  %2292 = vst [vmem:[#allocation1 + $0x21] ss:$4 sm:$0xff] %v1780_v1  ;;  %v1786_v1 = vrot.slane %v5649_v57, 2 }
 0x23a   : > { %v2923_v4 = vpop.permute.xlu0 %2922  ;;  %2293 = vst [vmem:[#allocation1 + $0x22] ss:$4 sm:$0xff] %v1781_v62  ;;  %v2749_v50 = vshll.u32 %v5639_v10, 16  ;;  %v2747_v16 = vshrl.u32 %v5639_v10, 16  ;;  %v2863_v42 = vrot.slane %v5639_v10, 1 }
 0x23b   : > { %v5631_v19 = vsel %vm3211_vm11, %v3190_v54, %v2923_v4  ;;  %v5633_v56 = vpop.permute.xlu2 %2924  ;;  %3131 = vrot.lane.b32.xlu1 %v2862_v33, %s4703_s18  ;;  %2294 = vst [vmem:[#allocation1 + $0x23] ss:$4 sm:$0xff] %v1782_v51  ;;  %v2295_v43 = vld.sshfl [vmem:[#allocation1] sm:$0xff pattern:$0x73625140]  ;;  %v2597_v54 = vpack.c.b16 %v2581_v48, %v2581_v48 }
 0x23c   : > { %2297 = vst [vmem:[#allocation1] ss:$4 sm:$0xff] %v1625_v9  ;;  %v2413_v32 = vsel %vm1866_vm6, %v2295_v43, 0.0  ;;  %v3410_v48 = vld [vmem:[%s6328_s2 + $0x4] sm:$0x3] }
 0x23d   : > { %v3040_v55 = vpop.permute.xlu1 %3039  ;;  %v2864_v4 = vrot.slane %v2597_v54, 1  ;;  %v2754_v39 = vshll.u32 %v2597_v54, 16 }
 0x23e   : > { %v3319_v60 = vsel %vm3309_vm13, %v5581_v13, %v3040_v55  ;;  %v2467_v13 = vpack.c.bf16 %v2413_v32, %v2413_v32 }
 0x23f   : > { %v3352_v37 = vsel %vm3342_vm14, %v3319_v60, %v3087_v26  ;;  %v1586_v26 = vadd.f32 %v5329_v63, %v1541_v15  ;;  %v2751_v63 = vrot.slane %v2749_v50, 1  ;;  %v3409_v60 = vld [vmem:[%s6328_s2 + $0x2] sm:$0x3]  ;;  %v3411_v50 = vld [vmem:[%s6328_s2 + $0x6] sm:$0x3] }
 0x240   : > { %2897 = vrot.lane.b32.xlu0 %v2862_v33, %s4697_s28  ;;  %v1784_v33 = vrot.slane %v1625_v9, 4  ;;  %v2909_v61 = vunpack.c.l.b16 %v2467_v13 }
 0x241   : > { %2979 = vrot.lane.b32.xlu2 %v2745_v2, %s4701_s12  ;;  %v1627_v12 = vmax.f32 %v1586_v26, 0.0 }
 0x242   : > { %v3122_v7 = vpop.permute.xlu0 %3121  ;;  %v2296_v25 = vld.sshfl [vmem:[#allocation1 + $0x20] sm:$0xff pattern:$0x73625140] }
 0x243   : > { %v5653_v59 = vpop.permute.xlu2 %3123  ;;  %2816 = vrot.lane.b32.xlu1 %v2745_v2, %s4698_s29  ;;  %v5657_v46 = vsel %vm3375_vm15, %v3352_v37, %v3122_v7  ;;  %2299 = vst [vmem:[#allocation1 + $0x20] ss:$4 sm:$0xff] %v1783_v44  ;;  %v2468_v21 = vpack.c.bf16 %v2296_v25, %v2296_v25  ;;  %v2298_v62 = vld.sshfl [vmem:[#allocation1] sm:$0xff pattern:$0x73625140]  ;;  %v2752_v37 = vor.u32 %v2751_v63, %v2747_v16  ;;  %v2756_v7 = vrot.slane %v2754_v39, 1 }
 0x244   : > { %2300 = vst [vmem:[#allocation1 + $0x21] ss:$4 sm:$0xff] %v1784_v33  ;;  %v2415_v51 = vsel %vm1925_vm7, %v2298_v62, 0.0  ;;  %v1789_v3 = vrot.slane %v1627_v12, 2  ;;  %v2406_v33 = vsel %vm1925_vm7, %v5523_v18, 0.0 }
 0x245   : > { %v2888_v58 = vpop.permute.xlu1 %2887  ;;  %2301 = vst [vmem:[#allocation1 + $0x22] ss:$4 sm:$0xff] %v1785_v38  ;;  %v2910_v36 = vunpack.c.l.b16 %v2468_v21  ;;  %v2469_v55 = vpack.c.bf16 %v2415_v51, %v2415_v51  ;;  %v2459_v38 = vpack.c.bf16 %v5515_v14, %v5515_v14  ;;  %v2757_v14 = vsel %vm2601_vm5, %v2752_v37, %v2756_v7 }
 0x246   : > { %2304 = vst [vmem:[#allocation1] ss:$4 sm:$0xff] %v1786_v1 }
 0x247   : > { %2305 = vst [vmem:[#allocation1 + $0x1] ss:$4 sm:$0xff] %v1787_v47  ;;  %v5671_v5 = vpack.c.b16 %v2910_v36, %v2909_v61  ;;  %v2945_v32 = vunpack.c.l.b16 %v2469_v55  ;;  %v2532_v16 = vunpack.c.l.b16 %v2459_v38  ;;  %v3416_v55 = vld [vmem:[%s6328_s2 + $0x10] sm:$0x3] }
 0x248   : > { %3096 = vrot.lane.b32.xlu0 %v2745_v2, %s4704_s19  ;;  %2306 = vst [vmem:[#allocation1 + $0x2] ss:$4 sm:$0xff] %v1788_v24  ;;  %v2404_v2 = vsel %vm1866_vm6, %v5487_v35, 0.0 }
 0x249   : > { %2934 = vrot.lane.b32.xlu2 %v5639_v10, %s4699_s30  ;;  %2307 = vst [vmem:[#allocation1 + $0x3] ss:$4 sm:$0xff] %v1627_v12  ;;  %v2950_v44 = vshll.u32 %v5671_v5, 16  ;;  %v2946_v54 = vpack.c.b16 %v2945_v32, %v2945_v32  ;;  %v2991_v21 = vrot.slane %v5671_v5, 1  ;;  %v2948_v1 = vshrl.u32 %v5671_v5, 16 }
 0x24a   : > { %v2807_v9 = vpop.permute.xlu0 %2806  ;;  %3418 = vst [vmem:[#allocation1] ss:$4 sm:$0xff] %v3408_v31  ;;  %v2458_v63 = vpack.c.bf16 %v2404_v2, %v2404_v2 }
 0x24b   : > { %v3159_v15 = vsel %vm3145_vm10, %v5264_v49, %v2807_v9  ;;  %v5679_v43 = vpop.permute.xlu2 %2808  ;;  %3051 = vrot.lane.b32.xlu1 %v5639_v10, %s4702_s17  ;;  %v2865_v49 = vsel %vm2826_vm8, %v2863_v42, %v2864_v4  ;;  %3421 = vst [vmem:[#allocation1 + $0x1] ss:$4 sm:$0xff] %v3409_v60  ;;  %v2992_v18 = vrot.slane %v2946_v54, 1  ;;  %v2955_v47 = vshll.u32 %v2946_v54, 16 }
 0x24c   : > { %v3192_v13 = vsel %vm3178_vm9, %v3159_v15, %v2888_v58  ;;  %3424 = vst [vmem:[#allocation1 + $0x2] ss:$4 sm:$0xff] %v3410_v48  ;;  %v3412_v58 = vld [vmem:[%s6328_s2 + $0x8] sm:$0x3]  ;;  %v2460_v4 = vpack.c.bf16 %v2406_v33, %v2406_v33  ;;  %v2531_v42 = vunpack.c.l.b16 %v2458_v63  ;;  %v3161_v2 = vsel %vm3145_vm10, %v5319_v53, %v5679_v43 }
 0x24d   : > { %v2970_v35 = vpop.permute.xlu1 %2969  ;;  %v5697_v26 = vsel %vm3211_vm11, %v3192_v13, %v5633_v56  ;;  %v2952_v56 = vrot.slane %v2950_v44, 1  ;;  %3427 = vst [vmem:[#allocation1 + $0x3] ss:$4 sm:$0xff] %v3411_v50  ;;  %v5724_v12 = vsel %vm2826_vm8, %v2991_v21, %v2992_v18  ;;  %v2957_v36 = vrot.slane %v2955_v47, 1 }
 0x24e   : > { %v3255_v25 = vsel %vm1341_vm4, %v5631_v19, %v2970_v35  ;;  %2302 = vst [vmem:[#allocation1 + $0x23] ss:$4 sm:$0xff] %v5649_v57  ;;  %v3413_v19 = vld [vmem:[%s6328_s2 + $0xa] sm:$0x3]  ;;  %v3415_v57 = vld [vmem:[%s6328_s2 + $0xe] sm:$0x3]  ;;  %v2582_v15 = vunpack.c.l.b16 %v2460_v4  ;;  %v5737_v37 = vpack.c.b16 %v2532_v16, %v2531_v42 }
 0x24f   : > { %v3288_v61 = vsel %vm3276_vm12, %v3255_v25, %v5583_v0  ;;  %2308 = vst [vmem:[#allocation1 + $0x20] ss:$4 sm:$0xff] %v1789_v3  ;;  %v3414_v0 = vld [vmem:[%s6328_s2 + $0xc] sm:$0x3]  ;;  %v2953_v62 = vor.u32 %v2952_v56, %v2948_v1  ;;  %v2409_v47 = vsel %vm1925_vm7, %v5575_v8, 0.0  ;;  %v2773_v16 = vshll.u32 %v5578_v17, 16 }
 0x250   : > { %3133 = vrot.lane.b32.xlu0 %v2865_v49, %s4703_s18  ;;  %3430 = vst [vmem:[#allocation1 + $0x20] ss:$4 sm:$0xff] %v3412_v58  ;;  %v2598_v32 = vpack.c.b16 %v2582_v15, %v2582_v15  ;;  %v2761_v50 = vshll.u32 %v5737_v37, 16  ;;  %v2866_v33 = vrot.slane %v5737_v37, 1  ;;  %v2759_v58 = vshrl.u32 %v5737_v37, 16 }
 0x251   : > { %3098 = vrot.lane.b32.xlu2 %v2757_v14, %s4704_s19  ;;  %3433 = vst [vmem:[#allocation1 + $0x21] ss:$4 sm:$0xff] %v3413_v19  ;;  %v5732_v31 = vsel %vm2601_vm5, %v2953_v62, %v2957_v36  ;;  %v2463_v62 = vpack.c.bf16 %v2409_v47, %v2409_v47 }
 0x252   : > { %v3042_v24 = vpop.permute.xlu0 %3041  ;;  %3436 = vst [vmem:[#allocation1 + $0x22] ss:$4 sm:$0xff] %v3414_v0  ;;  %v2867_v54 = vrot.slane %v2598_v32, 1  ;;  %v2763_v43 = vrot.slane %v2761_v50, 1  ;;  %v2766_v25 = vshll.u32 %v2598_v32, 16  ;;  %v2771_v50 = vshrl.u32 %v5578_v17, 16 }
 0x253   : > { %v3321_v39 = vsel %vm3309_vm13, %v3288_v61, %v3042_v24  ;;  %v3044_v51 = vpop.permute.xlu2 %3043  ;;  %3016 = vrot.lane.b32.xlu1 %v2865_v49, %s4700_s11  ;;  %3439 = vst [vmem:[#allocation1 + $0x23] ss:$4 sm:$0xff] %v3415_v57  ;;  %v2583_v24 = vunpack.c.l.b16 %v2463_v62  ;;  %v2872_v62 = vrot.slane %v5625_v23, 1 }
 0x254   : > { %v3440_v60 = vld.sshfl [vmem:[#allocation1] sm:$0xff pattern:$0x73625140]  ;;  %v2868_v56 = vsel %vm2826_vm8, %v2866_v33, %v2867_v54  ;;  %v2768_v1 = vrot.slane %v2766_v25, 1 }
 0x255   : > { %v3007_v9 = vpop.permute.xlu1 %3006  ;;  %3443 = vst [vmem:[#allocation1] ss:$4 sm:$0xff] %v3416_v55 }
 0x258   : > { %2981 = vrot.lane.b32.xlu0 %v2757_v14, %s4701_s12 }
 0x259   : > { %2818 = vrot.lane.b32.xlu2 %v2757_v14, %s4698_s29 }
 0x25a   : > { %v2890_v48 = vpop.permute.xlu0 %2889 }
 0x25b   : > { %v3194_v13 = vsel %vm3178_vm9, %v3161_v2, %v2890_v48  ;;  %v5745_v7 = vpop.permute.xlu2 %2891  ;;  %2899 = vrot.lane.b32.xlu1 %v2865_v49, %s4697_s28  ;;  %v3441_v49 = vld.sshfl [vmem:[#allocation1 + $0x20] sm:$0xff pattern:$0x73625140] }
 0x25c   : > { %v3444_v35 = vld.sshfl [vmem:[#allocation1] sm:$0xff pattern:$0x73625140] }
 0x25d   : > { %v3089_v44 = vpop.permute.xlu1 %3088  ;;  %v3481_v53 = vsel %vm3480_vm0, %v3444_v35, 0 }
 0x25e   : > { %v3354_v3 = vsel %vm3342_vm14, %v3321_v39, %v3089_v44  ;;  %3488 = vmatpush.bf16.msra.mxu1 %v3481_v53  ;;  %4576 = vmatpush.bf16.msrb.mxu3 %v3481_v53 }
 0x25f   : > { %v5754_v38 = vsel %vm3375_vm15, %v3354_v3, %v5653_v59  ;;  %v2764_v59 = vor.u32 %v2763_v43, %v2759_v58 }
 0x260   : > { %2936 = vrot.lane.b32.xlu0 %v5737_v37, %s4699_s30 }
 0x261   : > { %3053 = vrot.lane.b32.xlu2 %v5737_v37, %s4702_s17 }
 0x262   : > { %v2972_v21 = vpop.permute.xlu0 %2971  ;;  %3489 = vmatpush.bf16.msra.mxu1 %v3441_v49  ;;  %4577 = vmatpush.bf16.msrb.mxu3 %v3441_v49 }
 0x263   : > { %v3257_v61 = vsel %vm1341_vm4, %v5697_v26, %v2972_v21  ;;  %v2974_v18 = vpop.permute.xlu2 %2973  ;;  %3135 = vrot.lane.b32.xlu1 %v2868_v56, %s4703_s18  ;;  %v2769_v26 = vsel %vm2601_vm5, %v2764_v59, %v2768_v1 }
 0x264   : > { %v3290_v14 = vsel %vm3276_vm12, %v3257_v61, %v3007_v9 }
 0x265   : > { %v2927_v19 = vpop.permute.xlu1 %2926  ;;  %v3323_v63 = vsel %vm3309_vm13, %v3290_v14, %v3044_v51  ;;  %v2599_v51 = vpack.c.b16 %v2583_v24, %v2583_v24 }
 0x266   : > { %v3227_v0 = vsel %vm3211_vm11, %v3194_v13, %v2927_v19  ;;  %3490 = vmatpush.bf16.msra.mxu1 %v3440_v60  ;;  %4578 = vmatpush.bf16.msrb.mxu3 %v3440_v60  ;;  %v2869_v13 = vrot.slane %v5578_v17, 1  ;;  %v2783_v19 = vshrl.u32 %v5625_v23, 16 }
 0x267   : > { %v3259_v36 = vsel %vm1341_vm4, %v3227_v0, %v2974_v18  ;;  %v2778_v9 = vshll.u32 %v2599_v51, 16  ;;  %v2870_v15 = vrot.slane %v2599_v51, 1  ;;  %v2785_v18 = vshll.u32 %v5625_v23, 16 }
 0x268   : > { %3100 = vrot.lane.b32.xlu0 %v2769_v26, %s4704_s19 }
 0x269   : > { %2901 = vrot.lane.b32.xlu2 %v2868_v56, %s4697_s28  ;;  %4540 = vmatmul.msk.bf16.vlgmr.msra.gmra.mxu1 %vm3447_vm1, %v5409_v40  ;;  %v2775_v40 = vrot.slane %v2773_v16, 1  ;;  %v2780_v44 = vrot.slane %v2778_v9, 1  ;;  %v2871_v35 = vsel %vm2826_vm8, %v2869_v13, %v2870_v15  ;;  %v2787_v1 = vrot.slane %v2785_v18, 1 }
 0x26a   : > { %v3009_v8 = vpop.permute.xlu0 %3008 }
 0x26b   : > { %v3292_v4 = vsel %vm3276_vm12, %v3259_v36, %v3009_v8  ;;  %v5776_v57 = vpop.permute.xlu2 %3010  ;;  %2820 = vrot.lane.b32.xlu1 %v2769_v26, %s4698_s29  ;;  %v2776_v33 = vor.u32 %v2775_v40, %v2771_v50  ;;  %v2788_v8 = vor.u32 %v2787_v1, %v2783_v19 }
 0x26d   : > { %v3126_v39 = vpop.permute.xlu1 %3125  ;;  %v2781_v53 = vsel %vm2601_vm5, %v2776_v33, %v2780_v44 }
 0x270   : > { %2938 = vrot.lane.b32.xlu0 %v5578_v17, %s4699_s30 }
 0x271   : > { %3018 = vrot.lane.b32.xlu2 %v2868_v56, %s4700_s11 }
 0x272   : > { %v3091_v55 = vpop.permute.xlu0 %3090 }
 0x273   : > { %v3356_v42 = vsel %vm3342_vm14, %v3323_v63, %v3091_v55  ;;  %v3093_v60 = vpop.permute.xlu2 %3092  ;;  %2983 = vrot.lane.b32.xlu1 %v2769_v26, %s4701_s12 }
 0x274   : > { %v5788_v2 = vsel %vm3375_vm15, %v3356_v42, %v3126_v39 }
 0x275   : > { %v2811_v48 = vpop.permute.xlu1 %2810 }
 0x276   : > { %v3163_v32 = vsel %vm3145_vm10, %v5398_v27, %v2811_v48  ;;  %v2412_v27 = vsel %vm1925_vm7, %v5623_v6, 0.0 }
 0x277   : > { %v3196_v3 = vsel %vm3178_vm9, %v3163_v32, %v5745_v7  ;;  %v2466_v7 = vpack.c.bf16 %v2412_v27, %v2412_v27 }
 0x278   : > { %3055 = vrot.lane.b32.xlu0 %v5578_v17, %s4702_s17 }
 0x279   : > { %3020 = vrot.lane.b32.xlu2 %v2871_v35, %s4700_s11  ;;  %4541 = vmatmul.msk.bf16.gmra.mxu1 %vm3447_vm1, %v5462_v34  ;;  %v2584_v11 = vunpack.c.l.b16 %v2466_v7 }
 0x27a   : > { %v2929_v54 = vpop.permute.xlu0 %2928 }
 0x27b   : > { %v3229_v43 = vsel %vm3211_vm11, %v3196_v3, %v2929_v54  ;;  %v2931_v25 = vpop.permute.xlu2 %2930  ;;  %2985 = vrot.lane.b32.xlu1 %v2781_v53, %s4701_s12  ;;  %v2600_v34 = vpack.c.b16 %v2584_v11, %v2584_v11 }
 0x27d   : > { %v3046_v49 = vpop.permute.xlu1 %3045  ;;  %v2790_v47 = vshll.u32 %v2600_v34, 16  ;;  %v2873_v26 = vrot.slane %v2600_v34, 1 }
 0x27e   : > { %v3325_v58 = vsel %vm3309_vm13, %v3292_v4, %v3046_v49 }
 0x27f   : > { %v3358_v21 = vsel %vm3342_vm14, %v3325_v58, %v3093_v60  ;;  %v2792_v24 = vrot.slane %v2790_v47, 1 }
 0x280   : > { %2903 = vrot.lane.b32.xlu0 %v2871_v35, %s4697_s28 }
 0x281   : > { %3137 = vrot.lane.b32.xlu2 %v2871_v35, %s4703_s18  ;;  %v2793_v16 = vsel %vm2601_vm5, %v2788_v8, %v2792_v24  ;;  %v3692_v24 = vld [vmem:[%s6329_s3] sm:$0x3]  ;;  %vm4404_vm5 = vcmask 125952  }
 0x282   : > { %v3128_v6 = vpop.permute.xlu0 %3127 }
 0x283   : > { %v3130_v56 = vpop.permute.xlu2 %3129  ;;  %3102 = vrot.lane.b32.xlu1 %v2781_v53, %s4704_s19  ;;  %v5814_v61 = vsel %vm3375_vm15, %v3358_v21, %v3128_v6 }
 0x285   : > { %v2894_v59 = vpop.permute.xlu1 %2893 }
 0x288   : > { %3057 = vrot.lane.b32.xlu0 %v5625_v23, %s4702_s17 }
 0x289   : > { %2822 = vrot.lane.b32.xlu2 %v2781_v53, %s4698_s29  ;;  %4542 = vmatmul.msk.bf16.gmra.mxu1 %vm3447_vm1, %v5544_v20 }
 0x28a   : > { %v2813_v14 = vpop.permute.xlu0 %2812 }
 0x28b   : > { %v3165_v63 = vsel %vm3145_vm10, %v5464_v52, %v2813_v14  ;;  %v2815_v0 = vpop.permute.xlu2 %2814  ;;  %2940 = vrot.lane.b32.xlu1 %v5625_v23, %s4699_s30  ;;  %v2874_v52 = vsel %vm2826_vm8, %v2872_v62, %v2873_v26 }
 0x28c   : > { %v3198_v36 = vsel %vm3178_vm9, %v3165_v63, %v2894_v59 }
 0x28d   : > { %v2976_v4 = vpop.permute.xlu1 %2975  ;;  %v3231_v39 = vsel %vm3211_vm11, %v3198_v36, %v2931_v25 }
 0x28e   : > { %v3261_v51 = vsel %vm1341_vm4, %v3229_v43, %v2976_v4 }
 0x28f   : > { %v3294_v20 = vsel %vm3276_vm12, %v3261_v51, %v5776_v57  ;;  %v3167_v57 = vsel %vm3145_vm10, %v5521_v30, %v2815_v0 }
 0x290   : > { %3022 = vrot.lane.b32.xlu0 %v2874_v52, %s4700_s11 }
 0x291   : > { %3104 = vrot.lane.b32.xlu2 %v2793_v16, %s4704_s19 }
 0x292   : > { %v3048_v55 = vpop.permute.xlu0 %3047 }
 0x293   : > { %v3327_v9 = vsel %vm3309_vm13, %v3294_v20, %v3048_v55  ;;  %v3050_v42 = vpop.permute.xlu2 %3049  ;;  %3139 = vrot.lane.b32.xlu1 %v2874_v52, %s4703_s18 }
 0x295   : > { %v3013_v60 = vpop.permute.xlu1 %3012 }
 0x298   : > { %2824 = vrot.lane.b32.xlu0 %v2793_v16, %s4698_s29 }
 0x299   : > { %2987 = vrot.lane.b32.xlu2 %v2793_v16, %s4701_s12  ;;  %4543 = vmatmul.msk.bf16.gmra.mxu1 %vm3447_vm1, %v5605_v41 }
 0x29a   : > { %v2896_v15 = vpop.permute.xlu0 %2895 }
 0x29b   : > { %v3200_v40 = vsel %vm3178_vm9, %v3167_v57, %v2896_v15  ;;  %v2980_v48 = vpop.permute.xlu2 %2979  ;;  %3059 = vrot.lane.b32.xlu1 %v5671_v5, %s4702_s17  ;;  %v5919_v57 = vld [vmem:[%s6332_s6] ss:$0 sm:$0xff] }
 0x29d   : > { %v3095_v32 = vpop.permute.xlu1 %3094 }
 0x29e   : > { %v3360_v13 = vsel %vm3342_vm14, %v3327_v9, %v3095_v32 }
 0x29f   : > { %v5850_v50 = vsel %vm3375_vm15, %v3360_v13, %v3130_v56 }
 0x2a0   : > { %3106 = vrot.lane.b32.xlu0 %v5732_v31, %s4704_s19 }
 0x2a1   : > { %3141 = vrot.lane.b32.xlu2 %v5724_v12, %s4703_s18 }
 0x2a2   : > { %v2978_v30 = vpop.permute.xlu0 %2977 }
 0x2a3   : > { %v3263_v44 = vsel %vm1341_vm4, %v3231_v39, %v2978_v30  ;;  %v2935_v3 = vpop.permute.xlu2 %2934  ;;  %2905 = vrot.lane.b32.xlu1 %v2874_v52, %s4697_s28 }
 0x2a4   : > { %v3296_v41 = vsel %vm3276_vm12, %v3263_v44, %v3013_v60 }
 0x2a5   : > { %v2933_v35 = vpop.permute.xlu1 %2932  ;;  %v3329_v33 = vsel %vm3309_vm13, %v3296_v41, %v3050_v42 }
 0x2a6   : > { %v3233_v27 = vsel %vm3211_vm11, %v3200_v40, %v2933_v35  ;;  %v5929_v40 = vld [vmem:[%s6333_s7] ss:$0 sm:$0xff] }
 0x2a7   : > { %v3265_v54 = vsel %vm1341_vm4, %v3233_v27, %v2980_v48 }
 0x2a8   : > { %2989 = vrot.lane.b32.xlu0 %v5732_v31, %s4701_s12 }
 0x2a9   : > { %2942 = vrot.lane.b32.xlu2 %v5671_v5, %s4699_s30  ;;  %4544 = vmatmul.msk.bf16.gmra.mxu1 %vm3447_vm1, %v5657_v46 }
 0x2aa   : > { %v3015_v53 = vpop.permute.xlu0 %3014 }
 0x2ab   : > { %v3298_v43 = vsel %vm3276_vm12, %v3265_v54, %v3015_v53  ;;  %v3099_v25 = vpop.permute.xlu2 %3098  ;;  %3024 = vrot.lane.b32.xlu1 %v5724_v12, %s4700_s11 }
 0x2ad   : > { %v3132_v7 = vpop.permute.xlu1 %3131 }
 0x2b0   : > { %3108 = vrot.lane.b32.xlu0 %v5068_v45, %s4704_s19 }
 0x2b1   : > { %3061 = vrot.lane.b32.xlu2 %v5047_v22, %s4702_s17 }
 0x2b2   : > { %v2898_v31 = vpop.permute.xlu0 %2897 }
 0x2b3   : > { %3143 = vrot.lane.b32.xlu1 %v2827_v28, %s4703_s18  ;;  %v2819_v5 = vpop.permute.xlu2 %2818  ;;  %s4513_s18 = sshll.u32 %s4686_s13, 5 }
 0x2b4   : > { %v3171_v14 = vsel %vm3145_vm10, %v5639_v10, %v2819_v5  ;;  %p372_p5 = scmp.lt.s32.totalorder %s4513_s18, 63 }
 0x2b5   : > { %v2817_v49 = vpop.permute.xlu1 %2816 }
 0x2b6   : > { %v3169_v46 = vsel %vm3145_vm10, %v5589_v29, %v2817_v49  ;;  %s6344_s18 = smov (!%p372_p5, %s4513_s18), 63 }
 0x2b7   : > { %v3202_v58 = vsel %vm3178_vm9, %v3169_v46, %v2898_v31  ;;  %s4514_s24 = sshll.u32 %s6344_s18, 2 }
 0x2b8   : > { %v3235_v12 = vsel %vm3211_vm11, %v3202_v58, %v2935_v3  ;;  %s6053_s27 = scalar_lea.vmem %s6336_s10, %s4514_s24 }
 0x2b9   : > { %4545 = vmatmul.msk.bf16.gmra.mxu1 %vm3447_vm1, %v5754_v38 }
 0x2ba   : > { %v3097_v21 = vpop.permute.xlu0 %3096 }
 0x2bb   : > { %v3362_v45 = vsel %vm3342_vm14, %v3329_v33, %v3097_v21  ;;  %v3054_v28 = vpop.permute.xlu2 %3053 }
 0x2bc   : > { %v3395_v11 = vsel %vm3375_vm15, %v3362_v45, %v3132_v7 }
 0x2bd   : > { %v3052_v6 = vpop.permute.xlu1 %3051 }
 0x2be   : > { %v3331_v22 = vsel %vm3309_vm13, %v3298_v43, %v3052_v6 }
 0x2bf   : > { %v3364_v56 = vsel %vm3342_vm14, %v3331_v22, %v3099_v25 }
 0x2c2   : > { %v3134_v34 = vpop.permute.xlu0 %3133 }
 0x2c3   : > { %v5889_v29 = vsel %vm3375_vm15, %v3364_v56, %v3134_v34  ;;  %v2902_v59 = vpop.permute.xlu2 %2901 }
 0x2c5   : > { %v3017_v18 = vpop.permute.xlu1 %3016 }
 0x2c9   : > { %4546 = vmatmul.msk.bf16.gmra.mxu1 %vm3447_vm1, %v5788_v2  ;;  %v3742_v2 = vsel %vm3480_vm0, %v3692_v24, 0 }
 0x2ca   : > { %v2982_v1 = vpop.permute.xlu0 %2981  ;;  %3751 = vmatpush.bf16.msra.mxu2 %v3742_v2  ;;  %4579 = vmatpush.bf16.msra.mxu3 %v3742_v2 }
 0x2cb   : > { %v3267_v47 = vsel %vm1341_vm4, %v3235_v12, %v2982_v1  ;;  %v3019_v26 = vpop.permute.xlu2 %3018 }
 0x2cc   : > { %v3300_v38 = vsel %vm3276_vm12, %v3267_v47, %v3017_v18 }
 0x2cd   : > { %v2900_v19 = vpop.permute.xlu1 %2899  ;;  %v3333_v63 = vsel %vm3309_vm13, %v3300_v38, %v3054_v28 }
 0x2ce   : > { %v3204_v0 = vsel %vm3178_vm9, %v3171_v14, %v2900_v19 }
 0x2d2   : > { %v2937_v62 = vpop.permute.xlu0 %2936 }
 0x2d3   : > { %v3237_v36 = vsel %vm3211_vm11, %v3204_v0, %v2937_v62  ;;  %v3021_v51 = vpop.permute.xlu2 %3020 }
 0x2d5   : > { %v3136_v8 = vpop.permute.xlu1 %3135 }
 0x2d9   : > { %4547 = vmatmul.msk.bf16.gmra.mxu1 %vm3447_vm1, %v5814_v61 }
 0x2da   : > { %v3101_v4 = vpop.permute.xlu0 %3100 }
 0x2db   : > { %v3366_v10 = vsel %vm3342_vm14, %v3333_v63, %v3101_v4  ;;  %v5911_v9 = vpop.permute.xlu2 %3137 }
 0x2dc   : > { %v5908_v39 = vsel %vm3375_vm15, %v3366_v10, %v3136_v8 }
 0x2dd   : > { %v2821_v52 = vpop.permute.xlu1 %2820 }
 0x2de   : > { %v3173_v53 = vsel %vm3145_vm10, %v5737_v37, %v2821_v52 }
 0x2df   : > { %v3206_v7 = vsel %vm3178_vm9, %v3173_v53, %v2902_v59 }
 0x2e2   : > { %v2939_v20 = vpop.permute.xlu0 %2938 }
 0x2e3   : > { %v2823_v13 = vpop.permute.xlu2 %2822  ;;  %v3239_v31 = vsel %vm3211_vm11, %v3206_v7, %v2939_v20 }
 0x2e4   : > { %v3175_v14 = vsel %vm3145_vm10, %v5578_v17, %v2823_v13 }
 0x2e5   : > { %v2984_v16 = vpop.permute.xlu1 %2983 }
 0x2e6   : > { %v3269_v55 = vsel %vm1341_vm4, %v3237_v36, %v2984_v16  ;;  %v3492_v60 = vpop.f32.mrf.mxu1 }
 0x2e7   : > { %v5914_v42 = vsel %vm3276_vm12, %v3269_v55, %v3019_v26  ;;  %v3576_v15 = vmul.f32 %v5919_v57, %v3492_v60 }
 0x2e9   : > { %4548 = vmatmul.msk.bf16.gmra.mxu1 %vm3447_vm1, %v5850_v50  ;;  %v3612_v30 = vadd.f32 %v5929_v40, %v3576_v15 }
 0x2ea   : > { %v5921_v61 = vpop.permute.xlu0 %3055 }
 0x2eb   : > { %v3644_v35 = vmax.f32 %v3612_v30, 0.0  ;;  %v3105_v25 = vpop.permute.xlu2 %3104 }
 0x2ed   : > { %v2986_v48 = vpop.permute.xlu1 %2985 }
 0x2ee   : > { %v3494_v32 = vpop.f32.mrf.mxu1  ;;  %v3271_v46 = vsel %vm1341_vm4, %v3239_v31, %v2986_v48 }
 0x2ef   : > { %v3577_v44 = vmul.f32 %v5919_v57, %v3494_v32  ;;  %v3304_v37 = vsel %vm3276_vm12, %v3271_v46, %v3021_v51  ;;  %v3335_v46 = vsel %vm3309_vm13, %v5914_v42, %v5921_v61 }
 0x2f1   : > { %v3613_v41 = vadd.f32 %v5929_v40, %v3577_v44 }
 0x2f2   : > { %v2904_v3 = vpop.permute.xlu0 %2903 }
 0x2f3   : > { %v3645_v33 = vmax.f32 %v3613_v41, 0.0  ;;  %v2988_v22 = vpop.permute.xlu2 %2987  ;;  %v3208_v19 = vsel %vm3178_vm9, %v3175_v14, %v2904_v3 }
 0x2f5   : > { %v5934_v50 = vpop.permute.xlu1 %3102  ;;  %v3676_v27 = vpack.c.bf16 %v3645_v33, %v3644_v35 }
 0x2f6   : > { %v3497_v54 = vpop.f32.mrf.mxu1 }
 0x2f7   : > { %4556 = vmatmul.msk.bf16.vlgmr.msra.gmra.mxu2 %vm3145_vm10, %v3676_v27  ;;  %v3578_v5 = vmul.f32 %v5919_v57, %v3497_v54 }
 0x2f9   : > { %4549 = vmatmul.msk.bf16.gmra.mxu1 %vm3447_vm1, %v3395_v11  ;;  %v3614_v12 = vadd.f32 %v5929_v40, %v3578_v5 }
 0x2fa   : > { %v3058_v43 = vpop.permute.xlu0 %3057 }
 0x2fb   : > { %v3337_v45 = vsel %vm3309_vm13, %v3304_v37, %v3058_v43  ;;  %v3646_v28 = vmax.f32 %v3614_v12, 0.0  ;;  %v3142_v26 = vpop.permute.xlu2 %3141  ;;  %v3368_v12 = vsel %vm3342_vm14, %v3335_v46, %v5934_v50 }
 0x2fc   : > { %v3370_v18 = vsel %vm3342_vm14, %v3337_v45, %v3105_v25  ;;  %v3401_v45 = vsel %vm3375_vm15, %v3368_v12, %v5911_v9  ;;  %v4624_v12 = vld [vmem:[%s4788_s23 + $0x18] sm:$0xf] }
 0x2fd   : > { %v2941_v49 = vpop.permute.xlu1 %2940 }
 0x2fe   : > { %v3499_v58 = vpop.f32.mrf.mxu1  ;;  %v3241_v63 = vsel %vm3211_vm11, %v3208_v19, %v2941_v49 }
 0x2ff   : > { %v3579_v21 = vmul.f32 %v5919_v57, %v3499_v58  ;;  %v3273_v36 = vsel %vm1341_vm4, %v3241_v63, %v2988_v22 }
 0x301   : > { %v3615_v11 = vadd.f32 %v5929_v40, %v3579_v21 }
 0x302   : > { %v3023_v6 = vpop.permute.xlu0 %3022 }
 0x303   : > { %v3647_v56 = vmax.f32 %v3615_v11, 0.0  ;;  %v3306_v24 = vsel %vm3276_vm12, %v3273_v36, %v3023_v6  ;;  %v2943_v48 = vpop.permute.xlu2 %2942 }
 0x305   : > { %v3140_v34 = vpop.permute.xlu1 %3139  ;;  %v3677_v1 = vpack.c.bf16 %v3647_v56, %v3646_v28 }
 0x306   : > { %v3403_v59 = vsel %vm3375_vm15, %v3370_v18, %v3140_v34  ;;  %v3502_v47 = vpop.f32.mrf.mxu1 }
 0x307   : > { %4553 = vmatmul.msk.bf16.vlgmr.msrb.gmra.mxu3 %vm3447_vm1, %v3403_v59  ;;  %4557 = vmatmul.msk.bf16.gmra.mxu2 %vm3145_vm10, %v3677_v1  ;;  %v3580_v0 = vmul.f32 %v5919_v57, %v3502_v47 }
 0x309   : > { %4550 = vmatmul.msk.bf16.gmra.mxu1 %vm3447_vm1, %v5889_v29  ;;  %v3616_v2 = vadd.f32 %v5929_v40, %v3580_v0 }
 0x30a   : > { %v2825_v38 = vpop.permute.xlu0 %2824 }
 0x30b   : > { %v3648_v52 = vmax.f32 %v3616_v2, 0.0  ;;  %v3177_v13 = vsel %vm3145_vm10, %v5625_v23, %v2825_v38  ;;  %v3062_v53 = vpop.permute.xlu2 %3061 }
 0x30d   : > { %v3060_v62 = vpop.permute.xlu1 %3059 }
 0x30e   : > { %v3504_v8 = vpop.f32.mrf.mxu1  ;;  %v3339_v4 = vsel %vm3309_vm13, %v3306_v24, %v3060_v62 }
 0x30f   : > { %v3581_v17 = vmul.f32 %v5919_v57, %v3504_v8 }
 0x311   : > { %v3617_v10 = vadd.f32 %v5929_v40, %v3581_v17 }
 0x312   : > { %v3107_v29 = vpop.permute.xlu0 %3106 }
 0x313   : > { %v3372_v51 = vsel %vm3342_vm14, %v3339_v4, %v3107_v29  ;;  %v3649_v20 = vmax.f32 %v3617_v10, 0.0 }
 0x314   : > { %v3405_v55 = vsel %vm3375_vm15, %v3372_v51, %v3142_v26 }
 0x315   : > { %v2906_v16 = vpop.permute.xlu1 %2905  ;;  %v3678_v60 = vpack.c.bf16 %v3649_v20, %v3648_v52 }
 0x316   : > { %v3507_v15 = vpop.f32.mrf.mxu1  ;;  %v3210_v30 = vsel %vm3178_vm9, %v3177_v13, %v2906_v16 }
 0x317   : > { %4554 = vmatmul.msk.bf16.gmra.mxu3 %vm3447_vm1, %v3405_v55  ;;  %4558 = vmatmul.msk.bf16.gmra.mxu2 %vm3145_vm10, %v3678_v60  ;;  %v3582_v44 = vmul.f32 %v5919_v57, %v3507_v15  ;;  %v3243_v41 = vsel %vm3211_vm11, %v3210_v30, %v2943_v48  ;;  %v4622_v48 = vld [vmem:[%s4788_s23 + $0xc] sm:$0xf] }
 0x318   : > { %v3839_v13 = vshll.u32 %v4622_v48, 16 }
 0x319   : > { %4551 = vmatmul.msk.bf16.gmra.mxu1 %vm3447_vm1, %v5908_v39  ;;  %v3618_v27 = vadd.f32 %v5929_v40, %v3582_v44 }
 0x31a   : > { %v2990_v32 = vpop.permute.xlu0 %2989 }
 0x31b   : > { %v3275_v35 = vsel %vm1341_vm4, %v3243_v41, %v2990_v32  ;;  %v3650_v7 = vmax.f32 %v3618_v27, 0.0  ;;  %v3836_v32 = vshrl.u32 %v4622_v48, 16  ;;  %vm6022_vm4 = vmor %vm3833_vm2, %vm3834_vm3 }
 0x31d   : > { %v3025_v3 = vpop.permute.xlu1 %3024  ;;  %v3838_v44 = vrot.slane %v3836_v32, 4  ;;  %v4627_v32 = vld [vmem:[%s4788_s23 + $0x20] sm:$0x1] }
 0x31e   : > { %v3509_v33 = vpop.f32.mrf.mxu1  ;;  %v3308_v54 = vsel %vm3276_vm12, %v3275_v35, %v3025_v3  ;;  %v3841_v3 = vrot.slane %v3839_v13, 5  ;;  %v4623_v35 = vld [vmem:[%s4788_s23 + $0x10] sm:$0xf]  ;;  %v3874_v13 = vshll.u32 %v4627_v32, 16 }
 0x31f   : > { %v3583_v23 = vmul.f32 %v5919_v57, %v3509_v33  ;;  %v3341_v25 = vsel %vm3309_vm13, %v3308_v54, %v3062_v53  ;;  %v3844_v33 = vshll.u32 %v4623_v35, 16 }
 0x320   : > { %v3842_v53 = vor.u32 %v3841_v3, %v3838_v44 }
 0x321   : > { %v3619_v39 = vadd.f32 %v5929_v40, %v3583_v23  ;;  %v3848_v23 = vshrl.u32 %v4623_v35, 16 }
 0x322   : > { %v3109_v43 = vpop.permute.xlu0 %3108 }
 0x323   : > { %v3651_v31 = vmax.f32 %v3619_v39, 0.0  ;;  %v3374_v5 = vsel %vm3342_vm14, %v3341_v25, %v3109_v43  ;;  %v3846_v39 = vrot.slane %v3844_v33, 5 }
 0x325   : > { %v3144_v49 = vpop.permute.xlu1 %3143  ;;  %v3679_v37 = vpack.c.bf16 %v3651_v31, %v3650_v7  ;;  %v3843_v31 = vrot.slane %v3842_v53, 4 }
 0x326   : > { %v3407_v58 = vsel %vm3375_vm15, %v3374_v5, %v3144_v49  ;;  %v3512_v21 = vpop.f32.mrf.mxu1  ;;  %v3850_v5 = vrot.slane %v3848_v23, 4 }
 0x327   : > { %4555 = vmatmul.msk.bf16.gmra.mxu3 %vm3447_vm1, %v3407_v58  ;;  %4559 = vmatmul.msk.bf16.gmra.mxu2 %vm3145_vm10, %v3679_v37  ;;  %v3584_v6 = vmul.f32 %v5919_v57, %v3512_v21  ;;  %v3857_v37 = vshrl.u32 %v4624_v12, 16  ;;  %v3860_v21 = vshll.u32 %v4624_v12, 16 }
 0x329   : > { %4552 = vmatmul.msk.bf16.gmra.mxu1 %vm3447_vm1, %v3401_v45  ;;  %v3620_v42 = vadd.f32 %v5929_v40, %v3584_v6  ;;  %v3847_v45 = vsel %vm6022_vm4, %v3843_v31, %v3846_v39  ;;  %v6033_v6 = vld [vmem:[%s6334_s8] ss:$0 sm:$0xff] }
 0x32b   : > { %v3652_v22 = vmax.f32 %v3620_v42, 0.0  ;;  %v4625_v42 = vld [vmem:[%s4788_s23 + $0x14] sm:$0x1] }
 0x32e   : > { %v3514_v11 = vpop.f32.mrf.mxu1 }
 0x32f   : > { %v3585_v61 = vmul.f32 %v5919_v57, %v3514_v11  ;;  %v3851_v11 = vor.u32 %v3850_v5, %v3846_v39 }
 0x331   : > { %v3621_v50 = vadd.f32 %v5929_v40, %v3585_v61  ;;  %v3853_v61 = vshll.u32 %v4625_v42, 16 }
 0x333   : > { %v3653_v28 = vmax.f32 %v3621_v50, 0.0  ;;  %v6039_v50 = vld [vmem:[%s6335_s9] ss:$0 sm:$0xff] }
 0x335   : > { %v3680_v56 = vpack.c.bf16 %v3653_v28, %v3652_v22  ;;  %v4204_v28 = vunpack.c.l.bf16 %v3847_v45 }
 0x336   : > { %v3517_v34 = vpop.f32.mrf.mxu1 }
 0x337   : > { %4560 = vmatmul.msk.bf16.gmra.mxu2 %vm3145_vm10, %v3680_v56  ;;  %v3586_v18 = vmul.f32 %v5919_v57, %v3517_v34  ;;  %v3859_v56 = vrot.slane %v3857_v37, 4  ;;  %v3862_v34 = vrot.slane %v3860_v21, 5  ;;  %v4629_v21 = vld [vmem:[%s4788_s23 + $0x28] sm:$0xf] }
 0x338   : > { %v3886_v45 = vshll.u32 %v4629_v21, 16 }
 0x339   : > { %v3622_v59 = vadd.f32 %v5929_v40, %v3586_v18 }
 0x33b   : > { %v3654_v38 = vmax.f32 %v3622_v59, 0.0  ;;  %v3852_v59 = vrot.slane %v3851_v11, 4  ;;  %v3890_v11 = vshrl.u32 %v4629_v21, 16 }
 0x33e   : > { %v3519_v9 = vpop.f32.mrf.mxu1 }
 0x33f   : > { %v3587_v1 = vmul.f32 %v5919_v57, %v3519_v9 }
 0x341   : > { %v3623_v47 = vadd.f32 %v5929_v40, %v3587_v1  ;;  %v3855_v1 = vrot.slane %v3853_v61, 5 }
 0x343   : > { %v3655_v14 = vmax.f32 %v3623_v47, 0.0 }
 0x345   : > { %v3681_v19 = vpack.c.bf16 %v3655_v14, %v3654_v38  ;;  %v3863_v14 = vor.u32 %v3862_v34, %v3859_v56 }
 0x346   : > { %v3522_v63 = vpop.f32.mrf.mxu1 }
 0x347   : > { %4561 = vmatmul.msk.bf16.gmra.mxu2 %vm3145_vm10, %v3681_v19  ;;  %v3588_v0 = vmul.f32 %v5919_v57, %v3522_v63  ;;  %v4626_v19 = vld [vmem:[%s4788_s23 + $0x1c] sm:$0xf] }
 0x348   : > { %v3865_v63 = vshll.u32 %v4626_v19, 16 }
 0x349   : > { %v3624_v26 = vadd.f32 %v5929_v40, %v3588_v0  ;;  %v3869_v0 = vshrl.u32 %v4626_v19, 16 }
 0x34b   : > { %v3656_v24 = vmax.f32 %v3624_v26, 0.0 }
 0x34e   : > { %v3524_v62 = vpop.f32.mrf.mxu1 }
 0x34f   : > { %v3589_v36 = vmul.f32 %v5919_v57, %v3524_v62 }
 0x351   : > { %v3625_v8 = vadd.f32 %v5929_v40, %v3589_v36 }
 0x353   : > { %v3657_v2 = vmax.f32 %v3625_v8, 0.0  ;;  %v3856_v8 = vsel %vm6022_vm4, %v3852_v59, %v3855_v1 }
 0x355   : > { %v3682_v17 = vpack.c.bf16 %v3657_v2, %v3656_v24 }
 0x356   : > { %v3527_v4 = vpop.f32.mrf.mxu1 }
 0x357   : > { %4562 = vmatmul.msk.bf16.gmra.mxu2 %vm3145_vm10, %v3682_v17  ;;  %v3590_v29 = vmul.f32 %v5919_v57, %v3527_v4  ;;  %v4205_v4 = vunpack.c.l.bf16 %v3856_v8 }
 0x359   : > { %v3626_v51 = vadd.f32 %v5929_v40, %v3590_v29  ;;  %v3864_v29 = vrot.slane %v3863_v14, 4 }
 0x35b   : > { %v3658_v16 = vmax.f32 %v3626_v51, 0.0  ;;  %v3871_v51 = vrot.slane %v3869_v0, 4 }
 0x35e   : > { %v3529_v10 = vpop.f32.mrf.mxu1 }
 0x35f   : > { %v3591_v52 = vmul.f32 %v5919_v57, %v3529_v10  ;;  %v3867_v10 = vrot.slane %v3865_v63, 5 }
 0x361   : > { %v3627_v20 = vadd.f32 %v5929_v40, %v3591_v52  ;;  %v3868_v35 = vsel %vm6022_vm4, %v3864_v29, %v3867_v10  ;;  %v3872_v33 = vor.u32 %v3871_v51, %v3867_v10  ;;  %v4631_v10 = vld [vmem:[%s4788_s23 + $0x30] sm:$0xf] }
 0x362   : > { %v4206_v23 = vunpack.c.l.bf16 %v3868_v35  ;;  %v3899_v51 = vshrl.u32 %v4631_v10, 16 }
 0x363   : > { %v3659_v55 = vmax.f32 %v3627_v20, 0.0 }
 0x365   : > { %v3683_v60 = vpack.c.bf16 %v3659_v55, %v3658_v16 }
 0x366   : > { %v3532_v15 = vpop.f32.mrf.mxu1 }
 0x367   : > { %4563 = vmatmul.msk.bf16.gmra.mxu2 %vm3145_vm10, %v3683_v60  ;;  %v3592_v30 = vmul.f32 %v5919_v57, %v3532_v15 }
 0x369   : > { %v3628_v27 = vadd.f32 %v5929_v40, %v3592_v30  ;;  %v4628_v30 = vld [vmem:[%s4788_s23 + $0x24] sm:$0xf] }
 0x36a   : > { %v3878_v44 = vshrl.u32 %v4628_v30, 16  ;;  %v3881_v3 = vshll.u32 %v4628_v30, 16  ;;  %v3901_v30 = vrot.slane %v3899_v51, 4 }
 0x36b   : > { %v3660_v25 = vmax.f32 %v3628_v27, 0.0 }
 0x36c   : > { %v3880_v39 = vrot.slane %v3878_v44, 4 }
 0x36e   : > { %v3534_v41 = vpop.f32.mrf.mxu1 }
 0x36f   : > { %v3593_v54 = vmul.f32 %v5919_v57, %v3534_v41 }
 0x371   : > { %v3629_v43 = vadd.f32 %v5929_v40, %v3593_v54 }
 0x373   : > { %v3661_v7 = vmax.f32 %v3629_v43, 0.0  ;;  %v3876_v43 = vrot.slane %v3874_v13, 5 }
 0x375   : > { %v3684_v46 = vpack.c.bf16 %v3661_v7, %v3660_v25  ;;  %v3883_v25 = vrot.slane %v3881_v3, 5  ;;  %v4632_v3 = vld [vmem:[%s4788_s23 + $0x34] sm:$0xf] }
 0x376   : > { %v3537_v58 = vpop.f32.mrf.mxu1 }
 0x377   : > { %4564 = vmatmul.msk.bf16.gmra.mxu2 %vm3145_vm10, %v3684_v46  ;;  %v3594_v18 = vmul.f32 %v5919_v57, %v3537_v58  ;;  %v3873_v46 = vrot.slane %v3872_v33, 4  ;;  %v3884_v37 = vor.u32 %v3883_v25, %v3880_v39 }
 0x379   : > { %v3630_v62 = vadd.f32 %v5929_v40, %v3594_v18  ;;  %v3885_v1 = vrot.slane %v3884_v37, 4 }
 0x37a   : > { %v3753_v22 = vpop.f32.mrf.mxu2 }
 0x37b   : > { %v4240_v9 = vmul.f32 %v6033_v6, %v3753_v22  ;;  %v3662_v52 = vmax.f32 %v3630_v62, 0.0 }
 0x37d   : > { %v4276_v47 = vadd.f32 %v6039_v50, %v4240_v9 }
 0x37e   : > { %v3539_v38 = vpop.f32.mrf.mxu1 }
 0x37f   : > { %v4308_v26 = vadd.f32 %v4276_v47, %v4204_v28  ;;  %v3595_v36 = vmul.f32 %v5919_v57, %v3539_v38  ;;  %v3877_v28 = vsel %vm6022_vm4, %v3873_v46, %v3876_v43  ;;  %v3888_v47 = vrot.slane %v3886_v45, 5 }
 0x380   : > { %v4207_v59 = vunpack.c.l.bf16 %v3877_v28  ;;  %v3892_v38 = vrot.slane %v3890_v11, 4 }
 0x381   : > { %v4340_v24 = vmax.f32 %v4308_v26, 0.0  ;;  %v3631_v2 = vadd.f32 %v5929_v40, %v3595_v36 }
 0x382   : > { %v3755_v17 = vpop.f32.mrf.mxu2 }
 0x383   : > { %v4372_v20 = vpack.c.bf16 %v4340_v24, %v4340_v24  ;;  %v3663_v16 = vmax.f32 %v3631_v2, 0.0  ;;  %v4241_v55 = vmul.f32 %v6033_v6, %v3755_v17  ;;  %v3889_v24 = vsel %vm6022_vm4, %v3885_v1, %v3888_v47  ;;  %v4630_v17 = vld [vmem:[%s4788_s23 + $0x2c] sm:$0x1] }
 0x384   : > { %v3893_v2 = vor.u32 %v3892_v38, %v3888_v47 }
 0x385   : > { %4405 = vst.msk [vmem:[%s6053_s27] sm:$0xf] %vm4404_vm5, %v4372_v20  ;;  %v4277_v60 = vadd.f32 %v6039_v50, %v4241_v55  ;;  %v3685_v15 = vpack.c.bf16 %v3663_v16, %v3662_v52  ;;  %v3902_v52 = vshll.u32 %v4631_v10, 16 }
 0x386   : > { %v3542_v48 = vpop.f32.mrf.mxu1  ;;  %v3894_v32 = vrot.slane %v3893_v2, 4 }
 0x387   : > { %v4309_v41 = vadd.f32 %v4277_v60, %v4205_v4  ;;  %4565 = vmatmul.msk.bf16.gmra.mxu2 %vm3145_vm10, %v3685_v15  ;;  %v3596_v31 = vmul.f32 %v5919_v57, %v3542_v48  ;;  %v3895_v4 = vshll.u32 %v4630_v17, 16  ;;  %v4208_v60 = vunpack.c.l.bf16 %v3889_v24 }
 0x388   : > { %v3904_v44 = vrot.slane %v3902_v52, 5 }
 0x389   : > { %v4341_v54 = vmax.f32 %v4309_v41, 0.0  ;;  %v3632_v42 = vadd.f32 %v5929_v40, %v3596_v31  ;;  %v3897_v13 = vrot.slane %v3895_v4, 5  ;;  %v3911_v41 = vshrl.u32 %v4632_v3, 16 }
 0x38a   : > { %v6064_v27 = vpop.f32.mrf.mxu3  ;;  %v3758_v53 = vpop.f32.mrf.mxu2  ;;  %v3905_v31 = vor.u32 %v3904_v44, %v3901_v30 }
 0x38b   : > { %v4373_v7 = vpack.c.bf16 %v4341_v54, %v4341_v54  ;;  %v4242_v5 = vmul.f32 %v6033_v6, %v3758_v53  ;;  %v3664_v14 = vmax.f32 %v3632_v42, 0.0  ;;  %v3898_v25 = vsel %vm6022_vm4, %v3894_v32, %v3897_v13 }
 0x38c   : > { %v4209_v11 = vunpack.c.l.bf16 %v3898_v25 }
 0x38d   : > { %4406 = vst.msk [vmem:[%s6053_s27 + $0x4] sm:$0xf] %vm4404_vm5, %v4373_v7  ;;  %v4278_v58 = vadd.f32 %v6039_v50, %v4242_v5  ;;  %v3913_v5 = vrot.slane %v3911_v41, 4 }
 0x38e   : > { %v3544_v12 = vpop.f32.mrf.mxu1 }
 0x38f   : > { %v4310_v61 = vadd.f32 %v4278_v58, %v4206_v23  ;;  %v3597_v22 = vmul.f32 %v5919_v57, %v3544_v12  ;;  %v3907_v23 = vshll.u32 %v4632_v3, 16  ;;  %v4635_v3 = vld [vmem:[%s4788_s23 + $0x40] sm:$0xf] }
 0x390   : > { %v3928_v41 = vshll.u32 %v4635_v3, 16 }
 0x391   : > { %v4342_v34 = vmax.f32 %v4310_v61, 0.0  ;;  %v3633_v18 = vadd.f32 %v5929_v40, %v3597_v22  ;;  %v3909_v42 = vrot.slane %v3907_v23, 5 }
 0x392   : > { %v6076_v56 = vpop.f32.mrf.mxu3  ;;  %v3760_v9 = vpop.f32.mrf.mxu2 }
 0x393   : > { %v4374_v19 = vpack.c.bf16 %v4342_v34, %v4342_v34  ;;  %v3665_v63 = vmax.f32 %v3633_v18, 0.0  ;;  %v4243_v0 = vmul.f32 %v6033_v6, %v3760_v9  ;;  %v3906_v18 = vrot.slane %v3905_v31, 4 }
 0x394   : > { %v3914_v9 = vor.u32 %v3913_v5, %v3909_v42 }
 0x395   : > { %4407 = vst.msk [vmem:[%s6053_s27 + $0x8] sm:$0xf] %vm4404_vm5, %v4374_v19  ;;  %v4279_v62 = vadd.f32 %v6039_v50, %v4243_v0  ;;  %v3686_v26 = vpack.c.bf16 %v3665_v63, %v3664_v14  ;;  %v4634_v0 = vld [vmem:[%s4788_s23 + $0x3c] sm:$0xf]  ;;  %v3910_v2 = vsel %vm6022_vm4, %v3906_v18, %v3909_v42 }
 0x396   : > { %v3547_v36 = vpop.f32.mrf.mxu1  ;;  %v3915_v4 = vrot.slane %v3914_v9, 4  ;;  %v4636_v9 = vld [vmem:[%s4788_s23 + $0x44] sm:$0x1] }
 0x397   : > { %v4311_v8 = vadd.f32 %v4279_v62, %v4207_v59  ;;  %4566 = vmatmul.msk.bf16.gmra.mxu2 %vm3145_vm10, %v3686_v26  ;;  %v3598_v16 = vmul.f32 %v5919_v57, %v3547_v36  ;;  %v4633_v59 = vld [vmem:[%s4788_s23 + $0x38] sm:$0x1]  ;;  %v3920_v62 = vshrl.u32 %v4634_v0, 16  ;;  %v3923_v26 = vshll.u32 %v4634_v0, 16 }
 0x398   : > { %v3916_v1 = vshll.u32 %v4633_v59, 16  ;;  %v3937_v59 = vshll.u32 %v4636_v9, 16 }
 0x399   : > { %v4343_v20 = vmax.f32 %v4311_v8, 0.0  ;;  %v3634_v54 = vadd.f32 %v5929_v40, %v3598_v16  ;;  %v3922_v52 = vrot.slane %v3920_v62, 4  ;;  %v3602_v62 = vmul.f32 %v5919_v57, %v6064_v27 }
 0x39a   : > { %v3562_v29 = vpop.f32.mrf.mxu3  ;;  %v3763_v55 = vpop.f32.mrf.mxu2 }
 0x39b   : > { %v4375_v15 = vpack.c.bf16 %v4343_v20, %v4343_v20  ;;  %v4244_v48 = vmul.f32 %v6033_v6, %v3763_v55  ;;  %v3604_v35 = vmul.f32 %v5919_v57, %v3562_v29  ;;  %v3666_v21 = vmax.f32 %v3634_v54, 0.0 }
 0x39c   : > { %v3918_v29 = vrot.slane %v3916_v1, 5  ;;  %v3925_v20 = vrot.slane %v3923_v26, 5  ;;  %v4210_v55 = vunpack.c.l.bf16 %v3910_v2 }
 0x39d   : > { %4408 = vst.msk [vmem:[%s6053_s27 + $0xc] sm:$0xf] %vm4404_vm5, %v4375_v15  ;;  %v4280_v33 = vadd.f32 %v6039_v50, %v4244_v48  ;;  %v3640_v46 = vadd.f32 %v5929_v40, %v3604_v35  ;;  %v3932_v35 = vshrl.u32 %v4635_v3, 16 }
 0x39e   : > { %v3549_v53 = vpop.f32.mrf.mxu1  ;;  %v3919_v32 = vsel %vm6022_vm4, %v3915_v4, %v3918_v29  ;;  %v3926_v44 = vor.u32 %v3925_v20, %v3922_v52  ;;  %v4638_v52 = vld [vmem:[%s4788_s23 + $0x4c] sm:$0xf] }
 0x39f   : > { %v4312_v43 = vadd.f32 %v4280_v33, %v4208_v60  ;;  %v3599_v39 = vmul.f32 %v5919_v57, %v3549_v53  ;;  %v3672_v47 = vmax.f32 %v3640_v46, 0.0  ;;  %v4211_v23 = vunpack.c.l.bf16 %v3919_v32 }
 0x3a0   : > { %v3927_v46 = vrot.slane %v3926_v44, 4  ;;  %v3953_v20 = vshrl.u32 %v4638_v52, 16 }
 0x3a1   : > { %v4344_v58 = vmax.f32 %v4312_v43, 0.0  ;;  %v3635_v12 = vadd.f32 %v5929_v40, %v3599_v39 }
 0x3a2   : > { %v3564_v7 = vpop.f32.mrf.mxu3  ;;  %v3765_v45 = vpop.f32.mrf.mxu2 }
 0x3a3   : > { %v3605_v37 = vmul.f32 %v5919_v57, %v3564_v7  ;;  %v4376_v61 = vpack.c.bf16 %v4344_v58, %v4344_v58  ;;  %v3667_v22 = vmax.f32 %v3635_v12, 0.0  ;;  %v4245_v34 = vmul.f32 %v6033_v6, %v3765_v45 }
 0x3a4   : > { %v3930_v58 = vrot.slane %v3928_v41, 5  ;;  %v3934_v12 = vrot.slane %v3932_v35, 4 }
 0x3a5   : > { %v3641_v28 = vadd.f32 %v5929_v40, %v3605_v37  ;;  %4409 = vst.msk [vmem:[%s6053_s27 + $0x10] sm:$0xf] %vm4404_vm5, %v4376_v61  ;;  %v4281_v14 = vadd.f32 %v6039_v50, %v4245_v34  ;;  %v3687_v19 = vpack.c.bf16 %v3667_v22, %v3666_v21 }
 0x3a6   : > { %v3552_v63 = vpop.f32.mrf.mxu1  ;;  %v3931_v34 = vsel %vm6022_vm4, %v3927_v46, %v3930_v58  ;;  %v3935_v18 = vor.u32 %v3934_v12, %v3930_v58 }
 0x3a7   : > { %v3673_v38 = vmax.f32 %v3641_v28, 0.0  ;;  %v4313_v8 = vadd.f32 %v4281_v14, %v4209_v11  ;;  %4567 = vmatmul.msk.bf16.gmra.mxu2 %vm3145_vm10, %v3687_v19  ;;  %v3600_v10 = vmul.f32 %v5919_v57, %v3552_v63  ;;  %v3603_v63 = vmul.f32 %v5919_v57, %v6076_v56 }
 0x3a9   : > { %v3690_v36 = vpack.c.bf16 %v3673_v38, %v3672_v47  ;;  %v4345_v17 = vmax.f32 %v4313_v8, 0.0  ;;  %v3636_v13 = vadd.f32 %v5929_v40, %v3600_v10  ;;  %v4637_v38 = vld [vmem:[%s4788_s23 + $0x48] sm:$0xf]  ;;  %v3936_v8 = vrot.slane %v3935_v18, 4 }
 0x3aa   : > { %v3567_v24 = vpop.f32.mrf.mxu3  ;;  %v3768_v51 = vpop.f32.mrf.mxu2  ;;  %v3941_v14 = vshrl.u32 %v4637_v38, 16  ;;  %v3944_v19 = vshll.u32 %v4637_v38, 16  ;;  %v3639_v10 = vadd.f32 %v5929_v40, %v3603_v63 }
 0x3ab   : > { %4570 = vmatmul.msk.bf16.vlgmr.msra.gmra.mxu3 %vm3145_vm10, %v3690_v36  ;;  %v4377_v16 = vpack.c.bf16 %v4345_v17, %v4345_v17  ;;  %v4246_v60 = vmul.f32 %v6033_v6, %v3768_v51  ;;  %v3606_v15 = vmul.f32 %v5919_v57, %v3567_v24  ;;  %v3668_v31 = vmax.f32 %v3636_v13, 0.0 }
 0x3ac   : > { %v4212_v36 = vunpack.c.l.bf16 %v3931_v34  ;;  %v3939_v24 = vrot.slane %v3937_v59, 5  ;;  %v3943_v4 = vrot.slane %v3941_v14, 4  ;;  %v3946_v29 = vrot.slane %v3944_v19, 5 }
 0x3ad   : > { %4410 = vst.msk [vmem:[%s6053_s27 + $0x14] sm:$0xf] %vm4404_vm5, %v4377_v16  ;;  %v4282_v48 = vadd.f32 %v6039_v50, %v4246_v60  ;;  %v3642_v43 = vadd.f32 %v5929_v40, %v3606_v15  ;;  %v3638_v51 = vadd.f32 %v5929_v40, %v3602_v62  ;;  %v3671_v60 = vmax.f32 %v3639_v10, 0.0 }
 0x3ae   : > { %v3554_v30 = vpop.f32.mrf.mxu1  ;;  %v3940_v27 = vsel %vm6022_vm4, %v3936_v8, %v3939_v24  ;;  %v3947_v16 = vor.u32 %v3946_v29, %v3943_v4  ;;  %v4642_v8 = vld [vmem:[%s4788_s23 + $0x5c] sm:$0x1]  ;;  %v4643_v4 = vld [vmem:[%s4788_s23 + $0x60] sm:$0xf] }
 0x3af   : > { %v4314_v33 = vadd.f32 %v4282_v48, %v4210_v55  ;;  %v3601_v54 = vmul.f32 %v5919_v57, %v3554_v30  ;;  %v3674_v42 = vmax.f32 %v3642_v43, 0.0  ;;  %v3949_v55 = vshll.u32 %v4638_v52, 16 }
 0x3b0   : > { %v3670_v48 = vmax.f32 %v3638_v51, 0.0  ;;  %v4213_v13 = vunpack.c.l.bf16 %v3940_v27  ;;  %v3955_v30 = vrot.slane %v3953_v20, 4  ;;  %v3948_v3 = vrot.slane %v3947_v16, 4 }
 0x3b1   : > { %v4346_v39 = vmax.f32 %v4314_v33, 0.0  ;;  %v3637_v25 = vadd.f32 %v5929_v40, %v3601_v54  ;;  %v3951_v41 = vrot.slane %v3949_v55, 5  ;;  %v3979_v24 = vshll.u32 %v4642_v8, 16 }
 0x3b2   : > { %v3569_v53 = vpop.f32.mrf.mxu3  ;;  %v3770_v5 = vpop.f32.mrf.mxu2  ;;  %v3689_v35 = vpack.c.bf16 %v3671_v60, %v3670_v48  ;;  %v3983_v29 = vshrl.u32 %v4643_v4, 16  ;;  %v3986_v10 = vshll.u32 %v4643_v4, 16  ;;  %v4644_v48 = vld [vmem:[%s4788_s23 + $0x64] sm:$0xf] }
 0x3b3   : > { %v3607_v7 = vmul.f32 %v5919_v57, %v3569_v53  ;;  %v4378_v37 = vpack.c.bf16 %v4346_v39, %v4346_v39  ;;  %v3669_v21 = vmax.f32 %v3637_v25, 0.0  ;;  %v4247_v11 = vmul.f32 %v6033_v6, %v3770_v5  ;;  %v4639_v53 = vld [vmem:[%s4788_s23 + $0x50] sm:$0x1]  ;;  %v4640_v25 = vld [vmem:[%s4788_s23 + $0x54] sm:$0xf] }
 0x3b4   : > { %v3956_v54 = vor.u32 %v3955_v30, %v3951_v41  ;;  %v3952_v39 = vsel %vm6022_vm4, %v3948_v3, %v3951_v41  ;;  %v3985_v55 = vrot.slane %v3983_v29, 4  ;;  %v3988_v60 = vrot.slane %v3986_v10, 5  ;;  %v4648_v29 = vld [vmem:[%s4788_s23 + $0x74] sm:$0x1] }
 0x3b5   : > { %v3643_v45 = vadd.f32 %v5929_v40, %v3607_v7  ;;  %4411 = vst.msk [vmem:[%s6053_s27 + $0x18] sm:$0xf] %vm4404_vm5, %v4378_v37  ;;  %v3688_v61 = vpack.c.bf16 %v3669_v21, %v3668_v31  ;;  %v4283_v28 = vadd.f32 %v6039_v50, %v4247_v11  ;;  %v3962_v7 = vshrl.u32 %v4640_v25, 16 }
 0x3b6   : > { %v3965_v31 = vshll.u32 %v4640_v25, 16  ;;  %v4214_v58 = vunpack.c.l.bf16 %v3952_v39  ;;  %v3957_v12 = vrot.slane %v3956_v54, 4  ;;  %v4021_v10 = vshll.u32 %v4648_v29, 16 }
 0x3b7   : > { %v3675_v22 = vmax.f32 %v3643_v45, 0.0  ;;  %v4315_v1 = vadd.f32 %v4283_v28, %v4211_v23  ;;  %4568 = vmatmul.msk.bf16.gmra.mxu2 %vm3145_vm10, %v3688_v61  ;;  %v3958_v23 = vshll.u32 %v4639_v53, 16  ;;  %v3964_v11 = vrot.slane %v3962_v7, 4  ;;  %v4645_v7 = vld [vmem:[%s4788_s23 + $0x68] sm:$0x1] }
 0x3b9   : > { %v3691_v47 = vpack.c.bf16 %v3675_v22, %v3674_v42  ;;  %v4347_v0 = vmax.f32 %v4315_v1, 0.0  ;;  %v3960_v37 = vrot.slane %v3958_v23, 5  ;;  %v3967_v42 = vrot.slane %v3965_v31, 5  ;;  %v4641_v22 = vld [vmem:[%s4788_s23 + $0x58] sm:$0xf] }
 0x3ba   : > { %v3773_v26 = vpop.f32.mrf.mxu2  ;;  %v3974_v28 = vshrl.u32 %v4641_v22, 16  ;;  %v3970_v59 = vshll.u32 %v4641_v22, 16  ;;  %v4000_v31 = vshll.u32 %v4645_v7, 16 }
 0x3bb   : > { %4571 = vmatmul.msk.bf16.gmra.mxu3 %vm3145_vm10, %v3691_v47  ;;  %v4379_v2 = vpack.c.bf16 %v4347_v0, %v4347_v0  ;;  %v4248_v17 = vmul.f32 %v6033_v6, %v3773_v26  ;;  %v3961_v18 = vsel %vm6022_vm4, %v3957_v12, %v3960_v37  ;;  %v3968_v9 = vor.u32 %v3967_v42, %v3964_v11 }
 0x3bc   : > { %v4215_v38 = vunpack.c.l.bf16 %v3961_v18  ;;  %v3976_v14 = vrot.slane %v3974_v28, 4  ;;  %v3972_v62 = vrot.slane %v3970_v59, 5  ;;  %v4647_v59 = vld [vmem:[%s4788_s23 + $0x70] sm:$0xf] }
 0x3bd   : > { %4412 = vst.msk [vmem:[%s6053_s27 + $0x1c] sm:$0xf] %vm4404_vm5, %v4379_v2  ;;  %v4284_v56 = vadd.f32 %v6039_v50, %v4248_v17  ;;  %v3969_v0 = vrot.slane %v3968_v9, 4 }
 0x3bf   : > { %v4316_v57 = vadd.f32 %v4284_v56, %v4212_v36  ;;  %v3977_v36 = vor.u32 %v3976_v14, %v3972_v62  ;;  %v3973_v17 = vsel %vm6022_vm4, %v3969_v0, %v3972_v62 }
 0x3c0   : > { %v4216_v52 = vunpack.c.l.bf16 %v3973_v17 }
 0x3c1   : > { %v4348_v15 = vmax.f32 %v4316_v57, 0.0  ;;  %v3978_v20 = vrot.slane %v3977_v36, 4  ;;  %v3981_v57 = vrot.slane %v3979_v24, 5 }
 0x3c2   : > { %v3775_v32 = vpop.f32.mrf.mxu2 }
 0x3c3   : > { %v4380_v44 = vpack.c.bf16 %v4348_v15, %v4348_v15  ;;  %v4249_v40 = vmul.f32 %v6033_v6, %v3775_v32  ;;  %v3995_v32 = vshrl.u32 %v4644_v48, 16  ;;  %v3982_v30 = vsel %vm6022_vm4, %v3978_v20, %v3981_v57 }
 0x3c5   : > { %4413 = vst.msk [vmem:[%s6053_s27 + $0x20] sm:$0xf] %vm4404_vm5, %v4380_v44  ;;  %v4285_v33 = vadd.f32 %v6039_v50, %v4249_v40  ;;  %v3989_v44 = vor.u32 %v3988_v60, %v3985_v55  ;;  %v3991_v40 = vshll.u32 %v4644_v48, 16 }
 0x3c7   : > { %v4317_v43 = vadd.f32 %v4285_v33, %v4213_v13  ;;  %4569 = vmatmul.msk.bf16.gmra.mxu2 %vm3145_vm10, %v3689_v35  ;;  %v4217_v35 = vunpack.c.l.bf16 %v3982_v30  ;;  %v3997_v33 = vrot.slane %v3995_v32, 4  ;;  %v3990_v23 = vrot.slane %v3989_v44, 4 }
 0x3c9   : > { %v4349_v5 = vmax.f32 %v4317_v43, 0.0  ;;  %v3993_v43 = vrot.slane %v3991_v40, 5  ;;  %v4650_v40 = vld [vmem:[%s4788_s23 + $0x7c] sm:$0xf] }
 0x3ca   : > { %v3778_v46 = vpop.f32.mrf.mxu2 }
 0x3cb   : > { %v4381_v21 = vpack.c.bf16 %v4349_v5, %v4349_v5  ;;  %v4250_v45 = vmul.f32 %v6033_v6, %v3778_v46  ;;  %v3998_v25 = vor.u32 %v3997_v33, %v3993_v43  ;;  %v3994_v46 = vsel %vm6022_vm4, %v3990_v23, %v3993_v43 }
 0x3cc   : > { %v4218_v11 = vunpack.c.l.bf16 %v3994_v46 }
 0x3cd   : > { %4414 = vst.msk [vmem:[%s6053_s27 + $0x24] sm:$0xf] %vm4404_vm5, %v4381_v21  ;;  %v4286_v61 = vadd.f32 %v6039_v50, %v4250_v45  ;;  %v3999_v42 = vrot.slane %v3998_v25, 4 }
 0x3cf   : > { %v4318_v34 = vadd.f32 %v4286_v61, %v4214_v58  ;;  %v4646_v58 = vld [vmem:[%s4788_s23 + $0x6c] sm:$0xf]  ;;  %v4002_v61 = vrot.slane %v4000_v31, 5 }
 0x3d0   : > { %v4004_v12 = vshrl.u32 %v4646_v58, 16  ;;  %v4007_v37 = vshll.u32 %v4646_v58, 16 }
 0x3d1   : > { %v4350_v1 = vmax.f32 %v4318_v34, 0.0 }
 0x3d2   : > { %v3780_v47 = vpop.f32.mrf.mxu2  ;;  %v4006_v34 = vrot.slane %v4004_v12, 4  ;;  %v4009_v18 = vrot.slane %v4007_v37, 5  ;;  %v4651_v12 = vld [vmem:[%s4788_s23 + $0x80] sm:$0x1] }
 0x3d3   : > { %v4382_v19 = vpack.c.bf16 %v4350_v1, %v4350_v1  ;;  %v4251_v63 = vmul.f32 %v6033_v6, %v3780_v47  ;;  %v4016_v1 = vshrl.u32 %v4647_v59, 16  ;;  %v4042_v37 = vshll.u32 %v4651_v12, 16 }
 0x3d4   : > { %v4010_v14 = vor.u32 %v4009_v18, %v4006_v34 }
 0x3d5   : > { %4415 = vst.msk [vmem:[%s6053_s27 + $0x28] sm:$0xf] %vm4404_vm5, %v4382_v19  ;;  %v4287_v26 = vadd.f32 %v6039_v50, %v4251_v63  ;;  %v4012_v19 = vshll.u32 %v4647_v59, 16 }
 0x3d6   : > { %v4011_v24 = vrot.slane %v4010_v14, 4 }
 0x3d7   : > { %v4319_v2 = vadd.f32 %v4287_v26, %v4215_v38  ;;  %v4003_v38 = vsel %vm6022_vm4, %v3999_v42, %v4002_v61  ;;  %v4018_v26 = vrot.slane %v4016_v1, 4 }
 0x3d8   : > { %v4219_v62 = vunpack.c.l.bf16 %v4003_v38 }
 0x3d9   : > { %v4351_v56 = vmax.f32 %v4319_v2, 0.0  ;;  %v4014_v2 = vrot.slane %v4012_v19, 5 }
 0x3da   : > { %v3783_v51 = vpop.f32.mrf.mxu2 }
 0x3db   : > { %v4383_v27 = vpack.c.bf16 %v4351_v56, %v4351_v56  ;;  %v4252_v16 = vmul.f32 %v6033_v6, %v3783_v51  ;;  %v4019_v4 = vor.u32 %v4018_v26, %v4014_v2  ;;  %v4015_v51 = vsel %vm6022_vm4, %v4011_v24, %v4014_v2 }
 0x3dc   : > { %v4220_v55 = vunpack.c.l.bf16 %v4015_v51  ;;  %v4654_v51 = vld [vmem:[%s4788_s23 + $0x90] sm:$0xf] }
 0x3dd   : > { %4416 = vst.msk [vmem:[%s6053_s27 + $0x2c] sm:$0xf] %vm4404_vm5, %v4383_v27  ;;  %v4288_v15 = vadd.f32 %v6039_v50, %v4252_v16  ;;  %v4020_v60 = vrot.slane %v4019_v4, 4 }
 0x3df   : > { %v4320_v13 = vadd.f32 %v4288_v15, %v4216_v52  ;;  %v4649_v52 = vld [vmem:[%s4788_s23 + $0x78] sm:$0xf]  ;;  %v4023_v15 = vrot.slane %v4021_v10, 5 }
 0x3e0   : > { %v4025_v20 = vshrl.u32 %v4649_v52, 16  ;;  %v4028_v57 = vshll.u32 %v4649_v52, 16  ;;  %v4067_v52 = vshrl.u32 %v4654_v51, 16 }
 0x3e1   : > { %v4352_v3 = vmax.f32 %v4320_v13, 0.0 }
 0x3e2   : > { %v3785_v41 = vpop.f32.mrf.mxu2  ;;  %v4027_v13 = vrot.slane %v4025_v20, 4  ;;  %v4030_v30 = vrot.slane %v4028_v57, 5  ;;  %v4070_v20 = vshll.u32 %v4654_v51, 16 }
 0x3e3   : > { %v4384_v54 = vpack.c.bf16 %v4352_v3, %v4352_v3  ;;  %v4253_v53 = vmul.f32 %v6033_v6, %v3785_v41  ;;  %v4037_v3 = vshrl.u32 %v4650_v40, 16 }
 0x3e4   : > { %v4031_v33 = vor.u32 %v4030_v30, %v4027_v13  ;;  %v4656_v30 = vld [vmem:[%s4788_s23 + $0xb4] sm:$0xf] }
 0x3e5   : > { %4417 = vst.msk [vmem:[%s6053_s27 + $0x30] sm:$0xf] %vm4404_vm5, %v4384_v54  ;;  %v4289_v39 = vadd.f32 %v6039_v50, %v4253_v53  ;;  %v4033_v54 = vshll.u32 %v4650_v40, 16  ;;  %v4133_v40 = vshll.u32 %v4656_v30, 16 }
 0x3e6   : > { %v4032_v31 = vrot.slane %v4031_v33, 4 }
 0x3e7   : > { %v4321_v5 = vadd.f32 %v4289_v39, %v4217_v35  ;;  %v4024_v35 = vsel %vm6022_vm4, %v4020_v60, %v4023_v15  ;;  %v4039_v39 = vrot.slane %v4037_v3, 4  ;;  %v4655_v60 = vld [vmem:[%s4788_s23 + $0x8c] sm:$0x1] }
 0x3e8   : > { %v4221_v43 = vunpack.c.l.bf16 %v4024_v35  ;;  %v4063_v15 = vshll.u32 %v4655_v60, 16 }
 0x3e9   : > { %v4353_v21 = vmax.f32 %v4321_v5, 0.0  ;;  %v4035_v5 = vrot.slane %v4033_v54, 5 }
 0x3ea   : > { %v3788_v45 = vpop.f32.mrf.mxu2 }
 0x3eb   : > { %v4385_v22 = vpack.c.bf16 %v4353_v21, %v4353_v21  ;;  %v4254_v28 = vmul.f32 %v6033_v6, %v3788_v45  ;;  %v4040_v58 = vor.u32 %v4039_v39, %v4035_v5  ;;  %v4036_v45 = vsel %vm6022_vm4, %v4032_v31, %v4035_v5 }
 0x3ec   : > { %v4222_v34 = vunpack.c.l.bf16 %v4036_v45  ;;  %v4135_v31 = vrot.slane %v4133_v40, 5 }
 0x3ed   : > { %4418 = vst.msk [vmem:[%s6053_s27 + $0x34] sm:$0xf] %vm4404_vm5, %v4385_v22  ;;  %v4290_v9 = vadd.f32 %v6039_v50, %v4254_v28  ;;  %v4041_v18 = vrot.slane %v4040_v58, 4 }
 0x3ef   : > { %v4322_v47 = vadd.f32 %v4290_v9, %v4218_v11  ;;  %v4652_v11 = vld [vmem:[%s4788_s23 + $0x84] sm:$0xf]  ;;  %v4044_v9 = vrot.slane %v4042_v37, 5 }
 0x3f0   : > { %v4046_v42 = vshrl.u32 %v4652_v11, 16  ;;  %v4049_v61 = vshll.u32 %v4652_v11, 16  ;;  %v4658_v11 = vld [vmem:[%s4788_s23 + $0xb8] sm:$0xf] }
 0x3f1   : > { %v4354_v63 = vmax.f32 %v4322_v47, 0.0 }
 0x3f2   : > { %v3790_v0 = vpop.f32.mrf.mxu2  ;;  %v4048_v47 = vrot.slane %v4046_v42, 4  ;;  %v4051_v38 = vrot.slane %v4049_v61, 5  ;;  %v4138_v42 = vshll.u32 %v4658_v11, 16  ;;  %v4142_v61 = vshrl.u32 %v4658_v11, 16 }
 0x3f3   : > { %v4386_v36 = vpack.c.bf16 %v4354_v63, %v4354_v63  ;;  %v4255_v8 = vmul.f32 %v6033_v6, %v3790_v0  ;;  %v4045_v63 = vsel %vm6022_vm4, %v4041_v18, %v4044_v9 }
 0x3f4   : > { %v4052_v0 = vor.u32 %v4051_v38, %v4048_v47  ;;  %v4223_v2 = vunpack.c.l.bf16 %v4045_v63  ;;  %v4140_v38 = vrot.slane %v4138_v42, 5  ;;  %v4659_v63 = vld [vmem:[%s4788_s23 + $0x98] sm:$0x1] }
 0x3f5   : > { %4419 = vst.msk [vmem:[%s6053_s27 + $0x38] sm:$0xf] %vm4404_vm5, %v4386_v36  ;;  %v4291_v17 = vadd.f32 %v6039_v50, %v4255_v8 }
 0x3f6   : > { %v4053_v29 = vrot.slane %v4052_v0, 4  ;;  %v4084_v0 = vshll.u32 %v4659_v63, 16 }
 0x3f7   : > { %v4323_v56 = vadd.f32 %v4291_v17, %v4219_v62  ;;  %v4653_v62 = vld [vmem:[%s4788_s23 + $0x88] sm:$0xf] }
 0x3f8   : > { %v4054_v26 = vshll.u32 %v4653_v62, 16  ;;  %v4058_v36 = vshrl.u32 %v4653_v62, 16 }
 0x3f9   : > { %v4355_v27 = vmax.f32 %v4323_v56, 0.0 }
 0x3fa   : > { %v3793_v16 = vpop.f32.mrf.mxu2  ;;  %v4056_v10 = vrot.slane %v4054_v26, 5  ;;  %v4060_v56 = vrot.slane %v4058_v36, 4  ;;  %v4660_v26 = vld [vmem:[%s4788_s23 + $0x9c] sm:$0xf] }
 0x3fb   : > { %v4387_v48 = vpack.c.bf16 %v4355_v27, %v4355_v27  ;;  %v4256_v32 = vmul.f32 %v6033_v6, %v3793_v16  ;;  %v4088_v36 = vshrl.u32 %v4660_v26, 16 }
 0x3fc   : > { %v4057_v16 = vsel %vm6022_vm4, %v4053_v29, %v4056_v10  ;;  %v4661_v29 = vld [vmem:[%s4788_s23 + $0xbc] sm:$0x1] }
 0x3fd   : > { %4420 = vst.msk [vmem:[%s6053_s27 + $0x3c] sm:$0xf] %vm4404_vm5, %v4387_v48  ;;  %v4292_v44 = vadd.f32 %v6039_v50, %v4256_v32  ;;  %v4069_v48 = vrot.slane %v4067_v52, 4  ;;  %v4072_v32 = vrot.slane %v4070_v20, 5  ;;  %v4224_v35 = vunpack.c.l.bf16 %v4057_v16  ;;  %v4662_v20 = vld [vmem:[%s4788_s23 + $0xc0] sm:$0xf] }
 0x3fe   : > { %v4086_v52 = vrot.slane %v4084_v0, 5  ;;  %v4090_v60 = vrot.slane %v4088_v36, 4 }
 0x3ff   : > { %v4324_v41 = vadd.f32 %v4292_v44, %v4220_v55  ;;  %v4061_v55 = vor.u32 %v4060_v56, %v4056_v10  ;;  %v4130_v44 = vshrl.u32 %v4656_v30, 16  ;;  %v4147_v10 = vshll.u32 %v4661_v29, 16 }
 0x401   : > { %v4356_v53 = vmax.f32 %v4324_v41, 0.0  ;;  %v4062_v54 = vrot.slane %v4061_v55, 4  ;;  %v4149_v40 = vrot.slane %v4147_v10, 5 }
 0x402   : > { %v3795_v23 = vpop.f32.mrf.mxu2 }
 0x403   : > { %v4388_v25 = vpack.c.bf16 %v4356_v53, %v4356_v53  ;;  %v4257_v7 = vmul.f32 %v6033_v6, %v3795_v23  ;;  %v4065_v53 = vrot.slane %v4063_v15, 5  ;;  %v4073_v23 = vor.u32 %v4072_v32, %v4069_v48 }
 0x405   : > { %4421 = vst.msk [vmem:[%s6053_s27 + $0x40] sm:$0xf] %vm4404_vm5, %v4388_v25  ;;  %v4293_v46 = vadd.f32 %v6039_v50, %v4257_v7  ;;  %v4132_v7 = vrot.slane %v4130_v44, 4  ;;  %v4066_v58 = vsel %vm6022_vm4, %v4062_v54, %v4065_v53  ;;  %v4074_v12 = vrot.slane %v4073_v23, 4 }
 0x406   : > { %v4225_v18 = vunpack.c.l.bf16 %v4066_v58 }
 0x407   : > { %v4325_v21 = vadd.f32 %v4293_v46, %v4221_v43  ;;  %v4657_v43 = vld [vmem:[%s4788_s23 + $0x94] sm:$0xf]  ;;  %v4136_v45 = vor.u32 %v4135_v31, %v4132_v7 }
 0x408   : > { %v4075_v39 = vshll.u32 %v4657_v43, 16  ;;  %v4079_v5 = vshrl.u32 %v4657_v43, 16 }
 0x409   : > { %v4357_v22 = vmax.f32 %v4325_v21, 0.0  ;;  %v4137_v47 = vrot.slane %v4136_v45, 4 }
 0x40a   : > { %v3798_v28 = vpop.f32.mrf.mxu2  ;;  %v4077_v37 = vrot.slane %v4075_v39, 5 }
 0x40b   : > { %v4389_v59 = vpack.c.bf16 %v4357_v22, %v4357_v22  ;;  %v4258_v1 = vmul.f32 %v6033_v6, %v3798_v28  ;;  %v4081_v28 = vrot.slane %v4079_v5, 4 }
 0x40d   : > { %4422 = vst.msk [vmem:[%s6053_s27 + $0x44] sm:$0xf] %vm4404_vm5, %v4389_v59  ;;  %v4294_v14 = vadd.f32 %v6039_v50, %v4258_v1  ;;  %v4078_v59 = vsel %vm6022_vm4, %v4074_v12, %v4077_v37 }
 0x40f   : > { %v4326_v19 = vadd.f32 %v4294_v14, %v4222_v34  ;;  %v4144_v14 = vrot.slane %v4142_v61, 4 }
 0x411   : > { %v4358_v8 = vmax.f32 %v4326_v19, 0.0  ;;  %v4082_v19 = vor.u32 %v4081_v28, %v4077_v37  ;;  %v4664_v37 = vld [vmem:[%s4788_s23 + $0xc4] sm:$0xf] }
 0x412   : > { %v3800_v24 = vpop.f32.mrf.mxu2  ;;  %v4163_v45 = vshrl.u32 %v4664_v37, 16 }
 0x413   : > { %v4390_v17 = vpack.c.bf16 %v4358_v8, %v4358_v8  ;;  %v4259_v4 = vmul.f32 %v6033_v6, %v3800_v24  ;;  %v4091_v8 = vshll.u32 %v4660_v26, 16  ;;  %v4226_v24 = vunpack.c.l.bf16 %v4078_v59  ;;  %v4665_v26 = vld [vmem:[%s4788_s23 + $0xa4] sm:$0x1] }
 0x414   : > { %v4083_v51 = vrot.slane %v4082_v19, 4  ;;  %v4105_v36 = vshll.u32 %v4665_v26, 16 }
 0x415   : > { %4423 = vst.msk [vmem:[%s6053_s27 + $0x48] sm:$0xf] %vm4404_vm5, %v4390_v17  ;;  %v4295_v57 = vadd.f32 %v6039_v50, %v4259_v4  ;;  %v4141_v17 = vsel %vm6022_vm4, %v4137_v47, %v4140_v38  ;;  %v4145_v4 = vor.u32 %v4144_v14, %v4140_v38  ;;  %v4093_v15 = vrot.slane %v4091_v8, 5  ;;  %v4666_v8 = vld [vmem:[%s4788_s23 + $0xa8] sm:$0xf] }
 0x416   : > { %v4232_v32 = vunpack.c.l.bf16 %v4141_v17  ;;  %v4165_v14 = vrot.slane %v4163_v45, 4 }
 0x417   : > { %v4327_v27 = vadd.f32 %v4295_v57, %v4223_v2  ;;  %v4151_v57 = vshrl.u32 %v4662_v20, 16  ;;  %v4146_v44 = vrot.slane %v4145_v4, 4  ;;  %v4094_v43 = vor.u32 %v4093_v15, %v4090_v60 }
 0x418   : > { %v4107_v15 = vrot.slane %v4105_v36, 5 }
 0x419   : > { %v4359_v13 = vmax.f32 %v4327_v27, 0.0  ;;  %v4154_v27 = vshll.u32 %v4662_v20, 16  ;;  %v4150_v5 = vsel %vm6022_vm4, %v4146_v44, %v4149_v40  ;;  %v4668_v40 = vld [vmem:[%s6334_s8] ss:$0 sm:$0xff] }
 0x41a   : > { %v3803_v3 = vpop.f32.mrf.mxu2  ;;  %v4233_v59 = vunpack.c.l.bf16 %v4150_v5 }
 0x41b   : > { %v4391_v41 = vpack.c.bf16 %v4359_v13, %v4359_v13  ;;  %v4260_v33 = vmul.f32 %v6033_v6, %v3803_v3  ;;  %v4087_v3 = vsel %vm6022_vm4, %v4083_v51, %v4086_v52  ;;  %v4156_v54 = vrot.slane %v4154_v27, 5  ;;  %v4667_v51 = vld [vmem:[%s4788_s23 + $0xc8] sm:$0x1] }
 0x41c   : > { %v4227_v31 = vunpack.c.l.bf16 %v4087_v3  ;;  %v4168_v52 = vshll.u32 %v4667_v51, 16 }
 0x41d   : > { %4424 = vst.msk [vmem:[%s6053_s27 + $0x4c] sm:$0xf] %vm4404_vm5, %v4391_v41  ;;  %v4296_v25 = vadd.f32 %v6039_v50, %v4260_v33  ;;  %v4663_v41 = vld [vmem:[%s4788_s23 + $0xa0] sm:$0xf]  ;;  %v4153_v33 = vrot.slane %v4151_v57, 4 }
 0x41e   : > { %v4100_v39 = vshrl.u32 %v4663_v41, 16 }
 0x41f   : > { %v4328_v46 = vadd.f32 %v4296_v25, %v4224_v35  ;;  %v4096_v35 = vshll.u32 %v4663_v41, 16  ;;  %v4157_v12 = vor.u32 %v4156_v54, %v4153_v33  ;;  %v4669_v33 = vld [vmem:[%s6335_s9] ss:$0 sm:$0xff] }
 0x421   : > { %v4360_v21 = vmax.f32 %v4328_v46, 0.0  ;;  %v4098_v58 = vrot.slane %v4096_v35, 5  ;;  %v4158_v47 = vrot.slane %v4157_v12, 4  ;;  %v4170_v35 = vrot.slane %v4168_v52, 5 }
 0x422   : > { %v3805_v22 = vpop.f32.mrf.mxu2 }
 0x423   : > { %v4392_v34 = vpack.c.bf16 %v4360_v21, %v4360_v21  ;;  %v4261_v9 = vmul.f32 %v6033_v6, %v3805_v22  ;;  %v4159_v21 = vshll.u32 %v4664_v37, 16  ;;  %v4095_v22 = vrot.slane %v4094_v43, 4 }
 0x425   : > { %4425 = vst.msk [vmem:[%s6053_s27 + $0x50] sm:$0xf] %vm4404_vm5, %v4392_v34  ;;  %v4297_v1 = vadd.f32 %v6039_v50, %v4261_v9  ;;  %v4102_v34 = vrot.slane %v4100_v39, 4  ;;  %v4161_v38 = vrot.slane %v4159_v21, 5  ;;  %v4099_v0 = vsel %vm6022_vm4, %v4095_v22, %v4098_v58 }
 0x426   : > { %v4228_v27 = vunpack.c.l.bf16 %v4099_v0 }
 0x427   : > { %v4329_v62 = vadd.f32 %v4297_v1, %v4225_v18  ;;  %v4162_v10 = vsel %vm6022_vm4, %v4158_v47, %v4161_v38  ;;  %v4671_v47 = vld [vmem:[%s4788_s23 + $0xb0] sm:$0x1] }
 0x428   : > { %v4234_v44 = vunpack.c.l.bf16 %v4162_v10 }
 0x429   : > { %v4361_v2 = vmax.f32 %v4329_v62, 0.0  ;;  %v4103_v62 = vor.u32 %v4102_v34, %v4098_v58 }
 0x42a   : > { %v3808_v56 = vpop.f32.mrf.mxu2 }
 0x42b   : > { %v4393_v16 = vpack.c.bf16 %v4361_v2, %v4361_v2  ;;  %v4262_v55 = vmul.f32 %v6033_v6, %v3808_v56  ;;  %v4112_v2 = vshll.u32 %v4666_v8, 16  ;;  %v4166_v56 = vor.u32 %v4165_v14, %v4161_v38 }
 0x42c   : > { %v4104_v60 = vrot.slane %v4103_v62, 4  ;;  %v4126_v38 = vshll.u32 %v4671_v47, 16 }
 0x42d   : > { %4426 = vst.msk [vmem:[%s6053_s27 + $0x54] sm:$0xf] %vm4404_vm5, %v4393_v16  ;;  %v4298_v13 = vadd.f32 %v6039_v50, %v4262_v55  ;;  %v4167_v41 = vrot.slane %v4166_v56, 4 }
 0x42e   : > { %v3823_v48 = vpop.f32.mrf.mxu3 }
 0x42f   : > { %v4268_v30 = vmul.f32 %v6033_v6, %v3823_v48  ;;  %v4330_v53 = vadd.f32 %v4298_v13, %v4226_v24  ;;  %v4109_v24 = vshrl.u32 %v4666_v8, 16  ;;  %v4171_v5 = vsel %vm6022_vm4, %v4167_v41, %v4170_v35 }
 0x431   : > { %v4304_v23 = vadd.f32 %v6039_v50, %v4268_v30  ;;  %v4362_v25 = vmax.f32 %v4330_v53, 0.0  ;;  %v4111_v48 = vrot.slane %v4109_v24, 4  ;;  %v4108_v53 = vsel %vm6022_vm4, %v4104_v60, %v4107_v15 }
 0x432   : > { %v3810_v46 = vpop.f32.mrf.mxu2  ;;  %v4229_v12 = vunpack.c.l.bf16 %v4108_v53  ;;  %v4128_v24 = vrot.slane %v4126_v38, 5 }
 0x433   : > { %v4336_v7 = vadd.f32 %v4304_v23, %v4232_v32  ;;  %v4394_v11 = vpack.c.bf16 %v4362_v25, %v4362_v25  ;;  %v4263_v61 = vmul.f32 %v6033_v6, %v3810_v46  ;;  %v4114_v32 = vrot.slane %v4112_v2, 5  ;;  %v4670_v23 = vld [vmem:[%s4788_s23 + $0xac] sm:$0xf] }
 0x434   : > { %v4117_v43 = vshll.u32 %v4670_v23, 16  ;;  %v4121_v39 = vshrl.u32 %v4670_v23, 16 }
 0x435   : > { %v4368_v42 = vmax.f32 %v4336_v7, 0.0  ;;  %4427 = vst.msk [vmem:[%s6053_s27 + $0x58] sm:$0xf] %vm4404_vm5, %v4394_v11  ;;  %v4299_v9 = vadd.f32 %v6039_v50, %v4263_v61 }
 0x436   : > { %v3825_v28 = vpop.f32.mrf.mxu3  ;;  %v4119_v11 = vrot.slane %v4117_v43, 5 }
 0x437   : > { %v4400_v18 = vpack.c.bf16 %v4368_v42, %v4368_v42  ;;  %v4269_v1 = vmul.f32 %v6033_v6, %v3825_v28  ;;  %v4331_v19 = vadd.f32 %v4299_v9, %v4227_v31  ;;  %v4123_v42 = vrot.slane %v4121_v39, 4 }
 0x438   : > { %v4235_v28 = vunpack.c.l.bf16 %v4171_v5 }
 0x439   : > { %4433 = vst.msk [vmem:[%s6053_s27 + $0x70] sm:$0xf] %vm4404_vm5, %v4400_v18  ;;  %v4305_v63 = vadd.f32 %v6039_v50, %v4269_v1  ;;  %v4363_v17 = vmax.f32 %v4331_v19, 0.0  ;;  %v4124_v1 = vor.u32 %v4123_v42, %v4119_v11 }
 0x43a   : > { %v3813_v29 = vpop.f32.mrf.mxu2 }
 0x43b   : > { %v4337_v4 = vadd.f32 %v4305_v63, %v4233_v59  ;;  %v4395_v20 = vpack.c.bf16 %v4363_v17, %v4363_v17  ;;  %v4264_v16 = vmul.f32 %v6033_v6, %v3813_v29  ;;  %v4125_v8 = vrot.slane %v4124_v1, 4 }
 0x43d   : > { %v4369_v57 = vmax.f32 %v4337_v4, 0.0  ;;  %4428 = vst.msk [vmem:[%s6053_s27 + $0x5c] sm:$0xf] %vm4404_vm5, %v4395_v20  ;;  %v4300_v30 = vadd.f32 %v6039_v50, %v4264_v16  ;;  %v4115_v50 = vor.u32 %v4114_v32, %v4111_v48  ;;  %v4129_v29 = vsel %vm6022_vm4, %v4125_v8, %v4128_v24 }
 0x43e   : > { %v3828_v55 = vpop.f32.mrf.mxu3  ;;  %v4231_v52 = vunpack.c.l.bf16 %v4129_v29 }
 0x43f   : > { %v4401_v13 = vpack.c.bf16 %v4369_v57, %v4369_v57  ;;  %v4270_v3 = vmul.f32 %v4668_v40, %v3828_v55  ;;  %v4332_v6 = vadd.f32 %v4300_v30, %v4228_v27  ;;  %v4116_v45 = vrot.slane %v4115_v50, 4 }
 0x441   : > { %4434 = vst.msk [vmem:[%s6053_s27 + $0x74] sm:$0xf] %vm4404_vm5, %v4401_v13  ;;  %v4306_v54 = vadd.f32 %v4669_v33, %v4270_v3  ;;  %v4364_v25 = vmax.f32 %v4332_v6, 0.0  ;;  %v4120_v59 = vsel %vm6022_vm4, %v4116_v45, %v4119_v11 }
 0x442   : > { %v3815_v31 = vpop.f32.mrf.mxu2  ;;  %v4230_v26 = vunpack.c.l.bf16 %v4120_v59 }
 0x443   : > { %v4338_v7 = vadd.f32 %v4306_v54, %v4234_v44  ;;  %v4396_v46 = vpack.c.bf16 %v4364_v25, %v4364_v25  ;;  %v4265_v37 = vmul.f32 %v4668_v40, %v3815_v31 }
 0x445   : > { %v4370_v58 = vmax.f32 %v4338_v7, 0.0  ;;  %4429 = vst.msk [vmem:[%s6053_s27 + $0x60] sm:$0xf] %vm4404_vm5, %v4396_v46  ;;  %v4301_v22 = vadd.f32 %v4669_v33, %v4265_v37 }
 0x446   : > { %v3830_v21 = vpop.f32.mrf.mxu3 }
 0x447   : > { %v4402_v61 = vpack.c.bf16 %v4370_v58, %v4370_v58  ;;  %v4271_v34 = vmul.f32 %v4668_v40, %v3830_v21  ;;  %v4333_v18 = vadd.f32 %v4301_v22, %v4229_v12 }
 0x449   : > { %4435 = vst.msk [vmem:[%s6053_s27 + $0x78] sm:$0xf] %vm4404_vm5, %v4402_v61  ;;  %v4307_v9 = vadd.f32 %v4669_v33, %v4271_v34  ;;  %v4365_v14 = vmax.f32 %v4333_v18, 0.0 }
 0x44a   : > { %v3818_v63 = vpop.f32.mrf.mxu2 }
 0x44b   : > { %v4339_v19 = vadd.f32 %v4307_v9, %v4235_v28  ;;  %v4397_v0 = vpack.c.bf16 %v4365_v14, %v4365_v14  ;;  %v4266_v36 = vmul.f32 %v4668_v40, %v3818_v63 }
 0x44d   : > { %v4371_v62 = vmax.f32 %v4339_v19, 0.0  ;;  %4430 = vst.msk [vmem:[%s6053_s27 + $0x64] sm:$0xf] %vm4404_vm5, %v4397_v0  ;;  %v4302_v17 = vadd.f32 %v4669_v33, %v4266_v36 }
 0x44f   : > { %v4403_v2 = vpack.c.bf16 %v4371_v62, %v4371_v62  ;;  %v4334_v4 = vadd.f32 %v4302_v17, %v4230_v26 }
 0x451   : > { %4436 = vst.msk [vmem:[%s6053_s27 + $0x7c] sm:$0xf] %vm4404_vm5, %v4403_v2  ;;  %v4366_v10 = vmax.f32 %v4334_v4, 0.0 }
 0x452   : > { %v3820_v56 = vpop.f32.mrf.mxu2 }
 0x453   : > { %v4398_v51 = vpack.c.bf16 %v4366_v10, %v4366_v10  ;;  %v4267_v20 = vmul.f32 %v4668_v40, %v3820_v56 }
 0x455   : > { %4431 = vst.msk [vmem:[%s6053_s27 + $0x68] sm:$0xf] %vm4404_vm5, %v4398_v51  ;;  %v4303_v57 = vadd.f32 %v4669_v33, %v4267_v20 }
 0x457   : > { %v4335_v27 = vadd.f32 %v4303_v57, %v4231_v52 }
 0x459   : > { %v4367_v16 = vmax.f32 %v4335_v27, 0.0 }
 0x45b   : > { %v4399_v55 = vpack.c.bf16 %v4367_v16, %v4367_v16 }
 0x45d   : > { %4432 = vst.msk [vmem:[%s6053_s27 + $0x6c] sm:$0xf] %vm4404_vm5, %v4399_v55 }
 0x45e PF: > { %s20_s15 = sadd.s32 1, %s4694_s15   ;;  %s6339_s13 = smov %s4690_s14 }
 0x45f   : > { %p17_p6 = scmp.ge.s32.totalorder %s20_s15, 4   ;;  %s6340_s14 = smov %s6342_s16 }
 0x461   :  { %19 = sbr.rel (!%p17_p6) target bundleno = 2 (0x2), region = 112 }

// kernel: tpu_custom_call.1
= control target key start
LH: loop header
LB: loop body
LE: loop exit
PB: predicated region body
PF: predicated region fallthrough
CT: control target
= control target key end

     0   :  { %s5813_s13 = smov 0   ;;  %s5815_s14 = smov 0   ;;  %s7595_s0 = inlined_call_operand.vmem [shape: bf16[2,18,18,16], index: 0, kind: input, shape index: {}]   ;;  %s7596_s1 = inlined_call_operand.vmem [shape: bf16[16,4], index: 1, kind: input, shape index: {}]   ;;  %s7597_s2 = inlined_call_operand.vmem [shape: bf16[9,4,4], index: 2, kind: input, shape index: {}]   ;;  %s7598_s3 = inlined_call_operand.vmem [shape: bf16[4,16], index: 3, kind: input, shape index: {}]   ;;  %s7599_s4 = inlined_call_operand.vmem [shape: f32[1,4], index: 4, kind: input, shape index: {}]   ;;  %s7600_s5 = inlined_call_operand.vmem [shape: f32[1,4], index: 5, kind: input, shape index: {}]   ;;  %s7601_s6 = inlined_call_operand.vmem [shape: f32[1,4], index: 6, kind: input, shape index: {}]   ;;  %s7602_s7 = inlined_call_operand.vmem [shape: f32[1,4], index: 7, kind: input, shape index: {}]   ;;  %s7603_s8 = inlined_call_operand.vmem [shape: f32[1,16], index: 8, kind: input, shape index: {}]   ;;  %s7604_s9 = inlined_call_operand.vmem [shape: f32[1,16], index: 9, kind: input, shape index: {}]   ;;  %s7605_s10 = inlined_call_operand.vmem [shape: bf16[512,16], index: 10, kind: output, shape index: {}]  }
   0x1   :  { %s5817_s15 = smov 0  }
   0x2 LB: > { %s32_s16 = sadd.s32 1, %s5750_s14  ;;  %p5422_p0 = scmp.ge.s32.totalorder %s5754_s15, 1  ;;  %s5754_s15 = sphi %s5817_s15, %s20_s15   ;;  %s5750_s14 = sphi %s5815_s14, %s7732_s14   ;;  %s5746_s13 = sphi %s5813_s13, %s7731_s13  }
   0x3   : > { %p34_p1 = scmp.ge.s32.totalorder %s32_s16, 2  ;;  %p326_p2 = scmp.lt.s32.totalorder %s5754_s15, 3 }
   0x5   : > { %s7734_s16 = smov (%p34_p1, %s32_s16), 0  ;;  %p327_p3 = pnand %p5422_p0, %p326_p2 }
   0x7   : > { %330 = sbr.rel (%p327_p3) target bundleno = 1402 (0x57a), region = 60 }
   0xc   : > { %v5639_v0 = vld [vmem:[%s7596_s1] sm:$0xff]  ;;  %p365_p4 = scmp.lt.s32.totalorder %s5746_s13, 1  ;;  %vm545_vm0 = vcmask 1040384   ;;  %vm549_vm1 = vcmask 1041409   ;;  %vm553_vm2 = vcmask 1042434   ;;  %vm557_vm3 = vcmask 1043459  }
   0xd   : > { %1391 = vmatpush.bf16.msra.mxu0 %v5639_v0  ;;  %vm1341_vm4 = vcmask 130048   ;;  %vm2960_vm5 = vcmask 1041408   ;;  %vm3289_vm7 = vcmask 1042432   ;;  %vm3290_vm8 = vcmask 1046532   ;;  %s5424_s30 = sshll.u32 %s5746_s13, 5 }
   0xe   : > { %s366_s19 = scalar_select %p365_p4, %s5746_s13, 1  ;;  %vm6163_vm10 = vmor %vm3289_vm7, %vm3290_vm8  ;;  %vm2474_vm11 = vsmask.f32 3328  ;;  %vm2475_vm12 = vsmask.f32 7440  ;;  %vm2911_vm13 = vcmask 31744  }
   0xf   : > { %vm6212_vm14 = vmor %vm2474_vm11, %vm2475_vm12  ;;  %p7257_p5 = scmp.lt.s32.totalorder %s5424_s30, 63  ;;  %vm5315_vm15 = vcmask 125952  }
  0x10   : > { %s5643_s20 = smul.u32 216, %s366_s19 }
  0x11   : > { %s7736_s30 = smov (!%p7257_p5, %s5424_s30), 63 }
  0x12   : > { %s5841_s23 = scalar_lea.vmem %s7595_s0, %s5643_s20  ;;  %s5425_s19 = sshll.u32 %s7736_s30, 2 }
  0x13   : > { %v383_v1 = vld [vmem:[%s5841_s23] sm:$0xf]  ;;  %v384_v2 = vld [vmem:[%s5841_s23 + $0x4] sm:$0xf]  ;;  %v386_v19 = vld [vmem:[%s5841_s23 + $0xc] sm:$0xf]  ;;  %s7293_s22 = scalar_lea.vmem %s7605_s10, %s5425_s19 }
  0x14   : > { %v491_v3 = vrot.slane %v383_v1, 3  ;;  %v492_v4 = vrot.slane %v384_v2, 3  ;;  %v385_v20 = vld [vmem:[%s5841_s23 + $0x8] sm:$0x1]  ;;  %v494_v21 = vrot.slane %v386_v19, 3 }
  0x15   : > { %v387_v22 = vld [vmem:[%s5841_s23 + $0x10] sm:$0xf]  ;;  %v493_v23 = vrot.slane %v385_v20, 3  ;;  %v389_v39 = vld [vmem:[%s5841_s23 + $0x18] sm:$0xf] }
  0x16   : > { %v548_v5 = vsel %vm545_vm0, %v383_v1, %v491_v3  ;;  %v550_v6 = vsel %vm549_vm1, %v383_v1, %v491_v3  ;;  %v554_v7 = vsel %vm553_vm2, %v383_v1, %v491_v3  ;;  %v558_v8 = vsel %vm557_vm3, %v383_v1, %v491_v3  ;;  %v388_v40 = vld [vmem:[%s5841_s23 + $0x14] sm:$0x1]  ;;  %v390_v42 = vld [vmem:[%s5841_s23 + $0x1c] sm:$0xf]  ;;  %v392_v59 = vld [vmem:[%s5841_s23 + $0x24] sm:$0xf] }
  0x17   : > { %v552_v9 = vrot.slane %v550_v6, 1  ;;  %v556_v10 = vrot.slane %v554_v7, 2  ;;  %v560_v11 = vrot.slane %v558_v8, 3  ;;  %v563_v12 = vsel %vm545_vm0, %v384_v2, %v492_v4  ;;  %1037 = vst [vmem:[#allocation1] ss:$9 sm:$0xff] %v548_v5 }
  0x18   : > { %v564_v13 = vsel %vm549_vm1, %v384_v2, %v492_v4  ;;  %v567_v14 = vsel %vm553_vm2, %v384_v2, %v492_v4  ;;  %v570_v15 = vsel %vm557_vm3, %v384_v2, %v492_v4  ;;  %1048 = vst [vmem:[#allocation1 + $0x4] ss:$9 sm:$0xff] %v563_v12  ;;  %v495_v24 = vrot.slane %v387_v22, 3  ;;  %v391_v60 = vld [vmem:[%s5841_s23 + $0x20] sm:$0x1] }
  0x19   : > { %v566_v16 = vrot.slane %v564_v13, 1  ;;  %v569_v17 = vrot.slane %v567_v14, 2  ;;  %1040 = vst [vmem:[#allocation1 + $0x1] ss:$9 sm:$0xff] %v552_v9  ;;  %v572_v18 = vrot.slane %v570_v15, 3  ;;  %v579_v25 = vsel %vm549_vm1, %v386_v19, %v494_v21 }
  0x1a   : > { %1043 = vst [vmem:[#allocation1 + $0x2] ss:$9 sm:$0xff] %v556_v10  ;;  %v582_v26 = vsel %vm553_vm2, %v386_v19, %v494_v21  ;;  %v575_v27 = vsel %vm545_vm0, %v385_v20, %v493_v23  ;;  %v585_v28 = vsel %vm557_vm3, %v386_v19, %v494_v21  ;;  %v578_v29 = vsel %vm545_vm0, %v386_v19, %v494_v21  ;;  %v393_v2 = vld [vmem:[%s5841_s23 + $0x28] sm:$0xf]  ;;  %v395_v15 = vld [vmem:[%s5841_s23 + $0x30] sm:$0xf] }
  0x1b   : > { %1046 = vst [vmem:[#allocation1 + $0x3] ss:$9 sm:$0xff] %v560_v11  ;;  %v581_v30 = vrot.slane %v579_v25, 1  ;;  %v584_v32 = vrot.slane %v582_v26, 2  ;;  %v591_v33 = vsel %vm549_vm1, %v387_v22, %v495_v24  ;;  %v587_v34 = vrot.slane %v585_v28, 3 }
  0x1c   : > { %1051 = vst [vmem:[#allocation1 + $0x5] ss:$9 sm:$0xff] %v566_v16  ;;  %v594_v35 = vsel %vm553_vm2, %v387_v22, %v495_v24  ;;  %v590_v36 = vsel %vm545_vm0, %v387_v22, %v495_v24  ;;  %v593_v37 = vrot.slane %v591_v33, 1  ;;  %v497_v41 = vrot.slane %v389_v39, 3  ;;  %v394_v16 = vld [vmem:[%s5841_s23 + $0x2c] sm:$0x1] }
  0x1d   : > { %1054 = vst [vmem:[#allocation1 + $0x6] ss:$9 sm:$0xff] %v569_v17  ;;  %v596_v38 = vrot.slane %v594_v35, 2  ;;  %v597_v43 = vsel %vm557_vm3, %v387_v22, %v495_v24  ;;  %v496_v44 = vrot.slane %v388_v40, 3  ;;  %v498_v45 = vrot.slane %v390_v42, 3 }
  0x1e   : > { %1057 = vst [vmem:[#allocation1 + $0x7] ss:$9 sm:$0xff] %v572_v18  ;;  %v599_v46 = vrot.slane %v597_v43, 3  ;;  %v606_v47 = vsel %vm549_vm1, %v389_v39, %v497_v41  ;;  %v609_v48 = vsel %vm553_vm2, %v389_v39, %v497_v41  ;;  %v612_v50 = vsel %vm557_vm3, %v389_v39, %v497_v41  ;;  %v396_v33 = vld [vmem:[%s5841_s23 + $0x34] sm:$0xf] }
  0x1f   : > { %v602_v49 = vsel %vm545_vm0, %v388_v40, %v496_v44  ;;  %v605_v52 = vsel %vm545_vm0, %v389_v39, %v497_v41  ;;  %v608_v53 = vrot.slane %v606_v47, 1  ;;  %v611_v54 = vrot.slane %v609_v48, 2 }
  0x20   : > { %v618_v55 = vsel %vm549_vm1, %v390_v42, %v498_v45  ;;  %v614_v56 = vrot.slane %v612_v50, 3  ;;  %v617_v57 = vsel %vm545_vm0, %v390_v42, %v498_v45  ;;  %v500_v61 = vrot.slane %v392_v59, 3 }
  0x21   : > { %v620_v58 = vrot.slane %v618_v55, 1  ;;  %v621_v62 = vsel %vm553_vm2, %v390_v42, %v498_v45  ;;  %v624_v63 = vsel %vm557_vm3, %v390_v42, %v498_v45  ;;  %v499_v0 = vrot.slane %v391_v60, 3 }
  0x22   : > { %v623_v1 = vrot.slane %v621_v62, 2  ;;  %v626_v3 = vrot.slane %v624_v63, 3  ;;  %v633_v4 = vsel %vm549_vm1, %v392_v59, %v500_v61  ;;  %v636_v5 = vsel %vm553_vm2, %v392_v59, %v500_v61 }
  0x23   : > { %v629_v7 = vsel %vm545_vm0, %v391_v60, %v499_v0  ;;  %v639_v8 = vsel %vm557_vm3, %v392_v59, %v500_v61  ;;  %v501_v9 = vrot.slane %v393_v2, 3  ;;  %v632_v10 = vsel %vm545_vm0, %v392_v59, %v500_v61 }
  0x24   : > { %v635_v11 = vrot.slane %v633_v4, 1  ;;  %v638_v12 = vrot.slane %v636_v5, 2  ;;  %v641_v13 = vrot.slane %v639_v8, 3  ;;  %v503_v18 = vrot.slane %v395_v15, 3 }
  0x25   : > { %v1058_v31 = vld [vmem:[#allocation1] sm:$0xff]  ;;  %v644_v14 = vsel %vm545_vm0, %v393_v2, %v501_v9  ;;  %v645_v17 = vsel %vm549_vm1, %v393_v2, %v501_v9  ;;  %v648_v19 = vsel %vm553_vm2, %v393_v2, %v501_v9  ;;  %v651_v20 = vsel %vm557_vm3, %v393_v2, %v501_v9 }
  0x26   : > { %5430 = vmatmul.msk.bf16.vlgmr.msra.gmra.mxu0 %vm1341_vm4, %v1058_v31  ;;  %1059 = vst [vmem:[#allocation1] ss:$9 sm:$0xff] %v575_v27  ;;  %v502_v21 = vrot.slane %v394_v16, 3  ;;  %v647_v22 = vrot.slane %v645_v17, 1  ;;  %v650_v23 = vrot.slane %v648_v19, 2  ;;  %v653_v24 = vrot.slane %v651_v20, 3 }
  0x27   : > { %1060 = vst [vmem:[#allocation1 + $0x1] ss:$9 sm:$0xff] %v578_v29  ;;  %v660_v25 = vsel %vm549_vm1, %v395_v15, %v503_v18  ;;  %v663_v27 = vsel %vm553_vm2, %v395_v15, %v503_v18  ;;  %v666_v29 = vsel %vm557_vm3, %v395_v15, %v503_v18  ;;  %v504_v35 = vrot.slane %v396_v33, 3  ;;  %v404_v17 = vld [vmem:[%s5841_s23 + $0x54] sm:$0xf] }
  0x28   : > { %1062 = vst [vmem:[#allocation1 + $0x2] ss:$9 sm:$0xff] %v581_v30  ;;  %v656_v28 = vsel %vm545_vm0, %v394_v16, %v502_v21  ;;  %v659_v30 = vsel %vm545_vm0, %v395_v15, %v503_v18  ;;  %v662_v31 = vrot.slane %v660_v25, 1  ;;  %v512_v25 = vrot.slane %v404_v17, 3 }
  0x29   : > { %1064 = vst [vmem:[#allocation1 + $0x3] ss:$9 sm:$0xff] %v584_v32  ;;  %v665_v32 = vrot.slane %v663_v27, 2  ;;  %v675_v40 = vsel %vm553_vm2, %v396_v33, %v504_v35  ;;  %v678_v41 = vsel %vm557_vm3, %v396_v33, %v504_v35  ;;  %v671_v43 = vsel %vm545_vm0, %v396_v33, %v504_v35 }
  0x2a   : > { %1066 = vst [vmem:[#allocation1 + $0x4] ss:$9 sm:$0xff] %v587_v34  ;;  %v668_v34 = vrot.slane %v666_v29, 3  ;;  %v677_v45 = vrot.slane %v675_v40, 2  ;;  %v680_v47 = vrot.slane %v678_v41, 3  ;;  %v740_v29 = vsel %vm545_vm0, %v404_v17, %v512_v25 }
  0x2b   : > { %1067 = vst [vmem:[#allocation1 + $0x5] ss:$9 sm:$0xff] %v590_v36  ;;  %v398_v36 = vld [vmem:[%s5841_s23 + $0x3c] sm:$0xf] }
  0x2c   : > { %1069 = vst [vmem:[#allocation1 + $0x6] ss:$9 sm:$0xff] %v593_v37  ;;  %v397_v37 = vld [vmem:[%s5841_s23 + $0x38] sm:$0x1]  ;;  %v506_v39 = vrot.slane %v398_v36, 3 }
  0x2d   : > { %1071 = vst [vmem:[#allocation1 + $0x7] ss:$9 sm:$0xff] %v596_v38  ;;  %v672_v38 = vsel %vm549_vm1, %v396_v33, %v504_v35  ;;  %v505_v42 = vrot.slane %v397_v37, 3  ;;  %v744_v33 = vsel %vm553_vm2, %v404_v17, %v512_v25 }
  0x2e   : > { %v674_v44 = vrot.slane %v672_v38, 1  ;;  %v687_v48 = vsel %vm549_vm1, %v398_v36, %v506_v39 }
  0x2f   : > { %v683_v50 = vsel %vm545_vm0, %v397_v37, %v505_v42  ;;  %v746_v37 = vrot.slane %v744_v33, 2 }
  0x34   : > { %v1072_v51 = vld [vmem:[#allocation1] sm:$0xff] }
  0x35   : > { %1074 = vst [vmem:[#allocation1] ss:$9 sm:$0xff] %v599_v46 }
  0x36   : > { %5431 = vmatmul.msk.bf16.gmra.mxu0 %vm1341_vm4, %v1072_v51  ;;  %1075 = vst [vmem:[#allocation1 + $0x1] ss:$9 sm:$0xff] %v602_v49  ;;  %v690_v49 = vsel %vm553_vm2, %v398_v36, %v506_v39  ;;  %v686_v51 = vsel %vm545_vm0, %v398_v36, %v506_v39 }
  0x37   : > { %1076 = vst [vmem:[#allocation1 + $0x2] ss:$9 sm:$0xff] %v605_v52  ;;  %v689_v52 = vrot.slane %v687_v48, 1  ;;  %v407_v48 = vld [vmem:[%s5841_s23 + $0x60] sm:$0xf] }
  0x38   : > { %1078 = vst [vmem:[#allocation1 + $0x3] ss:$9 sm:$0xff] %v608_v53  ;;  %v692_v53 = vrot.slane %v690_v49, 2 }
  0x39   : > { %1080 = vst [vmem:[#allocation1 + $0x4] ss:$9 sm:$0xff] %v611_v54  ;;  %v399_v54 = vld [vmem:[%s5841_s23 + $0x40] sm:$0xf] }
  0x3a   : > { %1082 = vst [vmem:[#allocation1 + $0x5] ss:$9 sm:$0xff] %v614_v56  ;;  %v507_v55 = vrot.slane %v399_v54, 3  ;;  %v401_v56 = vld [vmem:[%s5841_s23 + $0x48] sm:$0xf] }
  0x3b   : > { %1083 = vst [vmem:[#allocation1 + $0x6] ss:$9 sm:$0xff] %v617_v57  ;;  %v693_v57 = vsel %vm557_vm3, %v398_v36, %v506_v39  ;;  %v509_v60 = vrot.slane %v401_v56, 3  ;;  %v406_v36 = vld [vmem:[%s5841_s23 + $0x5c] sm:$0x1] }
  0x3c   : > { %1085 = vst [vmem:[#allocation1 + $0x7] ss:$9 sm:$0xff] %v620_v58  ;;  %v400_v58 = vld [vmem:[%s5841_s23 + $0x44] sm:$0x1]  ;;  %v699_v59 = vsel %vm549_vm1, %v399_v54, %v507_v55  ;;  %v695_v61 = vrot.slane %v693_v57, 3  ;;  %v702_v62 = vsel %vm553_vm2, %v399_v54, %v507_v55  ;;  %v705_v63 = vsel %vm557_vm3, %v399_v54, %v507_v55 }
  0x3d   : > { %v508_v0 = vrot.slane %v400_v58, 3  ;;  %v701_v2 = vrot.slane %v699_v59, 1  ;;  %v704_v4 = vrot.slane %v702_v62, 2  ;;  %v707_v5 = vrot.slane %v705_v63, 3 }
  0x3e   : > { %v713_v8 = vsel %vm545_vm0, %v401_v56, %v509_v60 }
  0x43   : > { %v1086_v6 = vld [vmem:[#allocation1] sm:$0xff] }
  0x44   : > { %1088 = vst [vmem:[#allocation1] ss:$9 sm:$0xff] %v623_v1  ;;  %v698_v1 = vsel %vm545_vm0, %v399_v54, %v507_v55 }
  0x45   : > { %1090 = vst [vmem:[#allocation1 + $0x1] ss:$9 sm:$0xff] %v626_v3 }
  0x46   : > { %5432 = vmatmul.msk.bf16.gmra.mxu0 %vm1341_vm4, %v1086_v6  ;;  %1091 = vst [vmem:[#allocation1 + $0x2] ss:$9 sm:$0xff] %v629_v7  ;;  %v714_v6 = vsel %vm549_vm1, %v401_v56, %v509_v60  ;;  %v710_v7 = vsel %vm545_vm0, %v400_v58, %v508_v0 }
  0x47   : > { %1092 = vst [vmem:[#allocation1 + $0x3] ss:$9 sm:$0xff] %v632_v10  ;;  %v716_v9 = vrot.slane %v714_v6, 1  ;;  %v402_v10 = vld [vmem:[%s5841_s23 + $0x4c] sm:$0xf] }
  0x48   : > { %1094 = vst [vmem:[#allocation1 + $0x4] ss:$9 sm:$0xff] %v635_v11  ;;  %v510_v11 = vrot.slane %v402_v10, 3 }
  0x49   : > { %1096 = vst [vmem:[#allocation1 + $0x5] ss:$9 sm:$0xff] %v638_v12  ;;  %v717_v12 = vsel %vm553_vm2, %v401_v56, %v509_v60 }
  0x4a   : > { %1098 = vst [vmem:[#allocation1 + $0x6] ss:$9 sm:$0xff] %v641_v13  ;;  %v720_v13 = vsel %vm557_vm3, %v401_v56, %v509_v60  ;;  %v719_v15 = vrot.slane %v717_v12, 2  ;;  %v726_v16 = vsel %vm549_vm1, %v402_v10, %v510_v11  ;;  %v729_v19 = vsel %vm553_vm2, %v402_v10, %v510_v11 }
  0x4b   : > { %1099 = vst [vmem:[#allocation1 + $0x7] ss:$9 sm:$0xff] %v644_v14  ;;  %v403_v14 = vld [vmem:[%s5841_s23 + $0x50] sm:$0x1]  ;;  %v722_v18 = vrot.slane %v720_v13, 3  ;;  %v732_v20 = vsel %vm557_vm3, %v402_v10, %v510_v11 }
  0x4c   : > { %v734_v27 = vrot.slane %v732_v20, 3 }
  0x52   : > { %v1100_v26 = vld [vmem:[#allocation1] sm:$0xff] }
  0x53   : > { %1102 = vst [vmem:[#allocation1] ss:$9 sm:$0xff] %v647_v22  ;;  %v511_v22 = vrot.slane %v403_v14, 3 }
  0x54   : > { %1104 = vst [vmem:[#allocation1 + $0x1] ss:$9 sm:$0xff] %v650_v23  ;;  %v725_v23 = vsel %vm545_vm0, %v402_v10, %v510_v11 }
  0x55   : > { %1106 = vst [vmem:[#allocation1 + $0x2] ss:$9 sm:$0xff] %v653_v24  ;;  %v728_v24 = vrot.slane %v726_v16, 1 }
  0x56   : > { %5433 = vmatmul.msk.bf16.gmra.mxu0 %vm1341_vm4, %v1100_v26  ;;  %1107 = vst [vmem:[#allocation1 + $0x3] ss:$9 sm:$0xff] %v656_v28  ;;  %v731_v26 = vrot.slane %v729_v19, 2  ;;  %v737_v28 = vsel %vm545_vm0, %v403_v14, %v511_v22 }
  0x57   : > { %1108 = vst [vmem:[#allocation1 + $0x4] ss:$9 sm:$0xff] %v659_v30  ;;  %v405_v30 = vld [vmem:[%s5841_s23 + $0x58] sm:$0xf] }
  0x58   : > { %1110 = vst [vmem:[#allocation1 + $0x5] ss:$9 sm:$0xff] %v662_v31  ;;  %v513_v31 = vrot.slane %v405_v30, 3 }
  0x59   : > { %1112 = vst [vmem:[#allocation1 + $0x6] ss:$9 sm:$0xff] %v665_v32  ;;  %v741_v32 = vsel %vm549_vm1, %v404_v17, %v512_v25 }
  0x5a   : > { %1114 = vst [vmem:[#allocation1 + $0x7] ss:$9 sm:$0xff] %v668_v34  ;;  %v747_v34 = vsel %vm557_vm3, %v404_v17, %v512_v25  ;;  %v743_v35 = vrot.slane %v741_v32, 1  ;;  %v753_v38 = vsel %vm549_vm1, %v405_v30, %v513_v31  ;;  %v756_v40 = vsel %vm553_vm2, %v405_v30, %v513_v31  ;;  %v412_v25 = vld [vmem:[%s5841_s23 + $0x74] sm:$0x1] }
  0x5b   : > { %v749_v39 = vrot.slane %v747_v34, 3  ;;  %v759_v42 = vsel %vm557_vm3, %v405_v30, %v513_v31 }
  0x61   : > { %v1115_v46 = vld [vmem:[#allocation1] sm:$0xff] }
  0x62   : > { %1116 = vst [vmem:[#allocation1] ss:$9 sm:$0xff] %v671_v43  ;;  %v514_v43 = vrot.slane %v406_v36, 3 }
  0x63   : > { %1118 = vst [vmem:[#allocation1 + $0x1] ss:$9 sm:$0xff] %v674_v44  ;;  %v752_v44 = vsel %vm545_vm0, %v405_v30, %v513_v31 }
  0x64   : > { %1120 = vst [vmem:[#allocation1 + $0x2] ss:$9 sm:$0xff] %v677_v45  ;;  %v755_v45 = vrot.slane %v753_v38, 1  ;;  %v764_v49 = vsel %vm545_vm0, %v406_v36, %v514_v43 }
  0x65   : > { %1122 = vst [vmem:[#allocation1 + $0x3] ss:$9 sm:$0xff] %v680_v47  ;;  %v761_v47 = vrot.slane %v759_v42, 3 }
  0x66   : > { %5434 = vmatmul.msk.bf16.gmra.mxu0 %vm1341_vm4, %v1115_v46  ;;  %1123 = vst [vmem:[#allocation1 + $0x4] ss:$9 sm:$0xff] %v683_v50  ;;  %v758_v46 = vrot.slane %v756_v40, 2  ;;  %v515_v50 = vrot.slane %v407_v48, 3 }
  0x67   : > { %1124 = vst [vmem:[#allocation1 + $0x5] ss:$9 sm:$0xff] %v686_v51  ;;  %v408_v51 = vld [vmem:[%s5841_s23 + $0x64] sm:$0xf] }
  0x68   : > { %1126 = vst [vmem:[#allocation1 + $0x6] ss:$9 sm:$0xff] %v689_v52  ;;  %v516_v52 = vrot.slane %v408_v51, 3  ;;  %v771_v54 = vsel %vm553_vm2, %v407_v48, %v515_v50  ;;  %v774_v55 = vsel %vm557_vm3, %v407_v48, %v515_v50  ;;  %v767_v56 = vsel %vm545_vm0, %v407_v48, %v515_v50 }
  0x69   : > { %1128 = vst [vmem:[#allocation1 + $0x7] ss:$9 sm:$0xff] %v692_v53  ;;  %v768_v53 = vsel %vm549_vm1, %v407_v48, %v515_v50  ;;  %v773_v58 = vrot.slane %v771_v54, 2 }
  0x6a   : > { %v770_v57 = vrot.slane %v768_v53, 1  ;;  %v780_v59 = vsel %vm549_vm1, %v408_v51, %v516_v52  ;;  %v783_v62 = vsel %vm553_vm2, %v408_v51, %v516_v52  ;;  %v786_v63 = vsel %vm557_vm3, %v408_v51, %v516_v52 }
  0x6b   : > { %v779_v0 = vsel %vm545_vm0, %v408_v51, %v516_v52  ;;  %v417_v51 = vld [vmem:[%s5841_s23 + $0x88] sm:$0xf] }
  0x70   : > { %v1129_v3 = vld [vmem:[#allocation1] sm:$0xff] }
  0x71   : > { %1131 = vst [vmem:[#allocation1] ss:$9 sm:$0xff] %v695_v61  ;;  %v776_v61 = vrot.slane %v774_v55, 3 }
  0x72   : > { %1132 = vst [vmem:[#allocation1 + $0x1] ss:$9 sm:$0xff] %v698_v1  ;;  %v782_v1 = vrot.slane %v780_v59, 1 }
  0x73   : > { %1134 = vst [vmem:[#allocation1 + $0x2] ss:$9 sm:$0xff] %v701_v2  ;;  %v785_v2 = vrot.slane %v783_v62, 2 }
  0x74   : > { %1136 = vst [vmem:[#allocation1 + $0x3] ss:$9 sm:$0xff] %v704_v4  ;;  %v788_v4 = vrot.slane %v786_v63, 3 }
  0x75   : > { %1138 = vst [vmem:[#allocation1 + $0x4] ss:$9 sm:$0xff] %v707_v5  ;;  %v409_v5 = vld [vmem:[%s5841_s23 + $0x68] sm:$0x1] }
  0x76   : > { %5435 = vmatmul.msk.bf16.gmra.mxu0 %vm1341_vm4, %v1129_v3  ;;  %1139 = vst [vmem:[#allocation1 + $0x5] ss:$9 sm:$0xff] %v710_v7  ;;  %v410_v3 = vld [vmem:[%s5841_s23 + $0x6c] sm:$0xf]  ;;  %v411_v7 = vld [vmem:[%s5841_s23 + $0x70] sm:$0xf] }
  0x77   : > { %1140 = vst [vmem:[#allocation1 + $0x6] ss:$9 sm:$0xff] %v713_v8  ;;  %v518_v6 = vrot.slane %v410_v3, 3  ;;  %v517_v8 = vrot.slane %v409_v5, 3 }
  0x78   : > { %1142 = vst [vmem:[#allocation1 + $0x7] ss:$9 sm:$0xff] %v716_v9  ;;  %v519_v9 = vrot.slane %v411_v7, 3 }
  0x79   : > { %v795_v10 = vsel %vm549_vm1, %v410_v3, %v518_v6  ;;  %v798_v11 = vsel %vm553_vm2, %v410_v3, %v518_v6  ;;  %v791_v12 = vsel %vm545_vm0, %v409_v5, %v517_v8  ;;  %v801_v13 = vsel %vm557_vm3, %v410_v3, %v518_v6 }
  0x7a   : > { %v794_v14 = vsel %vm545_vm0, %v410_v3, %v518_v6  ;;  %v800_v16 = vrot.slane %v798_v11, 2  ;;  %v807_v17 = vsel %vm549_vm1, %v411_v7, %v519_v9  ;;  %v803_v19 = vrot.slane %v801_v13, 3 }
  0x7b   : > { %v810_v20 = vsel %vm553_vm2, %v411_v7, %v519_v9  ;;  %v809_v22 = vrot.slane %v807_v17, 1 }
  0x7f   : > { %v1143_v21 = vld [vmem:[#allocation1] sm:$0xff] }
  0x80   : > { %1145 = vst [vmem:[#allocation1] ss:$9 sm:$0xff] %v719_v15  ;;  %v797_v15 = vrot.slane %v795_v10, 1 }
  0x81   : > { %1147 = vst [vmem:[#allocation1 + $0x1] ss:$9 sm:$0xff] %v722_v18 }
  0x82   : > { %1148 = vst [vmem:[#allocation1 + $0x2] ss:$9 sm:$0xff] %v725_v23  ;;  %v812_v23 = vrot.slane %v810_v20, 2 }
  0x83   : > { %1150 = vst [vmem:[#allocation1 + $0x3] ss:$9 sm:$0xff] %v728_v24  ;;  %v413_v24 = vld [vmem:[%s5841_s23 + $0x78] sm:$0xf] }
  0x84   : > { %1152 = vst [vmem:[#allocation1 + $0x4] ss:$9 sm:$0xff] %v731_v26  ;;  %v521_v26 = vrot.slane %v413_v24, 3 }
  0x85   : > { %1154 = vst [vmem:[#allocation1 + $0x5] ss:$9 sm:$0xff] %v734_v27  ;;  %v414_v27 = vld [vmem:[%s5841_s23 + $0x7c] sm:$0xf] }
  0x86   : > { %5436 = vmatmul.msk.bf16.gmra.mxu0 %vm1341_vm4, %v1143_v21  ;;  %1155 = vst [vmem:[#allocation1 + $0x6] ss:$9 sm:$0xff] %v737_v28  ;;  %v806_v21 = vsel %vm545_vm0, %v411_v7, %v519_v9  ;;  %v813_v28 = vsel %vm557_vm3, %v411_v7, %v519_v9  ;;  %v522_v30 = vrot.slane %v414_v27, 3  ;;  %v822_v32 = vsel %vm549_vm1, %v413_v24, %v521_v26 }
  0x87   : > { %1156 = vst [vmem:[#allocation1 + $0x7] ss:$9 sm:$0xff] %v740_v29  ;;  %v520_v29 = vrot.slane %v412_v25, 3  ;;  %v815_v31 = vrot.slane %v813_v28, 3  ;;  %v825_v33 = vsel %vm553_vm2, %v413_v24, %v521_v26  ;;  %v821_v36 = vsel %vm545_vm0, %v413_v24, %v521_v26 }
  0x88   : > { %v834_v40 = vsel %vm549_vm1, %v414_v27, %v522_v30  ;;  %v833_v42 = vsel %vm545_vm0, %v414_v27, %v522_v30  ;;  %v840_v48 = vsel %vm557_vm3, %v414_v27, %v522_v30 }
  0x89   : > { %v818_v34 = vsel %vm545_vm0, %v412_v25, %v520_v29  ;;  %v836_v43 = vrot.slane %v834_v40, 1  ;;  %v842_v52 = vrot.slane %v840_v48, 3  ;;  %v423_v40 = vld [vmem:[%s5841_s23 + $0xa0] sm:$0xf] }
  0x8e   : > { %v1157_v41 = vld [vmem:[#allocation1] sm:$0xff] }
  0x8f   : > { %1159 = vst [vmem:[#allocation1] ss:$9 sm:$0xff] %v743_v35  ;;  %v828_v35 = vsel %vm557_vm3, %v413_v24, %v521_v26 }
  0x90   : > { %1161 = vst [vmem:[#allocation1 + $0x1] ss:$9 sm:$0xff] %v746_v37  ;;  %v824_v37 = vrot.slane %v822_v32, 1 }
  0x91   : > { %1163 = vst [vmem:[#allocation1 + $0x2] ss:$9 sm:$0xff] %v749_v39  ;;  %v827_v39 = vrot.slane %v825_v33, 2 }
  0x92   : > { %1164 = vst [vmem:[#allocation1 + $0x3] ss:$9 sm:$0xff] %v752_v44  ;;  %v416_v44 = vld [vmem:[%s5841_s23 + $0x84] sm:$0xf] }
  0x93   : > { %1166 = vst [vmem:[#allocation1 + $0x4] ss:$9 sm:$0xff] %v755_v45  ;;  %v415_v45 = vld [vmem:[%s5841_s23 + $0x80] sm:$0x1] }
  0x94   : > { %1168 = vst [vmem:[#allocation1 + $0x5] ss:$9 sm:$0xff] %v758_v46  ;;  %v524_v46 = vrot.slane %v416_v44, 3 }
  0x95   : > { %1170 = vst [vmem:[#allocation1 + $0x6] ss:$9 sm:$0xff] %v761_v47  ;;  %v837_v47 = vsel %vm553_vm2, %v414_v27, %v522_v30 }
  0x96   : > { %5437 = vmatmul.msk.bf16.gmra.mxu0 %vm1341_vm4, %v1157_v41  ;;  %1171 = vst [vmem:[#allocation1 + $0x7] ss:$9 sm:$0xff] %v764_v49  ;;  %v830_v41 = vrot.slane %v828_v35, 3  ;;  %v523_v49 = vrot.slane %v415_v45, 3  ;;  %v839_v50 = vrot.slane %v837_v47, 2  ;;  %v849_v53 = vsel %vm549_vm1, %v416_v44, %v524_v46 }
  0x97   : > { %v852_v54 = vsel %vm553_vm2, %v416_v44, %v524_v46  ;;  %v848_v59 = vsel %vm545_vm0, %v416_v44, %v524_v46 }
  0x98   : > { %v845_v55 = vsel %vm545_vm0, %v415_v45, %v523_v49  ;;  %v424_v45 = vld [vmem:[%s5841_s23 + $0xa4] sm:$0x1] }
  0x9d   : > { %v1172_v60 = vld [vmem:[#allocation1] sm:$0xff] }
  0x9e   : > { %1173 = vst [vmem:[#allocation1] ss:$9 sm:$0xff] %v767_v56  ;;  %v855_v56 = vsel %vm557_vm3, %v416_v44, %v524_v46 }
  0x9f   : > { %1175 = vst [vmem:[#allocation1 + $0x1] ss:$9 sm:$0xff] %v770_v57  ;;  %v857_v62 = vrot.slane %v855_v56, 3 }
  0xa0   : > { %1177 = vst [vmem:[#allocation1 + $0x2] ss:$9 sm:$0xff] %v773_v58  ;;  %v525_v58 = vrot.slane %v417_v51, 3 }
  0xa1   : > { %1179 = vst [vmem:[#allocation1 + $0x3] ss:$9 sm:$0xff] %v776_v61  ;;  %v854_v61 = vrot.slane %v852_v54, 2 }
  0xa2   : > { %1180 = vst [vmem:[#allocation1 + $0x4] ss:$9 sm:$0xff] %v779_v0  ;;  %v860_v63 = vsel %vm545_vm0, %v417_v51, %v525_v58  ;;  %v419_v0 = vld [vmem:[%s5841_s23 + $0x90] sm:$0xf]  ;;  %v867_v5 = vsel %vm557_vm3, %v417_v51, %v525_v58 }
  0xa3   : > { %1182 = vst [vmem:[#allocation1 + $0x5] ss:$9 sm:$0xff] %v782_v1  ;;  %v418_v1 = vld [vmem:[%s5841_s23 + $0x8c] sm:$0x1]  ;;  %v527_v3 = vrot.slane %v419_v0, 3  ;;  %v869_v9 = vrot.slane %v867_v5, 3  ;;  %v6004_v17 = vpop.f32.mrf.mxu0 }
  0xa4   : > { %1184 = vst [vmem:[#allocation1 + $0x6] ss:$9 sm:$0xff] %v785_v2  ;;  %v861_v2 = vsel %vm549_vm1, %v417_v51, %v525_v58  ;;  %v526_v6 = vrot.slane %v418_v1, 3 }
  0xa5   : > { %1186 = vst [vmem:[#allocation1 + $0x7] ss:$9 sm:$0xff] %v788_v4  ;;  %v864_v4 = vsel %vm553_vm2, %v417_v51, %v525_v58  ;;  %v863_v7 = vrot.slane %v861_v2, 1  ;;  %v876_v10 = vsel %vm549_vm1, %v419_v0, %v527_v3  ;;  %v879_v11 = vsel %vm553_vm2, %v419_v0, %v527_v3 }
  0xa6   : > { %5438 = vmatmul.msk.bf16.gmra.mxu0 %vm1341_vm4, %v1172_v60  ;;  %v851_v60 = vrot.slane %v849_v53, 1  ;;  %v866_v8 = vrot.slane %v864_v4, 2  ;;  %v872_v13 = vsel %vm545_vm0, %v418_v1, %v526_v6  ;;  %v532_v51 = vrot.slane %v424_v45, 3  ;;  %v427_v1 = vld [vmem:[%s5841_s23 + $0xb0] sm:$0x1] }
  0xa7   : > { %v428_v4 = vld [vmem:[%s5841_s23 + $0xb4] sm:$0xf] }
  0xa8   : > { %v926_v58 = vsel %vm545_vm0, %v424_v45, %v532_v51 }
  0xab   : > { %v6012_v28 = vpop.f32.mrf.mxu0 }
  0xac   : > { %v1187_v18 = vld [vmem:[#allocation1] sm:$0xff] }
  0xad   : > { %1188 = vst [vmem:[#allocation1] ss:$9 sm:$0xff] %v791_v12 }
  0xae   : > { %1189 = vst [vmem:[#allocation1 + $0x1] ss:$9 sm:$0xff] %v794_v14  ;;  %v882_v14 = vsel %vm557_vm3, %v419_v0, %v527_v3 }
  0xaf   : > { %1191 = vst [vmem:[#allocation1 + $0x2] ss:$9 sm:$0xff] %v797_v15  ;;  %v875_v15 = vsel %vm545_vm0, %v419_v0, %v527_v3  ;;  %v884_v20 = vrot.slane %v882_v14, 3 }
  0xb0   : > { %1193 = vst [vmem:[#allocation1 + $0x3] ss:$9 sm:$0xff] %v800_v16  ;;  %v878_v16 = vrot.slane %v876_v10, 1 }
  0xb1   : > { %1195 = vst [vmem:[#allocation1 + $0x4] ss:$9 sm:$0xff] %v803_v19  ;;  %v881_v19 = vrot.slane %v879_v11, 2 }
  0xb2   : > { %1196 = vst [vmem:[#allocation1 + $0x5] ss:$9 sm:$0xff] %v806_v21 }
  0xb3   : > { %1198 = vst [vmem:[#allocation1 + $0x6] ss:$9 sm:$0xff] %v809_v22  ;;  %v422_v22 = vld [vmem:[%s5841_s23 + $0x9c] sm:$0xf] }
  0xb4   : > { %1200 = vst [vmem:[#allocation1 + $0x7] ss:$9 sm:$0xff] %v812_v23  ;;  %v421_v23 = vld [vmem:[%s5841_s23 + $0x98] sm:$0x1]  ;;  %v530_v25 = vrot.slane %v422_v22, 3 }
  0xb5   : > { %v529_v29 = vrot.slane %v421_v23, 3 }
  0xb6   : > { %5439 = vmatmul.msk.bf16.gmra.mxu0 %vm1341_vm4, %v1187_v18  ;;  %v420_v18 = vld [vmem:[%s5841_s23 + $0x94] sm:$0xf]  ;;  %v909_v44 = vsel %vm557_vm3, %v422_v22, %v530_v25 }
  0xb7   : > { %v528_v21 = vrot.slane %v420_v18, 3  ;;  %v911_v48 = vrot.slane %v909_v44, 3 }
  0xb9   : > { %v888_v24 = vsel %vm549_vm1, %v420_v18, %v528_v21  ;;  %v891_v26 = vsel %vm553_vm2, %v420_v18, %v528_v21  ;;  %v894_v27 = vsel %vm557_vm3, %v420_v18, %v528_v21  ;;  %v887_v30 = vsel %vm545_vm0, %v420_v18, %v528_v21  ;;  %v429_v18 = vld [vmem:[%s5841_s23 + $0xb8] sm:$0xf] }
  0xba   : > { %v893_v32 = vrot.slane %v891_v26, 2  ;;  %v896_v33 = vrot.slane %v894_v27, 3 }
  0xbb   : > { %v1201_v38 = vld [vmem:[#allocation1] sm:$0xff] }
  0xbc   : > { %1203 = vst [vmem:[#allocation1] ss:$9 sm:$0xff] %v815_v31  ;;  %v890_v31 = vrot.slane %v888_v24, 1  ;;  %v430_v24 = vld [vmem:[%s5841_s23 + $0xbc] sm:$0x1] }
  0xbd   : > { %1204 = vst [vmem:[#allocation1 + $0x1] ss:$9 sm:$0xff] %v818_v34  ;;  %v903_v34 = vsel %vm549_vm1, %v422_v22, %v530_v25 }
  0xbe   : > { %1205 = vst [vmem:[#allocation1 + $0x2] ss:$9 sm:$0xff] %v821_v36  ;;  %v906_v36 = vsel %vm553_vm2, %v422_v22, %v530_v25 }
  0xbf   : > { %1207 = vst [vmem:[#allocation1 + $0x3] ss:$9 sm:$0xff] %v824_v37  ;;  %v899_v37 = vsel %vm545_vm0, %v421_v23, %v529_v29 }
  0xc0   : > { %1209 = vst [vmem:[#allocation1 + $0x4] ss:$9 sm:$0xff] %v827_v39  ;;  %v905_v39 = vrot.slane %v903_v34, 1 }
  0xc1   : > { %1211 = vst [vmem:[#allocation1 + $0x5] ss:$9 sm:$0xff] %v830_v41  ;;  %v908_v41 = vrot.slane %v906_v36, 2 }
  0xc2   : > { %1212 = vst [vmem:[#allocation1 + $0x6] ss:$9 sm:$0xff] %v833_v42  ;;  %v531_v42 = vrot.slane %v423_v40, 3 }
  0xc3   : > { %1214 = vst [vmem:[#allocation1 + $0x7] ss:$9 sm:$0xff] %v836_v43  ;;  %v425_v43 = vld [vmem:[%s5841_s23 + $0xa8] sm:$0xf] }
  0xc4   : > { %v915_v46 = vsel %vm549_vm1, %v423_v40, %v531_v42  ;;  %v533_v47 = vrot.slane %v425_v43, 3  ;;  %v918_v49 = vsel %vm553_vm2, %v423_v40, %v531_v42 }
  0xc5   : > { %v917_v53 = vrot.slane %v915_v46, 1  ;;  %v920_v54 = vrot.slane %v918_v49, 2 }
  0xc6   : > { %5440 = vmatmul.msk.bf16.gmra.mxu0 %vm1341_vm4, %v1201_v38  ;;  %v902_v38 = vsel %vm545_vm0, %v422_v22, %v530_v25  ;;  %v936_v0 = vsel %vm557_vm3, %v425_v43, %v533_v47 }
  0xc7   : > { %v938_v5 = vrot.slane %v936_v0, 3  ;;  %v435_v0 = vld [vmem:[%s5841_s23 + $0xd0] sm:$0xf] }
  0xca   : > { %v1215_v57 = vld [vmem:[#allocation1] sm:$0xff] }
  0xcb   : > { %1217 = vst [vmem:[#allocation1] ss:$9 sm:$0xff] %v839_v50  ;;  %v921_v50 = vsel %vm557_vm3, %v423_v40, %v531_v42 }
  0xcc   : > { %1219 = vst [vmem:[#allocation1 + $0x1] ss:$9 sm:$0xff] %v842_v52  ;;  %v914_v52 = vsel %vm545_vm0, %v423_v40, %v531_v42  ;;  %v923_v56 = vrot.slane %v921_v50, 3  ;;  %v1398_v42 = vpop.f32.mrf.mxu0 }
  0xcd   : > { %1220 = vst [vmem:[#allocation1 + $0x2] ss:$9 sm:$0xff] %v845_v55 }
  0xce   : > { %1221 = vst [vmem:[#allocation1 + $0x3] ss:$9 sm:$0xff] %v848_v59  ;;  %v929_v59 = vsel %vm545_vm0, %v425_v43, %v533_v47 }
  0xcf   : > { %1223 = vst [vmem:[#allocation1 + $0x4] ss:$9 sm:$0xff] %v851_v60 }
  0xd0   : > { %1225 = vst [vmem:[#allocation1 + $0x5] ss:$9 sm:$0xff] %v854_v61  ;;  %v426_v61 = vld [vmem:[%s5841_s23 + $0xac] sm:$0xf] }
  0xd1   : > { %1227 = vst [vmem:[#allocation1 + $0x6] ss:$9 sm:$0xff] %v857_v62  ;;  %v534_v62 = vrot.slane %v426_v61, 3 }
  0xd2   : > { %1228 = vst [vmem:[#allocation1 + $0x7] ss:$9 sm:$0xff] %v860_v63  ;;  %v933_v63 = vsel %vm553_vm2, %v425_v43, %v533_v47 }
  0xd3   : > { %v935_v2 = vrot.slane %v933_v63, 2  ;;  %v942_v3 = vsel %vm549_vm1, %v426_v61, %v534_v62  ;;  %v945_v6 = vsel %vm553_vm2, %v426_v61, %v534_v62 }
  0xd4   : > { %v944_v10 = vrot.slane %v942_v3, 1 }
  0xd6   : > { %5441 = vmatmul.msk.bf16.gmra.mxu0 %vm1341_vm4, %v1215_v57  ;;  %v930_v57 = vsel %vm549_vm1, %v425_v43, %v533_v47 }
  0xd7   : > { %v932_v60 = vrot.slane %v930_v57, 1 }
  0xd9   : > { %v1229_v12 = vld [vmem:[#allocation1] sm:$0xff] }
  0xda   : > { %1231 = vst [vmem:[#allocation1] ss:$9 sm:$0xff] %v863_v7  ;;  %v948_v7 = vsel %vm557_vm3, %v426_v61, %v534_v62 }
  0xdb   : > { %1233 = vst [vmem:[#allocation1 + $0x1] ss:$9 sm:$0xff] %v866_v8  ;;  %v535_v8 = vrot.slane %v427_v1, 3  ;;  %v950_v14 = vrot.slane %v948_v7, 3 }
  0xdc   : > { %1235 = vst [vmem:[#allocation1 + $0x2] ss:$9 sm:$0xff] %v869_v9  ;;  %v941_v9 = vsel %vm545_vm0, %v426_v61, %v534_v62  ;;  %v433_v62 = vld [vmem:[%s5841_s23 + $0xc8] sm:$0x1] }
  0xdd   : > { %1236 = vst [vmem:[#allocation1 + $0x3] ss:$9 sm:$0xff] %v872_v13  ;;  %v947_v13 = vrot.slane %v945_v6, 2 }
  0xde   : > { %1237 = vst [vmem:[#allocation1 + $0x4] ss:$9 sm:$0xff] %v875_v15  ;;  %v953_v15 = vsel %vm545_vm0, %v427_v1, %v535_v8  ;;  %v541_v1 = vrot.slane %v433_v62, 3 }
  0xdf   : > { %1239 = vst [vmem:[#allocation1 + $0x5] ss:$9 sm:$0xff] %v878_v16 }
  0xe0   : > { %1241 = vst [vmem:[#allocation1 + $0x6] ss:$9 sm:$0xff] %v881_v19  ;;  %v537_v19 = vrot.slane %v429_v18, 3 }
  0xe1   : > { %1243 = vst [vmem:[#allocation1 + $0x7] ss:$9 sm:$0xff] %v884_v20 }
  0xe2   : > { %v969_v26 = vsel %vm549_vm1, %v429_v18, %v537_v19  ;;  %v972_v29 = vsel %vm553_vm2, %v429_v18, %v537_v19 }
  0xe3   : > { %v971_v34 = vrot.slane %v969_v26, 1  ;;  %v974_v36 = vrot.slane %v972_v29, 2 }
  0xe6   : > { %5442 = vmatmul.msk.bf16.gmra.mxu0 %vm1341_vm4, %v1229_v12  ;;  %v536_v12 = vrot.slane %v428_v4, 3 }
  0xe8   : > { %v6017_v35 = vld [vmem:[#allocation1] sm:$0xff]  ;;  %v956_v16 = vsel %vm545_vm0, %v428_v4, %v536_v12  ;;  %v957_v20 = vsel %vm549_vm1, %v428_v4, %v536_v12  ;;  %v960_v21 = vsel %vm553_vm2, %v428_v4, %v536_v12  ;;  %v963_v22 = vsel %vm557_vm3, %v428_v4, %v536_v12 }
  0xe9   : > { %1245 = vst [vmem:[#allocation1] ss:$9 sm:$0xff] %v887_v30  ;;  %v959_v23 = vrot.slane %v957_v20, 1  ;;  %v962_v25 = vrot.slane %v960_v21, 2  ;;  %v965_v27 = vrot.slane %v963_v22, 3  ;;  %v975_v30 = vsel %vm557_vm3, %v429_v18, %v537_v19 }
  0xea   : > { %1247 = vst [vmem:[#allocation1 + $0x1] ss:$9 sm:$0xff] %v890_v31  ;;  %v6097_v21 = vld [vmem:[%s7600_s5] ss:$0 sm:$0xff]  ;;  %v436_v22 = vld [vmem:[%s5841_s23 + $0xd4] sm:$0x1] }
  0xeb   : > { %1249 = vst [vmem:[#allocation1 + $0x2] ss:$9 sm:$0xff] %v893_v32  ;;  %v538_v32 = vrot.slane %v430_v24, 3  ;;  %v544_v26 = vrot.slane %v436_v22, 3 }
  0xec   : > { %1251 = vst [vmem:[#allocation1 + $0x3] ss:$9 sm:$0xff] %v896_v33  ;;  %v968_v33 = vsel %vm545_vm0, %v429_v18, %v537_v19 }
  0xed   : > { %1252 = vst [vmem:[#allocation1 + $0x4] ss:$9 sm:$0xff] %v899_v37  ;;  %v431_v37 = vld [vmem:[%s5841_s23 + $0xc0] sm:$0xf] }
  0xee   : > { %1253 = vst [vmem:[#allocation1 + $0x5] ss:$9 sm:$0xff] %v902_v38  ;;  %v977_v38 = vrot.slane %v975_v30, 3  ;;  %v539_v40 = vrot.slane %v431_v37, 3 }
  0xef   : > { %1255 = vst [vmem:[#allocation1 + $0x6] ss:$9 sm:$0xff] %v905_v39  ;;  %v980_v39 = vsel %vm545_vm0, %v430_v24, %v538_v32 }
  0xf0   : > { %1257 = vst [vmem:[#allocation1 + $0x7] ss:$9 sm:$0xff] %v908_v41  ;;  %v432_v41 = vld [vmem:[%s5841_s23 + $0xc4] sm:$0xf]  ;;  %v984_v44 = vsel %vm549_vm1, %v431_v37, %v539_v40  ;;  %v987_v45 = vsel %vm553_vm2, %v431_v37, %v539_v40  ;;  %v990_v46 = vsel %vm557_vm3, %v431_v37, %v539_v40  ;;  %v983_v47 = vsel %vm545_vm0, %v431_v37, %v539_v40 }
  0xf1   : > { %v540_v43 = vrot.slane %v432_v41, 3  ;;  %v989_v49 = vrot.slane %v987_v45, 2  ;;  %v992_v51 = vrot.slane %v990_v46, 3 }
  0xf3   : > { %v996_v50 = vsel %vm549_vm1, %v432_v41, %v540_v43 }
  0xf4   : > { %v998_v57 = vrot.slane %v996_v50, 1 }
  0xf7   : > { %v6030_v55 = vld [vmem:[#allocation1] sm:$0xff] }
  0xf8   : > { %1260 = vst [vmem:[#allocation1] ss:$9 sm:$0xff] %v911_v48  ;;  %v986_v48 = vrot.slane %v984_v44, 1 }
  0xf9   : > { %1261 = vst [vmem:[#allocation1 + $0x1] ss:$9 sm:$0xff] %v914_v52  ;;  %v999_v52 = vsel %vm553_vm2, %v432_v41, %v540_v43 }
  0xfa   : > { %1263 = vst [vmem:[#allocation1 + $0x2] ss:$9 sm:$0xff] %v917_v53 }
  0xfb   : > { %1265 = vst [vmem:[#allocation1 + $0x3] ss:$9 sm:$0xff] %v920_v54  ;;  %v1002_v54 = vsel %vm557_vm3, %v432_v41, %v540_v43 }
  0xfc   : > { %1267 = vst [vmem:[#allocation1 + $0x4] ss:$9 sm:$0xff] %v923_v56  ;;  %v995_v56 = vsel %vm545_vm0, %v432_v41, %v540_v43  ;;  %v1004_v61 = vrot.slane %v1002_v54, 3 }
  0xfd   : > { %1268 = vst [vmem:[#allocation1 + $0x5] ss:$9 sm:$0xff] %v926_v58  ;;  %v1001_v58 = vrot.slane %v999_v52, 2 }
  0xfe   : > { %1269 = vst [vmem:[#allocation1 + $0x6] ss:$9 sm:$0xff] %v929_v59  ;;  %v1400_v59 = vpop.f32.mrf.mxu0  ;;  %5443 = vmatmul.msk.bf16.gmra.mxu0 %vm1341_vm4, %v6017_v35 }
  0xff   : > { %1271 = vst [vmem:[#allocation1 + $0x7] ss:$9 sm:$0xff] %v932_v60  ;;  %v434_v60 = vld [vmem:[%s5841_s23 + $0xcc] sm:$0xf] }
 0x100   : > { %v542_v63 = vrot.slane %v434_v60, 3 }
 0x102   : > { %v1011_v3 = vsel %vm549_vm1, %v434_v60, %v542_v63  ;;  %v1014_v4 = vsel %vm553_vm2, %v434_v60, %v542_v63  ;;  %v1017_v35 = vsel %vm557_vm3, %v434_v60, %v542_v63  ;;  %v1010_v6 = vsel %vm545_vm0, %v434_v60, %v542_v63 }
 0x103   : > { %v1013_v7 = vrot.slane %v1011_v3, 1 }
 0x106   : > { %v6044_v11 = vld [vmem:[#allocation1] sm:$0xff]  ;;  %v1403_v8 = vpop.f32.mrf.mxu0 }
 0x107   : > { %1274 = vst [vmem:[#allocation1] ss:$9 sm:$0xff] %v935_v2  ;;  %v543_v2 = vrot.slane %v435_v0, 3 }
 0x108   : > { %1276 = vst [vmem:[#allocation1 + $0x1] ss:$9 sm:$0xff] %v938_v5  ;;  %v1007_v5 = vsel %vm545_vm0, %v433_v62, %v541_v1  ;;  %v2473_v1 = vld [vmem:[%s7597_s2] sm:$0x3] }
 0x109   : > { %1277 = vst [vmem:[#allocation1 + $0x2] ss:$9 sm:$0xff] %v941_v9  ;;  %v1016_v9 = vrot.slane %v1014_v4, 2  ;;  %v3182_v3 = vsel %vm2960_vm5, %v2473_v1, 0 }
 0x10a   : > { %1279 = vst [vmem:[#allocation1 + $0x3] ss:$9 sm:$0xff] %v944_v10  ;;  %v1023_v10 = vsel %vm549_vm1, %v435_v0, %v543_v2  ;;  %5641 = vmatpush.bf16.msra.mxu2 %v3182_v3 }
 0x10b   : > { %1281 = vst [vmem:[#allocation1 + $0x4] ss:$9 sm:$0xff] %v947_v13  ;;  %v1019_v13 = vrot.slane %v1017_v35, 3  ;;  %v1025_v18 = vrot.slane %v1023_v10, 1 }
 0x10c   : > { %1283 = vst [vmem:[#allocation1 + $0x5] ss:$9 sm:$0xff] %v950_v14  ;;  %v1026_v14 = vsel %vm553_vm2, %v435_v0, %v543_v2 }
 0x10d   : > { %1284 = vst [vmem:[#allocation1 + $0x6] ss:$9 sm:$0xff] %v953_v15  ;;  %v6089_v15 = vld [vmem:[%s7599_s4] ss:$0 sm:$0xff]  ;;  %v1028_v19 = vrot.slane %v1026_v14, 2 }
 0x10e   : > { %1285 = vst [vmem:[#allocation1 + $0x7] ss:$9 sm:$0xff] %v956_v16  ;;  %v1022_v16 = vsel %vm545_vm0, %v435_v0, %v543_v2  ;;  %v1502_v20 = vmul.f32 %v6089_v15, %v6012_v28  ;;  %v1405_v24 = vpop.f32.mrf.mxu0  ;;  %5444 = vmatmul.msk.bf16.gmra.mxu0 %vm1341_vm4, %v6030_v55  ;;  %v1029_v28 = vsel %vm557_vm3, %v435_v0, %v543_v2 }
 0x10f   : > { %v1501_v29 = vmul.f32 %v6089_v15, %v6004_v17  ;;  %v1031_v30 = vrot.slane %v1029_v28, 3  ;;  %v1505_v46 = vmul.f32 %v6089_v15, %v1403_v8 }
 0x111   : > { %v1546_v55 = vadd.f32 %v6097_v21, %v1501_v29  ;;  %v1550_v54 = vadd.f32 %v6097_v21, %v1505_v46 }
 0x113   : > { %v1587_v17 = vmax.f32 %v1546_v55, 0.0 }
 0x115   : > { %v6056_v31 = vld [vmem:[#allocation1] sm:$0xff]  ;;  %v1670_v50 = vrot.slane %v1587_v17, 4  ;;  %v1671_v52 = vrot.slane %v1587_v17, 6 }
 0x116   : > { %1288 = vst [vmem:[#allocation1] ss:$9 sm:$0xff] %v959_v23  ;;  %v1503_v23 = vmul.f32 %v6089_v15, %v1398_v42  ;;  %v1408_v37 = vpop.f32.mrf.mxu0 }
 0x117   : > { %1290 = vst [vmem:[#allocation1 + $0x1] ss:$9 sm:$0xff] %v962_v25  ;;  %v1547_v25 = vadd.f32 %v6097_v21, %v1502_v20  ;;  %v1507_v62 = vmul.f32 %v6089_v15, %v1408_v37 }
 0x118   : > { %1292 = vst [vmem:[#allocation1 + $0x2] ss:$9 sm:$0xff] %v965_v27  ;;  %v1548_v27 = vadd.f32 %v6097_v21, %v1503_v23 }
 0x119   : > { %1293 = vst [vmem:[#allocation1 + $0x3] ss:$9 sm:$0xff] %v968_v33  ;;  %v1588_v32 = vmax.f32 %v1547_v25, 0.0  ;;  %v1034_v33 = vsel %vm545_vm0, %v436_v22, %v544_v26  ;;  %v1552_v4 = vadd.f32 %v6097_v21, %v1507_v62 }
 0x11a   : > { %1295 = vst [vmem:[#allocation1 + $0x4] ss:$9 sm:$0xff] %v971_v34 }
 0x11b   : > { %1297 = vst [vmem:[#allocation1 + $0x5] ss:$9 sm:$0xff] %v974_v36  ;;  %v1589_v36 = vmax.f32 %v1548_v27, 0.0  ;;  %v1673_v40 = vrot.slane %v1588_v32, 4  ;;  %v1674_v45 = vrot.slane %v1588_v32, 6 }
 0x11c   : > { %1299 = vst [vmem:[#allocation1 + $0x6] ss:$9 sm:$0xff] %v977_v38  ;;  %v1672_v38 = vrot.slane %v1588_v32, 2 }
 0x11d   : > { %1300 = vst [vmem:[#allocation1 + $0x7] ss:$9 sm:$0xff] %v980_v39  ;;  %v1504_v39 = vmul.f32 %v6089_v15, %v1400_v59  ;;  %v1675_v41 = vrot.slane %v1589_v36, 2  ;;  %v1676_v42 = vrot.slane %v1589_v36, 4  ;;  %v1677_v43 = vrot.slane %v1589_v36, 6 }
 0x11f   : > { %v1549_v44 = vadd.f32 %v6097_v21, %v1504_v39 }
 0x124   : > { %v6068_v53 = vld [vmem:[#allocation1] sm:$0xff] }
 0x125   : > { %1302 = vst [vmem:[#allocation1] ss:$9 sm:$0xff] %v983_v47  ;;  %v1410_v47 = vpop.f32.mrf.mxu0  ;;  %5445 = vmatmul.msk.bf16.gmra.mxu0 %vm1341_vm4, %v6044_v11  ;;  %v1591_v11 = vmax.f32 %v1550_v54, 0.0 }
 0x126   : > { %1304 = vst [vmem:[#allocation1 + $0x1] ss:$9 sm:$0xff] %v986_v48  ;;  %v1669_v48 = vrot.slane %v1587_v17, 2  ;;  %v1508_v25 = vmul.f32 %v6089_v15, %v1410_v47 }
 0x127   : > { %1306 = vst [vmem:[#allocation1 + $0x2] ss:$9 sm:$0xff] %v989_v49  ;;  %v1681_v2 = vrot.slane %v1591_v11, 2  ;;  %v1682_v10 = vrot.slane %v1591_v11, 4 }
 0x128   : > { %1308 = vst [vmem:[#allocation1 + $0x3] ss:$9 sm:$0xff] %v992_v51  ;;  %v1590_v51 = vmax.f32 %v1549_v44, 0.0  ;;  %v1553_v37 = vadd.f32 %v6097_v21, %v1508_v25 }
 0x129   : > { %1309 = vst [vmem:[#allocation1 + $0x4] ss:$9 sm:$0xff] %v995_v56  ;;  %v1808_v56 = vlaneseq }
 0x12a   : > { %1311 = vst [vmem:[#allocation1 + $0x5] ss:$9 sm:$0xff] %v998_v57  ;;  %v1678_v57 = vrot.slane %v1590_v51, 2  ;;  %v1679_v59 = vrot.slane %v1590_v51, 4  ;;  %v1680_v60 = vrot.slane %v1590_v51, 6 }
 0x12b   : > { %1313 = vst [vmem:[#allocation1 + $0x6] ss:$9 sm:$0xff] %v1001_v58  ;;  %v1506_v58 = vmul.f32 %v6089_v15, %v1405_v24  ;;  %v6122_v63 = vshrl.u32 %v1808_v56, 7 }
 0x12c   : > { %1315 = vst [vmem:[#allocation1 + $0x7] ss:$9 sm:$0xff] %v1004_v61 }
 0x12d   : > { %v1413_v61 = vpop.f32.mrf.mxu0  ;;  %v1551_v0 = vadd.f32 %v6097_v21, %v1506_v58  ;;  %vm1866_vm6 = vcmp.ge.s32.totalorder %v6122_v63, 1  ;;  %v6137_v8 = vadd.s32 16, %v6122_v63 }
 0x12e   : > { %v1509_v29 = vmul.f32 %v6089_v15, %v1413_v61 }
 0x12f   : > { %v1592_v35 = vmax.f32 %v1551_v0, 0.0  ;;  %7637 = vst [vmem:[#allocation2_spill] sm:$0xff] %v6137_v8  ;;  %vm1925_vm9 = vcmp.le.s32.totalorder %v6137_v8, 16 }
 0x131   : > { %v1685_v20 = vrot.slane %v1592_v35, 4  ;;  %v1686_v24 = vrot.slane %v1592_v35, 6 }
 0x133   : > { %v6083_v12 = vld [vmem:[#allocation1] sm:$0xff] }
 0x134   : > { %1317 = vst [vmem:[#allocation1] ss:$9 sm:$0xff] %v1007_v5 }
 0x135   : > { %1318 = vst [vmem:[#allocation1 + $0x1] ss:$9 sm:$0xff] %v1010_v6  ;;  %v6131_v6 = vpop.f32.mrf.mxu0  ;;  %5446 = vmatmul.msk.bf16.gmra.mxu0 %vm1341_vm4, %v6056_v31  ;;  %v5451_v31 = vld [vmem:[%s7597_s2 + $0x2] sm:$0x3] }
 0x136   : > { %1320 = vst [vmem:[#allocation1 + $0x2] ss:$9 sm:$0xff] %v1013_v7  ;;  %v5500_v7 = vld [vmem:[%s7597_s2 + $0x4] sm:$0x3]  ;;  %v2962_v28 = vsel %vm2960_vm5, %v5451_v31, 0  ;;  %v1510_v1 = vmul.f32 %v6089_v15, %v6131_v6 }
 0x137   : > { %1322 = vst [vmem:[#allocation1 + $0x3] ss:$9 sm:$0xff] %v1016_v9  ;;  %v6146_v14 = vsel %vm2960_vm5, %v5500_v7, 0  ;;  %5640 = vmatpush.bf16.msra.mxu1 %v2962_v28  ;;  %2971 = vmatpush.bf16.msrb.mxu0 %v2962_v28 }
 0x138   : > { %1324 = vst [vmem:[#allocation1 + $0x4] ss:$9 sm:$0xff] %v1019_v13  ;;  %v6143_v13 = vmax.f32 %v1552_v4, 0.0  ;;  %5642 = vmatpush.bf16.msra.mxu3 %v6146_v14  ;;  %v1555_v6 = vadd.f32 %v6097_v21, %v1510_v1 }
 0x139   : > { %1325 = vst [vmem:[#allocation1 + $0x5] ss:$9 sm:$0xff] %v1022_v16  ;;  %v1683_v16 = vrot.slane %v1591_v11, 6 }
 0x13a   : > { %1327 = vst [vmem:[#allocation1 + $0x6] ss:$9 sm:$0xff] %v1025_v18  ;;  %v1687_v26 = vrot.slane %v6143_v13, 2 }
 0x13b   : > { %1329 = vst [vmem:[#allocation1 + $0x7] ss:$9 sm:$0xff] %v1028_v19  ;;  %v1684_v19 = vrot.slane %v1592_v35, 2  ;;  %3191 = vmatpush.bf16.msra.mxu0 %v3182_v3 }
 0x13d   : > { %v1418_v55 = vpop.f32.mrf.mxu0 }
 0x13e   : > { %v1511_v3 = vmul.f32 %v6089_v15, %v1418_v55  ;;  %v1596_v55 = vmax.f32 %v1555_v6, 0.0 }
 0x140   : > { %v1556_v25 = vadd.f32 %v6097_v21, %v1511_v3 }
 0x142   : > { %v6109_v34 = vld [vmem:[#allocation1] sm:$0xff] }
 0x143   : > { %1332 = vst [vmem:[#allocation1] ss:$9 sm:$0xff] %v1031_v30 }
 0x144   : > { %1333 = vst [vmem:[#allocation1 + $0x1] ss:$9 sm:$0xff] %v1034_v33 }
 0x145   : > { %2096 = vst [vmem:[#allocation1 + $0x20] ss:$4 sm:$0xff] %v1588_v32 }
 0x146   : > { %2098 = vst [vmem:[#allocation1 + $0x21] ss:$4 sm:$0xff] %v1672_v38 }
 0x147   : > { %2100 = vst [vmem:[#allocation1 + $0x22] ss:$4 sm:$0xff] %v1673_v40 }
 0x148   : > { %2107 = vst [vmem:[#allocation1 + $0x20] ss:$4 sm:$0xff] %v1675_v41  ;;  %v1688_v41 = vrot.slane %v6143_v13, 4 }
 0x149   : > { %2108 = vst [vmem:[#allocation1 + $0x21] ss:$4 sm:$0xff] %v1676_v42 }
 0x14a   : > { %2109 = vst [vmem:[#allocation1 + $0x22] ss:$4 sm:$0xff] %v1677_v43  ;;  %v1594_v43 = vmax.f32 %v1553_v37, 0.0 }
 0x14b   : > { %v6117_v49 = vld [vmem:[#allocation1] sm:$0xff]  ;;  %2102 = vst [vmem:[#allocation1 + $0x23] ss:$4 sm:$0xff] %v1674_v45 }
 0x14c   : > { %2088 = vst [vmem:[#allocation1] ss:$4 sm:$0xff] %v1587_v17  ;;  %v1554_v17 = vadd.f32 %v6097_v21, %v1509_v29  ;;  %v1690_v54 = vrot.slane %v1594_v43, 2  ;;  %v1691_v56 = vrot.slane %v1594_v43, 4 }
 0x14d   : > { %2090 = vst [vmem:[#allocation1 + $0x1] ss:$4 sm:$0xff] %v1669_v48 }
 0x14e   : > { %2092 = vst [vmem:[#allocation1 + $0x2] ss:$4 sm:$0xff] %v1670_v50  ;;  %v6182_v47 = vmax.f32 %v1554_v17, 0.0 }
 0x14f   : > { %2094 = vst [vmem:[#allocation1 + $0x3] ss:$4 sm:$0xff] %v1671_v52  ;;  %v1689_v52 = vrot.slane %v6143_v13, 6 }
 0x150   : > { %2105 = vst [vmem:[#allocation1] ss:$4 sm:$0xff] %v1589_v36  ;;  %v1693_v62 = vrot.slane %v6182_v47, 2 }
 0x151   : > { %2110 = vst [vmem:[#allocation1 + $0x23] ss:$4 sm:$0xff] %v1590_v51 }
 0x152   : > { %2112 = vst [vmem:[#allocation1] ss:$4 sm:$0xff] %v1678_v57  ;;  %v6187_v57 = vpop.f32.mrf.mxu0  ;;  %5447 = vmatmul.msk.bf16.gmra.mxu0 %vm1341_vm4, %v6068_v53 }
 0x153   : > { %2113 = vst [vmem:[#allocation1 + $0x1] ss:$4 sm:$0xff] %v1679_v59 }
 0x154   : > { %2114 = vst [vmem:[#allocation1 + $0x2] ss:$4 sm:$0xff] %v1680_v60 }
 0x155   : > { %2115 = vst [vmem:[#allocation1 + $0x3] ss:$4 sm:$0xff] %v1591_v11  ;;  %v1692_v11 = vrot.slane %v1594_v43, 6 }
 0x158   : > { %v2111_v5 = vld.sshfl [vmem:[#allocation1 + $0x20] sm:$0xff pattern:$0x73625140] }
 0x159   : > { %2116 = vst [vmem:[#allocation1 + $0x20] ss:$4 sm:$0xff] %v1681_v2  ;;  %v2368_v9 = vsel %vm1866_vm6, %v2111_v5, 0.0 }
 0x15a   : > { %v6152_v22 = vpack.c.bf16 %v2368_v9, %v2368_v9  ;;  %v1423_v29 = vpop.f32.mrf.mxu0 }
 0x15c   : > { %v2117_v18 = vld.sshfl [vmem:[#allocation1] sm:$0xff pattern:$0x73625140]  ;;  %v5485_v36 = vrot.slane %v6152_v22, 9 }
 0x15d   : > { %2119 = vst [vmem:[#allocation1] ss:$4 sm:$0xff] %v1682_v10  ;;  %v6154_v23 = vpack.c.bf16 %v2117_v18, %v2117_v18 }
 0x15e   : > { %2120 = vst [vmem:[#allocation1 + $0x1] ss:$4 sm:$0xff] %v1683_v16 }
 0x15f   : > { %2121 = vst [vmem:[#allocation1 + $0x2] ss:$4 sm:$0xff] %v1592_v35  ;;  %v3301_v32 = vrot.slane %v6154_v23, 5 }
 0x160   : > { %v2118_v27 = vld.sshfl [vmem:[#allocation1 + $0x20] sm:$0xff pattern:$0x73625140]  ;;  %2122 = vst [vmem:[#allocation1 + $0x3] ss:$4 sm:$0xff] %v1684_v19 }
 0x161   : > { %2123 = vst [vmem:[#allocation1 + $0x20] ss:$4 sm:$0xff] %v1685_v20  ;;  %v2370_v33 = vsel %vm1925_vm9, %v2118_v27, 0.0  ;;  %v3302_v39 = vsel %vm6163_vm10, %v5485_v36, %v3301_v32  ;;  %v3303_v40 = vrot.slane %v3301_v32, 4  ;;  %v1695_v32 = vrot.slane %v6182_v47, 6 }
 0x162   : > { %2124 = vst [vmem:[#allocation1 + $0x21] ss:$4 sm:$0xff] %v1686_v24  ;;  %v6172_v38 = vpack.c.bf16 %v2370_v33, %v2370_v33  ;;  %v3408_v50 = vunpack.c.l.b16 %v3302_v39 }
 0x163   : > { %2125 = vst [vmem:[#allocation1 + $0x22] ss:$4 sm:$0xff] %v6143_v13  ;;  %v1694_v13 = vrot.slane %v6182_v47, 4 }
 0x164   : > { %2126 = vst [vmem:[#allocation1 + $0x23] ss:$4 sm:$0xff] %v1687_v26  ;;  %v3304_v42 = vrot.slane %v6172_v38, 5 }
 0x166   : > { %v3305_v44 = vsel %vm6163_vm10, %v3303_v40, %v3304_v42 }
 0x167   : > { %v2127_v45 = vld.sshfl [vmem:[#allocation1] sm:$0xff pattern:$0x73625140]  ;;  %v3409_v46 = vunpack.c.l.b16 %v3305_v44 }
 0x168   : > { %2129 = vst [vmem:[#allocation1] ss:$4 sm:$0xff] %v1688_v41  ;;  %v2371_v48 = vsel %vm1866_vm6, %v2127_v45, 0.0  ;;  %v5534_v41 = vld [vmem:[%s7597_s2 + $0x8] sm:$0x3] }
 0x169   : > { %v2425_v51 = vpack.c.bf16 %v2371_v48, %v2371_v48  ;;  %v6191_v58 = vpack.c.b16 %v3409_v46, %v3408_v50  ;;  %v3793_v50 = vsel %vm2960_vm5, %v5534_v41, 0 }
 0x16a   : > { %3802 = vmatpush.bf16.msrb.mxu2 %v3793_v50 }
 0x16b   : > { %v2128_v59 = vld.sshfl [vmem:[#allocation1 + $0x20] sm:$0xff pattern:$0x73625140]  ;;  %v2526_v60 = vshrl.u32 %v2425_v51, 16  ;;  %v2529_v61 = vshll.u32 %v2425_v51, 16  ;;  %v3089_v2 = vunpack.c.l.b16 %v2425_v51  ;;  %v5486_v20 = vrot.slane %v2425_v51, 9 }
 0x16c   : > { %2131 = vst [vmem:[#allocation1 + $0x20] ss:$4 sm:$0xff] %v1689_v52  ;;  %v2426_v0 = vpack.c.bf16 %v2128_v59, %v2128_v59  ;;  %v1696_v52 = vrot.slane %v1596_v55, 2 }
 0x16d   : > { %2132 = vst [vmem:[#allocation1 + $0x21] ss:$4 sm:$0xff] %v1594_v43  ;;  %v2528_v4 = vrot.slane %v2526_v60, 4  ;;  %v2531_v53 = vrot.slane %v2529_v61, 5  ;;  %v1597_v43 = vmax.f32 %v1556_v25, 0.0  ;;  %v1698_v60 = vrot.slane %v1596_v55, 6 }
 0x16e   : > { %2133 = vst [vmem:[#allocation1 + $0x22] ss:$4 sm:$0xff] %v1690_v54  ;;  %v3090_v5 = vunpack.c.l.b16 %v2426_v0  ;;  %v3308_v35 = vrot.slane %v2426_v0, 5  ;;  %v2535_v7 = vshll.u32 %v2426_v0, 16  ;;  %v2539_v9 = vshrl.u32 %v2426_v0, 16 }
 0x16f   : > { %v2130_v10 = vld.sshfl [vmem:[#allocation1] sm:$0xff pattern:$0x73625140]  ;;  %2134 = vst [vmem:[#allocation1 + $0x23] ss:$4 sm:$0xff] %v1691_v56  ;;  %v2532_v16 = vor.u32 %v2531_v53, %v2528_v4  ;;  %v1699_v1 = vrot.slane %v1597_v43, 2  ;;  %v1425_v53 = vpop.f32.mrf.mxu0  ;;  %5448 = vmatmul.msk.bf16.gmra.mxu0 %vm1341_vm4, %v6083_v12 }
 0x170   : > { %2136 = vst [vmem:[#allocation1] ss:$4 sm:$0xff] %v1692_v11  ;;  %v6198_v18 = vpack.c.b16 %v3090_v5, %v3089_v2  ;;  %v2373_v19 = vsel %vm1925_vm9, %v2130_v10, 0.0  ;;  %v3310_v24 = vrot.slane %v3308_v35, 4  ;;  %v2537_v28 = vrot.slane %v2535_v7, 5 }
 0x171   : > { %2137 = vst [vmem:[#allocation1 + $0x1] ss:$4 sm:$0xff] %v6182_v47  ;;  %v2427_v31 = vpack.c.bf16 %v2373_v19, %v2373_v19  ;;  %v3309_v26 = vsel %vm6163_vm10, %v5486_v20, %v3308_v35  ;;  %v2541_v27 = vrot.slane %v2539_v9, 4  ;;  %v2533_v36 = vrot.slane %v2532_v16, 4 }
 0x172   : > { %2138 = vst [vmem:[#allocation1 + $0x2] ss:$4 sm:$0xff] %v1693_v62  ;;  %5470 = vmatmul.msk.bf16.vlgmr.msra.gmra.mxu2 %vm2911_vm13, %v6198_v18  ;;  %v3410_v42 = vunpack.c.l.b16 %v3309_v26  ;;  %v1697_v11 = vrot.slane %v1596_v55, 4  ;;  %v1512_v2 = vmul.f32 %v6089_v15, %v6187_v57  ;;  %v1700_v5 = vrot.slane %v1597_v43, 4  ;;  %v5517_v57 = vld [vmem:[%s7597_s2 + $0x6] sm:$0x3] }
 0x173   : > { %2139 = vst [vmem:[#allocation1 + $0x3] ss:$4 sm:$0xff] %v1694_v13  ;;  %v3311_v33 = vrot.slane %v2427_v31, 5  ;;  %v2545_v37 = vshll.u32 %v2427_v31, 16  ;;  %v2542_v40 = vor.u32 %v2541_v27, %v2537_v28  ;;  %v2538_v44 = vsel %vm6212_vm14, %v2533_v36, %v2537_v28 }
 0x174   : > { %v2867_v61 = vunpack.c.l.b16 %v2538_v44  ;;  %v1701_v35 = vrot.slane %v1597_v43, 6  ;;  %v1513_v13 = vmul.f32 %v6089_v15, %v1423_v29  ;;  %v1557_v25 = vadd.f32 %v6097_v21, %v1512_v2 }
 0x175   : > { %v3312_v17 = vsel %vm6163_vm10, %v3310_v24, %v3311_v33  ;;  %v2543_v47 = vrot.slane %v2542_v40, 4  ;;  %v2547_v48 = vrot.slane %v2545_v37, 5  ;;  %v3637_v28 = vsel %vm2960_vm5, %v5517_v57, 0 }
 0x176   : > { %v2135_v45 = vld.sshfl [vmem:[#allocation1 + $0x20] sm:$0xff pattern:$0x73625140]  ;;  %v3411_v46 = vunpack.c.l.b16 %v3312_v17  ;;  %3646 = vmatpush.bf16.msrb.mxu1 %v3637_v28  ;;  %v1558_v37 = vadd.f32 %v6097_v21, %v1513_v13  ;;  %v1598_v17 = vmax.f32 %v1557_v25, 0.0 }
 0x177   : > { %2140 = vst [vmem:[#allocation1 + $0x20] ss:$4 sm:$0xff] %v1695_v32  ;;  %v2374_v51 = vsel %vm1866_vm6, %v2135_v45, 0.0  ;;  %v2548_v56 = vsel %vm6212_vm14, %v2543_v47, %v2547_v48  ;;  %v1428_v44 = vpop.f32.mrf.mxu0  ;;  %v1514_v47 = vmul.f32 %v6089_v15, %v1425_v53 }
 0x178   : > { %v6226_v54 = vpack.c.b16 %v3411_v46, %v3410_v42  ;;  %v2428_v59 = vpack.c.bf16 %v2374_v51, %v2374_v51  ;;  %v2868_v62 = vunpack.c.l.b16 %v2548_v56  ;;  %v1599_v51 = vmax.f32 %v1558_v37, 0.0 }
 0x179   : > { %v1704_v53 = vrot.slane %v1598_v17, 6 }
 0x17a   : > { %v2141_v0 = vld.sshfl [vmem:[#allocation1] sm:$0xff pattern:$0x73625140]  ;;  %5503 = vmatmul.msk.bf16.vlgmr.msra.gmra.mxu3 %vm2911_vm13, %v6226_v54  ;;  %v2550_v3 = vshrl.u32 %v2428_v59, 16  ;;  %v2553_v4 = vshll.u32 %v2428_v59, 16  ;;  %v6236_v7 = vpack.c.b16 %v2868_v62, %v2867_v61  ;;  %v3091_v10 = vunpack.c.l.b16 %v2428_v59 }
 0x17b   : > { %2143 = vst [vmem:[#allocation1] ss:$4 sm:$0xff] %v1596_v55  ;;  %v2429_v9 = vpack.c.bf16 %v2141_v0, %v2141_v0  ;;  %v5487_v29 = vrot.slane %v2428_v59, 9  ;;  %v1702_v61 = vrot.slane %v1598_v17, 2  ;;  %v1703_v62 = vrot.slane %v1598_v17, 4 }
 0x17c   : > { %2144 = vst [vmem:[#allocation1 + $0x1] ss:$4 sm:$0xff] %v1696_v52  ;;  %v2552_v16 = vrot.slane %v2550_v3, 4  ;;  %v2555_v6 = vrot.slane %v2553_v4, 5  ;;  %5454 = vmatmul.msk.bf16.vlgmr.msra.gmra.mxu1 %vm2911_vm13, %v6236_v7  ;;  %v1559_v4 = vadd.f32 %v6097_v21, %v1514_v47  ;;  %v1706_v13 = vrot.slane %v1599_v51, 4 }
 0x17d   : > { %2145 = vst [vmem:[#allocation1 + $0x2] ss:$4 sm:$0xff] %v1697_v11  ;;  %v3092_v12 = vunpack.c.l.b16 %v2429_v9  ;;  %v3315_v19 = vrot.slane %v2429_v9, 5  ;;  %v2559_v20 = vshll.u32 %v2429_v9, 16  ;;  %v2563_v31 = vshrl.u32 %v2429_v9, 16 }
 0x17e   : > { %v2142_v24 = vld.sshfl [vmem:[#allocation1 + $0x20] sm:$0xff pattern:$0x73625140]  ;;  %2146 = vst [vmem:[#allocation1 + $0x3] ss:$4 sm:$0xff] %v1698_v60  ;;  %v2556_v32 = vor.u32 %v2555_v6, %v2552_v16 }
 0x17f   : > { %2147 = vst [vmem:[#allocation1 + $0x20] ss:$4 sm:$0xff] %v1597_v43  ;;  %v6246_v26 = vpack.c.b16 %v3092_v12, %v3091_v10  ;;  %v2376_v27 = vsel %vm1925_vm9, %v2142_v24, 0.0  ;;  %v3317_v36 = vrot.slane %v3315_v19, 4  ;;  %v2561_v55 = vrot.slane %v2559_v20, 5  ;;  %v1430_v20 = vpop.f32.mrf.mxu0  ;;  %5449 = vmatmul.msk.bf16.gmra.mxu0 %vm1341_vm4, %v6109_v34 }
 0x180   : > { %2148 = vst [vmem:[#allocation1 + $0x21] ss:$4 sm:$0xff] %v1699_v1  ;;  %v2430_v33 = vpack.c.bf16 %v2376_v27, %v2376_v27  ;;  %v3316_v40 = vsel %vm6163_vm10, %v5487_v29, %v3315_v19  ;;  %v2565_v41 = vrot.slane %v2563_v31, 4  ;;  %v2557_v45 = vrot.slane %v2556_v32, 4 }
 0x181   : > { %2149 = vst [vmem:[#allocation1 + $0x22] ss:$4 sm:$0xff] %v1700_v5  ;;  %v3412_v50 = vunpack.c.l.b16 %v3316_v40  ;;  %v1705_v5 = vrot.slane %v1599_v51, 2  ;;  %v1515_v19 = vmul.f32 %v6089_v15, %v1428_v44  ;;  %v1707_v31 = vrot.slane %v1599_v51, 6 }
 0x182   : > { %2150 = vst [vmem:[#allocation1 + $0x23] ss:$4 sm:$0xff] %v1701_v35  ;;  %5471 = vmatmul.msk.bf16.gmra.mxu2 %vm2911_vm13, %v6246_v26  ;;  %v3318_v42 = vrot.slane %v2430_v33, 5  ;;  %v2569_v43 = vshll.u32 %v2430_v33, 16  ;;  %v2566_v46 = vor.u32 %v2565_v41, %v2561_v55  ;;  %v2562_v59 = vsel %vm6212_vm14, %v2557_v45, %v2561_v55 }
 0x183   : > { %v2869_v35 = vunpack.c.l.b16 %v2562_v59  ;;  %v1600_v24 = vmax.f32 %v1559_v4, 0.0  ;;  %v1560_v34 = vadd.f32 %v6097_v21, %v1515_v19  ;;  %v1516_v44 = vmul.f32 %v6089_v15, %v1430_v20 }
 0x184   : > { %v3319_v48 = vsel %vm6163_vm10, %v3317_v36, %v3318_v42  ;;  %v2567_v11 = vrot.slane %v2566_v46, 4  ;;  %v2571_v60 = vrot.slane %v2569_v43, 5 }
 0x185   : > { %v2151_v52 = vld.sshfl [vmem:[#allocation1] sm:$0xff pattern:$0x73625140]  ;;  %v3413_v56 = vunpack.c.l.b16 %v3319_v48  ;;  %v1708_v45 = vrot.slane %v1600_v24, 2 }
 0x186   : > { %2153 = vst [vmem:[#allocation1] ss:$4 sm:$0xff] %v1598_v17  ;;  %v2377_v0 = vsel %vm1866_vm6, %v2151_v52, 0.0  ;;  %v2572_v2 = vsel %vm6212_vm14, %v2567_v11, %v2571_v60  ;;  %v1601_v11 = vmax.f32 %v1560_v34, 0.0 }
 0x187   : > { %v6262_v1 = vpack.c.b16 %v3413_v56, %v3412_v50  ;;  %v2431_v3 = vpack.c.bf16 %v2377_v0, %v2377_v0  ;;  %v2870_v9 = vunpack.c.l.b16 %v2572_v2  ;;  %v1433_v59 = vpop.f32.mrf.mxu0 }
 0x189   : > { %v2152_v10 = vld.sshfl [vmem:[#allocation1 + $0x20] sm:$0xff pattern:$0x73625140]  ;;  %v2574_v16 = vshrl.u32 %v2431_v3, 16  ;;  %v2577_v6 = vshll.u32 %v2431_v3, 16  ;;  %v6269_v57 = vpack.c.b16 %v2870_v9, %v2869_v35  ;;  %v3093_v27 = vunpack.c.l.b16 %v2431_v3 }
 0x18a   : > { %2155 = vst [vmem:[#allocation1 + $0x20] ss:$4 sm:$0xff] %v1702_v61  ;;  %5504 = vmatmul.msk.bf16.gmra.mxu3 %vm2911_vm13, %v6262_v1  ;;  %v2432_v12 = vpack.c.bf16 %v2152_v10, %v2152_v10  ;;  %v5488_v42 = vrot.slane %v2431_v3, 9  ;;  %v1709_v35 = vrot.slane %v1600_v24, 4 }
 0x18b   : > { %2156 = vst [vmem:[#allocation1 + $0x21] ss:$4 sm:$0xff] %v1703_v62  ;;  %v2576_v25 = vrot.slane %v2574_v16, 4  ;;  %v2579_v28 = vrot.slane %v2577_v6, 5  ;;  %v1561_v62 = vadd.f32 %v6097_v21, %v1516_v44  ;;  %v1710_v16 = vrot.slane %v1600_v24, 6 }
 0x18c   : > { %2157 = vst [vmem:[#allocation1 + $0x22] ss:$4 sm:$0xff] %v1704_v53  ;;  %v3094_v29 = vunpack.c.l.b16 %v2432_v12  ;;  %v2583_v32 = vshll.u32 %v2432_v12, 16  ;;  %v2587_v33 = vshrl.u32 %v2432_v12, 16  ;;  %5455 = vmatmul.msk.bf16.gmra.mxu1 %vm2911_vm13, %v6269_v57  ;;  %v3322_v37 = vrot.slane %v2432_v12, 5 }
 0x18d   : > { %v2154_v36 = vld.sshfl [vmem:[#allocation1] sm:$0xff pattern:$0x73625140]  ;;  %2158 = vst [vmem:[#allocation1 + $0x23] ss:$4 sm:$0xff] %v1599_v51  ;;  %v2580_v41 = vor.u32 %v2579_v28, %v2576_v25  ;;  %v1711_v6 = vrot.slane %v1601_v11, 2 }
 0x18e   : > { %2160 = vst [vmem:[#allocation1] ss:$4 sm:$0xff] %v1705_v5  ;;  %v6276_v55 = vpack.c.b16 %v3094_v29, %v3093_v27  ;;  %v2379_v40 = vsel %vm1925_vm9, %v2154_v36, 0.0  ;;  %v2585_v43 = vrot.slane %v2583_v32, 5  ;;  %v2589_v46 = vrot.slane %v2587_v33, 4 }
 0x18f   : > { %2161 = vst [vmem:[#allocation1 + $0x1] ss:$4 sm:$0xff] %v1706_v13  ;;  %v2433_v17 = vpack.c.bf16 %v2379_v40, %v2379_v40  ;;  %v3323_v47 = vsel %vm6163_vm10, %v5488_v42, %v3322_v37  ;;  %v3324_v48 = vrot.slane %v3322_v37, 4  ;;  %v2581_v52 = vrot.slane %v2580_v41, 4  ;;  %v1435_v34 = vpop.f32.mrf.mxu0  ;;  %5450 = vmatmul.msk.bf16.gmra.mxu0 %vm1341_vm4, %v6117_v49 }
 0x190   : > { %2162 = vst [vmem:[#allocation1 + $0x2] ss:$4 sm:$0xff] %v1707_v31  ;;  %v2590_v56 = vor.u32 %v2589_v46, %v2585_v43  ;;  %v3414_v2 = vunpack.c.l.b16 %v3323_v47  ;;  %v6297_v31 = vmax.f32 %v1561_v62, 0.0  ;;  %v1712_v27 = vrot.slane %v1601_v11, 4 }
 0x191   : > { %2163 = vst [vmem:[#allocation1 + $0x3] ss:$4 sm:$0xff] %v1600_v24  ;;  %v3325_v50 = vrot.slane %v2433_v17, 5  ;;  %v2593_v51 = vshll.u32 %v2433_v17, 16  ;;  %v2586_v4 = vsel %vm6212_vm14, %v2581_v52, %v2585_v43  ;;  %v1517_v33 = vmul.f32 %v6089_v15, %v1433_v59 }
 0x192   : > { %5472 = vmatmul.msk.bf16.gmra.mxu2 %vm2911_vm13, %v6276_v55  ;;  %v2591_v53 = vrot.slane %v2590_v56, 4  ;;  %v2871_v12 = vunpack.c.l.b16 %v2586_v4  ;;  %v1713_v36 = vrot.slane %v1601_v11, 6  ;;  %v1714_v44 = vrot.slane %v6297_v31, 2 }
 0x193   : > { %v3326_v60 = vsel %vm6163_vm10, %v3324_v48, %v3325_v50  ;;  %v2595_v61 = vrot.slane %v2593_v51, 5  ;;  %v1562_v46 = vadd.f32 %v6097_v21, %v1517_v33  ;;  %v1518_v48 = vmul.f32 %v6089_v15, %v1435_v34 }
 0x194   : > { %v2159_v0 = vld.sshfl [vmem:[#allocation1 + $0x20] sm:$0xff pattern:$0x73625140]  ;;  %v3415_v3 = vunpack.c.l.b16 %v3326_v60  ;;  %v1715_v60 = vrot.slane %v6297_v31, 4 }
 0x195   : > { %2164 = vst [vmem:[#allocation1 + $0x20] ss:$4 sm:$0xff] %v1708_v45  ;;  %v2380_v5 = vsel %vm1866_vm6, %v2159_v0, 0.0  ;;  %v2596_v10 = vsel %vm6212_vm14, %v2591_v53, %v2595_v61  ;;  %v1603_v4 = vmax.f32 %v1562_v46, 0.0 }
 0x196   : > { %v6293_v9 = vpack.c.b16 %v3415_v3, %v3414_v2  ;;  %v2434_v13 = vpack.c.bf16 %v2380_v5, %v2380_v5  ;;  %v2872_v19 = vunpack.c.l.b16 %v2596_v10  ;;  %v1563_v3 = vadd.f32 %v6097_v21, %v1518_v48 }
 0x197   : > { %v1438_v10 = vpop.f32.mrf.mxu0  ;;  %v1717_v33 = vrot.slane %v1603_v4, 2 }
 0x198   : > { %v2165_v20 = vld.sshfl [vmem:[#allocation1] sm:$0xff pattern:$0x73625140]  ;;  %v2598_v25 = vshrl.u32 %v2434_v13, 16  ;;  %v2601_v28 = vshll.u32 %v2434_v13, 16  ;;  %v6299_v29 = vpack.c.b16 %v2872_v19, %v2871_v12  ;;  %v3095_v45 = vunpack.c.l.b16 %v2434_v13 }
 0x199   : > { %2167 = vst [vmem:[#allocation1] ss:$4 sm:$0xff] %v1709_v35  ;;  %v2435_v32 = vpack.c.bf16 %v2165_v20, %v2165_v20  ;;  %v5489_v59 = vrot.slane %v2434_v13, 9 }
 0x19a   : > { %2168 = vst [vmem:[#allocation1 + $0x1] ss:$4 sm:$0xff] %v1710_v16  ;;  %5505 = vmatmul.msk.bf16.gmra.mxu3 %vm2911_vm13, %v6293_v9  ;;  %v2600_v24 = vrot.slane %v2598_v25, 4  ;;  %v2603_v37 = vrot.slane %v2601_v28, 5  ;;  %v1716_v25 = vrot.slane %v6297_v31, 6 }
 0x19b   : > { %2169 = vst [vmem:[#allocation1 + $0x2] ss:$4 sm:$0xff] %v1601_v11  ;;  %v3096_v40 = vunpack.c.l.b16 %v2435_v32  ;;  %v3329_v41 = vrot.slane %v2435_v32, 5  ;;  %v2607_v17 = vshll.u32 %v2435_v32, 16  ;;  %v2611_v42 = vshrl.u32 %v2435_v32, 16 }
 0x19c   : > { %v2166_v43 = vld.sshfl [vmem:[#allocation1 + $0x20] sm:$0xff pattern:$0x73625140]  ;;  %2170 = vst [vmem:[#allocation1 + $0x3] ss:$4 sm:$0xff] %v1711_v6  ;;  %5456 = vmatmul.msk.bf16.gmra.mxu1 %vm2911_vm13, %v6299_v29  ;;  %v2604_v49 = vor.u32 %v2603_v37, %v2600_v24 }
 0x19d   : > { %2171 = vst [vmem:[#allocation1 + $0x20] ss:$4 sm:$0xff] %v1712_v27  ;;  %v2382_v47 = vsel %vm1925_vm9, %v2166_v43, 0.0  ;;  %v6313_v50 = vpack.c.b16 %v3096_v40, %v3095_v45  ;;  %v3331_v52 = vrot.slane %v3329_v41, 4  ;;  %v2609_v56 = vrot.slane %v2607_v17, 5 }
 0x19e   : > { %2172 = vst [vmem:[#allocation1 + $0x21] ss:$4 sm:$0xff] %v1713_v36  ;;  %v2436_v51 = vpack.c.bf16 %v2382_v47, %v2382_v47  ;;  %v2613_v11 = vrot.slane %v2611_v42, 4  ;;  %v3330_v0 = vsel %vm6163_vm10, %v5489_v59, %v3329_v41  ;;  %v2605_v5 = vrot.slane %v2604_v49, 4 }
 0x19f   : > { %2173 = vst [vmem:[#allocation1 + $0x22] ss:$4 sm:$0xff] %v6297_v31  ;;  %v3416_v12 = vunpack.c.l.b16 %v3330_v0  ;;  %v1604_v27 = vmax.f32 %v1563_v3, 0.0  ;;  %v1718_v36 = vrot.slane %v1603_v4, 4  ;;  %v1519_v41 = vmul.f32 %v6089_v15, %v1438_v10  ;;  %v1440_v49 = vpop.f32.mrf.mxu0 }
 0x1a0   : > { %2174 = vst [vmem:[#allocation1 + $0x23] ss:$4 sm:$0xff] %v1714_v44  ;;  %v3332_v61 = vrot.slane %v2436_v51, 5  ;;  %v2617_v62 = vshll.u32 %v2436_v51, 16  ;;  %v2614_v2 = vor.u32 %v2613_v11, %v2609_v56  ;;  %v2610_v19 = vsel %vm6212_vm14, %v2605_v5, %v2609_v56 }
 0x1a1   : > { %v2873_v40 = vunpack.c.l.b16 %v2610_v19  ;;  %v1719_v43 = vrot.slane %v1603_v4, 6  ;;  %v1720_v45 = vrot.slane %v1604_v27, 2  ;;  %v1721_v46 = vrot.slane %v1604_v27, 4 }
 0x1a2   : > { %5473 = vmatmul.msk.bf16.gmra.mxu2 %vm2911_vm13, %v6313_v50  ;;  %v3333_v53 = vsel %vm6163_vm10, %v3331_v52, %v3332_v61  ;;  %v2619_v35 = vrot.slane %v2617_v62, 5  ;;  %v2615_v6 = vrot.slane %v2614_v2, 4  ;;  %v1564_v59 = vadd.f32 %v6097_v21, %v1519_v41 }
 0x1a3   : > { %v2175_v13 = vld.sshfl [vmem:[#allocation1] sm:$0xff pattern:$0x73625140]  ;;  %v3417_v16 = vunpack.c.l.b16 %v3333_v53  ;;  %v1520_v61 = vmul.f32 %v6089_v15, %v1440_v49 }
 0x1a4   : > { %2177 = vst [vmem:[#allocation1] ss:$4 sm:$0xff] %v1715_v60  ;;  %v2383_v20 = vsel %vm1866_vm6, %v2175_v13, 0.0  ;;  %v2620_v28 = vsel %vm6212_vm14, %v2615_v6, %v2619_v35  ;;  %v1722_v13 = vrot.slane %v1604_v27, 6 }
 0x1a5   : > { %v2437_v32 = vpack.c.bf16 %v2383_v20, %v2383_v20  ;;  %v6331_v24 = vpack.c.b16 %v3417_v16, %v3416_v12  ;;  %v2874_v37 = vunpack.c.l.b16 %v2620_v28  ;;  %v1605_v16 = vmax.f32 %v1564_v59, 0.0 }
 0x1a6   : > { %v1565_v20 = vadd.f32 %v6097_v21, %v1520_v61 }
 0x1a7   : > { %v2176_v34 = vld.sshfl [vmem:[#allocation1 + $0x20] sm:$0xff pattern:$0x73625140]  ;;  %v2622_v17 = vshrl.u32 %v2437_v32, 16  ;;  %v2625_v42 = vshll.u32 %v2437_v32, 16  ;;  %v6334_v31 = vpack.c.b16 %v2874_v37, %v2873_v40  ;;  %v3097_v56 = vunpack.c.l.b16 %v2437_v32 }
 0x1a8   : > { %2179 = vst [vmem:[#allocation1 + $0x20] ss:$4 sm:$0xff] %v1716_v25  ;;  %v2438_v44 = vpack.c.bf16 %v2176_v34, %v2176_v34  ;;  %v5490_v3 = vrot.slane %v2437_v32, 9  ;;  %v1443_v34 = vpop.f32.mrf.mxu0  ;;  %v1723_v40 = vrot.slane %v1605_v16, 2 }
 0x1a9   : > { %2180 = vst [vmem:[#allocation1 + $0x21] ss:$4 sm:$0xff] %v1603_v4  ;;  %v2624_v48 = vrot.slane %v2622_v17, 4  ;;  %v2627_v51 = vrot.slane %v2625_v42, 5  ;;  %v1606_v42 = vmax.f32 %v1565_v20, 0.0  ;;  %v1521_v49 = vmul.f32 %v6089_v15, %v1443_v34 }
 0x1aa   : > { %2181 = vst [vmem:[#allocation1 + $0x22] ss:$4 sm:$0xff] %v1717_v33  ;;  %5506 = vmatmul.msk.bf16.gmra.mxu3 %vm2911_vm13, %v6331_v24  ;;  %v3098_v47 = vunpack.c.l.b16 %v2438_v44  ;;  %v3336_v11 = vrot.slane %v2438_v44, 5  ;;  %v2631_v62 = vshll.u32 %v2438_v44, 16  ;;  %v2635_v0 = vshrl.u32 %v2438_v44, 16 }
 0x1ab   : > { %v2178_v52 = vld.sshfl [vmem:[#allocation1] sm:$0xff pattern:$0x73625140]  ;;  %2182 = vst [vmem:[#allocation1 + $0x23] ss:$4 sm:$0xff] %v1718_v36  ;;  %v2628_v5 = vor.u32 %v2627_v51, %v2624_v48  ;;  %v1725_v48 = vrot.slane %v1605_v16, 6 }
 0x1ac   : > { %2184 = vst [vmem:[#allocation1] ss:$4 sm:$0xff] %v1719_v43  ;;  %v2385_v60 = vsel %vm1925_vm9, %v2178_v52, 0.0  ;;  %5457 = vmatmul.msk.bf16.gmra.mxu1 %vm2911_vm13, %v6334_v31  ;;  %v3338_v4 = vrot.slane %v3336_v11, 4  ;;  %v6344_v53 = vpack.c.b16 %v3098_v47, %v3097_v56  ;;  %v2633_v35 = vrot.slane %v2631_v62, 5 }
 0x1ad   : > { %2185 = vst [vmem:[#allocation1 + $0x1] ss:$4 sm:$0xff] %v1604_v27  ;;  %v2439_v2 = vpack.c.bf16 %v2385_v60, %v2385_v60  ;;  %v2637_v10 = vrot.slane %v2635_v0, 4  ;;  %v3337_v19 = vsel %vm6163_vm10, %v5490_v3, %v3336_v11  ;;  %v2629_v36 = vrot.slane %v2628_v5, 4 }
 0x1ae   : > { %2186 = vst [vmem:[#allocation1 + $0x2] ss:$4 sm:$0xff] %v1720_v45  ;;  %v3418_v41 = vunpack.c.l.b16 %v3337_v19  ;;  %v1726_v61 = vrot.slane %v1606_v42, 2  ;;  %v1727_v62 = vrot.slane %v1606_v42, 4  ;;  %v1728_v0 = vrot.slane %v1606_v42, 6 }
 0x1af   : > { %2187 = vst [vmem:[#allocation1 + $0x3] ss:$4 sm:$0xff] %v1721_v46  ;;  %v3339_v6 = vrot.slane %v2439_v2, 5  ;;  %v2641_v12 = vshll.u32 %v2439_v2, 16  ;;  %v2638_v25 = vor.u32 %v2637_v10, %v2633_v35  ;;  %v2634_v43 = vsel %vm6212_vm14, %v2629_v36, %v2633_v35 }
 0x1b0   : > { %v1724_v46 = vrot.slane %v1605_v16, 4  ;;  %v2875_v11 = vunpack.c.l.b16 %v2634_v43  ;;  %v1566_v3 = vadd.f32 %v6097_v21, %v1521_v49 }
 0x1b1   : > { %v3340_v28 = vsel %vm6163_vm10, %v3338_v4, %v3339_v6  ;;  %v2639_v27 = vrot.slane %v2638_v25, 4  ;;  %v2643_v37 = vrot.slane %v2641_v12, 5  ;;  %v6372_v6 = vld [vmem:[%s7599_s4] ss:$0 sm:$0xff] }
 0x1b2   : > { %v2183_v32 = vld.sshfl [vmem:[#allocation1 + $0x20] sm:$0xff pattern:$0x73625140]  ;;  %5474 = vmatmul.msk.bf16.gmra.mxu2 %vm2911_vm13, %v6344_v53  ;;  %v3419_v33 = vunpack.c.l.b16 %v3340_v28  ;;  %v1607_v28 = vmax.f32 %v1566_v3, 0.0 }
 0x1b3   : > { %2188 = vst [vmem:[#allocation1 + $0x20] ss:$4 sm:$0xff] %v1722_v13  ;;  %v2386_v17 = vsel %vm1866_vm6, %v2183_v32, 0.0  ;;  %v2644_v44 = vsel %vm6212_vm14, %v2639_v27, %v2643_v37  ;;  %v1445_v13 = vpop.f32.mrf.mxu0 }
 0x1b4   : > { %v2440_v45 = vpack.c.bf16 %v2386_v17, %v2386_v17  ;;  %v2876_v47 = vunpack.c.l.b16 %v2644_v44  ;;  %v6360_v51 = vpack.c.b16 %v3419_v33, %v3418_v41  ;;  %v1522_v21 = vmul.f32 %v6372_v6, %v1445_v13 }
 0x1b5   : > { %v1729_v44 = vrot.slane %v1607_v28, 2 }
 0x1b6   : > { %v2189_v52 = vld.sshfl [vmem:[#allocation1] sm:$0xff pattern:$0x73625140]  ;;  %v2646_v56 = vshrl.u32 %v2440_v45, 16  ;;  %v2649_v59 = vshll.u32 %v2440_v45, 16  ;;  %v6362_v2 = vpack.c.b16 %v2876_v47, %v2875_v11  ;;  %v3099_v19 = vunpack.c.l.b16 %v2440_v45 }
 0x1b7   : > { %v2441_v60 = vpack.c.bf16 %v2189_v52, %v2189_v52  ;;  %2191 = vst [vmem:[#allocation1] ss:$4 sm:$0xff] %v1605_v16  ;;  %v5491_v34 = vrot.slane %v2440_v45, 9  ;;  %v1731_v11 = vrot.slane %v1607_v28, 6 }
 0x1b8   : > { %2192 = vst [vmem:[#allocation1 + $0x1] ss:$4 sm:$0xff] %v1723_v40  ;;  %v2648_v4 = vrot.slane %v2646_v56, 4  ;;  %v2651_v15 = vrot.slane %v2649_v59, 5  ;;  %v6382_v40 = vld [vmem:[%s7600_s5] ss:$0 sm:$0xff] }
 0x1b9   : > { %2193 = vst [vmem:[#allocation1 + $0x2] ss:$4 sm:$0xff] %v1724_v46  ;;  %v3100_v35 = vunpack.c.l.b16 %v2441_v60  ;;  %v3343_v10 = vrot.slane %v2441_v60, 5  ;;  %v2655_v12 = vshll.u32 %v2441_v60, 16  ;;  %v2659_v32 = vshrl.u32 %v2441_v60, 16 }
 0x1ba   : > { %v2190_v5 = vld.sshfl [vmem:[#allocation1 + $0x20] sm:$0xff pattern:$0x73625140]  ;;  %5507 = vmatmul.msk.bf16.gmra.mxu3 %vm2911_vm13, %v6360_v51  ;;  %2194 = vst [vmem:[#allocation1 + $0x3] ss:$4 sm:$0xff] %v1725_v48  ;;  %v2652_v27 = vor.u32 %v2651_v15, %v2648_v4  ;;  %v1567_v41 = vadd.f32 %v6382_v40, %v1522_v21  ;;  %v1730_v46 = vrot.slane %v1607_v28, 4 }
 0x1bb   : > { %2195 = vst [vmem:[#allocation1 + $0x20] ss:$4 sm:$0xff] %v1606_v42  ;;  %v2388_v16 = vsel %vm1925_vm9, %v2190_v5, 0.0  ;;  %v3345_v25 = vrot.slane %v3343_v10, 4  ;;  %v6377_v33 = vpack.c.b16 %v3100_v35, %v3099_v19  ;;  %v2657_v37 = vrot.slane %v2655_v12, 5  ;;  %v1448_v59 = vpop.f32.mrf.mxu0 }
 0x1bc   : > { %2196 = vst [vmem:[#allocation1 + $0x21] ss:$4 sm:$0xff] %v1726_v61  ;;  %v2442_v20 = vpack.c.bf16 %v2388_v16, %v2388_v16  ;;  %5458 = vmatmul.msk.bf16.gmra.mxu1 %vm2911_vm13, %v6362_v2  ;;  %v2661_v17 = vrot.slane %v2659_v32, 4  ;;  %v3344_v47 = vsel %vm6163_vm10, %v5491_v34, %v3343_v10  ;;  %v2653_v48 = vrot.slane %v2652_v27, 4 }
 0x1bd   : > { %2197 = vst [vmem:[#allocation1 + $0x22] ss:$4 sm:$0xff] %v1727_v62  ;;  %v1608_v60 = vmax.f32 %v1567_v41, 0.0  ;;  %v1523_v62 = vmul.f32 %v6372_v6, %v1448_v59 }
 0x1be   : > { %2198 = vst [vmem:[#allocation1 + $0x23] ss:$4 sm:$0xff] %v1728_v0  ;;  %v3346_v36 = vrot.slane %v2442_v20, 5  ;;  %v2665_v43 = vshll.u32 %v2442_v20, 16  ;;  %v2662_v52 = vor.u32 %v2661_v17, %v2657_v37  ;;  %v3420_v0 = vunpack.c.l.b16 %v3344_v47 }
 0x1bf   : > { %v2658_v3 = vsel %vm6212_vm14, %v2653_v48, %v2657_v37  ;;  %v1568_v35 = vadd.f32 %v6382_v40, %v1523_v62  ;;  %v1732_v19 = vrot.slane %v1608_v60, 2  ;;  %v1734_v32 = vrot.slane %v1608_v60, 6 }
 0x1c0   : > { %v3347_v42 = vsel %vm6163_vm10, %v3345_v25, %v3346_v36  ;;  %v2663_v4 = vrot.slane %v2662_v52, 4  ;;  %v2667_v15 = vrot.slane %v2665_v43, 5  ;;  %v2877_v20 = vunpack.c.l.b16 %v2658_v3 }
 0x1c1   : > { %v2199_v49 = vld.sshfl [vmem:[#allocation1] sm:$0xff pattern:$0x73625140]  ;;  %v3421_v45 = vunpack.c.l.b16 %v3347_v42  ;;  %v6401_v36 = vmax.f32 %v1568_v35, 0.0 }
 0x1c2   : > { %5475 = vmatmul.msk.bf16.gmra.mxu2 %vm2911_vm13, %v6377_v33  ;;  %v2389_v56 = vsel %vm1866_vm6, %v2199_v49, 0.0  ;;  %2201 = vst [vmem:[#allocation1] ss:$4 sm:$0xff] %v1607_v28  ;;  %v2668_v16 = vsel %vm6212_vm14, %v2663_v4, %v2667_v15  ;;  %v1733_v28 = vrot.slane %v1608_v60, 4 }
 0x1c3   : > { %v2443_v61 = vpack.c.bf16 %v2389_v56, %v2389_v56  ;;  %v6397_v13 = vpack.c.b16 %v3421_v45, %v3420_v0  ;;  %v2878_v25 = vunpack.c.l.b16 %v2668_v16  ;;  %v1450_v42 = vpop.f32.mrf.mxu0  ;;  %v1735_v59 = vrot.slane %v6401_v36, 2 }
 0x1c4   : > { %v1524_v47 = vmul.f32 %v6372_v6, %v1450_v42 }
 0x1c5   : > { %v2200_v5 = vld.sshfl [vmem:[#allocation1 + $0x20] sm:$0xff pattern:$0x73625140]  ;;  %v2670_v10 = vshrl.u32 %v2443_v61, 16  ;;  %v2673_v12 = vshll.u32 %v2443_v61, 16  ;;  %v6403_v37 = vpack.c.b16 %v2878_v25, %v2877_v20  ;;  %v5492_v15 = vrot.slane %v2443_v61, 9 }
 0x1c6   : > { %2203 = vst [vmem:[#allocation1 + $0x20] ss:$4 sm:$0xff] %v1729_v44  ;;  %v2444_v21 = vpack.c.bf16 %v2200_v5, %v2200_v5 }
 0x1c7   : > { %2204 = vst [vmem:[#allocation1 + $0x21] ss:$4 sm:$0xff] %v1730_v46  ;;  %v2672_v41 = vrot.slane %v2670_v10, 4  ;;  %v2675_v17 = vrot.slane %v2673_v12, 5  ;;  %v3101_v46 = vunpack.c.l.b16 %v2443_v61 }
 0x1c8   : > { %2205 = vst [vmem:[#allocation1 + $0x22] ss:$4 sm:$0xff] %v1731_v11  ;;  %v2679_v27 = vshll.u32 %v2444_v21, 16  ;;  %v3102_v34 = vunpack.c.l.b16 %v2444_v21  ;;  %v3350_v44 = vrot.slane %v2444_v21, 5  ;;  %v2683_v52 = vshrl.u32 %v2444_v21, 16 }
 0x1c9   : > { %2206 = vst [vmem:[#allocation1 + $0x23] ss:$4 sm:$0xff] %v1608_v60  ;;  %v2202_v43 = vld.sshfl [vmem:[#allocation1] sm:$0xff pattern:$0x73625140]  ;;  %v1569_v11 = vadd.f32 %v6382_v40, %v1524_v47  ;;  %v2676_v60 = vor.u32 %v2675_v17, %v2672_v41  ;;  %v2502_v41 = vshrl.u32 %v6152_v22, 16 }
 0x1ca   : > { %5508 = vmatmul.msk.bf16.gmra.mxu3 %vm2911_vm13, %v6397_v13  ;;  %v2391_v49 = vsel %vm1925_vm9, %v2202_v43, 0.0  ;;  %2208 = vst [vmem:[#allocation1] ss:$4 sm:$0xff] %v1732_v19  ;;  %v2681_v48 = vrot.slane %v2679_v27, 5  ;;  %v6412_v56 = vpack.c.b16 %v3102_v34, %v3101_v46  ;;  %v3352_v62 = vrot.slane %v3350_v44, 4 }
 0x1cb   : > { %v2445_v45 = vpack.c.bf16 %v2391_v49, %v2391_v49  ;;  %2209 = vst [vmem:[#allocation1 + $0x1] ss:$4 sm:$0xff] %v1733_v28  ;;  %v2685_v3 = vrot.slane %v2683_v52, 4  ;;  %v1610_v21 = vmax.f32 %v1569_v11, 0.0  ;;  %v3351_v12 = vsel %vm6163_vm10, %v5492_v15, %v3350_v44  ;;  %v1453_v28 = vpop.f32.mrf.mxu0 }
 0x1cc   : > { %5459 = vmatmul.msk.bf16.gmra.mxu1 %vm2911_vm13, %v6403_v37  ;;  %2210 = vst [vmem:[#allocation1 + $0x2] ss:$4 sm:$0xff] %v1734_v32  ;;  %v2677_v19 = vrot.slane %v2676_v60, 4  ;;  %v1525_v27 = vmul.f32 %v6372_v6, %v1453_v28  ;;  %v1736_v17 = vrot.slane %v6401_v36, 4  ;;  %v3422_v42 = vunpack.c.l.b16 %v3351_v12 }
 0x1cd   : > { %v3353_v0 = vrot.slane %v2445_v45, 5  ;;  %2211 = vst [vmem:[#allocation1 + $0x3] ss:$4 sm:$0xff] %v6401_v36  ;;  %v2689_v4 = vshll.u32 %v2445_v45, 16  ;;  %v2686_v10 = vor.u32 %v2685_v3, %v2681_v48  ;;  %v2505_v44 = vshll.u32 %v6152_v22, 16 }
 0x1ce   : > { %v2682_v32 = vsel %vm6212_vm14, %v2677_v19, %v2681_v48  ;;  %v1737_v46 = vrot.slane %v6401_v36, 6  ;;  %v1739_v47 = vrot.slane %v1610_v21, 4  ;;  %v1570_v45 = vadd.f32 %v6382_v40, %v1525_v27 }
 0x1cf   : > { %v3354_v35 = vsel %vm6163_vm10, %v3352_v62, %v3353_v0  ;;  %v2691_v16 = vrot.slane %v2689_v4, 5  ;;  %v2687_v25 = vrot.slane %v2686_v10, 4  ;;  %v1740_v52 = vrot.slane %v1610_v21, 6 }
 0x1d0   : > { %v2207_v5 = vld.sshfl [vmem:[#allocation1 + $0x20] sm:$0xff pattern:$0x73625140]  ;;  %v3423_v20 = vunpack.c.l.b16 %v3354_v35  ;;  %v2879_v11 = vunpack.c.l.b16 %v2682_v32  ;;  %v1738_v62 = vrot.slane %v1610_v21, 2  ;;  %v6437_v0 = vmax.f32 %v1570_v45, 0.0 }
 0x1d1   : > { %2212 = vst [vmem:[#allocation1 + $0x20] ss:$4 sm:$0xff] %v1735_v59  ;;  %v2392_v61 = vsel %vm1866_vm6, %v2207_v5, 0.0  ;;  %v2692_v43 = vsel %vm6212_vm14, %v2687_v25, %v2691_v16  ;;  %v2511_v25 = vshll.u32 %v6154_v23, 16 }
 0x1d2   : > { %5476 = vmatmul.msk.bf16.gmra.mxu2 %vm2911_vm13, %v6412_v56  ;;  %v2446_v34 = vpack.c.bf16 %v2392_v61, %v2392_v61  ;;  %v2880_v49 = vunpack.c.l.b16 %v2692_v43  ;;  %v6435_v59 = vpack.c.b16 %v3423_v20, %v3422_v42  ;;  %v1741_v35 = vrot.slane %v6437_v0, 2 }
 0x1d3   : > { %v1455_v12 = vpop.f32.mrf.mxu0 }
 0x1d4   : > { %v2213_v48 = vld.sshfl [vmem:[#allocation1] sm:$0xff pattern:$0x73625140]  ;;  %v2694_v3 = vshrl.u32 %v2446_v34, 16  ;;  %v2697_v4 = vshll.u32 %v2446_v34, 16  ;;  %v6439_v5 = vpack.c.b16 %v2880_v49, %v2879_v11  ;;  %v3103_v28 = vunpack.c.l.b16 %v2446_v34 }
 0x1d5   : > { %v2447_v60 = vpack.c.bf16 %v2213_v48, %v2213_v48  ;;  %2215 = vst [vmem:[#allocation1] ss:$4 sm:$0xff] %v1736_v17  ;;  %v1526_v61 = vmul.f32 %v6372_v6, %v1455_v12  ;;  %v5493_v45 = vrot.slane %v2446_v34, 9  ;;  %v1743_v34 = vrot.slane %v6437_v0, 6 }
 0x1d6   : > { %2216 = vst [vmem:[#allocation1 + $0x1] ss:$4 sm:$0xff] %v1737_v46  ;;  %v2696_v32 = vrot.slane %v2694_v3, 4  ;;  %v2699_v27 = vrot.slane %v2697_v4, 5 }
 0x1d7   : > { %2217 = vst [vmem:[#allocation1 + $0x2] ss:$4 sm:$0xff] %v1610_v21  ;;  %v3357_v36 = vrot.slane %v2447_v60, 5  ;;  %v3104_v10 = vunpack.c.l.b16 %v2447_v60  ;;  %v2515_v21 = vshrl.u32 %v6154_v23, 16  ;;  %v2703_v42 = vshll.u32 %v2447_v60, 16 }
 0x1d8   : > { %v2214_v15 = vld.sshfl [vmem:[#allocation1 + $0x20] sm:$0xff pattern:$0x73625140]  ;;  %7642 = vst [vmem:[#allocation3_spill] sm:$0xff] %v6439_v5  ;;  %v2707_v43 = vshrl.u32 %v2447_v60, 16  ;;  %v1571_v49 = vadd.f32 %v6382_v40, %v1526_v61  ;;  %v6462_v61 = vrot.slane %v2511_v25, 5 }
 0x1d9   : > { %2219 = vst [vmem:[#allocation1 + $0x20] ss:$4 sm:$0xff] %v1739_v47  ;;  %v2394_v16 = vsel %vm1925_vm9, %v2214_v15, 0.0  ;;  %v3359_v20 = vrot.slane %v3357_v36, 4  ;;  %v6452_v47 = vpack.c.b16 %v3104_v10, %v3103_v28  ;;  %v2705_v11 = vrot.slane %v2703_v42, 5 }
 0x1da   : > { %2220 = vst [vmem:[#allocation1 + $0x21] ss:$4 sm:$0xff] %v1740_v52  ;;  %5509 = vmatmul.msk.bf16.gmra.mxu3 %vm2911_vm13, %v6435_v59  ;;  %v2448_v19 = vpack.c.bf16 %v2394_v16, %v2394_v16  ;;  %v2700_v52 = vor.u32 %v2699_v27, %v2696_v32  ;;  %v2709_v3 = vrot.slane %v2707_v43, 4  ;;  %v6457_v4 = vmax.f32 %v1571_v49, 0.0 }
 0x1db   : > { %2221 = vst [vmem:[#allocation1 + $0x22] ss:$4 sm:$0xff] %v6437_v0  ;;  %v5756_v15 = vmov 0   ;;  %v2507_v16 = vrot.slane %v2505_v44, 5  ;;  %v3358_v10 = vsel %vm6163_vm10, %v5493_v45, %v3357_v36  ;;  %v1458_v44 = vpop.f32.mrf.mxu0  ;;  %v1742_v36 = vrot.slane %v6437_v0, 4 }
 0x1dc   : > { %2222 = vst [vmem:[#allocation1 + $0x23] ss:$4 sm:$0xff] %v1741_v35  ;;  %v3360_v17 = vrot.slane %v2448_v19, 5  ;;  %v2713_v46 = vshll.u32 %v2448_v19, 16  ;;  %5460 = vmatmul.msk.bf16.gmra.mxu1 %vm2911_vm13, %v6439_v5  ;;  %v2480_v60 = vrot.slane %v5756_v15, 4  ;;  %v2504_v35 = vrot.slane %v2502_v41, 4 }
 0x1dd   : > { %2218 = vst [vmem:[#allocation1 + $0x3] ss:$4 sm:$0xff] %v1738_v62  ;;  %v2710_v12 = vor.u32 %v2709_v3, %v2705_v11  ;;  %v2483_v19 = vrot.slane %v5756_v15, 5  ;;  %v1744_v32 = vrot.slane %v6457_v4, 2  ;;  %v2701_v27 = vrot.slane %v2700_v52, 4 }
 0x1de   : > { %v3361_v48 = vsel %vm6163_vm10, %v3359_v20, %v3360_v17  ;;  %v2715_v62 = vrot.slane %v2713_v46, 5  ;;  %v2517_v20 = vrot.slane %v2515_v21, 4  ;;  %v1745_v43 = vrot.slane %v6457_v4, 4 }
 0x1df   : > { %v3425_v28 = vunpack.c.l.b16 %v3361_v48  ;;  %v2711_v41 = vrot.slane %v2710_v12, 4  ;;  %v2484_v17 = vor.u32 %v2483_v19, %v2480_v60  ;;  %v3424_v46 = vunpack.c.l.b16 %v3358_v10 }
 0x1e0   : > { %v1527_v49 = vmul.f32 %v6372_v6, %v1458_v44  ;;  %v2706_v25 = vsel %vm6212_vm14, %v2701_v27, %v2705_v11  ;;  %v2508_v12 = vor.u32 %v2507_v16, %v2504_v35 }
 0x1e1   : > { %v2716_v21 = vsel %vm6212_vm14, %v2711_v41, %v2715_v62  ;;  %v2485_v45 = vrot.slane %v2484_v17, 4  ;;  %v6478_v60 = vpack.c.b16 %v3425_v28, %v3424_v46  ;;  %v2881_v62 = vunpack.c.l.b16 %v2706_v25 }
 0x1e2   : > { %5477 = vmatmul.msk.bf16.gmra.mxu2 %vm2911_vm13, %v6452_v47  ;;  %v2882_v3 = vunpack.c.l.b16 %v2716_v21  ;;  %v1572_v0 = vadd.f32 %v6382_v40, %v1527_v49  ;;  %v2518_v17 = vor.u32 %v2517_v20, %v6462_v61  ;;  %v2521_v28 = vshll.u32 %v6172_v38, 16 }
 0x1e3   : > { %v2224_v42 = vld.sshfl [vmem:[#allocation1 + $0x20] sm:$0xff pattern:$0x73625140]  ;;  %7643 = vst [vmem:[#allocation4_spill] sm:$0xff] %v6478_v60  ;;  %v2490_v11 = vsel %vm6212_vm14, %v2485_v45, %v2483_v19  ;;  %v1460_v35 = vpop.f32.mrf.mxu0  ;;  %v2509_v20 = vrot.slane %v2508_v12, 4  ;;  %v1746_v25 = vrot.slane %v6457_v4, 6 }
 0x1e4   : > { %2227 = vst [vmem:[#allocation1 + $0x20] ss:$4 sm:$0xff] %v1743_v34  ;;  %v2223_v48 = vld.sshfl [vmem:[#allocation1] sm:$0xff pattern:$0x73625140]  ;;  %v2450_v52 = vpack.c.bf16 %v2224_v42, %v2224_v42  ;;  %v1613_v34 = vmax.f32 %v1572_v0, 0.0  ;;  %v2863_v27 = vunpack.c.l.b16 %v2490_v11  ;;  %v6483_v42 = vpack.c.b16 %v2882_v3, %v2881_v62 }
 0x1e5   : > { %2228 = vst [vmem:[#allocation1 + $0x21] ss:$4 sm:$0xff] %v6457_v4  ;;  %v2395_v15 = vsel %vm1866_vm6, %v2223_v48, 0.0  ;;  %v2519_v48 = vrot.slane %v2518_v17, 4  ;;  %v1528_v12 = vmul.f32 %v6372_v6, %v1460_v35 }
 0x1e6   : > { %2229 = vst [vmem:[#allocation1 + $0x22] ss:$4 sm:$0xff] %v1744_v32  ;;  %v2449_v10 = vpack.c.bf16 %v2395_v15, %v2395_v15  ;;  %v2727_v41 = vshll.u32 %v2450_v52, 16  ;;  %v6485_v49 = vpack.c.b16 %v2863_v27, %v2863_v27  ;;  %v3106_v19 = vunpack.c.l.b16 %v2450_v52 }
 0x1e7   : > { %2230 = vst [vmem:[#allocation1 + $0x23] ss:$4 sm:$0xff] %v1745_v43  ;;  %v1749_v43 = vrot.slane %v1613_v34, 6  ;;  %v2731_v46 = vshrl.u32 %v2450_v52, 16  ;;  %v3364_v3 = vrot.slane %v2450_v52, 5  ;;  %v2523_v15 = vrot.slane %v2521_v28, 5 }
 0x1e8   : > { %2225 = vst [vmem:[#allocation1] ss:$4 sm:$0xff] %v1742_v36  ;;  %v2718_v44 = vshrl.u32 %v2449_v10, 16  ;;  %v2721_v32 = vshll.u32 %v2449_v10, 16  ;;  %5452 = vmatmul.msk.bf16.vlgmr.msrb.gmra.mxu0 %vm2911_vm13, %v6485_v49  ;;  %v2729_v36 = vrot.slane %v2727_v41, 5  ;;  %v3105_v21 = vunpack.c.l.b16 %v2449_v10 }
 0x1e9   : > { %7644 = vst [vmem:[#allocation5_spill] sm:$0xff] %v6483_v42  ;;  %3512 = vmatpush.bf16.msrb.mxu0 %v6146_v14  ;;  %v5494_v38 = vrot.slane %v2449_v10, 9  ;;  %v2733_v0 = vrot.slane %v2731_v46, 4  ;;  %v1747_v62 = vrot.slane %v1613_v34, 2  ;;  %v1748_v4 = vrot.slane %v1613_v34, 4 }
 0x1ea   : > { %7645 = vst [vmem:[#allocation6_spill] sm:$0xff] %v6485_v49  ;;  %5510 = vmatmul.msk.bf16.gmra.mxu3 %vm2911_vm13, %v6478_v60  ;;  %v2720_v16 = vrot.slane %v2718_v44, 4  ;;  %v2723_v45 = vrot.slane %v2721_v32, 5  ;;  %v6496_v27 = vpack.c.b16 %v3106_v19, %v3105_v21  ;;  %v2514_v52 = vsel %vm6212_vm14, %v2509_v20, %v6462_v61 }
 0x1eb   : > { %v2734_v17 = vor.u32 %v2733_v0, %v2729_v36  ;;  %v3365_v19 = vsel %vm6163_vm10, %v5494_v38, %v3364_v3  ;;  %v3366_v35 = vrot.slane %v3364_v3, 4  ;;  %v1463_v46 = vpop.f32.mrf.mxu0  ;;  %v2865_v38 = vunpack.c.l.b16 %v2514_v52 }
 0x1ec   : > { %5461 = vmatmul.msk.bf16.gmra.mxu1 %vm2911_vm13, %v6483_v42  ;;  %v2724_v41 = vor.u32 %v2723_v45, %v2720_v16  ;;  %v2524_v16 = vsel %vm6212_vm14, %v2519_v48, %v2523_v15  ;;  %v1529_v21 = vmul.f32 %v6372_v6, %v1463_v46 }
 0x1ee   : > { %v2231_v11 = vld.sshfl [vmem:[#allocation1 + $0x20] sm:$0xff pattern:$0x73625140]  ;;  %v2725_v32 = vrot.slane %v2724_v41, 4 }
 0x1ef   : > { %2236 = vst [vmem:[#allocation1 + $0x20] ss:$4 sm:$0xff] %v1749_v43  ;;  %v2226_v44 = vld.sshfl [vmem:[#allocation1] sm:$0xff pattern:$0x73625140]  ;;  %v2398_v10 = vsel %vm1866_vm6, %v2231_v11, 0.0  ;;  %v1573_v43 = vadd.f32 %v6382_v40, %v1528_v12  ;;  %v1574_v11 = vadd.f32 %v6382_v40, %v1529_v21 }
 0x1f0   : > { %v2397_v14 = vsel %vm1925_vm9, %v2226_v44, 0.0  ;;  %2232 = vst [vmem:[#allocation1] ss:$4 sm:$0xff] %v1746_v25  ;;  %v2730_v61 = vsel %vm6212_vm14, %v2725_v32, %v2729_v36  ;;  %v6515_v20 = vpack.c.bf16 %v2398_v10, %v2398_v10 }
 0x1f1   : > { %v2451_v28 = vpack.c.bf16 %v2397_v14, %v2397_v14  ;;  %2233 = vst [vmem:[#allocation1 + $0x1] ss:$4 sm:$0xff] %v1613_v34  ;;  %v2735_v34 = vrot.slane %v2734_v17, 4  ;;  %v1614_v41 = vmax.f32 %v1573_v43, 0.0  ;;  %v2883_v14 = vunpack.c.l.b16 %v2730_v61 }
 0x1f2   : > { %5478 = vmatmul.msk.bf16.gmra.mxu2 %vm2911_vm13, %v6496_v27  ;;  %2234 = vst [vmem:[#allocation1 + $0x2] ss:$4 sm:$0xff] %v1747_v62  ;;  %v2742_v48 = vshrl.u32 %v6515_v20, 16  ;;  %v2745_v3 = vshll.u32 %v6515_v20, 16  ;;  %v2866_v62 = vunpack.c.l.b16 %v2524_v16  ;;  %v1615_v17 = vmax.f32 %v1574_v11, 0.0 }
 0x1f3   : > { %v3367_v25 = vrot.slane %v2451_v28, 5  ;;  %2235 = vst [vmem:[#allocation1 + $0x3] ss:$4 sm:$0xff] %v1748_v4  ;;  %v2737_v45 = vshll.u32 %v2451_v28, 16  ;;  %v3426_v4 = vunpack.c.l.b16 %v3365_v19  ;;  %v1750_v61 = vrot.slane %v1614_v41, 2 }
 0x1f4   : > { %v2744_v10 = vrot.slane %v2742_v48, 4  ;;  %v1753_v21 = vrot.slane %v1615_v17, 2  ;;  %v1754_v16 = vrot.slane %v1615_v17, 4  ;;  %v6529_v19 = vpack.c.b16 %v2866_v62, %v2865_v38  ;;  %v1465_v48 = vpop.f32.mrf.mxu0 }
 0x1f5   : > { %v3203_v0 = vpop.f32.mrf.mxu2  ;;  %v3368_v15 = vsel %vm6163_vm10, %v3366_v35, %v3367_v25  ;;  %v2739_v36 = vrot.slane %v2737_v45, 5  ;;  %v2747_v25 = vrot.slane %v2745_v3, 5  ;;  %v1755_v45 = vrot.slane %v1615_v17, 6 }
 0x1f6   : > { %v2238_v12 = vld.sshfl [vmem:[#allocation1 + $0x20] sm:$0xff pattern:$0x73625140]  ;;  %v3427_v44 = vunpack.c.l.b16 %v3368_v15  ;;  %v1752_v38 = vrot.slane %v1614_v41, 6  ;;  %v3107_v62 = vunpack.c.l.b16 %v6515_v20 }
 0x1f7   : > { %v2740_v32 = vsel %vm6212_vm14, %v2735_v34, %v2739_v36  ;;  %v2400_v52 = vsel %vm1925_vm9, %v2238_v12, 0.0  ;;  %2243 = vst [vmem:[#allocation1 + $0x20] ss:$4 sm:$0xff] %v1615_v17  ;;  %v1751_v36 = vrot.slane %v1614_v41, 4  ;;  %v1530_v12 = vmul.f32 %v6372_v6, %v1465_v48 }
 0x1f8   : > { %v6527_v28 = vpack.c.b16 %v3427_v44, %v3426_v4  ;;  %v2884_v35 = vunpack.c.l.b16 %v2740_v32  ;;  %v2454_v46 = vpack.c.bf16 %v2400_v52, %v2400_v52  ;;  %2244 = vst [vmem:[#allocation1 + $0x21] ss:$4 sm:$0xff] %v1753_v21  ;;  %5453 = vmatmul.msk.bf16.gmra.mxu0 %vm2911_vm13, %v6529_v19  ;;  %v2748_v44 = vor.u32 %v2747_v25, %v2744_v10 }
 0x1f9   : > { %v2983_v43 = vpop.f32.mrf.mxu1  ;;  %2245 = vst [vmem:[#allocation1 + $0x22] ss:$4 sm:$0xff] %v1754_v16  ;;  %v1575_v32 = vadd.f32 %v6382_v40, %v1530_v12  ;;  %v5495_v25 = vrot.slane %v6515_v20, 9 }
 0x1fa   : > { %7646 = vst [vmem:[#allocation7_spill] sm:$0xff] %v6527_v28  ;;  %5511 = vmatmul.msk.bf16.gmra.mxu3 %vm2911_vm13, %v6527_v28  ;;  %v6533_v34 = vpack.c.b16 %v2884_v35, %v2883_v14  ;;  %v2237_v15 = vld.sshfl [vmem:[#allocation1] sm:$0xff pattern:$0x73625140]  ;;  %v3204_v11 = vadd.f32 %v3203_v0, %v2983_v43  ;;  %v3374_v4 = vrot.slane %v2454_v46, 5  ;;  %v2761_v16 = vshll.u32 %v2454_v46, 16 }
 0x1fb   : > { %v2453_v3 = vpack.c.bf16 %v2237_v15, %v2237_v15  ;;  %2246 = vst [vmem:[#allocation1 + $0x23] ss:$4 sm:$0xff] %v1755_v45  ;;  %v1616_v10 = vmax.f32 %v1575_v32, 0.0  ;;  %v7609_v32 = vmov 0.0|0.0  }
 0x1fc   : > { %7647 = vst [vmem:[#allocation8_spill] sm:$0xff] %v6533_v34  ;;  %5462 = vmatmul.msk.bf16.gmra.mxu1 %vm2911_vm13, %v6533_v34  ;;  %v1468_v20 = vpop.f32.mrf.mxu0 }
 0x1fd   : > { %v3524_v17 = vpop.f32.mrf.mxu3  ;;  %v3205_v14 = vpop.f32.mrf.mxu2  ;;  %v3108_v0 = vunpack.c.l.b16 %v2453_v3  ;;  %v3371_v52 = vrot.slane %v2453_v3, 5  ;;  %v2751_v35 = vshll.u32 %v2453_v3, 16  ;;  %2239 = vst [vmem:[#allocation1] ss:$4 sm:$0xff] %v1614_v41  ;;  %v2755_v43 = vshrl.u32 %v2453_v3, 16 }
 0x1fe   : > { %v6542_v21 = vadd.f32 %v3524_v17, %v3204_v11  ;;  %2240 = vst [vmem:[#allocation1 + $0x1] ss:$4 sm:$0xff] %v1750_v61  ;;  %v1756_v28 = vrot.slane %v1616_v10, 2  ;;  %v2749_v11 = vrot.slane %v2748_v44, 4  ;;  %v1757_v61 = vrot.slane %v1616_v10, 4 }
 0x1ff   : > { %v6544_v15 = vpack.c.b16 %v3108_v0, %v3107_v62  ;;  %v3373_v45 = vrot.slane %v3371_v52, 4  ;;  %2241 = vst [vmem:[#allocation1 + $0x2] ss:$4 sm:$0xff] %v1751_v36  ;;  %v2753_v48 = vrot.slane %v2751_v35, 5  ;;  %v2757_v49 = vrot.slane %v2755_v43, 4 }
 0x200   : > { %7648 = vst [vmem:[#allocation9_spill] sm:$0xff] %v6542_v21  ;;  %v3372_v12 = vsel %vm6163_vm10, %v5495_v25, %v3371_v52  ;;  %v2763_v36 = vrot.slane %v2761_v16, 5  ;;  %v1758_v0 = vrot.slane %v1616_v10, 6  ;;  %v3085_v52 = vunpack.c.l.b16 %v7609_v32 }
 0x201   : > { %2242 = vst [vmem:[#allocation1 + $0x3] ss:$4 sm:$0xff] %v1752_v38  ;;  %v3375_v41 = vsel %vm6163_vm10, %v3373_v45, %v3374_v4  ;;  %v2985_v46 = vpop.f32.mrf.mxu1  ;;  %v2758_v62 = vor.u32 %v2757_v49, %v2753_v48  ;;  %v1531_v38 = vmul.f32 %v6372_v6, %v1468_v20  ;;  %v5552_v4 = vld [vmem:[%s7597_s2 + $0xa] sm:$0x3]  ;;  %v3428_v44 = vunpack.c.l.b16 %v3372_v12 }
 0x202   : > { %5479 = vmatmul.msk.bf16.gmra.mxu2 %vm2911_vm13, %v6544_v15  ;;  %v3429_v3 = vunpack.c.l.b16 %v3375_v41  ;;  %v3206_v17 = vadd.f32 %v3205_v14, %v2985_v46  ;;  %v2754_v35 = vsel %vm6212_vm14, %v2749_v11, %v2753_v48  ;;  %v2248_v25 = vld.sshfl [vmem:[#allocation1 + $0x20] sm:$0xff pattern:$0x73625140]  ;;  %v3933_v49 = vsel %vm2960_vm5, %v5552_v4, 0 }
 0x203   : > { %v2759_v43 = vrot.slane %v2758_v62, 4  ;;  %v1576_v45 = vadd.f32 %v6382_v40, %v1531_v38  ;;  %v6562_v41 = vpack.c.bf16 %v2248_v25, %v2248_v25  ;;  %2251 = vst [vmem:[#allocation1 + $0x20] ss:$4 sm:$0xff] %v1756_v28  ;;  %3942 = vmatpush.bf16.msrb.mxu3 %v3933_v49  ;;  %v2885_v11 = vunpack.c.l.b16 %v2754_v35 }
 0x204   : > { %v6566_v20 = vpack.c.b16 %v3429_v3, %v3428_v44  ;;  %2252 = vst [vmem:[#allocation1 + $0x21] ss:$4 sm:$0xff] %v1757_v61  ;;  %v6570_v4 = vpack.c.b16 %v3085_v52, %v3085_v52 }
 0x205   : > { %v3526_v16 = vpop.f32.mrf.mxu3  ;;  %v3208_v14 = vpop.f32.mrf.mxu2  ;;  %v2764_v12 = vsel %vm6212_vm14, %v2759_v43, %v2763_v36  ;;  %v1617_v48 = vmax.f32 %v1576_v45, 0.0  ;;  %2253 = vst [vmem:[#allocation1 + $0x22] ss:$4 sm:$0xff] %v1758_v0  ;;  %v2775_v38 = vshll.u32 %v6562_v41, 16  ;;  %v2779_v28 = vshrl.u32 %v6562_v41, 16 }
 0x206   : > { %v6564_v46 = vadd.f32 %v3526_v16, %v3206_v17  ;;  %7650 = vst [vmem:[#allocation11_spill] sm:$0xff] %v6566_v20  ;;  %v2886_v62 = vunpack.c.l.b16 %v2764_v12  ;;  %v1470_v36 = vpop.f32.mrf.mxu0  ;;  %v3110_v52 = vunpack.c.l.b16 %v6562_v41 }
 0x207   : > { %7651 = vst [vmem:[#allocation12_spill] sm:$0xff] %v6570_v4  ;;  %v1759_v44 = vrot.slane %v1617_v48, 2  ;;  %v2777_v35 = vrot.slane %v2775_v38, 5 }
 0x208   : > { %7649 = vst [vmem:[#allocation10_spill] sm:$0xff] %v6564_v46  ;;  %v2247_v32 = vld.sshfl [vmem:[#allocation1] sm:$0xff pattern:$0x73625140]  ;;  %v6573_v25 = vpack.c.b16 %v2886_v62, %v2885_v11  ;;  %5468 = vmatmul.msk.bf16.vlgmr.msra.gmra.mxu0 %vm2911_vm13, %v6570_v4  ;;  %v1760_v11 = vrot.slane %v1617_v48, 4  ;;  %v3378_v62 = vrot.slane %v6562_v41, 5 }
 0x209   : > { %2249 = vst [vmem:[#allocation1] ss:$4 sm:$0xff] %v1616_v10  ;;  %v2988_v3 = vpop.f32.mrf.mxu1  ;;  %v2401_v61 = vsel %vm1866_vm6, %v2247_v32, 0.0  ;;  %v1532_v10 = vmul.f32 %v6372_v6, %v1470_v36 }
 0x20a   : > { %7652 = vst [vmem:[#allocation13_spill] sm:$0xff] %v6573_v25  ;;  %5512 = vmatmul.msk.bf16.gmra.mxu3 %vm2911_vm13, %v6566_v20  ;;  %v3209_v17 = vadd.f32 %v3208_v14, %v2988_v3  ;;  %v2455_v0 = vpack.c.bf16 %v2401_v61, %v2401_v61  ;;  %v2781_v14 = vrot.slane %v2779_v28, 4  ;;  %v1761_v61 = vrot.slane %v1617_v48, 6 }
 0x20b   : > { %2254 = vst [vmem:[#allocation1 + $0x23] ss:$4 sm:$0xff] %v1617_v48  ;;  %v1577_v32 = vadd.f32 %v6382_v40, %v1532_v10 }
 0x20c   : > { %5463 = vmatmul.msk.bf16.gmra.mxu1 %vm2911_vm13, %v6573_v25  ;;  %v3109_v16 = vunpack.c.l.b16 %v2455_v0  ;;  %v2766_v45 = vshrl.u32 %v2455_v0, 16  ;;  %v2769_v3 = vshll.u32 %v2455_v0, 16  ;;  %v2782_v28 = vor.u32 %v2781_v14, %v2777_v35 }
 0x20d   : > { %v3529_v43 = vpop.f32.mrf.mxu3  ;;  %v3210_v49 = vpop.f32.mrf.mxu2  ;;  %v6592_v38 = vmax.f32 %v1577_v32, 0.0  ;;  %v3088_v32 = vunpack.c.l.b16 %v6154_v23  ;;  %v7655_v23 = vmov 0.0|0.0  }
 0x20e   : > { %v6587_v12 = vadd.f32 %v3529_v43, %v3209_v17  ;;  %v6590_v36 = vpack.c.b16 %v3110_v52, %v3109_v16  ;;  %v2768_v4 = vrot.slane %v2766_v45, 4  ;;  %v2771_v21 = vrot.slane %v2769_v3, 5  ;;  %v1473_v41 = vpop.f32.mrf.mxu0 }
 0x20f   : > { %v1762_v20 = vrot.slane %v6592_v38, 2  ;;  %v3087_v17 = vunpack.c.l.b16 %v6152_v22  ;;  %v5496_v52 = vrot.slane %v2455_v0, 9 }
 0x210   : > { %7653 = vst [vmem:[#allocation14_spill] sm:$0xff] %v6587_v12  ;;  %v2250_v46 = vld.sshfl [vmem:[#allocation1] sm:$0xff pattern:$0x73625140]  ;;  %v2772_v16 = vor.u32 %v2771_v21, %v2768_v4  ;;  %v1533_v12 = vmul.f32 %v6372_v6, %v1473_v41 }
 0x211   : > { %7654 = vst [vmem:[#allocation15_spill] sm:$0xff] %v6590_v36  ;;  %v2403_v10 = vsel %vm1925_vm9, %v2250_v46, 0.0  ;;  %v2990_v43 = vpop.f32.mrf.mxu1  ;;  %v3380_v46 = vrot.slane %v3378_v62, 4 }
 0x212   : > { %2256 = vst [vmem:[#allocation1] ss:$4 sm:$0xff] %v1759_v44  ;;  %5480 = vmatmul.msk.bf16.gmra.mxu2 %vm2911_vm13, %v6590_v36  ;;  %v2457_v48 = vpack.c.bf16 %v2403_v10, %v2403_v10  ;;  %v2255_v45 = vld.sshfl [vmem:[#allocation1 + $0x20] sm:$0xff pattern:$0x73625140]  ;;  %v3211_v3 = vadd.f32 %v3210_v49, %v2990_v43  ;;  %v3379_v44 = vsel %vm6163_vm10, %v5496_v52, %v3378_v62  ;;  %v2773_v0 = vrot.slane %v2772_v16, 4 }
 0x213   : > { %2257 = vst [vmem:[#allocation1 + $0x1] ss:$4 sm:$0xff] %v1760_v11  ;;  %v2404_v22 = vsel %vm1866_vm6, %v2255_v45, 0.0  ;;  %v6608_v10 = vrot.slane %v7655_v23, 5  ;;  %v1578_v49 = vadd.f32 %v6382_v40, %v1533_v12  ;;  %v2783_v43 = vrot.slane %v2782_v28, 4 }
 0x214   : > { %2258 = vst [vmem:[#allocation1 + $0x2] ss:$4 sm:$0xff] %v1761_v61  ;;  %v3381_v14 = vrot.slane %v2457_v48, 5  ;;  %v2785_v11 = vshll.u32 %v2457_v48, 16  ;;  %v6611_v61 = vpack.c.bf16 %v2404_v22, %v2404_v22  ;;  %v2778_v52 = vsel %vm6212_vm14, %v2773_v0, %v2777_v35 }
 0x215   : > { %2259 = vst [vmem:[#allocation1 + $0x3] ss:$4 sm:$0xff] %v6592_v38  ;;  %v3531_v21 = vpop.f32.mrf.mxu3  ;;  %v3213_v4 = vpop.f32.mrf.mxu2  ;;  %v1619_v16 = vmax.f32 %v1578_v49, 0.0  ;;  %v3430_v45 = vunpack.c.l.b16 %v3379_v44  ;;  %v6619_v36 = vpack.c.b16 %v3088_v32, %v3087_v17  ;;  %v5484_v12 = vrot.slane %v7655_v23, 9 }
 0x216   : > { %2260 = vst [vmem:[#allocation1 + $0x20] ss:$4 sm:$0xff] %v1762_v20  ;;  %v6613_v41 = vadd.f32 %v3531_v21, %v3211_v3  ;;  %v3382_v62 = vsel %vm6163_vm10, %v3380_v46, %v3381_v14  ;;  %v2787_v48 = vrot.slane %v2785_v11, 5  ;;  %v1763_v28 = vrot.slane %v6592_v38, 4  ;;  %v1475_v11 = vpop.f32.mrf.mxu0 }
 0x217   : > { %v3431_v25 = vunpack.c.l.b16 %v3382_v62  ;;  %v1764_v20 = vrot.slane %v6592_v38, 6  ;;  %v2887_v46 = vunpack.c.l.b16 %v2778_v52  ;;  %v3111_v35 = vunpack.c.l.b16 %v6611_v61 }
 0x218   : > { %7656 = vst [vmem:[#allocation16_spill] sm:$0xff] %v6613_v41  ;;  %v2788_v3 = vsel %vm6212_vm14, %v2783_v43, %v2787_v48  ;;  %v3296_v14 = vrot.slane %v6608_v10, 4  ;;  %v1765_v0 = vrot.slane %v1619_v16, 2  ;;  %v1766_v17 = vrot.slane %v1619_v16, 4  ;;  %5469 = vmatmul.msk.bf16.gmra.mxu0 %vm2911_vm13, %v6619_v36 }
 0x219   : > { %v6626_v22 = vpack.c.b16 %v3431_v25, %v3430_v45  ;;  %v2993_v44 = vpop.f32.mrf.mxu1  ;;  %v2888_v32 = vunpack.c.l.b16 %v2788_v3  ;;  %v2790_v21 = vshrl.u32 %v6611_v61, 16  ;;  %v1767_v49 = vrot.slane %v1619_v16, 6 }
 0x21a   : > { %v3214_v23 = vadd.f32 %v3213_v4, %v2993_v44  ;;  %v1534_v25 = vmul.f32 %v6372_v6, %v1475_v11  ;;  %v2793_v43 = vshll.u32 %v6611_v61, 16  ;;  %v3295_v4 = vsel %vm6163_vm10, %v5484_v12, %v6608_v10 }
 0x21b   : > { %7657 = vst [vmem:[#allocation17_spill] sm:$0xff] %v6626_v22  ;;  %5513 = vmatmul.msk.bf16.gmra.mxu3 %vm2911_vm13, %v6626_v22  ;;  %v6637_v62 = vpack.c.b16 %v2888_v32, %v2887_v46  ;;  %v2792_v45 = vrot.slane %v2790_v21, 4  ;;  %v3298_v11 = vsel %vm6163_vm10, %v3296_v14, %v6608_v10 }
 0x21c   : > { %v2261_v38 = vld.sshfl [vmem:[#allocation1] sm:$0xff pattern:$0x73625140]  ;;  %v1579_v41 = vadd.f32 %v6382_v40, %v1534_v25  ;;  %v2795_v32 = vrot.slane %v2793_v43, 5 }
 0x21d   : > { %7658 = vst [vmem:[#allocation18_spill] sm:$0xff] %v6637_v62  ;;  %v2459_v52 = vpack.c.bf16 %v2261_v38, %v2261_v38  ;;  %v2262_v48 = vld.sshfl [vmem:[#allocation1 + $0x20] sm:$0xff pattern:$0x73625140]  ;;  %v3215_v3 = vpop.f32.mrf.mxu2  ;;  %v3534_v44 = vpop.f32.mrf.mxu3  ;;  %5464 = vmatmul.msk.bf16.gmra.mxu1 %vm2911_vm13, %v6637_v62  ;;  %v3407_v62 = vunpack.c.l.b16 %v3298_v11 }
 0x21e   : > { %2263 = vst [vmem:[#allocation1] ss:$4 sm:$0xff] %v1763_v28  ;;  %v2406_v46 = vsel %vm1925_vm9, %v2262_v48, 0.0  ;;  %v6648_v28 = vadd.f32 %v3534_v44, %v3214_v23  ;;  %v6652_v22 = vmax.f32 %v1579_v41, 0.0  ;;  %v2796_v23 = vor.u32 %v2795_v32, %v2792_v45 }
 0x21f   : > { %2264 = vst [vmem:[#allocation1 + $0x1] ss:$4 sm:$0xff] %v1764_v20  ;;  %v3112_v12 = vunpack.c.l.b16 %v2459_v52  ;;  %v2460_v21 = vpack.c.bf16 %v2406_v46, %v2406_v46  ;;  %v3385_v38 = vrot.slane %v2459_v52, 5  ;;  %v5497_v20 = vrot.slane %v6611_v61, 9  ;;  %v1478_v61 = vpop.f32.mrf.mxu0 }
 0x220   : > { %7659 = vst [vmem:[#allocation19_spill] sm:$0xff] %v6648_v28  ;;  %v2799_v25 = vshll.u32 %v2459_v52, 16  ;;  %v2803_v10 = vshrl.u32 %v2459_v52, 16  ;;  %v1768_v44 = vrot.slane %v6652_v22, 2  ;;  %v3406_v28 = vunpack.c.l.b16 %v3295_v4 }
 0x221   : > { %2265 = vst [vmem:[#allocation1 + $0x2] ss:$4 sm:$0xff] %v1619_v16  ;;  %v6655_v14 = vpack.c.b16 %v3112_v12, %v3111_v35  ;;  %v3387_v48 = vrot.slane %v3385_v38, 4  ;;  %v3388_v43 = vrot.slane %v2460_v21, 5  ;;  %v3386_v16 = vsel %vm6163_vm10, %v5497_v20, %v3385_v38  ;;  %v2995_v41 = vpop.f32.mrf.mxu1 }
 0x222   : > { %2266 = vst [vmem:[#allocation1 + $0x3] ss:$4 sm:$0xff] %v1765_v0  ;;  %v1769_v0 = vrot.slane %v6652_v22, 4  ;;  %v2805_v52 = vrot.slane %v2803_v10, 4  ;;  %v3216_v4 = vadd.f32 %v3215_v3, %v2995_v41  ;;  %v1535_v45 = vmul.f32 %v6372_v6, %v1478_v61 }
 0x223   : > { %7660 = vst [vmem:[#allocation20_spill] sm:$0xff] %v6655_v14  ;;  %5481 = vmatmul.msk.bf16.gmra.mxu2 %vm2911_vm13, %v6655_v14  ;;  %v3389_v35 = vsel %vm6163_vm10, %v3387_v48, %v3388_v43  ;;  %v2797_v46 = vrot.slane %v2796_v23, 4  ;;  %v3432_v14 = vunpack.c.l.b16 %v3386_v16  ;;  %v6672_v6 = vpack.c.b16 %v3407_v62, %v3406_v28 }
 0x224   : > { %2267 = vst [vmem:[#allocation1 + $0x20] ss:$4 sm:$0xff] %v1766_v17  ;;  %v2801_v17 = vrot.slane %v2799_v25, 5  ;;  %v3433_v11 = vunpack.c.l.b16 %v3389_v35  ;;  %v1580_v20 = vadd.f32 %v6382_v40, %v1535_v45  ;;  %v1770_v40 = vrot.slane %v6652_v22, 6 }
 0x225   : > { %2268 = vst [vmem:[#allocation1 + $0x21] ss:$4 sm:$0xff] %v1767_v49  ;;  %v2809_v49 = vshll.u32 %v2460_v21, 16  ;;  %v3536_v12 = vpop.f32.mrf.mxu3  ;;  %v3218_v38 = vpop.f32.mrf.mxu2 }
 0x226   : > { %2269 = vst [vmem:[#allocation1 + $0x22] ss:$4 sm:$0xff] %v6652_v22  ;;  %v2806_v32 = vor.u32 %v2805_v52, %v2801_v17  ;;  %v6668_v60 = vadd.f32 %v3536_v12, %v3216_v4  ;;  %v2802_v25 = vsel %vm6212_vm14, %v2797_v46, %v2801_v17  ;;  %v1621_v48 = vmax.f32 %v1580_v20, 0.0 }
 0x227   : > { %2270 = vst [vmem:[#allocation1 + $0x23] ss:$4 sm:$0xff] %v1768_v44  ;;  %v2811_v34 = vrot.slane %v2809_v49, 5  ;;  %v6674_v43 = vpack.c.b16 %v3433_v11, %v3432_v14  ;;  %v2889_v61 = vunpack.c.l.b16 %v2802_v25  ;;  %v1480_v62 = vpop.f32.mrf.mxu0 }
 0x228   : > { %7661 = vst [vmem:[#allocation21_spill] sm:$0xff] %v6668_v60  ;;  %v2807_v10 = vrot.slane %v2806_v32, 4  ;;  %v1771_v16 = vrot.slane %v1621_v48, 2  ;;  %v1772_v41 = vrot.slane %v1621_v48, 4  ;;  %v1773_v52 = vrot.slane %v1621_v48, 6  ;;  %5501 = vmatmul.msk.bf16.vlgmr.msrb.gmra.mxu0 %vm2911_vm13, %v6672_v6 }
 0x229   : > { %v2271_v3 = vld.sshfl [vmem:[#allocation1] sm:$0xff pattern:$0x73625140]  ;;  %7662 = vst [vmem:[#allocation22_spill] sm:$0xff] %v6672_v6  ;;  %v2998_v17 = vpop.f32.mrf.mxu1 }
 0x22a   : > { %v2407_v21 = vsel %vm1866_vm6, %v2271_v3, 0.0  ;;  %2273 = vst [vmem:[#allocation1] ss:$4 sm:$0xff] %v1769_v0  ;;  %v2812_v23 = vsel %vm6212_vm14, %v2807_v10, %v2811_v34  ;;  %v3219_v45 = vadd.f32 %v3218_v38, %v2998_v17  ;;  %v6690_v34 = vld [vmem:[%s7599_s4] ss:$0 sm:$0xff] }
 0x22b   : > { %v2461_v44 = vpack.c.bf16 %v2407_v21, %v2407_v21  ;;  %v2890_v35 = vunpack.c.l.b16 %v2812_v23  ;;  %5514 = vmatmul.msk.bf16.gmra.mxu3 %vm2911_vm13, %v6674_v43  ;;  %v1536_v0 = vmul.f32 %v6690_v34, %v1480_v62  ;;  %v6696_v38 = vld [vmem:[%s7600_s5] ss:$0 sm:$0xff] }
 0x22d   : > { %v2814_v14 = vshrl.u32 %v2461_v44, 16  ;;  %v2817_v4 = vshll.u32 %v2461_v44, 16  ;;  %v6685_v22 = vpack.c.b16 %v2890_v35, %v2889_v61  ;;  %v3539_v32 = vpop.f32.mrf.mxu3  ;;  %v3220_v12 = vpop.f32.mrf.mxu2  ;;  %v1581_v20 = vadd.f32 %v6696_v38, %v1536_v0 }
 0x22e   : > { %v2272_v28 = vld.sshfl [vmem:[#allocation1 + $0x20] sm:$0xff pattern:$0x73625140]  ;;  %v5498_v25 = vrot.slane %v2461_v44, 9  ;;  %v6699_v10 = vadd.f32 %v3539_v32, %v3219_v45  ;;  %v3113_v3 = vunpack.c.l.b16 %v2461_v44 }
 0x22f   : > { %7663 = vst [vmem:[#allocation23_spill] sm:$0xff] %v6685_v22  ;;  %v2462_v11 = vpack.c.bf16 %v2272_v28, %v2272_v28  ;;  %v2816_v49 = vrot.slane %v2814_v14, 4  ;;  %v2819_v46 = vrot.slane %v2817_v4, 5  ;;  %5465 = vmatmul.msk.bf16.gmra.mxu1 %vm2911_vm13, %v6685_v22  ;;  %v1622_v23 = vmax.f32 %v1581_v20, 0.0  ;;  %v1483_v32 = vpop.f32.mrf.mxu0 }
 0x230   : > { %2275 = vst [vmem:[#allocation1 + $0x20] ss:$4 sm:$0xff] %v1770_v40 }
 0x231   : > { %2276 = vst [vmem:[#allocation1 + $0x21] ss:$4 sm:$0xff] %v1621_v48  ;;  %v3114_v48 = vunpack.c.l.b16 %v2462_v11  ;;  %v2274_v21 = vld.sshfl [vmem:[#allocation1] sm:$0xff pattern:$0x73625140]  ;;  %v3392_v40 = vrot.slane %v2462_v11, 5  ;;  %v2820_v14 = vor.u32 %v2819_v46, %v2816_v49 }
 0x232   : > { %2277 = vst [vmem:[#allocation1 + $0x22] ss:$4 sm:$0xff] %v1771_v16  ;;  %v2409_v61 = vsel %vm1925_vm9, %v2274_v21, 0.0  ;;  %v2823_v35 = vshll.u32 %v2462_v11, 16  ;;  %v2827_v17 = vshrl.u32 %v2462_v11, 16  ;;  %v1774_v4 = vrot.slane %v1622_v23, 2 }
 0x233   : > { %7664 = vst [vmem:[#allocation24_spill] sm:$0xff] %v6699_v10  ;;  %v6705_v62 = vpack.c.b16 %v3114_v48, %v3113_v3  ;;  %v2463_v16 = vpack.c.bf16 %v2409_v61, %v2409_v61  ;;  %v3394_v28 = vrot.slane %v3392_v40, 4  ;;  %v1775_v45 = vrot.slane %v1622_v23, 4 }
 0x234   : > { %2278 = vst [vmem:[#allocation1 + $0x23] ss:$4 sm:$0xff] %v1772_v41  ;;  %v3393_v44 = vsel %vm6163_vm10, %v5498_v25, %v3392_v40  ;;  %v3000_v41 = vpop.f32.mrf.mxu1  ;;  %v1776_v0 = vrot.slane %v1622_v23, 6  ;;  %v2825_v20 = vrot.slane %v2823_v35, 5  ;;  %v2829_v11 = vrot.slane %v2827_v17, 4 }
 0x235   : > { %2280 = vst [vmem:[#allocation1] ss:$4 sm:$0xff] %v1773_v52  ;;  %5482 = vmatmul.msk.bf16.gmra.mxu2 %vm2911_vm13, %v6705_v62  ;;  %v3395_v52 = vrot.slane %v2463_v16, 5  ;;  %v3221_v3 = vadd.f32 %v3220_v12, %v3000_v41  ;;  %v1537_v48 = vmul.f32 %v6690_v34, %v1483_v32  ;;  %v2833_v49 = vshll.u32 %v2463_v16, 16  ;;  %v3541_v40 = vpop.f32.mrf.mxu3 }
 0x236   : > { %2281 = vst [vmem:[#allocation1 + $0x1] ss:$4 sm:$0xff] %v1622_v23  ;;  %v2821_v25 = vrot.slane %v2820_v14, 4  ;;  %v2830_v21 = vor.u32 %v2829_v11, %v2825_v20  ;;  %v3223_v23 = vpop.f32.mrf.mxu2  ;;  %v3434_v6 = vunpack.c.l.b16 %v3393_v44  ;;  %v5569_v14 = vld [vmem:[%s7597_s2 + $0xc] sm:$0x3] }
 0x237   : > { %2282 = vst [vmem:[#allocation1 + $0x2] ss:$4 sm:$0xff] %v1774_v4  ;;  %v3396_v46 = vsel %vm6163_vm10, %v3394_v28, %v3395_v52  ;;  %v1582_v61 = vadd.f32 %v6696_v38, %v1537_v48  ;;  %v2835_v60 = vrot.slane %v2833_v49, 5  ;;  %v6715_v17 = vadd.f32 %v3541_v40, %v3221_v3 }
 0x238   : > { %2283 = vst [vmem:[#allocation1 + $0x3] ss:$4 sm:$0xff] %v1775_v45  ;;  %v3435_v10 = vunpack.c.l.b16 %v3396_v46  ;;  %v2826_v12 = vsel %vm6212_vm14, %v2821_v25, %v2825_v20  ;;  %v2831_v16 = vrot.slane %v2830_v21, 4  ;;  %v4067_v41 = vsel %vm2960_vm5, %v5569_v14, 0  ;;  %5502 = vmatmul.msk.bf16.gmra.mxu0 %vm2911_vm13, %v6191_v58 }
 0x239   : > { %7665 = vst [vmem:[#allocation25_spill] sm:$0xff] %v6715_v17  ;;  %v1623_v4 = vmax.f32 %v1582_v61, 0.0  ;;  %4076 = vmatpush.bf16.msra.mxu0 %v4067_v41  ;;  %v2891_v20 = vunpack.c.l.b16 %v2826_v12 }
 0x23a   : > { %v6724_v45 = vpack.c.b16 %v3435_v10, %v3434_v6  ;;  %v2836_v32 = vsel %vm6212_vm14, %v2831_v16, %v2835_v60 }
 0x23b   : > { %v2279_v35 = vld.sshfl [vmem:[#allocation1 + $0x20] sm:$0xff pattern:$0x73625140]  ;;  %v1777_v52 = vrot.slane %v1623_v4, 2  ;;  %v2892_v11 = vunpack.c.l.b16 %v2836_v32  ;;  %v1778_v48 = vrot.slane %v1623_v4, 4  ;;  %v1779_v21 = vrot.slane %v1623_v4, 6 }
 0x23c   : > { %v2410_v28 = vsel %vm1866_vm6, %v2279_v35, 0.0  ;;  %2284 = vst [vmem:[#allocation1 + $0x20] ss:$4 sm:$0xff] %v1776_v0  ;;  %v3003_v3 = vpop.f32.mrf.mxu1  ;;  %v1485_v0 = vpop.f32.mrf.mxu0  ;;  %5515 = vmatmul.msk.bf16.gmra.mxu3 %vm2911_vm13, %v6724_v45 }
 0x23d   : > { %7666 = vst [vmem:[#allocation26_spill] sm:$0xff] %v6724_v45  ;;  %v2464_v44 = vpack.c.bf16 %v2410_v28, %v2410_v28  ;;  %v3224_v25 = vadd.f32 %v3223_v23, %v3003_v3  ;;  %v1538_v6 = vmul.f32 %v6690_v34, %v1485_v0  ;;  %v6734_v60 = vpack.c.b16 %v2892_v11, %v2891_v20  ;;  %v3544_v12 = vpop.f32.mrf.mxu3 }
 0x23e   : > { %v3225_v16 = vpop.f32.mrf.mxu2 }
 0x23f   : > { %v2838_v49 = vshrl.u32 %v2464_v44, 16  ;;  %v2841_v46 = vshll.u32 %v2464_v44, 16  ;;  %7667 = vst [vmem:[#allocation27_spill] sm:$0xff] %v6734_v60  ;;  %v2285_v10 = vld.sshfl [vmem:[#allocation1] sm:$0xff pattern:$0x73625140]  ;;  %v1583_v23 = vadd.f32 %v6696_v38, %v1538_v6  ;;  %v3115_v28 = vunpack.c.l.b16 %v2464_v44  ;;  %5466 = vmatmul.msk.bf16.gmra.mxu1 %vm2911_vm13, %v6734_v60 }
 0x240   : > { %v2465_v40 = vpack.c.bf16 %v2285_v10, %v2285_v10  ;;  %2287 = vst [vmem:[#allocation1] ss:$4 sm:$0xff] %v1623_v4  ;;  %v6737_v41 = vadd.f32 %v3544_v12, %v3224_v25  ;;  %v5499_v0 = vrot.slane %v2464_v44, 9 }
 0x241   : > { %v2840_v61 = vrot.slane %v2838_v49, 4  ;;  %v2843_v35 = vrot.slane %v2841_v46, 5  ;;  %2288 = vst [vmem:[#allocation1 + $0x1] ss:$4 sm:$0xff] %v1777_v52  ;;  %v1624_v11 = vmax.f32 %v1583_v23, 0.0 }
 0x242   : > { %7668 = vst [vmem:[#allocation28_spill] sm:$0xff] %v6737_v41  ;;  %v3116_v32 = vunpack.c.l.b16 %v2465_v40  ;;  %v3399_v4 = vrot.slane %v2465_v40, 5  ;;  %v2847_v49 = vshll.u32 %v2465_v40, 16  ;;  %v2851_v25 = vshrl.u32 %v2465_v40, 16 }
 0x243   : > { %v2286_v14 = vld.sshfl [vmem:[#allocation1 + $0x20] sm:$0xff pattern:$0x73625140]  ;;  %2289 = vst [vmem:[#allocation1 + $0x2] ss:$4 sm:$0xff] %v1778_v48  ;;  %v2844_v6 = vor.u32 %v2843_v35, %v2840_v61  ;;  %v1780_v10 = vrot.slane %v1624_v11, 2 }
 0x244   : > { %v2412_v20 = vsel %vm1925_vm9, %v2286_v14, 0.0  ;;  %2290 = vst [vmem:[#allocation1 + $0x3] ss:$4 sm:$0xff] %v1779_v21  ;;  %v6743_v46 = vpack.c.b16 %v3116_v32, %v3115_v28  ;;  %v3401_v52 = vrot.slane %v3399_v4, 4  ;;  %v1781_v12 = vrot.slane %v1624_v11, 4  ;;  %v3005_v48 = vpop.f32.mrf.mxu1  ;;  %v6747_v14 = vpop.f32.mrf.mxu0 }
 0x245   : > { %v2466_v3 = vpack.c.bf16 %v2412_v20, %v2412_v20  ;;  %v1782_v41 = vrot.slane %v1624_v11, 6  ;;  %2291 = vst [vmem:[#allocation1 + $0x20] ss:$4 sm:$0xff] %v1624_v11  ;;  %v3400_v44 = vsel %vm6163_vm10, %v5499_v0, %v3399_v4  ;;  %v2849_v21 = vrot.slane %v2847_v49, 5  ;;  %v3546_v11 = vpop.f32.mrf.mxu3 }
 0x246   : > { %5483 = vmatmul.msk.bf16.gmra.mxu2 %vm2911_vm13, %v6743_v46  ;;  %v2853_v23 = vrot.slane %v2851_v25, 4  ;;  %v3226_v28 = vadd.f32 %v3225_v16, %v3005_v48  ;;  %2292 = vst [vmem:[#allocation1 + $0x21] ss:$4 sm:$0xff] %v1780_v10  ;;  %v2845_v32 = vrot.slane %v2844_v6, 4  ;;  %v3228_v45 = vpop.f32.mrf.mxu2  ;;  %v3436_v8 = vunpack.c.l.b16 %v3400_v44 }
 0x247   : > { %v3402_v17 = vrot.slane %v2466_v3, 5  ;;  %v2857_v61 = vshll.u32 %v2466_v3, 16  ;;  %2293 = vst [vmem:[#allocation1 + $0x22] ss:$4 sm:$0xff] %v1781_v12  ;;  %v5586_v3 = vld [vmem:[%s7597_s2 + $0xe] sm:$0x3] }
 0x248   : > { %v2854_v20 = vor.u32 %v2853_v23, %v2849_v21  ;;  %2294 = vst [vmem:[#allocation1 + $0x23] ss:$4 sm:$0xff] %v1782_v41  ;;  %v6753_v60 = vadd.f32 %v3546_v11, %v3226_v28  ;;  %v2850_v4 = vsel %vm6212_vm14, %v2845_v32, %v2849_v21  ;;  %v4223_v41 = vsel %vm2960_vm5, %v5586_v3, 0  ;;  %5570 = vmatmul.msk.bf16.vlgmr.msra.gmra.mxu0 %vm2911_vm13, %v6198_v18 }
 0x249   : > { %v3403_v40 = vsel %vm6163_vm10, %v3401_v52, %v3402_v17  ;;  %v2859_v16 = vrot.slane %v2857_v61, 5  ;;  %v5604_v17 = vld [vmem:[%s7597_s2 + $0x10] sm:$0x3]  ;;  %4232 = vmatpush.bf16.msra.mxu1 %v4223_v41  ;;  %v2893_v25 = vunpack.c.l.b16 %v2850_v4 }
 0x24a   : > { %v3437_v35 = vunpack.c.l.b16 %v3403_v40  ;;  %v2855_v0 = vrot.slane %v2854_v20, 4  ;;  %v4363_v52 = vsel %vm2960_vm5, %v5604_v17, 0 }
 0x24b   : > { %4372 = vmatpush.bf16.msra.mxu2 %v4363_v52 }
 0x24c   : > { %v6763_v49 = vpack.c.b16 %v3437_v35, %v3436_v8  ;;  %v2860_v6 = vsel %vm6212_vm14, %v2855_v0, %v2859_v16  ;;  %v3008_v12 = vpop.f32.mrf.mxu1  ;;  %v6769_v48 = vpop.f32.mrf.mxu0 }
 0x24d   : > { %v2894_v10 = vunpack.c.l.b16 %v2860_v6  ;;  %v3229_v44 = vadd.f32 %v3228_v45, %v3008_v12  ;;  %v3549_v21 = vpop.f32.mrf.mxu3 }
 0x24e   : > { %5516 = vmatmul.msk.bf16.gmra.mxu3 %vm2911_vm13, %v6763_v49  ;;  %v3230_v23 = vpop.f32.mrf.mxu2 }
 0x24f   : > { %v6775_v8 = vpack.c.b16 %v2894_v10, %v2893_v25  ;;  %v6777_v28 = vadd.f32 %v3549_v21, %v3229_v44 }
 0x251   : > { %5467 = vmatmul.msk.bf16.gmra.mxu1 %vm2911_vm13, %v6775_v8 }
 0x254   : > { %v3010_v40 = vpop.f32.mrf.mxu1  ;;  %v6783_v45 = vpop.f32.mrf.mxu0 }
 0x255   : > { %v3231_v61 = vadd.f32 %v3230_v23, %v3010_v40  ;;  %v3551_v35 = vpop.f32.mrf.mxu3 }
 0x256   : > { %5535 = vmatmul.msk.bf16.vlgmr.msrb.gmra.mxu2 %vm2911_vm13, %v6529_v19  ;;  %v3233_v32 = vpop.f32.mrf.mxu2 }
 0x257   : > { %v6785_v20 = vadd.f32 %v3551_v35, %v3231_v61 }
 0x258   : > { %5571 = vmatmul.msk.bf16.gmra.mxu0 %vm2911_vm13, %v6246_v26 }
 0x25c   : > { %v3013_v11 = vpop.f32.mrf.mxu1  ;;  %v1495_v4 = vpop.f32.mrf.mxu0 }
 0x25d   : > { %v3234_v0 = vadd.f32 %v3233_v32, %v3013_v11  ;;  %v3554_v17 = vpop.f32.mrf.mxu3 }
 0x25e   : > { %5553 = vmatmul.msk.bf16.vlgmr.msrb.gmra.mxu3 %vm2911_vm13, %v6191_v58  ;;  %v3235_v16 = vpop.f32.mrf.mxu2 }
 0x25f   : > { %v6791_v3 = vadd.f32 %v3554_v17, %v3234_v0 }
 0x261   : > { %5518 = vmatmul.msk.bf16.vlgmr.msrb.gmra.mxu1 %vm2911_vm13, %v6619_v36 }
 0x264   : > { %v3015_v19 = vpop.f32.mrf.mxu1 }
 0x265   : > { %v3236_v52 = vadd.f32 %v3235_v16, %v3015_v19  ;;  %v3556_v41 = vpop.f32.mrf.mxu3  ;;  %v2973_v10 = vpop.f32.mrf.mxu0 }
 0x266   : > { %5536 = vmatmul.msk.bf16.gmra.mxu2 %vm2911_vm13, %v6236_v7  ;;  %v3238_v6 = vpop.f32.mrf.mxu2 }
 0x267   : > { %v6797_v25 = vadd.f32 %v3556_v41, %v3236_v52 }
 0x268   : > { %5572 = vmatmul.msk.bf16.gmra.mxu0 %vm2911_vm13, %v6276_v55 }
 0x26c   : > { %v3018_v12 = vpop.f32.mrf.mxu1 }
 0x26d   : > { %v3239_v44 = vadd.f32 %v3238_v6, %v3018_v12  ;;  %v3559_v58 = vpop.f32.mrf.mxu3  ;;  %v2975_v23 = vpop.f32.mrf.mxu0 }
 0x26e   : > { %5554 = vmatmul.msk.bf16.gmra.mxu3 %vm2911_vm13, %v6226_v54  ;;  %v3240_v36 = vpop.f32.mrf.mxu2 }
 0x26f   : > { %v6803_v21 = vadd.f32 %v3559_v58, %v3239_v44 }
 0x271   : > { %5519 = vmatmul.msk.bf16.gmra.mxu1 %vm2911_vm13, %v6198_v18 }
 0x274   : > { %v3020_v40 = vpop.f32.mrf.mxu1 }
 0x275   : > { %v3241_v61 = vadd.f32 %v3240_v36, %v3020_v40  ;;  %v3561_v35 = vpop.f32.mrf.mxu3  ;;  %v2978_v4 = vpop.f32.mrf.mxu0 }
 0x276   : > { %5537 = vmatmul.msk.bf16.gmra.mxu2 %vm2911_vm13, %v6269_v57  ;;  %v3243_v32 = vpop.f32.mrf.mxu2 }
 0x277   : > { %v6809_v11 = vadd.f32 %v3561_v35, %v3241_v61 }
 0x278   : > { %5573 = vmatmul.msk.bf16.gmra.mxu0 %vm2911_vm13, %v6313_v50 }
 0x27c   : > { %v3023_v0 = vpop.f32.mrf.mxu1 }
 0x27d   : > { %v3244_v16 = vadd.f32 %v3243_v32, %v3023_v0  ;;  %v3564_v18 = vpop.f32.mrf.mxu3  ;;  %v2980_v52 = vpop.f32.mrf.mxu0 }
 0x27e   : > { %5555 = vmatmul.msk.bf16.gmra.mxu3 %vm2911_vm13, %v6262_v1  ;;  %v3245_v17 = vpop.f32.mrf.mxu2 }
 0x27f   : > { %v6815_v19 = vadd.f32 %v3564_v18, %v3244_v16 }
 0x281   : > { %5520 = vmatmul.msk.bf16.gmra.mxu1 %vm2911_vm13, %v6246_v26 }
 0x284   : > { %v3025_v41 = vpop.f32.mrf.mxu1 }
 0x285   : > { %v3246_v6 = vadd.f32 %v3245_v17, %v3025_v41  ;;  %v3566_v12 = vpop.f32.mrf.mxu3  ;;  %v3193_v36 = vpop.f32.mrf.mxu0 }
 0x286   : > { %5538 = vmatmul.msk.bf16.gmra.mxu2 %vm2911_vm13, %v6299_v29  ;;  %v3248_v44 = vpop.f32.mrf.mxu2  ;;  %v3194_v40 = vadd.f32 %v3193_v36, %v2973_v10 }
 0x287   : > { %v6821_v58 = vadd.f32 %v3566_v12, %v3246_v6 }
 0x288   : > { %5574 = vmatmul.msk.bf16.gmra.mxu0 %vm2911_vm13, %v6344_v53 }
 0x28c   : > { %v3028_v61 = vpop.f32.mrf.mxu1 }
 0x28d   : > { %v3249_v35 = vadd.f32 %v3248_v44, %v3028_v61  ;;  %v3569_v26 = vpop.f32.mrf.mxu3  ;;  %v3195_v16 = vpop.f32.mrf.mxu0 }
 0x28e   : > { %5556 = vmatmul.msk.bf16.gmra.mxu3 %vm2911_vm13, %v6293_v9  ;;  %v3250_v32 = vpop.f32.mrf.mxu2  ;;  %v3196_v18 = vadd.f32 %v3195_v16, %v2975_v23 }
 0x28f   : > { %v6827_v0 = vadd.f32 %v3569_v26, %v3249_v35 }
 0x291   : > { %5521 = vmatmul.msk.bf16.gmra.mxu1 %vm2911_vm13, %v6276_v55 }
 0x294   : > { %v3030_v17 = vpop.f32.mrf.mxu1 }
 0x295   : > { %v3251_v10 = vadd.f32 %v3250_v32, %v3030_v17  ;;  %v3571_v41 = vpop.f32.mrf.mxu3  ;;  %v3198_v44 = vpop.f32.mrf.mxu0 }
 0x296   : > { %5539 = vmatmul.msk.bf16.gmra.mxu2 %vm2911_vm13, %v6334_v31  ;;  %v3253_v6 = vpop.f32.mrf.mxu2  ;;  %v3199_v36 = vadd.f32 %v3198_v44, %v2978_v4 }
 0x297   : > { %v6833_v12 = vadd.f32 %v3571_v41, %v3251_v10 }
 0x298   : > { %5575 = vmatmul.msk.bf16.gmra.mxu0 %vm2911_vm13, %v6377_v33 }
 0x299   : > { %7669 = vst [vmem:[#allocation29_spill] sm:$0xff] %v6833_v12 }
 0x29c   : > { %v3033_v61 = vpop.f32.mrf.mxu1 }
 0x29d   : > { %v3254_v55 = vadd.f32 %v3253_v6, %v3033_v61  ;;  %v3200_v32 = vpop.f32.mrf.mxu0 }
 0x29e   : > { %5557 = vmatmul.msk.bf16.gmra.mxu3 %vm2911_vm13, %v6331_v24  ;;  %v3255_v23 = vpop.f32.mrf.mxu2  ;;  %v3574_v35 = vpop.f32.mrf.mxu3  ;;  %v3201_v16 = vadd.f32 %v3200_v32, %v2980_v52 }
 0x29f   : > { %v6841_v26 = vadd.f32 %v3574_v35, %v3254_v55 }
 0x2a1   : > { %5522 = vmatmul.msk.bf16.gmra.mxu1 %vm2911_vm13, %v6313_v50 }
 0x2a4   : > { %v3035_v4 = vpop.f32.mrf.mxu1 }
 0x2a5   : > { %v3256_v17 = vadd.f32 %v3255_v23, %v3035_v4  ;;  %v3514_v12 = vpop.f32.mrf.mxu0 }
 0x2a6   : > { %5540 = vmatmul.msk.bf16.gmra.mxu2 %vm2911_vm13, %v6362_v2  ;;  %v3258_v10 = vpop.f32.mrf.mxu2  ;;  %v3576_v41 = vpop.f32.mrf.mxu3  ;;  %v3594_v6 = vadd.f32 %v3514_v12, %v3194_v40 }
 0x2a7   : > { %v6845_v44 = vadd.f32 %v3576_v41, %v3256_v17 }
 0x2a8   : > { %5576 = vmatmul.msk.bf16.gmra.mxu0 %vm2911_vm13, %v6412_v56 }
 0x2a9   : > { %7670 = vst [vmem:[#allocation30_spill] sm:$0xff] %v6845_v44 }
 0x2ac   : > { %v3038_v61 = vpop.f32.mrf.mxu1 }
 0x2ad   : > { %v3259_v50 = vadd.f32 %v3258_v10, %v3038_v61  ;;  %v3516_v35 = vpop.f32.mrf.mxu0 }
 0x2ae   : > { %5558 = vmatmul.msk.bf16.gmra.mxu3 %vm2911_vm13, %v6360_v51  ;;  %v3260_v52 = vpop.f32.mrf.mxu2  ;;  %v3579_v55 = vpop.f32.mrf.mxu3  ;;  %v3595_v32 = vadd.f32 %v3516_v35, %v3196_v18 }
 0x2af   : > { %v6853_v23 = vadd.f32 %v3579_v55, %v3259_v50 }
 0x2b1   : > { %5523 = vmatmul.msk.bf16.gmra.mxu1 %vm2911_vm13, %v6344_v53 }
 0x2b4   : > { %v3040_v40 = vpop.f32.mrf.mxu1 }
 0x2b5   : > { %v3261_v12 = vadd.f32 %v3260_v52, %v3040_v40  ;;  %v3519_v44 = vpop.f32.mrf.mxu0 }
 0x2b6   : > { %5541 = vmatmul.msk.bf16.gmra.mxu2 %vm2911_vm13, %v6403_v37  ;;  %v3581_v17 = vpop.f32.mrf.mxu3  ;;  %v3596_v10 = vadd.f32 %v3519_v44, %v3199_v36 }
 0x2b7   : > { %v6857_v41 = vadd.f32 %v3581_v17, %v3261_v12 }
 0x2b8   : > { %v3263_v4 = vpop.f32.mrf.mxu2  ;;  %5577 = vmatmul.msk.bf16.gmra.mxu0 %vm2911_vm13, %v6452_v47 }
 0x2bc   : > { %v3043_v53 = vpop.f32.mrf.mxu1 }
 0x2bd   : > { %v3264_v61 = vadd.f32 %v3263_v4, %v3043_v53  ;;  %v3521_v55 = vpop.f32.mrf.mxu0 }
 0x2be   : > { %5559 = vmatmul.msk.bf16.gmra.mxu3 %vm2911_vm13, %v6397_v13  ;;  %v3597_v35 = vadd.f32 %v3521_v55, %v3201_v16 }
 0x2bf   : > { %v3584_v50 = vpop.f32.mrf.mxu3 }
 0x2c0   : > { %v3265_v18 = vpop.f32.mrf.mxu2  ;;  %v6865_v52 = vadd.f32 %v3584_v50, %v3264_v61 }
 0x2c1   : > { %5524 = vmatmul.msk.bf16.gmra.mxu1 %vm2911_vm13, %v6377_v33 }
 0x2c2   : > { %7671 = vst [vmem:[#allocation31_spill] sm:$0xff] %v6865_v52 }
 0x2c4   : > { %v3045_v36 = vpop.f32.mrf.mxu1 }
 0x2c5   : > { %v3266_v44 = vadd.f32 %v3265_v18, %v3045_v36  ;;  %v4606_v18 = vld [vmem:[%s7598_s3] sm:$0x3]  ;;  %v4078_v55 = vpop.f32.mrf.mxu0 }
 0x2c6   : > { %5542 = vmatmul.msk.bf16.gmra.mxu2 %vm2911_vm13, %v6439_v5  ;;  %v4656_v50 = vsel %vm2960_vm5, %v4606_v18, 0 }
 0x2c7   : > { %v3586_v12 = vpop.f32.mrf.mxu3  ;;  %4665 = vmatpush.bf16.msra.mxu3 %v4656_v50  ;;  %v7676_v50 = vld [vmem:[#allocation8_spill] sm:$0xff] }
 0x2c8   : > { %v6869_v17 = vadd.f32 %v3586_v12, %v3266_v44  ;;  %5578 = vmatmul.msk.bf16.gmra.mxu0 %vm2911_vm13, %v6496_v27 }
 0x2c9   : > { %v3268_v40 = vpop.f32.mrf.mxu2 }
 0x2ca   : > { %7672 = vst [vmem:[#allocation32_spill] sm:$0xff] %v6869_v17 }
 0x2cd   : > { %v4080_v18 = vpop.f32.mrf.mxu0 }
 0x2ce   : > { %5560 = vmatmul.msk.bf16.gmra.mxu3 %vm2911_vm13, %v6435_v59  ;;  %v3048_v33 = vpop.f32.mrf.mxu1 }
 0x2cf   : > { %v3269_v4 = vadd.f32 %v3268_v40, %v3048_v33 }
 0x2d1   : > { %v3270_v53 = vpop.f32.mrf.mxu2  ;;  %v3589_v61 = vpop.f32.mrf.mxu3  ;;  %5525 = vmatmul.msk.bf16.gmra.mxu1 %vm2911_vm13, %v6412_v56  ;;  %v7675_v56 = vld [vmem:[#allocation4_spill] sm:$0xff] }
 0x2d2   : > { %v6877_v16 = vadd.f32 %v3589_v61, %v3269_v4 }
 0x2d4   : > { %7673 = vst [vmem:[#allocation33_spill] sm:$0xff] %v6877_v16 }
 0x2d5   : > { %v4083_v52 = vpop.f32.mrf.mxu0 }
 0x2d6   : > { %5543 = vmatmul.msk.bf16.gmra.mxu2 %vm2911_vm13, %v6483_v42  ;;  %v3050_v36 = vpop.f32.mrf.mxu1 }
 0x2d7   : > { %v3271_v44 = vadd.f32 %v3270_v53, %v3050_v36 }
 0x2d8   : > { %5579 = vmatmul.msk.bf16.gmra.mxu0 %vm2911_vm13, %v6544_v15 }
 0x2d9   : > { %v3804_v40 = vpop.f32.mrf.mxu2  ;;  %v3591_v12 = vpop.f32.mrf.mxu3 }
 0x2da   : > { %v6885_v33 = vadd.f32 %v3591_v12, %v3271_v44 }
 0x2dc   : > { %7674 = vst [vmem:[#allocation34_spill] sm:$0xff] %v6885_v33 }
 0x2de   : > { %5561 = vmatmul.msk.bf16.gmra.mxu3 %vm2911_vm13, %v7675_v56  ;;  %v3648_v4 = vpop.f32.mrf.mxu1 }
 0x2df   : > { %v3728_v61 = vadd.f32 %v3648_v4, %v3594_v6 }
 0x2e1   : > { %v3806_v16 = vpop.f32.mrf.mxu2  ;;  %v3884_v17 = vadd.f32 %v3804_v40, %v3728_v61  ;;  %v3944_v42 = vpop.f32.mrf.mxu3  ;;  %5526 = vmatmul.msk.bf16.gmra.mxu1 %vm2911_vm13, %v6452_v47  ;;  %v7678_v40 = vld [vmem:[#allocation15_spill] sm:$0xff] }
 0x2e2   : > { %v7679_v61 = vld [vmem:[#allocation7_spill] sm:$0xff] }
 0x2e3   : > { %v4024_v53 = vadd.f32 %v3944_v42, %v3884_v17 }
 0x2e5   : > { %v6895_v36 = vadd.f32 %v4078_v55, %v4024_v53 }
 0x2e6   : > { %5544 = vmatmul.msk.bf16.gmra.mxu2 %vm2911_vm13, %v7676_v50  ;;  %v3650_v44 = vpop.f32.mrf.mxu1 }
 0x2e7   : > { %v3729_v12 = vadd.f32 %v3650_v44, %v3595_v32  ;;  %v7680_v44 = vld [vmem:[#allocation13_spill] sm:$0xff] }
 0x2e8   : > { %5580 = vmatmul.msk.bf16.gmra.mxu0 %vm2911_vm13, %v7678_v40 }
 0x2e9   : > { %v3809_v33 = vpop.f32.mrf.mxu2  ;;  %v3885_v5 = vadd.f32 %v3806_v16, %v3729_v12  ;;  %v3946_v56 = vpop.f32.mrf.mxu3 }
 0x2ea   : > { %v4085_v16 = vpop.f32.mrf.mxu0 }
 0x2eb   : > { %v4025_v6 = vadd.f32 %v3946_v56, %v3885_v5 }
 0x2ed   : > { %v6897_v4 = vadd.f32 %v4080_v18, %v4025_v6 }
 0x2ee   : > { %5562 = vmatmul.msk.bf16.gmra.mxu3 %vm2911_vm13, %v7679_v61  ;;  %v3653_v47 = vpop.f32.mrf.mxu1 }
 0x2ef   : > { %7677 = vst [vmem:[#allocation35_spill] sm:$0xff] %v6897_v4  ;;  %v3730_v42 = vadd.f32 %v3653_v47, %v3596_v10  ;;  %v7681_v47 = vld [vmem:[#allocation20_spill] sm:$0xff] }
 0x2f1   : > { %v3811_v17 = vpop.f32.mrf.mxu2  ;;  %v3886_v55 = vadd.f32 %v3809_v33, %v3730_v42  ;;  %v3949_v53 = vpop.f32.mrf.mxu3  ;;  %5527 = vmatmul.msk.bf16.gmra.mxu1 %vm2911_vm13, %v6496_v27  ;;  %v7682_v27 = vld [vmem:[#allocation11_spill] sm:$0xff] }
 0x2f2   : > { %v4088_v33 = vpop.f32.mrf.mxu0 }
 0x2f3   : > { %v4026_v32 = vadd.f32 %v3949_v53, %v3886_v55  ;;  %v7683_v55 = vld [vmem:[#allocation9_spill] sm:$0xff] }
 0x2f5   : > { %v6907_v5 = vadd.f32 %v4083_v52, %v4026_v32 }
 0x2f6   : > { %5545 = vmatmul.msk.bf16.gmra.mxu2 %vm2911_vm13, %v7680_v44  ;;  %v3655_v56 = vpop.f32.mrf.mxu1 }
 0x2f7   : > { %v3731_v18 = vadd.f32 %v3655_v56, %v3597_v35  ;;  %v1539_v35 = vmul.f32 %v6690_v34, %v6747_v14 }
 0x2f8   : > { %5581 = vmatmul.msk.bf16.gmra.mxu0 %vm2911_vm13, %v7681_v47 }
 0x2f9   : > { %v3814_v12 = vpop.f32.mrf.mxu2  ;;  %v3887_v6 = vadd.f32 %v3811_v17, %v3731_v18  ;;  %v3951_v4 = vpop.f32.mrf.mxu3  ;;  %v7684_v17 = vld [vmem:[#allocation18_spill] sm:$0xff]  ;;  %v1584_v56 = vadd.f32 %v6696_v38, %v1539_v35 }
 0x2fa   : > { %v4090_v14 = vpop.f32.mrf.mxu0 }
 0x2fb   : > { %v4027_v50 = vadd.f32 %v3951_v4, %v3887_v6  ;;  %v1541_v4 = vmul.f32 %v6690_v34, %v6783_v45  ;;  %v7686_v6 = vld [vmem:[#allocation10_spill] sm:$0xff] }
 0x2fd   : > { %v6909_v10 = vadd.f32 %v4085_v16, %v4027_v50 }
 0x2fe   : > { %5563 = vmatmul.msk.bf16.gmra.mxu3 %vm2911_vm13, %v7682_v27  ;;  %v3658_v42 = vpop.f32.mrf.mxu1 }
 0x2ff   : > { %v3732_v53 = vadd.f32 %v3658_v42, %v7683_v55  ;;  %v6931_v42 = vadd.f32 %v6696_v38, %v1541_v4 }
 0x301   : > { %v3816_v52 = vpop.f32.mrf.mxu2  ;;  %v3888_v32 = vadd.f32 %v3814_v12, %v3732_v53  ;;  %v3954_v44 = vpop.f32.mrf.mxu3  ;;  %5528 = vmatmul.msk.bf16.gmra.mxu1 %vm2911_vm13, %v6544_v15  ;;  %v1540_v12 = vmul.f32 %v6690_v34, %v6769_v48  ;;  %v1625_v53 = vmax.f32 %v1584_v56, 0.0  ;;  %v1627_v35 = vmax.f32 %v6931_v42, 0.0  ;;  %v7688_v48 = vld [vmem:[#allocation17_spill] sm:$0xff] }
 0x303   : > { %v4028_v50 = vadd.f32 %v3954_v44, %v3888_v32  ;;  %v1585_v32 = vadd.f32 %v6696_v38, %v1540_v12  ;;  %v1785_v34 = vrot.slane %v1625_v53, 6  ;;  %v1789_v38 = vrot.slane %v1627_v35, 2 }
 0x305   : > { %v6924_v16 = vadd.f32 %v4088_v33, %v4028_v50  ;;  %v1783_v50 = vrot.slane %v1625_v53, 2 }
 0x306   : > { %5546 = vmatmul.msk.bf16.gmra.mxu2 %vm2911_vm13, %v7684_v17  ;;  %v3660_v18 = vpop.f32.mrf.mxu1  ;;  %v1784_v17 = vrot.slane %v1625_v53, 4 }
 0x307   : > { %7685 = vst [vmem:[#allocation15_spill] sm:$0xff] %v6924_v16  ;;  %v3733_v15 = vadd.f32 %v3660_v18, %v7686_v6  ;;  %v7689_v18 = vld [vmem:[#allocation14_spill] sm:$0xff]  ;;  %v2296_v6 = vld.sshfl [vmem:[#allocation1 + $0x20] sm:$0xff pattern:$0x73625140] }
 0x308   : > { %5582 = vmatmul.msk.bf16.gmra.mxu0 %vm2911_vm13, %v6705_v62  ;;  %2299 = vst [vmem:[#allocation1 + $0x20] ss:$4 sm:$0xff] %v1783_v50  ;;  %v7690_v50 = vld [vmem:[#allocation16_spill] sm:$0xff] }
 0x309   : > { %v3819_v44 = vpop.f32.mrf.mxu2  ;;  %v3889_v55 = vadd.f32 %v3816_v52, %v3733_v15  ;;  %v3956_v45 = vpop.f32.mrf.mxu3  ;;  %v1626_v52 = vmax.f32 %v1585_v32, 0.0  ;;  %2300 = vst [vmem:[#allocation1 + $0x21] ss:$4 sm:$0xff] %v1784_v17 }
 0x30a   : > { %2301 = vst [vmem:[#allocation1 + $0x22] ss:$4 sm:$0xff] %v1785_v34 }
 0x30b   : > { %v4029_v33 = vadd.f32 %v3956_v45, %v3889_v55  ;;  %v2295_v55 = vld.sshfl [vmem:[#allocation1] sm:$0xff pattern:$0x73625140]  ;;  %2302 = vst [vmem:[#allocation1 + $0x23] ss:$4 sm:$0xff] %v1626_v52 }
 0x30c   : > { %2308 = vst [vmem:[#allocation1 + $0x20] ss:$4 sm:$0xff] %v1789_v38 }
 0x30d   : > { %v6935_v16 = vadd.f32 %v4090_v14, %v4029_v33  ;;  %v4093_v14 = vpop.f32.mrf.mxu0  ;;  %2297 = vst [vmem:[#allocation1] ss:$4 sm:$0xff] %v1625_v53  ;;  %v7692_v53 = vld [vmem:[#allocation19_spill] sm:$0xff] }
 0x30e   : > { %5564 = vmatmul.msk.bf16.gmra.mxu3 %vm2911_vm13, %v7688_v48  ;;  %v3663_v4 = vpop.f32.mrf.mxu1 }
 0x30f   : > { %7687 = vst [vmem:[#allocation7_spill] sm:$0xff] %v6935_v16  ;;  %v3734_v56 = vadd.f32 %v3663_v4, %v7689_v18 }
 0x311   : > { %v3821_v12 = vpop.f32.mrf.mxu2  ;;  %v3890_v15 = vadd.f32 %v3819_v44, %v3734_v56  ;;  %v3959_v42 = vpop.f32.mrf.mxu3  ;;  %5529 = vmatmul.msk.bf16.gmra.mxu1 %vm2911_vm13, %v7678_v40 }
 0x313   : > { %v4030_v45 = vadd.f32 %v3959_v42, %v3890_v15  ;;  %v2413_v15 = vsel %vm1866_vm6, %v2295_v55, 0.0 }
 0x315   : > { %v6946_v32 = vadd.f32 %v4093_v14, %v4030_v45  ;;  %v4095_v17 = vpop.f32.mrf.mxu0  ;;  %v6960_v45 = vpack.c.bf16 %v2413_v15, %v2413_v15 }
 0x316   : > { %5547 = vmatmul.msk.bf16.gmra.mxu2 %vm2911_vm13, %v6685_v22  ;;  %v3665_v33 = vpop.f32.mrf.mxu1 }
 0x317   : > { %v3735_v44 = vadd.f32 %v3665_v33, %v7690_v50  ;;  %v6962_v33 = vpack.c.bf16 %v2296_v6, %v2296_v6  ;;  %v3630_v55 = vunpack.c.l.b16 %v6960_v45 }
 0x318   : > { %5583 = vmatmul.msk.bf16.gmra.mxu0 %vm2911_vm13, %v6743_v46 }
 0x319   : > { %v3824_v4 = vpop.f32.mrf.mxu2  ;;  %v3891_v18 = vadd.f32 %v3821_v12, %v3735_v44  ;;  %v3961_v56 = vpop.f32.mrf.mxu3  ;;  %v1786_v44 = vrot.slane %v1626_v52, 2 }
 0x31b   : > { %v4031_v40 = vadd.f32 %v3961_v56, %v3891_v18  ;;  %v1787_v18 = vrot.slane %v1626_v52, 4  ;;  %v7694_v56 = vld [vmem:[#allocation27_spill] sm:$0xff] }
 0x31d   : > { %v6949_v16 = vadd.f32 %v4095_v17, %v4031_v40  ;;  %v1788_v40 = vrot.slane %v1626_v52, 6  ;;  %v7695_v17 = vld [vmem:[#allocation21_spill] sm:$0xff]  ;;  %v3761_v52 = vshrl.u32 %v6960_v45, 16 }
 0x31e   : > { %5565 = vmatmul.msk.bf16.gmra.mxu3 %vm2911_vm13, %v6674_v43  ;;  %v3668_v34 = vpop.f32.mrf.mxu1 }
 0x31f   : > { %7691 = vst [vmem:[#allocation20_spill] sm:$0xff] %v6949_v16  ;;  %v3736_v38 = vadd.f32 %v3668_v34, %v7692_v53 }
 0x321   : > { %v3826_v42 = vpop.f32.mrf.mxu2  ;;  %v3892_v14 = vadd.f32 %v3824_v4, %v3736_v38  ;;  %v3964_v12 = vpop.f32.mrf.mxu3  ;;  %5530 = vmatmul.msk.bf16.gmra.mxu1 %vm2911_vm13, %v7681_v47  ;;  %v3631_v4 = vunpack.c.l.b16 %v6962_v33  ;;  %v2298_v47 = vld.sshfl [vmem:[#allocation1] sm:$0xff pattern:$0x73625140] }
 0x322   : > { %2304 = vst [vmem:[#allocation1] ss:$4 sm:$0xff] %v1786_v44  ;;  %v3774_v44 = vshrl.u32 %v6962_v33, 16 }
 0x323   : > { %v6964_v50 = vadd.f32 %v3964_v12, %v3892_v14  ;;  %2305 = vst [vmem:[#allocation1 + $0x1] ss:$4 sm:$0xff] %v1787_v18  ;;  %v6975_v15 = vpack.c.b16 %v3631_v4, %v3630_v55  ;;  %v2415_v12 = vsel %vm1925_vm9, %v2298_v47, 0.0  ;;  %v7700_v18 = vld [vmem:[#allocation24_spill] sm:$0xff]  ;;  %v3763_v4 = vrot.slane %v3761_v52, 4 }
 0x324   : > { %2306 = vst [vmem:[#allocation1 + $0x2] ss:$4 sm:$0xff] %v1788_v40  ;;  %v2469_v40 = vpack.c.bf16 %v2415_v12, %v2415_v12  ;;  %v3776_v14 = vrot.slane %v3774_v44, 4  ;;  %v7701_v12 = vld [vmem:[#allocation25_spill] sm:$0xff] }
 0x325   : > { %7693 = vst [vmem:[#allocation11_spill] sm:$0xff] %v6964_v50 }
 0x326   : > { %5548 = vmatmul.msk.bf16.gmra.mxu2 %vm2911_vm13, %v7694_v56  ;;  %v3670_v63 = vpop.f32.mrf.mxu1  ;;  %2307 = vst [vmem:[#allocation1 + $0x3] ss:$4 sm:$0xff] %v1627_v35  ;;  %v3764_v56 = vshll.u32 %v6960_v45, 16  ;;  %v3780_v22 = vshll.u32 %v2469_v40, 16 }
 0x327   : > { %v3737_v34 = vadd.f32 %v3670_v63, %v7695_v17  ;;  %v3770_v63 = vshll.u32 %v6962_v33, 16 }
 0x328   : > { %5584 = vmatmul.msk.bf16.gmra.mxu0 %vm2911_vm13, %v6975_v15  ;;  %v3782_v44 = vrot.slane %v3780_v22, 5  ;;  %v7703_v22 = vld [vmem:[#allocation28_spill] sm:$0xff] }
 0x329   : > { %v3829_v53 = vpop.f32.mrf.mxu2  ;;  %v6971_v6 = vadd.f32 %v3826_v42, %v3737_v34  ;;  %v6973_v38 = vpop.f32.mrf.mxu3  ;;  %v7699_v42 = vld [vmem:[#allocation26_spill] sm:$0xff]  ;;  %v3766_v34 = vrot.slane %v3764_v56, 5  ;;  %v3772_v47 = vrot.slane %v3770_v63, 5 }
 0x32a   : > { %7697 = vst [vmem:[#allocation10_spill] sm:$0xff] %v6973_v38 }
 0x32b   : > { %7696 = vst [vmem:[#allocation9_spill] sm:$0xff] %v6971_v6  ;;  %v3767_v16 = vor.u32 %v3766_v34, %v3763_v4  ;;  %v7702_v34 = vld [vmem:[#allocation12_spill] sm:$0xff] }
 0x32d   : > { %v3768_v56 = vrot.slane %v3767_v16, 4 }
 0x32e   : > { %5566 = vmatmul.msk.bf16.gmra.mxu3 %vm2911_vm13, %v7699_v42  ;;  %v3673_v17 = vpop.f32.mrf.mxu1  ;;  %v3777_v42 = vor.u32 %v3776_v14, %v3772_v47 }
 0x32f   : > { %v3738_v35 = vadd.f32 %v3673_v17, %v7700_v18 }
 0x330   : > { %v3778_v63 = vrot.slane %v3777_v42, 4 }
 0x331   : > { %v3831_v55 = vpop.f32.mrf.mxu2  ;;  %v3894_v38 = vadd.f32 %v3829_v53, %v3738_v35  ;;  %v3969_v6 = vpop.f32.mrf.mxu3  ;;  %5531 = vmatmul.msk.bf16.gmra.mxu1 %vm2911_vm13, %v6705_v62  ;;  %v3773_v62 = vsel %vm6212_vm14, %v3768_v56, %v3772_v47  ;;  %v5551_v47 = vrot.slane %v6960_v45, 9 }
 0x332   : > { %v3786_v42 = vunpack.c.l.b16 %v3773_v62 }
 0x333   : > { %v6990_v50 = vadd.f32 %v3969_v6, %v3894_v38  ;;  %v3783_v6 = vsel %vm6212_vm14, %v3778_v63, %v3782_v44  ;;  %v3919_v38 = vrot.slane %v6962_v33, 5 }
 0x335   : > { %v3921_v33 = vrot.slane %v3919_v38, 4  ;;  %v3920_v44 = vsel %vm6163_vm10, %v5551_v47, %v3919_v38 }
 0x336   : > { %5549 = vmatmul.msk.bf16.gmra.mxu2 %vm2911_vm13, %v6775_v8  ;;  %v3675_v17 = vpop.f32.mrf.mxu1  ;;  %v3926_v45 = vunpack.c.l.b16 %v3920_v44 }
 0x337   : > { %v3739_v18 = vadd.f32 %v3675_v17, %v7701_v12 }
 0x338   : > { %5585 = vmatmul.msk.bf16.gmra.mxu0 %vm2911_vm13, %v7702_v34 }
 0x339   : > { %v3834_v52 = vpop.f32.mrf.mxu2  ;;  %v6995_v53 = vadd.f32 %v3831_v55, %v3739_v18  ;;  %v6997_v35 = vpop.f32.mrf.mxu3  ;;  %v3787_v55 = vunpack.c.l.b16 %v3783_v6  ;;  %v3922_v18 = vrot.slane %v2469_v40, 5 }
 0x33b   : > { %v7014_v63 = vpack.c.b16 %v3787_v55, %v3786_v42 }
 0x33e   : > { %5567 = vmatmul.msk.bf16.gmra.mxu3 %vm2911_vm13, %v6763_v49  ;;  %v3678_v4 = vpop.f32.mrf.mxu1 }
 0x33f   : > { %v3740_v16 = vadd.f32 %v3678_v4, %v7703_v22 }
 0x341   : > { %v3836_v14 = vpop.f32.mrf.mxu2  ;;  %v3896_v17 = vadd.f32 %v3834_v52, %v3740_v16  ;;  %v3974_v12 = vpop.f32.mrf.mxu3  ;;  %5532 = vmatmul.msk.bf16.gmra.mxu1 %vm2911_vm13, %v6743_v46  ;;  %v3923_v52 = vsel %vm6163_vm10, %v3921_v33, %v3922_v18 }
 0x342   : > { %v3927_v4 = vunpack.c.l.b16 %v3923_v52 }
 0x343   : > { %v7012_v56 = vadd.f32 %v3974_v12, %v3896_v17 }
 0x344   : > { %v7027_v22 = vpack.c.b16 %v3927_v4, %v3926_v45 }
 0x346   : > { %5550 = vmatmul.msk.bf16.gmra.mxu2 %vm2911_vm13, %v7014_v63  ;;  %v3680_v62 = vpop.f32.mrf.mxu1 }
 0x347   : > { %v3741_v46 = vadd.f32 %v3680_v62, %v6753_v60 }
 0x349   : > { %v3839_v6 = vpop.f32.mrf.mxu2  ;;  %v7023_v40 = vadd.f32 %v3836_v14, %v3741_v46  ;;  %v7025_v34 = vpop.f32.mrf.mxu3 }
 0x34e   : > { %5568 = vmatmul.msk.bf16.gmra.mxu3 %vm2911_vm13, %v7027_v22  ;;  %v3683_v16 = vpop.f32.mrf.mxu1 }
 0x34f   : > { %v3742_v38 = vadd.f32 %v3683_v16, %v6777_v28 }
 0x351   : > { %v3841_v30 = vpop.f32.mrf.mxu2  ;;  %v3898_v42 = vadd.f32 %v3839_v6, %v3742_v38  ;;  %v3979_v55 = vpop.f32.mrf.mxu3  ;;  %5533 = vmatmul.msk.bf16.gmra.mxu1 %vm2911_vm13, %v6975_v15 }
 0x353   : > { %v7034_v60 = vadd.f32 %v3979_v55, %v3898_v42 }
 0x356   : > { %5605 = vmatmul.msk.bf16.vlgmr.msra.gmra.mxu2 %vm2911_vm13, %v6226_v54  ;;  %v3685_v14 = vpop.f32.mrf.mxu1 }
 0x357   : > { %v3743_v17 = vadd.f32 %v3685_v14, %v6785_v20 }
 0x359   : > { %v3844_v12 = vpop.f32.mrf.mxu2  ;;  %v7039_v47 = vadd.f32 %v3841_v30, %v3743_v17  ;;  %v7041_v33 = vpop.f32.mrf.mxu3 }
 0x35e   : > { %v3688_v28 = vpop.f32.mrf.mxu1 }
 0x35f   : > { %v3744_v18 = vadd.f32 %v3688_v28, %v6791_v3 }
 0x361   : > { %v3846_v44 = vpop.f32.mrf.mxu2  ;;  %v3900_v52 = vadd.f32 %v3844_v12, %v3744_v18  ;;  %v3984_v62 = vpop.f32.mrf.mxu3  ;;  %5587 = vmatmul.msk.bf16.vlgmr.msra.gmra.mxu1 %vm2911_vm13, %v6236_v7 }
 0x363   : > { %v7046_v15 = vadd.f32 %v3984_v62, %v3900_v52 }
 0x366   : > { %5606 = vmatmul.msk.bf16.gmra.mxu2 %vm2911_vm13, %v6262_v1  ;;  %v3690_v54 = vpop.f32.mrf.mxu1 }
 0x367   : > { %v3745_v20 = vadd.f32 %v3690_v54, %v6797_v25 }
 0x369   : > { %v3849_v46 = vpop.f32.mrf.mxu2  ;;  %v7051_v6 = vadd.f32 %v3846_v44, %v3745_v20  ;;  %v7053_v45 = vpop.f32.mrf.mxu3 }
 0x36e   : > { %v3693_v3 = vpop.f32.mrf.mxu1 }
 0x36f   : > { %v3746_v4 = vadd.f32 %v3693_v3, %v6803_v21 }
 0x371   : > { %v3851_v16 = vpop.f32.mrf.mxu2  ;;  %v3902_v38 = vadd.f32 %v3849_v46, %v3746_v4  ;;  %v3989_v30 = vpop.f32.mrf.mxu3  ;;  %5588 = vmatmul.msk.bf16.gmra.mxu1 %vm2911_vm13, %v6269_v57 }
 0x373   : > { %v7058_v7 = vadd.f32 %v3989_v30, %v3902_v38 }
 0x376   : > { %5607 = vmatmul.msk.bf16.gmra.mxu2 %vm2911_vm13, %v6293_v9  ;;  %v3695_v1 = vpop.f32.mrf.mxu1 }
 0x377   : > { %v3747_v25 = vadd.f32 %v3695_v1, %v6809_v11 }
 0x379   : > { %v3854_v42 = vpop.f32.mrf.mxu2  ;;  %v7063_v55 = vadd.f32 %v3851_v16, %v3747_v25  ;;  %v7065_v14 = vpop.f32.mrf.mxu3 }
 0x37e   : > { %v3698_v21 = vpop.f32.mrf.mxu1 }
 0x37f   : > { %v3748_v17 = vadd.f32 %v3698_v21, %v6815_v19 }
 0x381   : > { %v3856_v12 = vpop.f32.mrf.mxu2  ;;  %v3904_v28 = vadd.f32 %v3854_v42, %v3748_v17  ;;  %v3994_v18 = vpop.f32.mrf.mxu3  ;;  %5589 = vmatmul.msk.bf16.gmra.mxu1 %vm2911_vm13, %v6299_v29  ;;  %v7705_v17 = vld [vmem:[#allocation30_spill] sm:$0xff] }
 0x383   : > { %v7070_v57 = vadd.f32 %v3994_v18, %v3904_v28 }
 0x386   : > { %5608 = vmatmul.msk.bf16.gmra.mxu2 %vm2911_vm13, %v6331_v24  ;;  %v3700_v9 = vpop.f32.mrf.mxu1 }
 0x387   : > { %v3749_v11 = vadd.f32 %v3700_v9, %v6821_v58  ;;  %v7704_v58 = vld [vmem:[#allocation29_spill] sm:$0xff] }
 0x389   : > { %v3859_v44 = vpop.f32.mrf.mxu2  ;;  %v7075_v52 = vadd.f32 %v3856_v12, %v3749_v11  ;;  %v7077_v62 = vpop.f32.mrf.mxu3 }
 0x38e   : > { %v3703_v19 = vpop.f32.mrf.mxu1 }
 0x38f   : > { %v3750_v54 = vadd.f32 %v3703_v19, %v6827_v0 }
 0x391   : > { %v3861_v20 = vpop.f32.mrf.mxu2  ;;  %v3906_v46 = vadd.f32 %v3859_v44, %v3750_v54  ;;  %v3999_v3 = vpop.f32.mrf.mxu3  ;;  %5590 = vmatmul.msk.bf16.gmra.mxu1 %vm2911_vm13, %v6334_v31 }
 0x393   : > { %v7082_v29 = vadd.f32 %v3999_v3, %v3906_v46 }
 0x396   : > { %5609 = vmatmul.msk.bf16.gmra.mxu2 %vm2911_vm13, %v6360_v51  ;;  %v3705_v24 = vpop.f32.mrf.mxu1 }
 0x397   : > { %v3751_v4 = vadd.f32 %v3705_v24, %v7704_v58  ;;  %v7706_v58 = vld [vmem:[#allocation31_spill] sm:$0xff] }
 0x399   : > { %v3864_v16 = vpop.f32.mrf.mxu2  ;;  %v7087_v38 = vadd.f32 %v3861_v20, %v3751_v4  ;;  %v7089_v30 = vpop.f32.mrf.mxu3 }
 0x39e   : > { %v3708_v0 = vpop.f32.mrf.mxu1 }
 0x39f   : > { %v3752_v1 = vadd.f32 %v3708_v0, %v6841_v26 }
 0x3a1   : > { %v3866_v25 = vpop.f32.mrf.mxu2  ;;  %v3908_v42 = vadd.f32 %v3864_v16, %v3752_v1  ;;  %v4004_v21 = vpop.f32.mrf.mxu3  ;;  %5591 = vmatmul.msk.bf16.gmra.mxu1 %vm2911_vm13, %v6362_v2 }
 0x3a3   : > { %v7094_v31 = vadd.f32 %v4004_v21, %v3908_v42  ;;  %v7709_v42 = vld [vmem:[#allocation32_spill] sm:$0xff] }
 0x3a6   : > { %5610 = vmatmul.msk.bf16.gmra.mxu2 %vm2911_vm13, %v6397_v13  ;;  %v3710_v51 = vpop.f32.mrf.mxu1 }
 0x3a7   : > { %v3753_v12 = vadd.f32 %v3710_v51, %v7705_v17 }
 0x3a9   : > { %v3869_v28 = vpop.f32.mrf.mxu2  ;;  %v7099_v18 = vadd.f32 %v3866_v25, %v3753_v12  ;;  %v7101_v9 = vpop.f32.mrf.mxu3 }
 0x3ae   : > { %v3713_v26 = vpop.f32.mrf.mxu1 }
 0x3af   : > { %v3754_v11 = vadd.f32 %v3713_v26, %v6853_v23  ;;  %v7710_v26 = vld [vmem:[#allocation33_spill] sm:$0xff] }
 0x3b1   : > { %v3871_v44 = vpop.f32.mrf.mxu2  ;;  %v3910_v19 = vadd.f32 %v3869_v28, %v3754_v11  ;;  %v4009_v54 = vpop.f32.mrf.mxu3  ;;  %5592 = vmatmul.msk.bf16.gmra.mxu1 %vm2911_vm13, %v6403_v37  ;;  %v7707_v37 = vld [vmem:[#allocation3_spill] sm:$0xff] }
 0x3b3   : > { %v7106_v2 = vadd.f32 %v4009_v54, %v3910_v19  ;;  %v7711_v54 = vld [vmem:[#allocation5_spill] sm:$0xff] }
 0x3b6   : > { %5611 = vmatmul.msk.bf16.gmra.mxu2 %vm2911_vm13, %v6435_v59  ;;  %v3715_v13 = vpop.f32.mrf.mxu1  ;;  %v7708_v59 = vld [vmem:[#allocation4_spill] sm:$0xff] }
 0x3b7   : > { %v3755_v20 = vadd.f32 %v3715_v13, %v6857_v41 }
 0x3b9   : > { %v3874_v46 = vpop.f32.mrf.mxu2  ;;  %v7111_v3 = vadd.f32 %v3871_v44, %v3755_v20  ;;  %v7113_v24 = vpop.f32.mrf.mxu3 }
 0x3be   : > { %v3718_v23 = vpop.f32.mrf.mxu1 }
 0x3bf   : > { %v3756_v4 = vadd.f32 %v3718_v23, %v7706_v58  ;;  %v7712_v23 = vld [vmem:[#allocation34_spill] sm:$0xff] }
 0x3c1   : > { %v3876_v16 = vpop.f32.mrf.mxu2  ;;  %v3912_v0 = vadd.f32 %v3874_v46, %v3756_v4  ;;  %v4014_v1 = vpop.f32.mrf.mxu3  ;;  %5593 = vmatmul.msk.bf16.gmra.mxu1 %vm2911_vm13, %v7707_v37 }
 0x3c3   : > { %v7118_v25 = vadd.f32 %v4014_v1, %v3912_v0 }
 0x3c6   : > { %5612 = vmatmul.msk.bf16.gmra.mxu2 %vm2911_vm13, %v7708_v59  ;;  %v3720_v41 = vpop.f32.mrf.mxu1  ;;  %v7714_v59 = vld [vmem:[#allocation8_spill] sm:$0xff] }
 0x3c7   : > { %v3757_v21 = vadd.f32 %v3720_v41, %v7709_v42  ;;  %v7143_v42 = vld [vmem:[%s7601_s6] ss:$0 sm:$0xff] }
 0x3c9   : > { %v3879_v51 = vpop.f32.mrf.mxu2  ;;  %v7123_v17 = vadd.f32 %v3876_v16, %v3757_v21  ;;  %v7125_v12 = vpop.f32.mrf.mxu3 }
 0x3ce   : > { %v3723_v28 = vpop.f32.mrf.mxu1 }
 0x3cf   : > { %v3758_v11 = vadd.f32 %v3723_v28, %v7710_v26 }
 0x3d1   : > { %v3881_v44 = vpop.f32.mrf.mxu2  ;;  %v3914_v19 = vadd.f32 %v3879_v51, %v3758_v11  ;;  %5594 = vmatmul.msk.bf16.gmra.mxu1 %vm2911_vm13, %v7711_v54  ;;  %v4019_v13 = vpop.f32.mrf.mxu3  ;;  %v7715_v51 = vld [vmem:[#allocation35_spill] sm:$0xff] }
 0x3d3   : > { %v7130_v20 = vadd.f32 %v4019_v13, %v3914_v19 }
 0x3d6   : > { %5613 = vmatmul.msk.bf16.gmra.mxu2 %vm2911_vm13, %v7679_v61  ;;  %v3725_v46 = vpop.f32.mrf.mxu1 }
 0x3d7   : > { %v3759_v58 = vadd.f32 %v3725_v46, %v7712_v23 }
 0x3d9   : > { %v4374_v4 = vpop.f32.mrf.mxu2  ;;  %v7135_v16 = vadd.f32 %v3881_v44, %v3759_v58 }
 0x3db   : > { %7713 = vst [vmem:[#allocation17_spill] sm:$0xff] %v7135_v16 }
 0x3de   : > { %v4234_v0 = vpop.f32.mrf.mxu1 }
 0x3df   : > { %v4314_v1 = vadd.f32 %v4234_v0, %v6895_v36  ;;  %v7151_v36 = vld [vmem:[%s7602_s7] ss:$0 sm:$0xff] }
 0x3e1   : > { %v4376_v37 = vpop.f32.mrf.mxu2  ;;  %5595 = vmatmul.msk.bf16.gmra.mxu1 %vm2911_vm13, %v7714_v59  ;;  %v4454_v41 = vadd.f32 %v4374_v4, %v4314_v1  ;;  %v7716_v1 = vld [vmem:[#allocation13_spill] sm:$0xff] }
 0x3e3   : > { %v4490_v21 = vmul.f32 %v7143_v42, %v4454_v41 }
 0x3e5   : > { %v4526_v44 = vadd.f32 %v7151_v36, %v4490_v21 }
 0x3e6   : > { %5614 = vmatmul.msk.bf16.gmra.mxu2 %vm2911_vm13, %v7682_v27  ;;  %v4236_v61 = vpop.f32.mrf.mxu1  ;;  %v4098_v27 = vpop.f32.mrf.mxu0 }
 0x3e7   : > { %v4315_v28 = vadd.f32 %v4236_v61, %v7715_v51  ;;  %v4558_v46 = vmax.f32 %v4526_v44, 0.0 }
 0x3e9   : > { %v4379_v26 = vpop.f32.mrf.mxu2  ;;  %v4455_v11 = vadd.f32 %v4376_v37, %v4315_v28 }
 0x3eb   : > { %v4491_v19 = vmul.f32 %v7143_v42, %v4455_v11 }
 0x3ed   : > { %v4527_v54 = vadd.f32 %v7151_v36, %v4491_v19 }
 0x3ee   : > { %v4239_v13 = vpop.f32.mrf.mxu1  ;;  %v4100_v51 = vpop.f32.mrf.mxu0 }
 0x3ef   : > { %v4559_v23 = vmax.f32 %v4527_v54, 0.0  ;;  %v4316_v58 = vadd.f32 %v4239_v13, %v6907_v5  ;;  %v7717_v13 = vld [vmem:[#allocation15_spill] sm:$0xff] }
 0x3f1   : > { %v4381_v4 = vpop.f32.mrf.mxu2  ;;  %v4590_v0 = vpack.c.bf16 %v4559_v23, %v4558_v46  ;;  %5596 = vmatmul.msk.bf16.gmra.mxu1 %vm2911_vm13, %v7716_v1  ;;  %v4456_v59 = vadd.f32 %v4379_v26, %v4316_v58  ;;  %v7718_v23 = vld [vmem:[#allocation18_spill] sm:$0xff] }
 0x3f3   : > { %5621 = vmatmul.msk.bf16.vlgmr.msra.gmra.mxu3 %vm2911_vm13, %v4590_v0  ;;  %v4492_v41 = vmul.f32 %v7143_v42, %v4456_v59  ;;  %v7719_v59 = vld [vmem:[#allocation7_spill] sm:$0xff] }
 0x3f5   : > { %v4528_v5 = vadd.f32 %v7151_v36, %v4492_v41 }
 0x3f6   : > { %5615 = vmatmul.msk.bf16.gmra.mxu2 %vm2911_vm13, %v7688_v48  ;;  %v4241_v37 = vpop.f32.mrf.mxu1 }
 0x3f7   : > { %v4317_v61 = vadd.f32 %v4241_v37, %v6909_v10  ;;  %v4560_v19 = vmax.f32 %v4528_v5, 0.0  ;;  %v4103_v10 = vpop.f32.mrf.mxu0 }
 0x3f9   : > { %v4384_v21 = vpop.f32.mrf.mxu2  ;;  %v4457_v28 = vadd.f32 %v4381_v4, %v4317_v61 }
 0x3fb   : > { %v4493_v11 = vmul.f32 %v7143_v42, %v4457_v28 }
 0x3fd   : > { %v4529_v44 = vadd.f32 %v7151_v36, %v4493_v11 }
 0x3fe   : > { %v4244_v26 = vpop.f32.mrf.mxu1 }
 0x3ff   : > { %v4561_v54 = vmax.f32 %v4529_v44, 0.0  ;;  %v4318_v46 = vadd.f32 %v4244_v26, %v7717_v13  ;;  %v4105_v11 = vpop.f32.mrf.mxu0  ;;  %v7720_v13 = vld [vmem:[#allocation23_spill] sm:$0xff] }
 0x401   : > { %v4386_v48 = vpop.f32.mrf.mxu2  ;;  %5597 = vmatmul.msk.bf16.gmra.mxu1 %vm2911_vm13, %v7718_v23  ;;  %v4591_v58 = vpack.c.bf16 %v4561_v54, %v4560_v19  ;;  %v4458_v0 = vadd.f32 %v4384_v21, %v4318_v46 }
 0x403   : > { %5622 = vmatmul.msk.bf16.gmra.mxu3 %vm2911_vm13, %v4591_v58  ;;  %v4494_v1 = vmul.f32 %v7143_v42, %v4458_v0 }
 0x405   : > { %v4530_v28 = vadd.f32 %v7151_v36, %v4494_v1  ;;  %v7722_v1 = vld [vmem:[#allocation20_spill] sm:$0xff] }
 0x406   : > { %5616 = vmatmul.msk.bf16.gmra.mxu2 %vm2911_vm13, %v6674_v43  ;;  %v4246_v4 = vpop.f32.mrf.mxu1 }
 0x407   : > { %v4319_v37 = vadd.f32 %v4246_v4, %v7719_v59  ;;  %v4562_v26 = vmax.f32 %v4530_v28, 0.0  ;;  %v4108_v0 = vpop.f32.mrf.mxu0 }
 0x409   : > { %v4389_v41 = vpop.f32.mrf.mxu2  ;;  %v4459_v61 = vadd.f32 %v4386_v48, %v4319_v37  ;;  %v7721_v48 = vld [vmem:[#allocation26_spill] sm:$0xff] }
 0x40b   : > { %v4495_v5 = vmul.f32 %v7143_v42, %v4459_v61 }
 0x40d   : > { %v4531_v44 = vadd.f32 %v7151_v36, %v4495_v5 }
 0x40e   : > { %v4249_v21 = vpop.f32.mrf.mxu1 }
 0x40f   : > { %v4563_v19 = vmax.f32 %v4531_v44, 0.0  ;;  %v4320_v54 = vadd.f32 %v4249_v21, %v6946_v32  ;;  %v4110_v16 = vpop.f32.mrf.mxu0 }
 0x411   : > { %v4391_v43 = vpop.f32.mrf.mxu2  ;;  %5598 = vmatmul.msk.bf16.gmra.mxu1 %vm2911_vm13, %v7720_v13  ;;  %v4592_v46 = vpack.c.bf16 %v4563_v19, %v4562_v26  ;;  %v4460_v23 = vadd.f32 %v4389_v41, %v4320_v54  ;;  %v7723_v41 = vld [vmem:[#allocation11_spill] sm:$0xff] }
 0x412   : > { %v4166_v44 = vadd.f32 %v4098_v27, %v7723_v41 }
 0x413   : > { %5623 = vmatmul.msk.bf16.gmra.mxu3 %vm2911_vm13, %v4592_v46  ;;  %v4496_v4 = vmul.f32 %v7143_v42, %v4460_v23  ;;  %v7724_v46 = vld [vmem:[#allocation9_spill] sm:$0xff] }
 0x415   : > { %v4532_v32 = vadd.f32 %v7151_v36, %v4496_v4 }
 0x416   : > { %5617 = vmatmul.msk.bf16.gmra.mxu2 %vm2911_vm13, %v7721_v48  ;;  %v4251_v58 = vpop.f32.mrf.mxu1  ;;  %v7725_v48 = vld [vmem:[#allocation10_spill] sm:$0xff] }
 0x417   : > { %v4321_v59 = vadd.f32 %v4251_v58, %v7722_v1  ;;  %v4564_v26 = vmax.f32 %v4532_v32, 0.0  ;;  %v4033_v23 = vadd.f32 %v7725_v48, %v7724_v46  ;;  %v7726_v58 = vld [vmem:[#allocation27_spill] sm:$0xff]  ;;  %v4035_v46 = vadd.f32 %v6997_v35, %v6995_v53 }
 0x419   : > { %v4394_v37 = vpop.f32.mrf.mxu2  ;;  %v4461_v61 = vadd.f32 %v4391_v43, %v4321_v59  ;;  %v4167_v1 = vadd.f32 %v4100_v51, %v4033_v23 }
 0x41b   : > { %v4497_v28 = vmul.f32 %v7143_v42, %v4461_v61 }
 0x41d   : > { %v4533_v5 = vadd.f32 %v7151_v36, %v4497_v28 }
 0x41e   : > { %v4254_v21 = vpop.f32.mrf.mxu1 }
 0x41f   : > { %v4565_v19 = vmax.f32 %v4533_v5, 0.0  ;;  %v4322_v54 = vadd.f32 %v4254_v21, %v4166_v44  ;;  %v4113_v5 = vpop.f32.mrf.mxu0 }
 0x421   : > { %v4396_v13 = vpop.f32.mrf.mxu2  ;;  %5599 = vmatmul.msk.bf16.gmra.mxu1 %vm2911_vm13, %v7726_v58  ;;  %v4593_v43 = vpack.c.bf16 %v4565_v19, %v4564_v26  ;;  %v4462_v4 = vadd.f32 %v4394_v37, %v4322_v54  ;;  %v4168_v37 = vadd.f32 %v4103_v10, %v6990_v50  ;;  %v4169_v58 = vadd.f32 %v4105_v11, %v4035_v46 }
 0x422   : > { %v4172_v46 = vadd.f32 %v4113_v5, %v7034_v60 }
 0x423   : > { %5624 = vmatmul.msk.bf16.gmra.mxu3 %vm2911_vm13, %v4593_v43  ;;  %v4498_v59 = vmul.f32 %v7143_v42, %v4462_v4 }
 0x425   : > { %v4534_v41 = vadd.f32 %v7151_v36, %v4498_v59 }
 0x426   : > { %5618 = vmatmul.msk.bf16.gmra.mxu2 %vm2911_vm13, %v6763_v49  ;;  %v4256_v27 = vpop.f32.mrf.mxu1 }
 0x427   : > { %v4323_v61 = vadd.f32 %v4256_v27, %v4167_v1  ;;  %v4566_v51 = vmax.f32 %v4534_v41, 0.0  ;;  %v4115_v23 = vpop.f32.mrf.mxu0  ;;  %v4170_v27 = vadd.f32 %v4108_v0, %v7012_v56  ;;  %v4037_v41 = vadd.f32 %v7025_v34, %v7023_v40 }
 0x429   : > { %v4399_v32 = vpop.f32.mrf.mxu2  ;;  %v4463_v28 = vadd.f32 %v4396_v13, %v4323_v61 }
 0x42b   : > { %v4499_v44 = vmul.f32 %v7143_v42, %v4463_v28 }
 0x42d   : > { %v4535_v21 = vadd.f32 %v7151_v36, %v4499_v44 }
 0x42e   : > { %v4259_v26 = vpop.f32.mrf.mxu1 }
 0x42f   : > { %v4567_v19 = vmax.f32 %v4535_v21, 0.0  ;;  %v4324_v54 = vadd.f32 %v4259_v26, %v4168_v37  ;;  %v4118_v61 = vpop.f32.mrf.mxu0  ;;  %v4171_v37 = vadd.f32 %v4110_v16, %v4037_v41  ;;  %v7727_v26 = vld [vmem:[#allocation22_spill] sm:$0xff] }
 0x431   : > { %v4401_v49 = vpop.f32.mrf.mxu2  ;;  %5600 = vmatmul.msk.bf16.gmra.mxu1 %vm2911_vm13, %v6775_v8  ;;  %v4594_v13 = vpack.c.bf16 %v4567_v19, %v4566_v51  ;;  %v4464_v48 = vadd.f32 %v4399_v32, %v4324_v54 }
 0x433   : > { %5625 = vmatmul.msk.bf16.gmra.mxu3 %vm2911_vm13, %v4594_v13  ;;  %v4500_v10 = vmul.f32 %v7143_v42, %v4464_v48 }
 0x435   : > { %v4536_v53 = vadd.f32 %v7151_v36, %v4500_v10  ;;  %v4039_v10 = vadd.f32 %v7041_v33, %v7039_v47 }
 0x436   : > { %5619 = vmatmul.msk.bf16.gmra.mxu2 %vm2911_vm13, %v7027_v22  ;;  %v4261_v50 = vpop.f32.mrf.mxu1 }
 0x437   : > { %v4325_v43 = vadd.f32 %v4261_v50, %v4169_v58  ;;  %v4568_v11 = vmax.f32 %v4536_v53, 0.0  ;;  %v4120_v54 = vpop.f32.mrf.mxu0 }
 0x439   : > { %v4404_v4 = vpop.f32.mrf.mxu2  ;;  %v4465_v1 = vadd.f32 %v4401_v49, %v4325_v43  ;;  %v7728_v43 = vld [vmem:[#allocation6_spill] sm:$0xff] }
 0x43b   : > { %v4501_v35 = vmul.f32 %v7143_v42, %v4465_v1 }
 0x43d   : > { %v4537_v8 = vadd.f32 %v7151_v36, %v4501_v35  ;;  %v4173_v35 = vadd.f32 %v4115_v23, %v4039_v10 }
 0x43e   : > { %v4264_v59 = vpop.f32.mrf.mxu1 }
 0x43f   : > { %v4569_v32 = vmax.f32 %v4537_v8, 0.0  ;;  %v4326_v28 = vadd.f32 %v4264_v59, %v4170_v27  ;;  %v4123_v1 = vpop.f32.mrf.mxu0 }
 0x441   : > { %v4406_v22 = vpop.f32.mrf.mxu2  ;;  %5601 = vmatmul.msk.bf16.gmra.mxu1 %vm2911_vm13, %v7014_v63  ;;  %v4595_v44 = vpack.c.bf16 %v4569_v32, %v4568_v11  ;;  %v4466_v21 = vadd.f32 %v4404_v4, %v4326_v28  ;;  %v4174_v28 = vadd.f32 %v4118_v61, %v7046_v15 }
 0x443   : > { %5626 = vmatmul.msk.bf16.gmra.mxu3 %vm2911_vm13, %v4595_v44  ;;  %v4502_v0 = vmul.f32 %v7143_v42, %v4466_v21 }
 0x445   : > { %v4538_v40 = vadd.f32 %v7151_v36, %v4502_v0 }
 0x446   : > { %5620 = vmatmul.msk.bf16.gmra.mxu2 %vm2911_vm13, %v7727_v26  ;;  %v4266_v56 = vpop.f32.mrf.mxu1 }
 0x447   : > { %v4327_v51 = vadd.f32 %v4266_v56, %v4171_v37  ;;  %v4570_v16 = vmax.f32 %v4538_v40, 0.0  ;;  %v4125_v33 = vpop.f32.mrf.mxu0  ;;  %v4041_v37 = vadd.f32 %v7053_v45, %v7051_v6  ;;  %v5680_v56 = vld [vmem:[%s5841_s23 + $0xc] sm:$0xf]  ;;  %v5681_v45 = vld [vmem:[%s5841_s23 + $0x10] sm:$0xf] }
 0x448   : > { %v4747_v0 = vshrl.u32 %v5680_v56, 16  ;;  %v4759_v10 = vshrl.u32 %v5681_v45, 16 }
 0x449   : > { %v4409_v19 = vpop.f32.mrf.mxu2  ;;  %v4467_v49 = vadd.f32 %v4406_v22, %v4327_v51  ;;  %v4750_v51 = vshll.u32 %v5680_v56, 16 }
 0x44b   : > { %v4503_v34 = vmul.f32 %v7143_v42, %v4467_v49  ;;  %v4175_v49 = vadd.f32 %v4120_v54, %v4041_v37  ;;  %v4752_v15 = vrot.slane %v4750_v51, 5 }
 0x44d   : > { %v4539_v63 = vadd.f32 %v7151_v36, %v4503_v34  ;;  %v4749_v34 = vrot.slane %v4747_v0, 4 }
 0x44e   : > { %v4269_v13 = vpop.f32.mrf.mxu1 }
 0x44f   : > { %v4571_v48 = vmax.f32 %v4539_v63, 0.0  ;;  %v4328_v58 = vadd.f32 %v4269_v13, %v4172_v46  ;;  %v7241_v61 = vpop.f32.mrf.mxu0  ;;  %v4753_v6 = vor.u32 %v4752_v15, %v4749_v34 }
 0x451   : > { %v4411_v50 = vpop.f32.mrf.mxu2  ;;  %5602 = vmatmul.msk.bf16.gmra.mxu1 %vm2911_vm13, %v7728_v43  ;;  %v4596_v4 = vpack.c.bf16 %v4571_v48, %v4570_v16  ;;  %v4468_v53 = vadd.f32 %v4409_v19, %v4328_v58  ;;  %v4755_v48 = vshll.u32 %v5681_v45, 16  ;;  %v4176_v43 = vadd.f32 %v4123_v1, %v7058_v7 }
 0x453   : > { %5627 = vmatmul.msk.bf16.gmra.mxu3 %vm2911_vm13, %v4596_v4  ;;  %v4504_v60 = vmul.f32 %v7143_v42, %v4468_v53  ;;  %v7249_v4 = vpop.f32.mrf.mxu3 }
 0x455   : > { %v4540_v11 = vadd.f32 %v7151_v36, %v4504_v60 }
 0x456   : > { %v4271_v8 = vpop.f32.mrf.mxu1 }
 0x457   : > { %v4329_v5 = vadd.f32 %v4271_v8, %v4173_v35  ;;  %v4572_v41 = vmax.f32 %v4540_v11, 0.0  ;;  %v4754_v35 = vrot.slane %v4753_v6, 4  ;;  %v4757_v8 = vrot.slane %v4755_v48, 5  ;;  %v5684_v6 = vld [vmem:[%s5841_s23 + $0x1c] sm:$0xf] }
 0x458   : > { %v4780_v45 = vshrl.u32 %v5684_v6, 16 }
 0x459   : > { %v4414_v27 = vpop.f32.mrf.mxu2  ;;  %v4469_v59 = vadd.f32 %v4411_v50, %v4329_v5  ;;  %v4758_v1 = vsel %vm6212_vm14, %v4754_v35, %v4757_v8 }
 0x45b   : > { %v4505_v47 = vmul.f32 %v7143_v42, %v4469_v59  ;;  %v4761_v59 = vrot.slane %v4759_v10, 4 }
 0x45d   : > { %v4541_v32 = vadd.f32 %v7151_v36, %v4505_v47  ;;  %v7252_v47 = vpop.f32.mrf.mxu0 }
 0x45e   : > { %v4274_v22 = vpop.f32.mrf.mxu1 }
 0x45f   : > { %v4573_v44 = vmax.f32 %v4541_v32, 0.0  ;;  %v4330_v23 = vadd.f32 %v4274_v22, %v4174_v28  ;;  %v4043_v32 = vadd.f32 %v7065_v14, %v7063_v55  ;;  %v7266_v22 = vld [vmem:[%s7603_s8] ss:$0 sm:$0xff]  ;;  %v5683_v14 = vld [vmem:[%s5841_s23 + $0x18] sm:$0xf] }
 0x461   : > { %v4416_v21 = vpop.f32.mrf.mxu2  ;;  %v4597_v26 = vpack.c.bf16 %v4573_v44, %v4572_v41  ;;  %v4470_v19 = vadd.f32 %v4414_v27, %v4330_v23  ;;  %v4762_v41 = vor.u32 %v4761_v59, %v4757_v8  ;;  %v5682_v44 = vld [vmem:[%s5841_s23 + $0x14] sm:$0x1]  ;;  %v4768_v23 = vshrl.u32 %v5683_v14, 16 }
 0x462   : > { %v4764_v55 = vshll.u32 %v5682_v44, 16  ;;  %v4177_v37 = vadd.f32 %v4125_v33, %v4043_v32 }
 0x463   : > { %5628 = vmatmul.msk.bf16.gmra.mxu3 %vm2911_vm13, %v4597_v26  ;;  %v4506_v63 = vmul.f32 %v7143_v42, %v4470_v19  ;;  %v7273_v26 = vld [vmem:[%s7604_s9] ss:$0 sm:$0xff]  ;;  %v5115_v19 = vunpack.c.l.bf16 %v4758_v1  ;;  %v4763_v34 = vrot.slane %v4762_v41, 4  ;;  %v4770_v33 = vrot.slane %v4768_v23, 4 }
 0x464   : > { %v4766_v15 = vrot.slane %v4764_v55, 5 }
 0x465   : > { %v4542_v58 = vadd.f32 %v7151_v36, %v4506_v63 }
 0x466   : > { %v4276_v40 = vpop.f32.mrf.mxu1 }
 0x467   : > { %v4331_v46 = vadd.f32 %v4276_v40, %v4175_v49  ;;  %v4574_v60 = vmax.f32 %v4542_v58, 0.0  ;;  %v4776_v58 = vshll.u32 %v5684_v6, 16 }
 0x469   : > { %v4419_v13 = vpop.f32.mrf.mxu2  ;;  %v4471_v16 = vadd.f32 %v4416_v21, %v4331_v46  ;;  %v4771_v21 = vshll.u32 %v5683_v14, 16 }
 0x46b   : > { %v4507_v50 = vmul.f32 %v7143_v42, %v4471_v16  ;;  %v4773_v46 = vrot.slane %v4771_v21, 5 }
 0x46d   : > { %v4543_v54 = vadd.f32 %v7151_v36, %v4507_v50  ;;  %v7282_v50 = vpop.f32.mrf.mxu0 }
 0x46e   : > { %v4279_v53 = vpop.f32.mrf.mxu1 }
 0x46f   : > { %v4575_v5 = vmax.f32 %v4543_v54, 0.0  ;;  %v4332_v27 = vadd.f32 %v4279_v53, %v4176_v43  ;;  %v4767_v43 = vsel %vm6212_vm14, %v4763_v34, %v4766_v15  ;;  %v4774_v53 = vor.u32 %v4773_v46, %v4770_v33 }
 0x470   : > { %v5116_v32 = vunpack.c.l.bf16 %v4767_v43 }
 0x471   : > { %v4421_v11 = vpop.f32.mrf.mxu2  ;;  %v4598_v28 = vpack.c.bf16 %v4575_v5, %v4574_v60  ;;  %v4472_v7 = vadd.f32 %v4419_v13, %v4332_v27  ;;  %v4178_v60 = vadd.f32 %v7241_v61, %v7070_v57  ;;  %v4782_v5 = vrot.slane %v4780_v45, 4 }
 0x472   : > { %v4045_v61 = vadd.f32 %v7077_v62, %v7075_v52  ;;  %v4775_v55 = vrot.slane %v4774_v53, 4 }
 0x473   : > { %5629 = vmatmul.msk.bf16.gmra.mxu3 %vm2911_vm13, %v4598_v28  ;;  %v4508_v56 = vmul.f32 %v7143_v42, %v4472_v7  ;;  %v4778_v28 = vrot.slane %v4776_v58, 5 }
 0x474   : > { %v4179_v15 = vadd.f32 %v7252_v47, %v4045_v61 }
 0x475   : > { %v4544_v48 = vadd.f32 %v7151_v36, %v4508_v56  ;;  %v4783_v21 = vor.u32 %v4782_v5, %v4778_v28  ;;  %v4779_v52 = vsel %vm6212_vm14, %v4775_v55, %v4778_v28  ;;  %v4135_v62 = vpop.f32.mrf.mxu0  ;;  %v5687_v5 = vld [vmem:[%s5841_s23 + $0x28] sm:$0xf] }
 0x476   : > { %v4281_v0 = vpop.f32.mrf.mxu1  ;;  %v4667_v51 = vpop.f32.mrf.mxu3 }
 0x477   : > { %v4333_v49 = vadd.f32 %v4281_v0, %v4177_v37  ;;  %v5151_v40 = vmul.f32 %v7266_v22, %v4667_v51  ;;  %v4576_v27 = vmax.f32 %v4544_v48, 0.0  ;;  %v5685_v37 = vld [vmem:[%s5841_s23 + $0x20] sm:$0x1]  ;;  %v5686_v51 = vld [vmem:[%s5841_s23 + $0x24] sm:$0xf]  ;;  %v4784_v33 = vrot.slane %v4783_v21, 4 }
 0x478   : > { %v4785_v56 = vshll.u32 %v5685_v37, 16 }
 0x479   : > { %v4424_v63 = vpop.f32.mrf.mxu2  ;;  %v4473_v13 = vadd.f32 %v4421_v11, %v4333_v49  ;;  %v5187_v16 = vadd.f32 %v7273_v26, %v5151_v40  ;;  %v4792_v49 = vshll.u32 %v5686_v51, 16 }
 0x47a   : > { %v4787_v46 = vrot.slane %v4785_v56, 5 }
 0x47b   : > { %v4509_v10 = vmul.f32 %v7143_v42, %v4473_v13  ;;  %v5219_v54 = vadd.f32 %v5187_v16, %v5115_v19  ;;  %v4789_v19 = vshrl.u32 %v5686_v51, 16  ;;  %v4794_v45 = vrot.slane %v4792_v49, 5 }
 0x47c   : > { %v4047_v49 = vadd.f32 %v7089_v30, %v7087_v38 }
 0x47d   : > { %v4545_v35 = vadd.f32 %v7151_v36, %v4509_v10  ;;  %v5251_v8 = vmax.f32 %v5219_v54, 0.0  ;;  %v4791_v6 = vrot.slane %v4789_v19, 4  ;;  %v5117_v10 = vunpack.c.l.bf16 %v4779_v52  ;;  %v4138_v21 = vpop.f32.mrf.mxu0  ;;  %v5688_v52 = vld [vmem:[%s5841_s23 + $0x2c] sm:$0x1] }
 0x47e   : > { %v4284_v59 = vpop.f32.mrf.mxu1  ;;  %v4669_v11 = vpop.f32.mrf.mxu3  ;;  %v4181_v30 = vadd.f32 %v4135_v62, %v4047_v49 }
 0x47f   : > { %v4577_v7 = vmax.f32 %v4545_v35, 0.0  ;;  %v5283_v1 = vpack.c.bf16 %v5251_v8, %v5251_v8  ;;  %v4334_v41 = vadd.f32 %v4284_v59, %v4178_v60  ;;  %v5152_v57 = vmul.f32 %v7266_v22, %v4669_v11 }
 0x480   : > { %v4788_v35 = vsel %vm6212_vm14, %v4784_v33, %v4787_v46  ;;  %v4795_v60 = vor.u32 %v4794_v45, %v4791_v6  ;;  %v4801_v59 = vshrl.u32 %v5687_v5, 16 }
 0x481   : > { %v4426_v44 = vpop.f32.mrf.mxu2  ;;  %5316 = vst.msk [vmem:[%s7293_s22] sm:$0xf] %vm5315_vm15, %v5283_v1  ;;  %v5188_v14 = vadd.f32 %v7273_v26, %v5152_v57  ;;  %v4599_v23 = vpack.c.bf16 %v4577_v7, %v4576_v27  ;;  %v4474_v0 = vadd.f32 %v4424_v63, %v4334_v41  ;;  %v4797_v27 = vshll.u32 %v5687_v5, 16 }
 0x482   : > { %v4180_v1 = vadd.f32 %v7282_v50, %v7082_v29  ;;  %v5118_v41 = vunpack.c.l.bf16 %v4788_v35  ;;  %v4796_v55 = vrot.slane %v4795_v60, 4 }
 0x483   : > { %v5220_v40 = vadd.f32 %v5188_v14, %v5116_v32  ;;  %5630 = vmatmul.msk.bf16.gmra.mxu3 %vm2911_vm13, %v4599_v23  ;;  %v4510_v13 = vmul.f32 %v7143_v42, %v4474_v0  ;;  %v4799_v14 = vrot.slane %v4797_v27, 5  ;;  %v4803_v23 = vrot.slane %v4801_v59, 4  ;;  %v5690_v59 = vld [vmem:[%s5841_s23 + $0x34] sm:$0xf] }
 0x485   : > { %v5252_v34 = vmax.f32 %v5220_v40, 0.0  ;;  %v4546_v8 = vadd.f32 %v7151_v36, %v4510_v13  ;;  %v4800_v33 = vsel %vm6212_vm14, %v4796_v55, %v4799_v14  ;;  %v4804_v46 = vor.u32 %v4803_v23, %v4799_v14  ;;  %v5689_v13 = vld [vmem:[%s5841_s23 + $0x30] sm:$0xf]  ;;  %v4140_v5 = vpop.f32.mrf.mxu0 }
 0x486   : > { %v4286_v63 = vpop.f32.mrf.mxu1  ;;  %v4672_v16 = vpop.f32.mrf.mxu3  ;;  %v4182_v55 = vadd.f32 %v4138_v21, %v7094_v31 }
 0x487   : > { %v5284_v48 = vpack.c.bf16 %v5252_v34, %v5252_v34  ;;  %v4335_v58 = vadd.f32 %v4286_v63, %v4179_v15  ;;  %v5153_v54 = vmul.f32 %v7266_v22, %v4672_v16  ;;  %v4578_v57 = vmax.f32 %v4546_v8, 0.0 }
 0x488   : > { %v4806_v34 = vshll.u32 %v5688_v52, 16  ;;  %v4810_v63 = vshrl.u32 %v5689_v13, 16  ;;  %v4813_v16 = vshll.u32 %v5689_v13, 16 }
 0x489   : > { %v4429_v43 = vpop.f32.mrf.mxu2  ;;  %5317 = vst.msk [vmem:[%s7293_s22 + $0x4] sm:$0xf] %vm5315_vm15, %v5284_v48  ;;  %v4475_v53 = vadd.f32 %v4426_v44, %v4335_v58  ;;  %v5189_v47 = vadd.f32 %v7273_v26, %v5153_v54  ;;  %v5119_v58 = vunpack.c.l.bf16 %v4800_v33  ;;  %v5691_v33 = vld [vmem:[%s5841_s23 + $0x38] sm:$0x1] }
 0x48a   : > { %v4812_v8 = vrot.slane %v4810_v63, 4  ;;  %v4815_v60 = vrot.slane %v4813_v16, 5  ;;  %v5692_v63 = vld [vmem:[%s5841_s23 + $0x3c] sm:$0xf] }
 0x48b   : > { %v4511_v11 = vmul.f32 %v7143_v42, %v4475_v53  ;;  %v5221_v32 = vadd.f32 %v5189_v47, %v5117_v10  ;;  %v4808_v10 = vrot.slane %v4806_v34, 5  ;;  %v4805_v47 = vrot.slane %v4804_v46, 4 }
 0x48c   : > { %v4827_v46 = vshll.u32 %v5691_v33, 16  ;;  %v4831_v16 = vshrl.u32 %v5692_v63, 16 }
 0x48d   : > { %v4547_v28 = vadd.f32 %v7151_v36, %v4511_v11  ;;  %v5253_v7 = vmax.f32 %v5221_v32, 0.0  ;;  %v4822_v11 = vshrl.u32 %v5690_v59, 16 }
 0x48e   : > { %v4289_v61 = vpop.f32.mrf.mxu1  ;;  %v4674_v44 = vpop.f32.mrf.mxu3 }
 0x48f   : > { %v4579_v37 = vmax.f32 %v4547_v28, 0.0  ;;  %v5285_v56 = vpack.c.bf16 %v5253_v7, %v5253_v7  ;;  %v4336_v0 = vadd.f32 %v4289_v61, %v4180_v1  ;;  %v5154_v51 = vmul.f32 %v7266_v22, %v4674_v44 }
 0x490   : > { %v4818_v28 = vshll.u32 %v5690_v59, 16  ;;  %v4824_v14 = vrot.slane %v4822_v11, 4 }
 0x491   : > { %v4431_v19 = vpop.f32.mrf.mxu2  ;;  %5318 = vst.msk [vmem:[%s7293_s22 + $0x8] sm:$0xf] %vm5315_vm15, %v5285_v56  ;;  %v5190_v29 = vadd.f32 %v7273_v26, %v5154_v51  ;;  %v4600_v50 = vpack.c.bf16 %v4579_v37, %v4578_v57  ;;  %v4476_v40 = vadd.f32 %v4429_v43, %v4336_v0  ;;  %v4816_v57 = vor.u32 %v4815_v60, %v4812_v8 }
 0x492   : > { %v4820_v51 = vrot.slane %v4818_v28, 5 }
 0x493   : > { %v5222_v15 = vadd.f32 %v5190_v29, %v5118_v41  ;;  %5631 = vmatmul.msk.bf16.gmra.mxu3 %vm2911_vm13, %v4600_v50  ;;  %v4512_v6 = vmul.f32 %v7143_v42, %v4476_v40  ;;  %v4809_v41 = vsel %vm6212_vm14, %v4805_v47, %v4808_v10  ;;  %v4049_v40 = vadd.f32 %v7101_v9, %v7099_v18 }
 0x494   : > { %v5120_v0 = vunpack.c.l.bf16 %v4809_v41  ;;  %v4817_v34 = vrot.slane %v4816_v57, 4 }
 0x495   : > { %v5254_v38 = vmax.f32 %v5222_v15, 0.0  ;;  %v4548_v32 = vadd.f32 %v7151_v36, %v4512_v6  ;;  %v4825_v15 = vor.u32 %v4824_v14, %v4820_v51 }
 0x496   : > { %v4291_v45 = vpop.f32.mrf.mxu1  ;;  %v4677_v48 = vpop.f32.mrf.mxu3  ;;  %v4821_v18 = vsel %vm6212_vm14, %v4817_v34, %v4820_v51 }
 0x497   : > { %v5286_v54 = vpack.c.bf16 %v5254_v38, %v5254_v38  ;;  %v4337_v43 = vadd.f32 %v4291_v45, %v4181_v30  ;;  %v5155_v53 = vmul.f32 %v7266_v22, %v4677_v48  ;;  %v4580_v23 = vmax.f32 %v4548_v32, 0.0  ;;  %v4143_v30 = vpop.f32.mrf.mxu0 }
 0x498   : > { %v4834_v38 = vshll.u32 %v5692_v63, 16  ;;  %v4183_v45 = vadd.f32 %v4140_v5, %v4049_v40  ;;  %v4826_v48 = vrot.slane %v4825_v15, 4  ;;  %v5121_v60 = vunpack.c.l.bf16 %v4821_v18 }
 0x499   : > { %v4434_v35 = vpop.f32.mrf.mxu2  ;;  %5319 = vst.msk [vmem:[%s7293_s22 + $0xc] sm:$0xf] %vm5315_vm15, %v5286_v54  ;;  %v4477_v27 = vadd.f32 %v4431_v19, %v4337_v43  ;;  %v5191_v62 = vadd.f32 %v7273_v26, %v5155_v53  ;;  %v4833_v53 = vrot.slane %v4831_v16, 4 }
 0x49a   : > { %v4836_v47 = vrot.slane %v4834_v38, 5 }
 0x49b   : > { %v4513_v7 = vmul.f32 %v7143_v42, %v4477_v27  ;;  %v5223_v1 = vadd.f32 %v5191_v62, %v5119_v58  ;;  %v4829_v58 = vrot.slane %v4827_v46, 5  ;;  %v5694_v46 = vld [vmem:[%s5841_s23 + $0x44] sm:$0x1] }
 0x49c   : > { %v4837_v28 = vor.u32 %v4836_v47, %v4833_v53 }
 0x49d   : > { %v4549_v61 = vadd.f32 %v7151_v36, %v4513_v7  ;;  %v5255_v44 = vmax.f32 %v5223_v1, 0.0  ;;  %v4830_v11 = vsel %vm6212_vm14, %v4826_v48, %v4829_v58  ;;  %v5693_v7 = vld [vmem:[%s5841_s23 + $0x40] sm:$0xf] }
 0x49e   : > { %v4294_v37 = vpop.f32.mrf.mxu1  ;;  %v4679_v56 = vpop.f32.mrf.mxu3  ;;  %v4839_v1 = vshll.u32 %v5693_v7, 16  ;;  %v4843_v41 = vshrl.u32 %v5693_v7, 16 }
 0x49f   : > { %v4581_v19 = vmax.f32 %v4549_v61, 0.0  ;;  %v5287_v49 = vpack.c.bf16 %v5255_v44, %v5255_v44  ;;  %v4338_v29 = vadd.f32 %v4294_v37, %v4182_v55  ;;  %v5156_v50 = vmul.f32 %v7266_v22, %v4679_v56  ;;  %v4145_v44 = vpop.f32.mrf.mxu0 }
 0x4a0   : > { %v5122_v37 = vunpack.c.l.bf16 %v4830_v11 }
 0x4a1   : > { %v4436_v52 = vpop.f32.mrf.mxu2  ;;  %5320 = vst.msk [vmem:[%s7293_s22 + $0x10] sm:$0xf] %vm5315_vm15, %v5287_v49  ;;  %v5192_v31 = vadd.f32 %v7273_v26, %v5156_v50  ;;  %v4601_v21 = vpack.c.bf16 %v4581_v19, %v4580_v23  ;;  %v4478_v13 = vadd.f32 %v4434_v35, %v4338_v29  ;;  %v4184_v23 = vadd.f32 %v4143_v30, %v7106_v2  ;;  %v5695_v30 = vld [vmem:[%s5841_s23 + $0x48] sm:$0xf] }
 0x4a2   : > { %v4838_v19 = vrot.slane %v4837_v28, 4  ;;  %v4841_v49 = vrot.slane %v4839_v1, 5  ;;  %v4845_v29 = vrot.slane %v4843_v41, 4  ;;  %v4855_v18 = vshll.u32 %v5695_v30, 16 }
 0x4a3   : > { %v5224_v6 = vadd.f32 %v5192_v31, %v5120_v0  ;;  %5632 = vmatmul.msk.bf16.gmra.mxu3 %vm2911_vm13, %v4601_v21  ;;  %v4514_v10 = vmul.f32 %v7143_v42, %v4478_v13  ;;  %v4051_v21 = vadd.f32 %v7113_v24, %v7111_v3  ;;  %v4848_v13 = vshll.u32 %v5694_v46, 16  ;;  %v5698_v46 = vld [vmem:[%s5841_s23 + $0x54] sm:$0xf] }
 0x4a4   : > { %v4842_v16 = vsel %vm6212_vm14, %v4838_v19, %v4841_v49  ;;  %v4846_v38 = vor.u32 %v4845_v29, %v4841_v49 }
 0x4a5   : > { %v5256_v9 = vmax.f32 %v5224_v6, 0.0  ;;  %v4550_v32 = vadd.f32 %v7151_v36, %v4514_v10  ;;  %v4852_v6 = vshrl.u32 %v5695_v30, 16  ;;  %v5123_v10 = vunpack.c.l.bf16 %v4842_v16 }
 0x4a6   : > { %v4296_v54 = vpop.f32.mrf.mxu1  ;;  %v4682_v43 = vpop.f32.mrf.mxu3 }
 0x4a7   : > { %v5288_v35 = vpack.c.bf16 %v5256_v9, %v5256_v9  ;;  %v4339_v8 = vadd.f32 %v4296_v54, %v4183_v45  ;;  %v5157_v27 = vmul.f32 %v7266_v22, %v4682_v43  ;;  %v4582_v56 = vmax.f32 %v4550_v32, 0.0  ;;  %v4148_v3 = vpop.f32.mrf.mxu0 }
 0x4a8   : > { %v4185_v9 = vadd.f32 %v4145_v44, %v4051_v21  ;;  %v4850_v54 = vrot.slane %v4848_v13, 5  ;;  %v4873_v13 = vshrl.u32 %v5698_v46, 16 }
 0x4a9   : > { %v4439_v62 = vpop.f32.mrf.mxu2  ;;  %5321 = vst.msk [vmem:[%s7293_s22 + $0x14] sm:$0xf] %vm5315_vm15, %v5288_v35  ;;  %v4479_v59 = vadd.f32 %v4436_v52, %v4339_v8  ;;  %v5193_v5 = vadd.f32 %v7273_v26, %v5157_v27  ;;  %v4847_v35 = vrot.slane %v4846_v38, 4  ;;  %v4854_v8 = vrot.slane %v4852_v6, 4 }
 0x4ab   : > { %v4515_v57 = vmul.f32 %v7143_v42, %v4479_v59  ;;  %v5225_v61 = vadd.f32 %v5193_v5, %v5121_v60  ;;  %v4857_v60 = vrot.slane %v4855_v18, 5  ;;  %v5696_v5 = vld [vmem:[%s5841_s23 + $0x4c] sm:$0xf]  ;;  %v4851_v41 = vsel %vm6212_vm14, %v4847_v35, %v4850_v54 }
 0x4ac   : > { %v4864_v11 = vshrl.u32 %v5696_v5, 16  ;;  %v4860_v28 = vshll.u32 %v5696_v5, 16 }
 0x4ad   : > { %v4551_v55 = vadd.f32 %v7151_v36, %v4515_v57  ;;  %v5257_v14 = vmax.f32 %v5225_v61, 0.0  ;;  %v4858_v57 = vor.u32 %v4857_v60, %v4854_v8 }
 0x4ae   : > { %v4299_v0 = vpop.f32.mrf.mxu1  ;;  %v4684_v51 = vpop.f32.mrf.mxu3 }
 0x4af   : > { %v4583_v50 = vmax.f32 %v4551_v55, 0.0  ;;  %v5289_v40 = vpack.c.bf16 %v5257_v14, %v5257_v14  ;;  %v4340_v52 = vadd.f32 %v4299_v0, %v4184_v23  ;;  %v5158_v34 = vmul.f32 %v7266_v22, %v4684_v51 }
 0x4b0   : > { %v4186_v55 = vadd.f32 %v4148_v3, %v7118_v25  ;;  %v4866_v14 = vrot.slane %v4864_v11, 4  ;;  %v5124_v0 = vunpack.c.l.bf16 %v4851_v41  ;;  %v4862_v51 = vrot.slane %v4860_v28, 5 }
 0x4b1   : > { %v4441_v31 = vpop.f32.mrf.mxu2  ;;  %5322 = vst.msk [vmem:[%s7293_s22 + $0x18] sm:$0xf] %vm5315_vm15, %v5289_v40  ;;  %v5194_v2 = vadd.f32 %v7273_v26, %v5158_v34  ;;  %v4602_v15 = vpack.c.bf16 %v4583_v50, %v4582_v56  ;;  %v4480_v33 = vadd.f32 %v4439_v62, %v4340_v52  ;;  %v4150_v40 = vpop.f32.mrf.mxu0  ;;  %v4053_v52 = vadd.f32 %v7125_v12, %v7123_v17 }
 0x4b2   : > { %v4859_v34 = vrot.slane %v4858_v57, 4  ;;  %v4867_v21 = vor.u32 %v4866_v14, %v4862_v51 }
 0x4b3   : > { %v5226_v63 = vadd.f32 %v5194_v2, %v5122_v37  ;;  %5633 = vmatmul.msk.bf16.gmra.mxu3 %vm2911_vm13, %v4602_v15  ;;  %v4516_v45 = vmul.f32 %v7143_v42, %v4480_v33  ;;  %v5697_v2 = vld [vmem:[%s5841_s23 + $0x50] sm:$0x1]  ;;  %v4187_v30 = vadd.f32 %v4150_v40, %v4053_v52 }
 0x4b4   : > { %v4869_v15 = vshll.u32 %v5697_v2, 16  ;;  %v4863_v17 = vsel %vm6212_vm14, %v4859_v34, %v4862_v51  ;;  %v4868_v6 = vrot.slane %v4867_v21, 4  ;;  %v5701_v34 = vld [vmem:[%s5841_s23 + $0x60] sm:$0xf] }
 0x4b5   : > { %v5258_v24 = vmax.f32 %v5226_v63, 0.0  ;;  %v4552_v32 = vadd.f32 %v7151_v36, %v4516_v45  ;;  %v4876_v63 = vshll.u32 %v5698_v46, 16  ;;  %v4875_v45 = vrot.slane %v4873_v13, 4 }
 0x4b6   : > { %v4301_v48 = vpop.f32.mrf.mxu1  ;;  %v4687_v58 = vpop.f32.mrf.mxu3  ;;  %v4871_v18 = vrot.slane %v4869_v15, 5  ;;  %v5125_v54 = vunpack.c.l.bf16 %v4863_v17 }
 0x4b7   : > { %v5290_v43 = vpack.c.bf16 %v5258_v24, %v5258_v24  ;;  %v4341_v53 = vadd.f32 %v4301_v48, %v4185_v9  ;;  %v5159_v47 = vmul.f32 %v7266_v22, %v4687_v58  ;;  %v4584_v23 = vmax.f32 %v4552_v32, 0.0 }
 0x4b8   : > { %v4878_v48 = vrot.slane %v4876_v63, 5  ;;  %v4872_v8 = vsel %vm6212_vm14, %v4868_v6, %v4871_v18 }
 0x4b9   : > { %5323 = vst.msk [vmem:[%s7293_s22 + $0x1c] sm:$0xf] %vm5315_vm15, %v5290_v43  ;;  %v4481_v27 = vadd.f32 %v4441_v31, %v4341_v53  ;;  %v5195_v62 = vadd.f32 %v7273_v26, %v5159_v47  ;;  %v4444_v59 = vpop.f32.mrf.mxu2  ;;  %v4153_v53 = vpop.f32.mrf.mxu0  ;;  %v5126_v57 = vunpack.c.l.bf16 %v4872_v8 }
 0x4ba   : > { %v4188_v28 = vadd.f32 %v4153_v53, %v7130_v20  ;;  %v7730_v20 = vld [vmem:[#allocation17_spill] sm:$0xff] }
 0x4bb   : > { %v4517_v7 = vmul.f32 %v7143_v42, %v4481_v27  ;;  %v5227_v1 = vadd.f32 %v5195_v62, %v5123_v10  ;;  %v4879_v27 = vor.u32 %v4878_v48, %v4875_v45  ;;  %v5699_v62 = vld [vmem:[%s5841_s23 + $0x58] sm:$0xf]  ;;  %v5704_v53 = vld [vmem:[%s7602_s7] ss:$0 sm:$0xff] }
 0x4bc   : > { %v4885_v5 = vshrl.u32 %v5699_v62, 16 }
 0x4bd   : > { %v4553_v61 = vadd.f32 %v7151_v36, %v4517_v7  ;;  %v5259_v44 = vmax.f32 %v5227_v1, 0.0  ;;  %v4880_v14 = vrot.slane %v4879_v27, 4 }
 0x4be   : > { %v4304_v37 = vpop.f32.mrf.mxu1  ;;  %v4689_v56 = vpop.f32.mrf.mxu3 }
 0x4bf   : > { %v4585_v19 = vmax.f32 %v4553_v61, 0.0  ;;  %v5291_v49 = vpack.c.bf16 %v5259_v44, %v5259_v44  ;;  %v4342_v29 = vadd.f32 %v4304_v37, %v4186_v55  ;;  %v5160_v50 = vmul.f32 %v7266_v22, %v4689_v56 }
 0x4c0   : > { %v4887_v37 = vrot.slane %v4885_v5, 4 }
 0x4c1   : > { %5324 = vst.msk [vmem:[%s7293_s22 + $0x20] sm:$0xf] %vm5315_vm15, %v5291_v49  ;;  %v5196_v25 = vadd.f32 %v7273_v26, %v5160_v50  ;;  %v4603_v31 = vpack.c.bf16 %v4585_v19, %v4584_v23  ;;  %v4482_v33 = vadd.f32 %v4444_v59, %v4342_v29  ;;  %v4446_v38 = vpop.f32.mrf.mxu2  ;;  %v4881_v59 = vshll.u32 %v5699_v62, 16  ;;  %v5700_v29 = vld [vmem:[%s5841_s23 + $0x5c] sm:$0x1]  ;;  %v4155_v40 = vpop.f32.mrf.mxu0 }
 0x4c2   : > { %v4055_v19 = vadd.f32 %v7249_v4, %v7730_v20  ;;  %v4890_v50 = vshll.u32 %v5700_v29, 16 }
 0x4c3   : > { %v5228_v16 = vadd.f32 %v5196_v25, %v5124_v0  ;;  %5634 = vmatmul.msk.bf16.gmra.mxu3 %vm2911_vm13, %v4603_v31  ;;  %v4518_v3 = vmul.f32 %v7143_v42, %v4482_v33  ;;  %v4883_v23 = vrot.slane %v4881_v59, 5  ;;  %v4894_v25 = vshrl.u32 %v5701_v34, 16 }
 0x4c4   : > { %v4897_v31 = vshll.u32 %v5701_v34, 16  ;;  %v4189_v4 = vadd.f32 %v4155_v40, %v4055_v19  ;;  %v4892_v46 = vrot.slane %v4890_v50, 5 }
 0x4c5   : > { %v5260_v12 = vmax.f32 %v5228_v16, 0.0  ;;  %v4554_v60 = vadd.f32 %v7151_v36, %v4518_v3  ;;  %v4888_v52 = vor.u32 %v4887_v37, %v4883_v23  ;;  %v4884_v15 = vsel %vm6212_vm14, %v4880_v14, %v4883_v23  ;;  %v5705_v14 = vld [vmem:[%s5841_s23 + $0x68] sm:$0x1] }
 0x4c6   : > { %v4306_v24 = vpop.f32.mrf.mxu1  ;;  %v4692_v9 = vpop.f32.mrf.mxu3  ;;  %v5127_v16 = vunpack.c.l.bf16 %v4884_v15  ;;  %v4896_v17 = vrot.slane %v4894_v25, 4  ;;  %v4911_v23 = vshll.u32 %v5705_v14, 16 }
 0x4c7   : > { %v5292_v58 = vpack.c.bf16 %v5260_v12, %v5260_v12  ;;  %v4343_v10 = vadd.f32 %v4306_v24, %v4187_v30  ;;  %v5161_v43 = vmul.f32 %v7266_v22, %v4692_v9  ;;  %v4586_v61 = vmax.f32 %v4554_v60, 0.0  ;;  %v5702_v30 = vld [vmem:[%s7601_s6] ss:$0 sm:$0xff] }
 0x4c8   : > { %v4899_v12 = vrot.slane %v4897_v31, 5  ;;  %v4913_v29 = vrot.slane %v4911_v23, 5  ;;  %v5707_v31 = vld [vmem:[%s5841_s23 + $0x70] sm:$0xf] }
 0x4c9   : > { %5325 = vst.msk [vmem:[%s7293_s22 + $0x24] sm:$0xf] %vm5315_vm15, %v5292_v58  ;;  %v4483_v47 = vadd.f32 %v4446_v38, %v4343_v10  ;;  %v5197_v35 = vadd.f32 %v7273_v26, %v5161_v43  ;;  %v4449_v41 = vpop.f32.mrf.mxu2  ;;  %v4889_v38 = vrot.slane %v4888_v52, 4  ;;  %v5703_v10 = vld [vmem:[%s5841_s23 + $0x64] sm:$0xf] }
 0x4ca   : > { %v4900_v58 = vor.u32 %v4899_v12, %v4896_v17  ;;  %v4906_v43 = vshrl.u32 %v5703_v10, 16 }
 0x4cb   : > { %v4519_v11 = vmul.f32 %v7143_v42, %v4483_v47  ;;  %v5229_v32 = vadd.f32 %v5197_v35, %v5125_v54  ;;  %v4902_v54 = vshll.u32 %v5703_v10, 16  ;;  %v4893_v60 = vsel %vm6212_vm14, %v4889_v38, %v4892_v46 }
 0x4cc   : > { %v5128_v5 = vunpack.c.l.bf16 %v4893_v60 }
 0x4cd   : > { %v4555_v7 = vadd.f32 %v7151_v36, %v4519_v11  ;;  %v5261_v1 = vmax.f32 %v5229_v32, 0.0  ;;  %v4901_v11 = vrot.slane %v4900_v58, 4  ;;  %v4904_v32 = vrot.slane %v4902_v54, 5 }
 0x4ce   : > { %v4309_v44 = vpop.f32.mrf.mxu1  ;;  %v4694_v55 = vpop.f32.mrf.mxu3 }
 0x4cf   : > { %v4587_v56 = vmax.f32 %v4555_v7, 0.0  ;;  %v5293_v0 = vpack.c.bf16 %v5261_v1, %v5261_v1  ;;  %v4344_v42 = vadd.f32 %v4309_v44, %v4188_v28  ;;  %v5162_v51 = vmul.f32 %v7266_v22, %v4694_v55 }
 0x4d0   : > { %v4908_v28 = vrot.slane %v4906_v43, 4 }
 0x4d1   : > { %5326 = vst.msk [vmem:[%s7293_s22 + $0x28] sm:$0xf] %vm5315_vm15, %v5293_v0  ;;  %v5198_v36 = vadd.f32 %v7273_v26, %v5162_v51  ;;  %v4604_v49 = vpack.c.bf16 %v4587_v56, %v4586_v61  ;;  %v4484_v21 = vadd.f32 %v4449_v41, %v4344_v42  ;;  %v4451_v9 = vpop.f32.mrf.mxu2  ;;  %v4905_v56 = vsel %vm6212_vm14, %v4901_v11, %v4904_v32  ;;  %v5706_v0 = vld [vmem:[%s5841_s23 + $0x6c] sm:$0xf] }
 0x4d2   : > { %v4909_v55 = vor.u32 %v4908_v28, %v4904_v32  ;;  %v4915_v42 = vshrl.u32 %v5706_v0, 16  ;;  %v4918_v51 = vshll.u32 %v5706_v0, 16 }
 0x4d3   : > { %v5230_v2 = vadd.f32 %v5198_v36, %v5126_v57  ;;  %5635 = vmatmul.msk.bf16.gmra.mxu3 %vm2911_vm13, %v4604_v49  ;;  %v4520_v6 = vmul.f32 %v5702_v30, %v4484_v21  ;;  %v5129_v36 = vunpack.c.l.bf16 %v4905_v56  ;;  %v4927_v21 = vshrl.u32 %v5707_v31, 16 }
 0x4d4   : > { %v4910_v49 = vrot.slane %v4909_v55, 4  ;;  %v4917_v52 = vrot.slane %v4915_v42, 4  ;;  %v4920_v34 = vrot.slane %v4918_v51, 5  ;;  %v5711_v42 = vld [vmem:[%s5841_s23 + $0x80] sm:$0x1] }
 0x4d5   : > { %v5262_v33 = vmax.f32 %v5230_v2, 0.0  ;;  %v4556_v47 = vadd.f32 %v5704_v53, %v4520_v6  ;;  %v4953_v51 = vshll.u32 %v5711_v42, 16 }
 0x4d6   : > { %v4311_v13 = vpop.f32.mrf.mxu1  ;;  %v4697_v63 = vpop.f32.mrf.mxu3  ;;  %v4914_v15 = vsel %vm6212_vm14, %v4910_v49, %v4913_v29 }
 0x4d7   : > { %v5294_v18 = vpack.c.bf16 %v5262_v33, %v5262_v33  ;;  %v4345_v3 = vadd.f32 %v4311_v13, %v4189_v4  ;;  %v5163_v24 = vmul.f32 %v7266_v22, %v4697_v63  ;;  %v4588_v7 = vmax.f32 %v4556_v47, 0.0 }
 0x4d8   : > { %v4921_v4 = vor.u32 %v4920_v34, %v4917_v52  ;;  %v4923_v33 = vshll.u32 %v5707_v31, 16  ;;  %v5130_v63 = vunpack.c.l.bf16 %v4914_v15 }
 0x4d9   : > { %5327 = vst.msk [vmem:[%s7293_s22 + $0x2c] sm:$0xf] %vm5315_vm15, %v5294_v18  ;;  %v4485_v45 = vadd.f32 %v4451_v9, %v4345_v3  ;;  %v5199_v48 = vadd.f32 %v7273_v26, %v5163_v24  ;;  %v5708_v3 = vld [vmem:[%s5841_s23 + $0x74] sm:$0x1] }
 0x4da   : > { %v4922_v12 = vrot.slane %v4921_v4, 4  ;;  %v4932_v24 = vshll.u32 %v5708_v3, 16 }
 0x4db   : > { %v4521_v35 = vmul.f32 %v5702_v30, %v4485_v45  ;;  %v5231_v8 = vadd.f32 %v5199_v48, %v5127_v16  ;;  %v4929_v16 = vrot.slane %v4927_v21, 4  ;;  %v4925_v30 = vrot.slane %v4923_v33, 5  ;;  %v5709_v48 = vld [vmem:[%s5841_s23 + $0x78] sm:$0xf]  ;;  %v5713_v33 = vld [vmem:[%s5841_s23 + $0x88] sm:$0xf] }
 0x4dc   : > { %v4936_v58 = vshrl.u32 %v5709_v48, 16  ;;  %v4939_v10 = vshll.u32 %v5709_v48, 16 }
 0x4dd   : > { %v4557_v27 = vadd.f32 %v5704_v53, %v4521_v35  ;;  %v5263_v62 = vmax.f32 %v5231_v8, 0.0  ;;  %v4930_v18 = vor.u32 %v4929_v16, %v4925_v30  ;;  %v4926_v45 = vsel %vm6212_vm14, %v4922_v12, %v4925_v30 }
 0x4de   : > { %v4699_v59 = vpop.f32.mrf.mxu3  ;;  %v5131_v53 = vunpack.c.l.bf16 %v4926_v45  ;;  %v4934_v35 = vrot.slane %v4932_v24, 5 }
 0x4df   : > { %v4589_v1 = vmax.f32 %v4557_v27, 0.0  ;;  %v5295_v41 = vpack.c.bf16 %v5263_v62, %v5263_v62  ;;  %v5164_v57 = vmul.f32 %v7266_v22, %v4699_v59  ;;  %v4931_v47 = vrot.slane %v4930_v18, 4 }
 0x4e0   : > { %v4938_v27 = vrot.slane %v4936_v58, 4  ;;  %v4941_v62 = vrot.slane %v4939_v10, 5  ;;  %v5714_v58 = vld [vmem:[%s5841_s23 + $0x8c] sm:$0x1] }
 0x4e1   : > { %5328 = vst.msk [vmem:[%s7293_s22 + $0x30] sm:$0xf] %vm5315_vm15, %v5295_v41  ;;  %v5200_v61 = vadd.f32 %v7273_v26, %v5164_v57  ;;  %v4605_v44 = vpack.c.bf16 %v4589_v1, %v4588_v7  ;;  %v4935_v28 = vsel %vm6212_vm14, %v4931_v47, %v4934_v35  ;;  %v4974_v10 = vshll.u32 %v5714_v58, 16 }
 0x4e2   : > { %v4942_v7 = vor.u32 %v4941_v62, %v4938_v27 }
 0x4e3   : > { %v5232_v37 = vadd.f32 %v5200_v61, %v5128_v5  ;;  %5636 = vmatmul.msk.bf16.gmra.mxu3 %vm2911_vm13, %v4605_v44  ;;  %v5710_v5 = vld [vmem:[%s5841_s23 + $0x7c] sm:$0xf]  ;;  %v5132_v61 = vunpack.c.l.bf16 %v4935_v28 }
 0x4e4   : > { %v4948_v11 = vshrl.u32 %v5710_v5, 16  ;;  %v4944_v1 = vshll.u32 %v5710_v5, 16  ;;  %v4943_v23 = vrot.slane %v4942_v7, 4 }
 0x4e5   : > { %v5264_v20 = vmax.f32 %v5232_v37, 0.0 }
 0x4e6   : > { %v4702_v19 = vpop.f32.mrf.mxu3  ;;  %v4950_v44 = vrot.slane %v4948_v11, 4  ;;  %v4946_v37 = vrot.slane %v4944_v1, 5  ;;  %v5716_v1 = vld [vmem:[%s5841_s23 + $0x94] sm:$0xf] }
 0x4e7   : > { %v5296_v50 = vpack.c.bf16 %v5264_v20, %v5264_v20  ;;  %v5165_v40 = vmul.f32 %v7266_v22, %v4702_v19 }
 0x4e8   : > { %v4951_v0 = vor.u32 %v4950_v44, %v4946_v37  ;;  %v4947_v19 = vsel %vm6212_vm14, %v4943_v23, %v4946_v37 }
 0x4e9   : > { %5329 = vst.msk [vmem:[%s7293_s22 + $0x34] sm:$0xf] %vm5315_vm15, %v5296_v50  ;;  %v5201_v25 = vadd.f32 %v7273_v26, %v5165_v40  ;;  %v5133_v52 = vunpack.c.l.bf16 %v4947_v19 }
 0x4ea   : > { %v4952_v34 = vrot.slane %v4951_v0, 4 }
 0x4eb   : > { %v5233_v2 = vadd.f32 %v5201_v25, %v5129_v36  ;;  %v5712_v36 = vld [vmem:[%s5841_s23 + $0x84] sm:$0xf]  ;;  %v4955_v25 = vrot.slane %v4953_v51, 5 }
 0x4ec   : > { %v4957_v49 = vshrl.u32 %v5712_v36, 16  ;;  %v4960_v29 = vshll.u32 %v5712_v36, 16 }
 0x4ed   : > { %v5265_v46 = vmax.f32 %v5233_v2, 0.0 }
 0x4ee   : > { %v4704_v13 = vpop.f32.mrf.mxu3  ;;  %v4959_v2 = vrot.slane %v4957_v49, 4  ;;  %v4962_v15 = vrot.slane %v4960_v29, 5  ;;  %v5717_v49 = vld [vmem:[%s5841_s23 + $0x98] sm:$0x1] }
 0x4ef   : > { %v5297_v38 = vpack.c.bf16 %v5265_v46, %v5265_v46  ;;  %v5166_v17 = vmul.f32 %v7266_v22, %v4704_v13  ;;  %v4969_v46 = vshrl.u32 %v5713_v33, 16  ;;  %v4995_v29 = vshll.u32 %v5717_v49, 16 }
 0x4f0   : > { %v4963_v16 = vor.u32 %v4962_v15, %v4959_v2 }
 0x4f1   : > { %5330 = vst.msk [vmem:[%s7293_s22 + $0x38] sm:$0xf] %vm5315_vm15, %v5297_v38  ;;  %v5202_v6 = vadd.f32 %v7273_v26, %v5166_v17  ;;  %v4965_v38 = vshll.u32 %v5713_v33, 16 }
 0x4f2   : > { %v4964_v24 = vrot.slane %v4963_v16, 4 }
 0x4f3   : > { %v5234_v9 = vadd.f32 %v5202_v6, %v5130_v63  ;;  %v4956_v63 = vsel %vm6212_vm14, %v4952_v34, %v4955_v25  ;;  %v4971_v6 = vrot.slane %v4969_v46, 4 }
 0x4f4   : > { %v5134_v30 = vunpack.c.l.bf16 %v4956_v63 }
 0x4f5   : > { %v5266_v54 = vmax.f32 %v5234_v9, 0.0  ;;  %v4967_v9 = vrot.slane %v4965_v38, 5  ;;  %v5719_v38 = vld [vmem:[%s5841_s23 + $0xa0] sm:$0xf] }
 0x4f6   : > { %v4707_v43 = vpop.f32.mrf.mxu3 }
 0x4f7   : > { %v5298_v8 = vpack.c.bf16 %v5266_v54, %v5266_v54  ;;  %v5167_v60 = vmul.f32 %v7266_v22, %v4707_v43  ;;  %v4972_v48 = vor.u32 %v4971_v6, %v4967_v9  ;;  %v4968_v43 = vsel %vm6212_vm14, %v4964_v24, %v4967_v9 }
 0x4f8   : > { %v5135_v27 = vunpack.c.l.bf16 %v4968_v43 }
 0x4f9   : > { %5331 = vst.msk [vmem:[%s7293_s22 + $0x3c] sm:$0xf] %vm5315_vm15, %v5298_v8  ;;  %v5203_v59 = vadd.f32 %v7273_v26, %v5167_v60  ;;  %v4973_v62 = vrot.slane %v4972_v48, 4 }
 0x4fb   : > { %v5235_v32 = vadd.f32 %v5203_v59, %v5131_v53  ;;  %v5715_v53 = vld [vmem:[%s5841_s23 + $0x90] sm:$0xf]  ;;  %v4976_v59 = vrot.slane %v4974_v10, 5 }
 0x4fc   : > { %v4978_v47 = vshrl.u32 %v5715_v53, 16  ;;  %v4981_v35 = vshll.u32 %v5715_v53, 16 }
 0x4fd   : > { %v5267_v41 = vmax.f32 %v5235_v32, 0.0 }
 0x4fe   : > { %v4709_v57 = vpop.f32.mrf.mxu3  ;;  %v4980_v32 = vrot.slane %v4978_v47, 4  ;;  %v4983_v28 = vrot.slane %v4981_v35, 5  ;;  %v5722_v47 = vld [vmem:[%s5841_s23 + $0xa4] sm:$0x1] }
 0x4ff   : > { %v5299_v55 = vpack.c.bf16 %v5267_v41, %v5267_v41  ;;  %v5168_v14 = vmul.f32 %v7266_v22, %v4709_v57  ;;  %v4990_v41 = vshrl.u32 %v5716_v1, 16  ;;  %v5016_v35 = vshll.u32 %v5722_v47, 16 }
 0x500   : > { %v4984_v44 = vor.u32 %v4983_v28, %v4980_v32 }
 0x501   : > { %5332 = vst.msk [vmem:[%s7293_s22 + $0x40] sm:$0xf] %vm5315_vm15, %v5299_v55  ;;  %v5204_v56 = vadd.f32 %v7273_v26, %v5168_v14  ;;  %v4986_v55 = vshll.u32 %v5716_v1, 16 }
 0x502   : > { %v4985_v51 = vrot.slane %v4984_v44, 4 }
 0x503   : > { %v5236_v20 = vadd.f32 %v5204_v56, %v5132_v61  ;;  %v4977_v61 = vsel %vm6212_vm14, %v4973_v62, %v4976_v59  ;;  %v4992_v56 = vrot.slane %v4990_v41, 4 }
 0x504   : > { %v5136_v37 = vunpack.c.l.bf16 %v4977_v61 }
 0x505   : > { %v5268_v50 = vmax.f32 %v5236_v20, 0.0  ;;  %v4988_v20 = vrot.slane %v4986_v55, 5  ;;  %v5724_v55 = vld [vmem:[%s5841_s23 + $0xac] sm:$0xf] }
 0x506   : > { %v4712_v40 = vpop.f32.mrf.mxu3 }
 0x507   : > { %v5300_v31 = vpack.c.bf16 %v5268_v50, %v5268_v50  ;;  %v5169_v21 = vmul.f32 %v7266_v22, %v4712_v40  ;;  %v4993_v36 = vor.u32 %v4992_v56, %v4988_v20  ;;  %v4989_v40 = vsel %vm6212_vm14, %v4985_v51, %v4988_v20 }
 0x508   : > { %v5137_v2 = vunpack.c.l.bf16 %v4989_v40 }
 0x509   : > { %5333 = vst.msk [vmem:[%s7293_s22 + $0x44] sm:$0xf] %vm5315_vm15, %v5300_v31  ;;  %v5205_v4 = vadd.f32 %v7273_v26, %v5169_v21  ;;  %v4994_v15 = vrot.slane %v4993_v36, 4 }
 0x50b   : > { %v5237_v13 = vadd.f32 %v5205_v4, %v5133_v52  ;;  %v5718_v52 = vld [vmem:[%s5841_s23 + $0x9c] sm:$0xf]  ;;  %v4997_v4 = vrot.slane %v4995_v29, 5 }
 0x50c   : > { %v4999_v34 = vshrl.u32 %v5718_v52, 16  ;;  %v5002_v25 = vshll.u32 %v5718_v52, 16 }
 0x50d   : > { %v5269_v17 = vmax.f32 %v5237_v13, 0.0 }
 0x50e   : > { %v4714_v12 = vpop.f32.mrf.mxu3  ;;  %v5001_v13 = vrot.slane %v4999_v34, 4  ;;  %v5004_v63 = vrot.slane %v5002_v25, 5  ;;  %v5725_v34 = vld [vmem:[%s5841_s23 + $0xb0] sm:$0x1] }
 0x50f   : > { %v5301_v18 = vpack.c.bf16 %v5269_v17, %v5269_v17  ;;  %v5170_v3 = vmul.f32 %v7266_v22, %v4714_v12  ;;  %v5011_v17 = vshrl.u32 %v5719_v38, 16  ;;  %v5037_v25 = vshll.u32 %v5725_v34, 16 }
 0x510   : > { %v5005_v6 = vor.u32 %v5004_v63, %v5001_v13 }
 0x511   : > { %5334 = vst.msk [vmem:[%s7293_s22 + $0x48] sm:$0xf] %vm5315_vm15, %v5301_v18  ;;  %v5206_v45 = vadd.f32 %v7273_v26, %v5170_v3  ;;  %v5007_v18 = vshll.u32 %v5719_v38, 16  ;;  %v5013_v9 = vrot.slane %v5011_v17, 4 }
 0x512   : > { %v5006_v58 = vrot.slane %v5005_v6, 4 }
 0x513   : > { %v5238_v54 = vadd.f32 %v5206_v45, %v5134_v30  ;;  %v4998_v30 = vsel %vm6212_vm14, %v4994_v15, %v4997_v4  ;;  %v5009_v10 = vrot.slane %v5007_v18, 5 }
 0x515   : > { %v5270_v8 = vmax.f32 %v5238_v54, 0.0  ;;  %v7523_v54 = vld [vmem:[%s7604_s9] ss:$0 sm:$0xff]  ;;  %v5014_v53 = vor.u32 %v5013_v9, %v5009_v10 }
 0x516   : > { %v4717_v60 = vpop.f32.mrf.mxu3 }
 0x517   : > { %v5302_v5 = vpack.c.bf16 %v5270_v8, %v5270_v8  ;;  %v5171_v11 = vmul.f32 %v7266_v22, %v4717_v60  ;;  %v5010_v60 = vsel %vm6212_vm14, %v5006_v58, %v5009_v10  ;;  %v5015_v28 = vrot.slane %v5014_v53, 4 }
 0x518   : > { %v5139_v32 = vunpack.c.l.bf16 %v5010_v60 }
 0x519   : > { %5335 = vst.msk [vmem:[%s7293_s22 + $0x4c] sm:$0xf] %vm5315_vm15, %v5302_v5  ;;  %v5207_v7 = vadd.f32 %v7273_v26, %v5171_v11 }
 0x51b   : > { %v5239_v57 = vadd.f32 %v5207_v7, %v5135_v27  ;;  %v5723_v27 = vld [vmem:[%s5841_s23 + $0xa8] sm:$0xf]  ;;  %v5018_v7 = vrot.slane %v5016_v35, 5 }
 0x51c   : > { %v5020_v62 = vshrl.u32 %v5723_v27, 16  ;;  %v5023_v59 = vshll.u32 %v5723_v27, 16 }
 0x51d   : > { %v5271_v14 = vmax.f32 %v5239_v57, 0.0 }
 0x51e   : > { %v4719_v23 = vpop.f32.mrf.mxu3  ;;  %v5022_v57 = vrot.slane %v5020_v62, 4  ;;  %v5025_v61 = vrot.slane %v5023_v59, 5 }
 0x51f   : > { %v5303_v0 = vpack.c.bf16 %v5271_v14, %v5271_v14  ;;  %v5172_v42 = vmul.f32 %v7266_v22, %v4719_v23  ;;  %v5032_v14 = vshrl.u32 %v5724_v55, 16 }
 0x520   : > { %v5026_v56 = vor.u32 %v5025_v61, %v5022_v57 }
 0x521   : > { %5336 = vst.msk [vmem:[%s7293_s22 + $0x50] sm:$0xf] %vm5315_vm15, %v5303_v0  ;;  %v5208_v19 = vadd.f32 %v7273_v26, %v5172_v42  ;;  %v5028_v0 = vshll.u32 %v5724_v55, 16 }
 0x522   : > { %v5027_v29 = vrot.slane %v5026_v56, 4 }
 0x523   : > { %v5240_v50 = vadd.f32 %v5208_v19, %v5136_v37  ;;  %v5019_v37 = vsel %vm6212_vm14, %v5015_v28, %v5018_v7  ;;  %v5034_v19 = vrot.slane %v5032_v14, 4 }
 0x524   : > { %v5140_v20 = vunpack.c.l.bf16 %v5019_v37 }
 0x525   : > { %v5272_v31 = vmax.f32 %v5240_v50, 0.0  ;;  %v5030_v50 = vrot.slane %v5028_v0, 5 }
 0x526   : > { %v4722_v21 = vpop.f32.mrf.mxu3 }
 0x527   : > { %v5304_v33 = vpack.c.bf16 %v5272_v31, %v5272_v31  ;;  %v5173_v46 = vmul.f32 %v7266_v22, %v4722_v21  ;;  %v5138_v22 = vunpack.c.l.bf16 %v4998_v30  ;;  %v5035_v52 = vor.u32 %v5034_v19, %v5030_v50 }
 0x528   : > { %v5031_v21 = vsel %vm6212_vm14, %v5027_v29, %v5030_v50 }
 0x529   : > { %5337 = vst.msk [vmem:[%s7293_s22 + $0x54] sm:$0xf] %vm5315_vm15, %v5304_v33  ;;  %v5209_v16 = vadd.f32 %v7273_v26, %v5173_v46  ;;  %v7515_v26 = vld [vmem:[%s7603_s8] ss:$0 sm:$0xff]  ;;  %v5141_v13 = vunpack.c.l.bf16 %v5031_v21  ;;  %v5036_v63 = vrot.slane %v5035_v52, 4 }
 0x52b   : > { %v5241_v12 = vadd.f32 %v5209_v16, %v5137_v2  ;;  %v5726_v2 = vld [vmem:[%s5841_s23 + $0xb4] sm:$0xf]  ;;  %v5039_v16 = vrot.slane %v5037_v25, 5 }
 0x52c   : > { %v5041_v15 = vshrl.u32 %v5726_v2, 16  ;;  %v5044_v4 = vshll.u32 %v5726_v2, 16 }
 0x52d   : > { %v5273_v3 = vmax.f32 %v5241_v12, 0.0 }
 0x52e   : > { %v4724_v24 = vpop.f32.mrf.mxu3  ;;  %v5043_v12 = vrot.slane %v5041_v15, 4  ;;  %v5046_v30 = vrot.slane %v5044_v4, 5 }
 0x52f   : > { %v5305_v45 = vpack.c.bf16 %v5273_v3, %v5273_v3  ;;  %v5174_v48 = vmul.f32 %v7515_v26, %v4724_v24  ;;  %v5040_v3 = vsel %vm6212_vm14, %v5036_v63, %v5039_v16 }
 0x530   : > { %v5047_v24 = vor.u32 %v5046_v30, %v5043_v12  ;;  %v5142_v10 = vunpack.c.l.bf16 %v5040_v3 }
 0x531   : > { %5338 = vst.msk [vmem:[%s7293_s22 + $0x58] sm:$0xf] %vm5315_vm15, %v5305_v45  ;;  %v5210_v43 = vadd.f32 %v7523_v54, %v5174_v48 }
 0x532   : > { %v5048_v47 = vrot.slane %v5047_v24, 4 }
 0x533   : > { %v5242_v8 = vadd.f32 %v5210_v43, %v5138_v22  ;;  %v5727_v22 = vld [vmem:[%s5841_s23 + $0xb8] sm:$0xf] }
 0x534   : > { %v5049_v9 = vshll.u32 %v5727_v22, 16  ;;  %v5053_v45 = vshrl.u32 %v5727_v22, 16 }
 0x535   : > { %v5274_v5 = vmax.f32 %v5242_v8, 0.0 }
 0x536   : > { %v4727_v11 = vpop.f32.mrf.mxu3  ;;  %v5051_v35 = vrot.slane %v5049_v9, 5  ;;  %v5055_v8 = vrot.slane %v5053_v45, 4 }
 0x537   : > { %v5306_v1 = vpack.c.bf16 %v5274_v5, %v5274_v5  ;;  %v5175_v41 = vmul.f32 %v7515_v26, %v4727_v11  ;;  %v5728_v5 = vld [vmem:[%s5841_s23 + $0xbc] sm:$0x1] }
 0x538   : > { %v5052_v62 = vsel %vm6212_vm14, %v5048_v47, %v5051_v35  ;;  %v5056_v59 = vor.u32 %v5055_v8, %v5051_v35  ;;  %v5058_v11 = vshll.u32 %v5728_v5, 16 }
 0x539   : > { %5339 = vst.msk [vmem:[%s7293_s22 + $0x5c] sm:$0xf] %vm5315_vm15, %v5306_v1  ;;  %v5211_v44 = vadd.f32 %v7523_v54, %v5175_v41  ;;  %v5143_v61 = vunpack.c.l.bf16 %v5052_v62 }
 0x53a   : > { %v5057_v55 = vrot.slane %v5056_v59, 4  ;;  %v5060_v14 = vrot.slane %v5058_v11, 5 }
 0x53b   : > { %v5243_v23 = vadd.f32 %v5211_v44, %v5139_v32  ;;  %v5729_v32 = vld [vmem:[%s5841_s23 + $0xc0] sm:$0xf] }
 0x53c   : > { %v5062_v28 = vshrl.u32 %v5729_v32, 16  ;;  %v5065_v7 = vshll.u32 %v5729_v32, 16 }
 0x53d   : > { %v5275_v42 = vmax.f32 %v5243_v23, 0.0 }
 0x53e   : > { %v4729_v51 = vpop.f32.mrf.mxu3  ;;  %v5064_v23 = vrot.slane %v5062_v28, 4  ;;  %v5067_v37 = vrot.slane %v5065_v7, 5 }
 0x53f   : > { %v5307_v36 = vpack.c.bf16 %v5275_v42, %v5275_v42  ;;  %v5176_v49 = vmul.f32 %v7515_v26, %v4729_v51  ;;  %v5061_v42 = vsel %vm6212_vm14, %v5057_v55, %v5060_v14 }
 0x540   : > { %v5068_v51 = vor.u32 %v5067_v37, %v5064_v23 }
 0x541   : > { %5340 = vst.msk [vmem:[%s7293_s22 + $0x60] sm:$0xf] %vm5315_vm15, %v5307_v36  ;;  %v5212_v40 = vadd.f32 %v7523_v54, %v5176_v49 }
 0x542   : > { %v5069_v34 = vrot.slane %v5068_v51, 4 }
 0x543   : > { %v5244_v31 = vadd.f32 %v5212_v40, %v5140_v20  ;;  %v5730_v20 = vld [vmem:[%s5841_s23 + $0xc4] sm:$0xf]  ;;  %v5144_v40 = vunpack.c.l.bf16 %v5061_v42 }
 0x544   : > { %v5070_v19 = vshll.u32 %v5730_v20, 16  ;;  %v5074_v36 = vshrl.u32 %v5730_v20, 16 }
 0x545   : > { %v5276_v33 = vmax.f32 %v5244_v31, 0.0 }
 0x546   : > { %v4732_v46 = vpop.f32.mrf.mxu3  ;;  %v5072_v25 = vrot.slane %v5070_v19, 5  ;;  %v5076_v31 = vrot.slane %v5074_v36, 4 }
 0x547   : > { %v5308_v38 = vpack.c.bf16 %v5276_v33, %v5276_v33  ;;  %v5177_v17 = vmul.f32 %v7515_v26, %v4732_v46  ;;  %v5731_v33 = vld [vmem:[%s5841_s23 + $0xc8] sm:$0x1] }
 0x548   : > { %v5073_v15 = vsel %vm6212_vm14, %v5069_v34, %v5072_v25  ;;  %v5077_v4 = vor.u32 %v5076_v31, %v5072_v25  ;;  %v5079_v46 = vshll.u32 %v5731_v33, 16 }
 0x549   : > { %5341 = vst.msk [vmem:[%s7293_s22 + $0x64] sm:$0xf] %vm5315_vm15, %v5308_v38  ;;  %v5213_v6 = vadd.f32 %v7523_v54, %v5177_v17  ;;  %v5145_v38 = vunpack.c.l.bf16 %v5073_v15 }
 0x54a   : > { %v5078_v12 = vrot.slane %v5077_v4, 4  ;;  %v5081_v30 = vrot.slane %v5079_v46, 5 }
 0x54b   : > { %v5245_v18 = vadd.f32 %v5213_v6, %v5141_v13 }
 0x54c   : > { %v5082_v3 = vsel %vm6212_vm14, %v5078_v12, %v5081_v30 }
 0x54d   : > { %v5277_v48 = vmax.f32 %v5245_v18, 0.0  ;;  %v5146_v45 = vunpack.c.l.bf16 %v5082_v3 }
 0x54e   : > { %v4734_v58 = vpop.f32.mrf.mxu3 }
 0x54f   : > { %v5309_v43 = vpack.c.bf16 %v5277_v48, %v5277_v48  ;;  %v5178_v53 = vmul.f32 %v7515_v26, %v4734_v58 }
 0x551   : > { %5342 = vst.msk [vmem:[%s7293_s22 + $0x68] sm:$0xf] %vm5315_vm15, %v5309_v43  ;;  %v5214_v60 = vadd.f32 %v7523_v54, %v5178_v53 }
 0x553   : > { %v5246_v27 = vadd.f32 %v5214_v60, %v5142_v10 }
 0x555   : > { %v5278_v1 = vmax.f32 %v5246_v27, 0.0 }
 0x556   : > { %v4737_v41 = vpop.f32.mrf.mxu3 }
 0x557   : > { %v5310_v57 = vpack.c.bf16 %v5278_v1, %v5278_v1  ;;  %v5179_v44 = vmul.f32 %v7515_v26, %v4737_v41 }
 0x559   : > { %5343 = vst.msk [vmem:[%s7293_s22 + $0x6c] sm:$0xf] %vm5315_vm15, %v5310_v57  ;;  %v5215_v56 = vadd.f32 %v7523_v54, %v5179_v44 }
 0x55b   : > { %v5247_v0 = vadd.f32 %v5215_v56, %v5143_v61 }
 0x55d   : > { %v5279_v49 = vmax.f32 %v5247_v0, 0.0 }
 0x55e   : > { %v4739_v29 = vpop.f32.mrf.mxu3 }
 0x55f   : > { %v5311_v50 = vpack.c.bf16 %v5279_v49, %v5279_v49  ;;  %v5180_v52 = vmul.f32 %v7515_v26, %v4739_v29 }
 0x561   : > { %5344 = vst.msk [vmem:[%s7293_s22 + $0x70] sm:$0xf] %vm5315_vm15, %v5311_v50  ;;  %v5216_v21 = vadd.f32 %v7523_v54, %v5180_v52 }
 0x563   : > { %v5248_v2 = vadd.f32 %v5216_v21, %v5144_v40 }
 0x565   : > { %v5280_v13 = vmax.f32 %v5248_v2, 0.0 }
 0x566   : > { %v4742_v63 = vpop.f32.mrf.mxu3 }
 0x567   : > { %v5312_v16 = vpack.c.bf16 %v5280_v13, %v5280_v13  ;;  %v5181_v17 = vmul.f32 %v7515_v26, %v4742_v63 }
 0x569   : > { %5345 = vst.msk [vmem:[%s7293_s22 + $0x74] sm:$0xf] %vm5315_vm15, %v5312_v16  ;;  %v5217_v6 = vadd.f32 %v7523_v54, %v5181_v17 }
 0x56b   : > { %v5249_v18 = vadd.f32 %v5217_v6, %v5145_v38 }
 0x56d   : > { %v5281_v24 = vmax.f32 %v5249_v18, 0.0 }
 0x56e   : > { %v4744_v22 = vpop.f32.mrf.mxu3 }
 0x56f   : > { %v5313_v9 = vpack.c.bf16 %v5281_v24, %v5281_v24  ;;  %v5182_v48 = vmul.f32 %v7515_v26, %v4744_v22 }
 0x571   : > { %5346 = vst.msk [vmem:[%s7293_s22 + $0x78] sm:$0xf] %vm5315_vm15, %v5313_v9  ;;  %v5218_v58 = vadd.f32 %v7523_v54, %v5182_v48 }
 0x573   : > { %v5250_v10 = vadd.f32 %v5218_v58, %v5146_v45 }
 0x575   : > { %v5282_v43 = vmax.f32 %v5250_v10, 0.0 }
 0x577   : > { %v5314_v53 = vpack.c.bf16 %v5282_v43, %v5282_v43 }
 0x579   : > { %5347 = vst.msk [vmem:[%s7293_s22 + $0x7c] sm:$0xf] %vm5315_vm15, %v5314_v53 }
 0x57a PF: > { %s20_s15 = sadd.s32 1, %s5754_s15   ;;  %s7731_s13 = smov %s5750_s14 }
 0x57b   : > { %p17_p6 = scmp.ge.s32.totalorder %s20_s15, 4   ;;  %s7732_s14 = smov %s7734_s16 }
 0x57d   :  { %19 = sbr.rel (!%p17_p6) target bundleno = 2 (0x2), region = 113 }

</bundles_post_ra>
